<compile_context>
chip_gen: v7x
topology: tpu7x:2x2x1
jax: 0.10.0
libtpu: 0.0.40
codegen_flags: <defaults>
</compile_context>

<pallas_src>
import functools
import math

import jax
import jax.numpy as jnp
from jax import lax
from jax.experimental import pallas as pl
from jax.experimental.pallas import tpu as pltpu


_VMEM_LIMIT = 48 * 1024 * 1024  # safe on v5e/v6e (128 MiB) and v7x (64 MiB)


# --------------------------------------------------------------------------
# Kernel 1: fused RMSNorm + QKV projection + RoPE epilogue
#   grid = (M tiles, n_heads + 2*n_kv heads); one head (= 128 lanes) per N step.
#   The normalized x tile is cached in VMEM and reused across all head tiles.
#   Q and K head tiles get the split-half rotation in the epilogue; V copies.
# --------------------------------------------------------------------------

def _rms_qkv_rope_kernel(x_ref, g_ref, w_ref, cos_ref, sin_ref, o_ref,
                         xn_ref, *, eps, n_rot, half):
    j = pl.program_id(1)

    @pl.when(j == 0)
    def _norm():
        x = x_ref[...].astype(jnp.float32)
        var = jnp.mean(x * x, axis=-1, keepdims=True)
        xn_ref[...] = ((x * lax.rsqrt(var + eps)) * g_ref[...]).astype(jnp.bfloat16)

    y = jnp.dot(xn_ref[...], w_ref[...], preferred_element_type=jnp.float32)

    @pl.when(j < n_rot)                     # Q and K heads: apply RoPE
    def _rope():
        yr = y * cos_ref[...] + pltpu.roll(y, shift=half, axis=1) * sin_ref[...]
        o_ref[...] = yr.astype(o_ref.dtype)

    @pl.when(j >= n_rot)                    # V heads: plain projection
    def _copy():
        o_ref[...] = y.astype(o_ref.dtype)


def rms_qkv_rope(x2d, gamma, w_qkv, cos_m, sin_m, eps, *,
                 n_heads, n_kv, head_dim, tm=512):
    M, H = x2d.shape
    total_heads = n_heads + 2 * n_kv
    assert w_qkv.shape == (H, total_heads * head_dim)
    assert head_dim % 128 == 0, "head_dim must be a multiple of 128"
    TM = min(M, tm)
    assert M % TM == 0 and TM % 8 == 0
    grid = (M // TM, total_heads)
    n_rot = n_heads + n_kv
    return pl.pallas_call(
        functools.partial(_rms_qkv_rope_kernel, eps=eps, n_rot=n_rot,
                          half=head_dim // 2),
        out_shape=jax.ShapeDtypeStruct((M, total_heads * head_dim), jnp.bfloat16),
        grid=grid,
        in_specs=[
            pl.BlockSpec((TM, H), lambda i, j: (i, 0)),
            pl.BlockSpec((1, H), lambda i, j: (0, 0)),
            pl.BlockSpec((H, head_dim), lambda i, j: (0, j)),
            pl.BlockSpec((TM, head_dim), lambda i, j: (i, 0)),
            pl.BlockSpec((TM, head_dim), lambda i, j: (i, 0)),
        ],
        out_specs=pl.BlockSpec((TM, head_dim), lambda i, j: (i, j)),
        scratch_shapes=[pltpu.VMEM((TM, H), jnp.bfloat16)],   # normalized x
        compiler_params=pltpu.CompilerParams(
            dimension_semantics=("parallel", "arbitrary"),
            vmem_limit_bytes=_VMEM_LIMIT),
    )(x2d, gamma.reshape(1, H), w_qkv, cos_m, sin_m)


# --------------------------------------------------------------------------
# Kernel 2: GQA-aware flash attention (RoPE already applied to Q/K)
#   grid = (B, n_kv_groups, nq, nk); each step streams ONE K/V tile and
#   processes all kv_rep query heads of that group (K/V HBM traffic / kv_rep).
# --------------------------------------------------------------------------

def _flash_attn_kernel(q_ref, k_ref, v_ref, o_ref, m_ref, l_ref, acc_ref,
                       *, scale, kv_rep, head_dim):
    ki = pl.program_id(3)
    D = head_dim

    @pl.when(ki == 0)
    def _init():
        m_ref[...] = jnp.full(m_ref.shape, -jnp.inf, jnp.float32)
        l_ref[...] = jnp.zeros(l_ref.shape, jnp.float32)
        acc_ref[...] = jnp.zeros(acc_ref.shape, jnp.float32)

    k = k_ref[...]
    v = v_ref[...]
    for r in range(kv_rep):                      # all q heads of this KV group
        q = q_ref[:, r * D:(r + 1) * D]
        # scores (TQ, TKV): contract over head_dim, no explicit transpose.
        s = lax.dot_general(q, k, (((1,), (1,)), ((), ())),
                            preferred_element_type=jnp.float32) * scale
        # TODO(synk): no causal mask — matches the reference attention_mask=None
        # path, which applies no mask at all.
        m_prev = m_ref[r]
        m_new = jnp.maximum(m_prev, jnp.max(s, axis=-1, keepdims=True))
        alpha = jnp.exp(m_prev - m_new)
        p = jnp.exp(s - m_new)
        l_ref[r] = alpha * l_ref[r] + jnp.sum(p, axis=-1, keepdims=True)
        acc_ref[:, r * D:(r + 1) * D] = (
            alpha * acc_ref[:, r * D:(r + 1) * D]
            + jnp.dot(p.astype(v.dtype), v, preferred_element_type=jnp.float32))
        m_ref[r] = m_new

    @pl.when(ki == pl.num_programs(3) - 1)
    def _fin():
        for r in range(kv_rep):
            inv = 1.0 / l_ref[r]                 # exact recip (tiny tile)
            o_ref[:, r * D:(r + 1) * D] = (
                acc_ref[:, r * D:(r + 1) * D] * inv).astype(o_ref.dtype)


def flash_attention(qkv, *, B, S, n_heads, n_kv, head_dim, tq=256, tkv=512):
    """qkv: (B*S, (n_heads + 2*n_kv) * head_dim) bf16 -> (B*S, n_heads*head_dim)."""
    M = B * S
    D = head_dim
    kv_rep = n_heads // n_kv
    assert D % 128 == 0, "head_dim must be a multiple of 128 for lane-aligned heads"
    TQ = min(S, tq)
    TKV = min(S, tkv)
    assert S % TQ == 0 and S % TKV == 0 and TQ % 8 == 0 and TKV % 8 == 0
    nq = S // TQ
    nk = S // TKV
    scale = 1.0 / math.sqrt(D)
    grid = (B, n_kv, nq, nk)

    q_map = lambda b, g, qi, ki: (b * nq + qi, g)               # kv_rep*D wide
    k_map = lambda b, g, qi, ki: (b * nk + ki, n_heads + g)      # D wide
    v_map = lambda b, g, qi, ki: (b * nk + ki, n_heads + n_kv + g)
    o_map = lambda b, g, qi, ki: (b * nq + qi, g)

    return pl.pallas_call(
        functools.partial(_flash_attn_kernel, scale=scale, kv_rep=kv_rep,
                          head_dim=D),
        out_shape=jax.ShapeDtypeStruct((M, n_heads * D), jnp.bfloat16),
        grid=grid,
        in_specs=[
            pl.BlockSpec((TQ, kv_rep * D), q_map),   # all q heads of the group
            pl.BlockSpec((TKV, D), k_map),           # shared K head
            pl.BlockSpec((TKV, D), v_map),           # shared V head
        ],
        out_specs=pl.BlockSpec((TQ, kv_rep * D), o_map),
        scratch_shapes=[
            pltpu.VMEM((kv_rep, TQ, 1), jnp.float32),        # running max / head
            pltpu.VMEM((kv_rep, TQ, 1), jnp.float32),        # running denom / head
            pltpu.VMEM((TQ, kv_rep * D), jnp.float32),       # output accumulator
        ],
        compiler_params=pltpu.CompilerParams(
            dimension_semantics=("parallel", "parallel", "parallel", "arbitrary")),
    )(qkv, qkv, qkv)


# --------------------------------------------------------------------------
# Kernel 3: matmul with fused residual add (o_proj epilogue), residual aliased
# --------------------------------------------------------------------------

def _matmul_residual_kernel(x_ref, w_ref, r_ref, o_ref):
    y = jnp.dot(x_ref[...], w_ref[...], preferred_element_type=jnp.float32)
    o_ref[...] = (r_ref[...].astype(jnp.float32) + y).astype(o_ref.dtype)


def matmul_residual(x2d, w, resid, tm=512, tn=512):
    M, K = x2d.shape
    K2, N = w.shape
    assert K == K2 and resid.shape == (M, N)
    TM = min(M, tm)
    TN = min(N, tn)
    assert M % TM == 0 and N % TN == 0 and TN % 128 == 0 and TM % 8 == 0
    grid = (M // TM, N // TN)
    return pl.pallas_call(
        _matmul_residual_kernel,
        out_shape=jax.ShapeDtypeStruct((M, N), jnp.bfloat16),
        grid=grid,
        in_specs=[
            pl.BlockSpec((TM, K), lambda i, j: (i, 0)),
            pl.BlockSpec((K, TN), lambda i, j: (0, j)),
            pl.BlockSpec((TM, TN), lambda i, j: (i, j)),
        ],
        out_specs=pl.BlockSpec((TM, TN), lambda i, j: (i, j)),
        input_output_aliases={2: 0},     # write the residual buffer in place
        compiler_params=pltpu.CompilerParams(
            dimension_semantics=("parallel", "parallel"),
            vmem_limit_bytes=_VMEM_LIMIT),
    )(x2d, w, resid)


# --------------------------------------------------------------------------
# Kernel 4: fused RMSNorm + SwiGLU MLP + residual, tiled over intermediate dim
# --------------------------------------------------------------------------

def _mlp_kernel(x_ref, g_ref, wg_ref, wu_ref, wd_ref, o_ref,
                xn_ref, acc_ref, *, eps):
    ii = pl.program_id(1)

    @pl.when(ii == 0)
    def _init():
        x = x_ref[...].astype(jnp.float32)
        var = jnp.mean(x * x, axis=-1, keepdims=True)
        xn_ref[...] = ((x * lax.rsqrt(var + eps)) * g_ref[...]).astype(jnp.bfloat16)
        acc_ref[...] = jnp.zeros(acc_ref.shape, jnp.float32)

    xn = xn_ref[...]
    gp = jnp.dot(xn, wg_ref[...], preferred_element_type=jnp.float32)
    up = jnp.dot(xn, wu_ref[...], preferred_element_type=jnp.float32)
    hp = (gp * jax.nn.sigmoid(gp)) * up                     # silu(g) * u, f32
    acc_ref[...] += jnp.dot(hp.astype(jnp.bfloat16), wd_ref[...],
                            preferred_element_type=jnp.float32)

    @pl.when(ii == pl.num_programs(1) - 1)
    def _fin():
        o_ref[...] = (x_ref[...].astype(jnp.float32) + acc_ref[...]).astype(o_ref.dtype)


def mlp_block(h2d, gamma, wg, wu, wd, eps, tm=256, ti=512):
    """out = h2d + down( silu(rms(h2d)@wg) * (rms(h2d)@wu) )."""
    M, H = h2d.shape
    H2, I = wg.shape
    assert H == H2
    TM = min(M, tm)
    TI = min(I, ti)
    assert M % TM == 0 and I % TI == 0 and TI % 128 == 0 and TM % 8 == 0
    grid = (M // TM, I // TI)
    return pl.pallas_call(
        functools.partial(_mlp_kernel, eps=eps),
        out_shape=jax.ShapeDtypeStruct((M, H), jnp.bfloat16),
        grid=grid,
        in_specs=[
            pl.BlockSpec((TM, H), lambda i, ii: (i, 0)),
            pl.BlockSpec((1, H), lambda i, ii: (0, 0)),
            pl.BlockSpec((H, TI), lambda i, ii: (0, ii)),
            pl.BlockSpec((H, TI), lambda i, ii: (0, ii)),
            pl.BlockSpec((TI, H), lambda i, ii: (ii, 0)),
        ],
        out_specs=pl.BlockSpec((TM, H), lambda i, ii: (i, 0)),
        scratch_shapes=[
            pltpu.VMEM((TM, H), jnp.bfloat16),   # normalized activations
            pltpu.VMEM((TM, H), jnp.float32),    # down-proj accumulator
        ],
        compiler_params=pltpu.CompilerParams(
            dimension_semantics=("parallel", "arbitrary"),
            vmem_limit_bytes=_VMEM_LIMIT),
    )(h2d, gamma.reshape(1, H), wg, wu, wd)


# --------------------------------------------------------------------------
# Kernel 5: fused final RMSNorm + lm_head (normalized x cached across N tiles)
# --------------------------------------------------------------------------

def _rms_matmul_kernel(x_ref, g_ref, w_ref, o_ref, xn_ref, *, eps):
    j = pl.program_id(1)

    @pl.when(j == 0)
    def _norm():
        x = x_ref[...].astype(jnp.float32)
        var = jnp.mean(x * x, axis=-1, keepdims=True)
        xn_ref[...] = ((x * lax.rsqrt(var + eps)) * g_ref[...]).astype(jnp.bfloat16)

    o_ref[...] = jnp.dot(xn_ref[...], w_ref[...],
                         preferred_element_type=jnp.float32).astype(o_ref.dtype)


def rms_matmul(x2d, gamma, w, eps, out_dtype=jnp.bfloat16, tm=512, tn=512):
    """out = rmsnorm(x2d; gamma) @ w, tiled over (M, N); norm computed once per M tile."""
    M, H = x2d.shape
    H2, N = w.shape
    assert H == H2
    TM = min(M, tm)
    TN = min(N, tn)
    assert M % TM == 0 and N % TN == 0 and TN % 128 == 0 and TM % 8 == 0
    grid = (M // TM, N // TN)
    return pl.pallas_call(
        functools.partial(_rms_matmul_kernel, eps=eps),
        out_shape=jax.ShapeDtypeStruct((M, N), out_dtype),
        grid=grid,
        in_specs=[
            pl.BlockSpec((TM, H), lambda i, j: (i, 0)),
            pl.BlockSpec((1, H), lambda i, j: (0, 0)),
            pl.BlockSpec((H, TN), lambda i, j: (0, j)),
        ],
        out_specs=pl.BlockSpec((TM, TN), lambda i, j: (i, j)),
        scratch_shapes=[pltpu.VMEM((TM, H), jnp.bfloat16)],   # normalized x
        compiler_params=pltpu.CompilerParams(
            dimension_semantics=("parallel", "arbitrary"),
            vmem_limit_bytes=_VMEM_LIMIT),
    )(x2d, gamma.reshape(1, H), w)


# --------------------------------------------------------------------------
# RoPE tables (split-half form; pairs with the Q/K weight-column permutation)
# --------------------------------------------------------------------------

def precompute_rope(seq_len, head_dim, theta=10000.0):
    # TODO(synk): the torch reference passes head_dim//2 to precompute_freqs_cis
    # and its reshape_for_broadcast assert cannot hold for batched position_ids
    # (the reference forward would raise); as before we implement the intended
    # LLaMA interleaved RoPE over the full head_dim, realized as a split-half
    # rotation on permuted Q/K weight columns (attention scores identical).
    inv = 1.0 / (theta ** (jnp.arange(0, head_dim, 2, dtype=jnp.float32) / head_dim))
    t = jnp.arange(seq_len, dtype=jnp.float32)
    freqs = jnp.outer(t, inv)                                # (S, D//2)
    cos = jnp.cos(freqs)
    sin = jnp.sin(freqs)
    cos_full = jnp.concatenate([cos, cos], axis=-1)          # (S, D)
    sin_rot = jnp.concatenate([-sin, sin], axis=-1)          # (S, D)
    return cos_full, sin_rot


# --------------------------------------------------------------------------
# Full model forward (mask=None / no cache / no labels path)
# --------------------------------------------------------------------------

def brahma_forward(params, input_ids, cfg):
    B, S = input_ids.shape
    H = cfg["hidden_size"]
    nH = cfg["num_attention_heads"]
    nKV = cfg["num_key_value_heads"]
    D = H // nH
    eps = cfg["rms_norm_eps"]
    M = B * S

    # TODO(synk): token-embedding gather stays in plain JAX (no tiled Pallas gather).
    h = params["embed"][input_ids].reshape(M, H)             # (M, H) bf16

    cos_s, sin_s = precompute_rope(S, D, cfg["rope_theta"])
    cos_m = jnp.tile(cos_s, (B, 1))                          # (M, D) f32
    sin_m = jnp.tile(sin_s, (B, 1))                          # (M, D) f32

    for layer in params["layers"]:
        # RMSNorm + fused QKV projection with RoPE fused into the epilogue
        qkv = rms_qkv_rope(h, layer["ln1"], layer["w_qkv"], cos_m, sin_m, eps,
                           n_heads=nH, n_kv=nKV, head_dim=D)
        # GQA-aware flash attention (no RoPE / no tables in the inner loop)
        # TODO(synk): only the attention_mask=None / use_cache=False path is
        # implemented (the reference mask construction is shape-inconsistent).
        attn = flash_attention(qkv, B=B, S=S, n_heads=nH, n_kv=nKV, head_dim=D)
        # o_proj with residual add fused into the epilogue (residual aliased)
        h = matmul_residual(attn, layer["wo"], h)
        # RMSNorm + SwiGLU MLP + residual, I-tiled with f32 accumulator
        h = mlp_block(h, layer["ln2"], layer["wg"], layer["wu"], layer["wd"], eps)

    # final RMSNorm fused with lm_head; logits kept in f32 deliberately
    logits = rms_matmul(h, params["norm"], params["lm_head"], eps,
                        out_dtype=jnp.float32)
    return logits.reshape(B, S, cfg["vocab_size"])


# --------------------------------------------------------------------------
# Deterministic parameter init (torch shapes; normal std=0.02; bf16 storage)
# --------------------------------------------------------------------------

def init_params(key, cfg):
    H = cfg["hidden_size"]
    I = cfg["intermediate_size"]
    V = cfg["vocab_size"]
    nH = cfg["num_attention_heads"]
    nKV = cfg["num_key_value_heads"]
    L = cfg["num_hidden_layers"]
    D = H // nH
    std = cfg["initializer_range"]

    def normal(k, shape):
        return std * jax.random.normal(k, shape, dtype=jnp.float32)

    # per-head permutation: interleaved (even, odd) dims -> (first half, second half)
    pair_perm = jnp.concatenate([jnp.arange(0, D, 2), jnp.arange(1, D, 2)])
    q_perm = (jnp.arange(nH)[:, None] * D + pair_perm[None, :]).reshape(-1)
    k_perm = (jnp.arange(nKV)[:, None] * D + pair_perm[None, :]).reshape(-1)

    keys = jax.random.split(key, 2 + 7 * L)
    ki = iter(range(len(keys)))

    params = {
        "embed": normal(keys[next(ki)], (V, H)).astype(jnp.bfloat16),
        "norm": jnp.ones((H,), jnp.float32),
        # torch nn.Linear weight is (out, in); store transposed (in, out)
        "lm_head": normal(keys[next(ki)], (V, H)).T.astype(jnp.bfloat16),
        "layers": [],
    }
    for _ in range(L):
        wq = normal(keys[next(ki)], (nH * D, H)).T
        wk = normal(keys[next(ki)], (nKV * D, H)).T
        wv = normal(keys[next(ki)], (nKV * D, H)).T
        # permute Q/K output columns into split-half RoPE order, fuse q|k|v
        w_qkv = jnp.concatenate([wq[:, q_perm], wk[:, k_perm], wv], axis=1)
        layer = {
            "ln1": jnp.ones((H,), jnp.float32),
            "ln2": jnp.ones((H,), jnp.float32),
            "w_qkv": w_qkv.astype(jnp.bfloat16),
            "wo": normal(keys[next(ki)], (H, nH * D)).T.astype(jnp.bfloat16),
            "wg": normal(keys[next(ki)], (I, H)).T.astype(jnp.bfloat16),
            "wu": normal(keys[next(ki)], (I, H)).T.astype(jnp.bfloat16),
            "wd": normal(keys[next(ki)], (H, I)).T.astype(jnp.bfloat16),
        }
        params["layers"].append(layer)
    return params


# --------------------------------------------------------------------------

if __name__ == "__main__":
    cfg = dict(
        vocab_size=256,
        hidden_size=512,            # 4 heads x head_dim 128 (lane-aligned heads)
        intermediate_size=1024,
        num_hidden_layers=2,
        num_attention_heads=4,
        num_key_value_heads=2,
        max_position_embeddings=16,
        initializer_range=0.02,
        rms_norm_eps=1e-6,
        rope_theta=10000.0,
    )
    key = jax.random.PRNGKey(0)
    pkey, ikey = jax.random.split(key)
    params = init_params(pkey, cfg)

    batch, seq = 2, 8
    input_ids = jax.random.randint(ikey, (batch, seq), 0, cfg["vocab_size"],
                                   dtype=jnp.int32)

    fwd = jax.jit(lambda p, ids: brahma_forward(p, ids, cfg))
    logits = fwd(params, input_ids)
    logits = jax.block_until_ready(logits)
    assert logits.shape == (batch, seq, cfg["vocab_size"])
    assert logits.dtype == jnp.float32
    assert bool(jnp.all(jnp.isfinite(logits)))
    print("KERNEL_OK")
</pallas_src>

<mosaic_0001>
module attributes {stable_mosaic.version = 11 : i64} {
  func.func @_matmul_residual_kernel(%arg0: i32, %arg1: i32, %arg2: memref<16x512xbf16, #tpu.memory_space<vmem>>, %arg3: memref<512x512xbf16, #tpu.memory_space<vmem>>, %arg4: memref<16x512xbf16, #tpu.memory_space<vmem>>, %arg5: memref<16x512xbf16, #tpu.memory_space<vmem>>) attributes {dimension_semantics = [#tpu.dimension_semantics<parallel>, #tpu.dimension_semantics<parallel>], iteration_bounds = array<i64: 1, 1>, scalar_prefetch = 0 : i64, scratch_operands = 0 : i64, tpu.core_type = #tpu.core_type<tc>, window_params = [{transform_indices = @transform_0, window_bounds = array<i64: 16, 512>}, {transform_indices = @transform_1, window_bounds = array<i64: 512, 512>}, {transform_indices = @transform_2, window_bounds = array<i64: 16, 512>}, {transform_indices = @transform_3, window_bounds = array<i64: 16, 512>}]} {
    %c0 = arith.constant 0 : index
    %c0_0 = arith.constant 0 : index
    %0 = vector.load %arg2[%c0, %c0_0] : memref<16x512xbf16, #tpu.memory_space<vmem>>, vector<16x512xbf16>
    %c0_1 = arith.constant 0 : index
    %c0_2 = arith.constant 0 : index
    %1 = vector.load %arg3[%c0_1, %c0_2] : memref<512x512xbf16, #tpu.memory_space<vmem>>, vector<512x512xbf16>
    %cst = arith.constant dense<0.000000e+00> : vector<16x512xf32>
    %2 = tpu.matmul %0, %1, %cst {dimension_numbers = #tpu.dot_dimension_numbers<[1], [0], [0], [1], [0, 0, 1, 1], [], []>} : vector<16x512xbf16>, vector<512x512xbf16>, vector<16x512xf32> -> vector<16x512xf32>
    %c0_3 = arith.constant 0 : index
    %c0_4 = arith.constant 0 : index
    %3 = vector.load %arg4[%c0_3, %c0_4] : memref<16x512xbf16, #tpu.memory_space<vmem>>, vector<16x512xbf16>
    %4 = arith.extf %3 : vector<16x512xbf16> to vector<16x512xf32>
    %5 = arith.addf %4, %2 : vector<16x512xf32>
    %6 = arith.truncf %5 : vector<16x512xf32> to vector<16x512xbf16>
    %c0_5 = arith.constant 0 : index
    %c0_6 = arith.constant 0 : index
    %7 = vector.load %arg5[%c0_5, %c0_6] : memref<16x512xbf16, #tpu.memory_space<vmem>>, vector<16x512xbf16>
    tpu.vector_store %arg5[%c0_5, %c0_6], %6 {strides = array<i32>} : memref<16x512xbf16, #tpu.memory_space<vmem>>, vector<16x512xbf16>,
    return
  }
  func.func @transform_0(%arg0: i32, %arg1: i32) -> (i32, i32) {
    %c0_i32 = arith.constant 0 : i32
    %c0_i32_0 = arith.constant 0 : i32
    return %arg0, %c0_i32 : i32, i32
  }
  func.func @transform_1(%arg0: i32, %arg1: i32) -> (i32, i32) {
    %c0_i32 = arith.constant 0 : i32
    %c0_i32_0 = arith.constant 0 : i32
    return %c0_i32, %arg1 : i32, i32
  }
  func.func @transform_2(%arg0: i32, %arg1: i32) -> (i32, i32) {
    %c0_i32 = arith.constant 0 : i32
    return %arg0, %arg1 : i32, i32
  }
  func.func @transform_3(%arg0: i32, %arg1: i32) -> (i32, i32) {
    %c0_i32 = arith.constant 0 : i32
    return %arg0, %arg1 : i32, i32
  }
}

module attributes {stable_mosaic.version = 11 : i64} {
  func.func @_rms_qkv_rope_kernel(%arg0: i32, %arg1: i32, %arg2: memref<16x512xbf16, #tpu.memory_space<vmem>>, %arg3: memref<1x512xf32, #tpu.memory_space<vmem>>, %arg4: memref<512x128xbf16, #tpu.memory_space<vmem>>, %arg5: memref<16x128xf32, #tpu.memory_space<vmem>>, %arg6: memref<16x128xf32, #tpu.memory_space<vmem>>, %arg7: memref<16x128xbf16, #tpu.memory_space<vmem>>, %arg8: memref<16x512xbf16, #tpu.memory_space<vmem>>) attributes {dimension_semantics = [#tpu.dimension_semantics<parallel>, #tpu.dimension_semantics<arbitrary>], iteration_bounds = array<i64: 1, 8>, scalar_prefetch = 0 : i64, scratch_operands = 1 : i64, tpu.core_type = #tpu.core_type<tc>, window_params = [{transform_indices = @transform_0, window_bounds = array<i64: 16, 512>}, {pipeline_mode = #tpu.pipeline_mode<synchronous>, transform_indices = @transform_1, window_bounds = array<i64: 1, 512>}, {transform_indices = @transform_2, window_bounds = array<i64: 512, 128>}, {transform_indices = @transform_3, window_bounds = array<i64: 16, 128>}, {transform_indices = @transform_4, window_bounds = array<i64: 16, 128>}, {transform_indices = @transform_5, window_bounds = array<i64: 16, 128>}]} {
    %c0_i32 = arith.constant 0 : i32
    %0 = arith.cmpi eq, %arg1, %c0_i32 : i32
    %1 = arith.extui %0 : i1 to i32
    %c0_i32_0 = arith.constant 0 : i32
    %2 = arith.cmpi ne, %1, %c0_i32_0 : i32
    scf.if %2 {
      %c0_7 = arith.constant 0 : index
      %c0_8 = arith.constant 0 : index
      %12 = vector.load %arg2[%c0_7, %c0_8] : memref<16x512xbf16, #tpu.memory_space<vmem>>, vector<16x512xbf16>
      %13 = arith.extf %12 : vector<16x512xbf16> to vector<16x512xf32>
      %14 = arith.mulf %13, %13 : vector<16x512xf32>
      %cst_9 = arith.constant dense<0.000000e+00> : vector<16xf32>
      %15 = vector.multi_reduction <add>, %14, %cst_9 [1] : vector<16x512xf32> to vector<16xf32>
      %16 = vector.shape_cast %15 : vector<16xf32> to vector<16x1xf32>
      %cst_10 = arith.constant 5.120000e+02 : f32
      %17 = vector.broadcast %cst_10 : f32 to vector<16x1xf32>
      %18 = arith.divf %16, %17 : vector<16x1xf32>
      %cst_11 = arith.constant 9.99999997E-7 : f32
      %19 = vector.broadcast %cst_11 : f32 to vector<16x1xf32>
      %20 = arith.addf %18, %19 : vector<16x1xf32>
      %21 = math.rsqrt %20 : vector<16x1xf32>
      %22 = vector.broadcast %21 : vector<16x1xf32> to vector<16x512xf32>
      %23 = arith.mulf %13, %22 : vector<16x512xf32>
      %c0_12 = arith.constant 0 : index
      %c0_13 = arith.constant 0 : index
      %24 = vector.load %arg3[%c0_12, %c0_13] : memref<1x512xf32, #tpu.memory_space<vmem>>, vector<1x512xf32>
      %25 = vector.broadcast %24 : vector<1x512xf32> to vector<16x512xf32>
      %26 = arith.mulf %23, %25 : vector<16x512xf32>
      %27 = arith.truncf %26 : vector<16x512xf32> to vector<16x512xbf16>
      %c0_14 = arith.constant 0 : index
      %c0_15 = arith.constant 0 : index
      %28 = vector.load %arg8[%c0_14, %c0_15] : memref<16x512xbf16, #tpu.memory_space<vmem>>, vector<16x512xbf16>
      tpu.vector_store %arg8[%c0_14, %c0_15], %27 {strides = array<i32>} : memref<16x512xbf16, #tpu.memory_space<vmem>>, vector<16x512xbf16>,
    } else {
    }
    %c0 = arith.constant 0 : index
    %c0_1 = arith.constant 0 : index
    %3 = vector.load %arg8[%c0, %c0_1] : memref<16x512xbf16, #tpu.memory_space<vmem>>, vector<16x512xbf16>
    %c0_2 = arith.constant 0 : index
    %c0_3 = arith.constant 0 : index
    %4 = vector.load %arg4[%c0_2, %c0_3] : memref<512x128xbf16, #tpu.memory_space<vmem>>, vector<512x128xbf16>
    %cst = arith.constant dense<0.000000e+00> : vector<16x128xf32>
    %5 = tpu.matmul %3, %4, %cst {dimension_numbers = #tpu.dot_dimension_numbers<[1], [0], [0], [1], [0, 0, 1, 1], [], []>} : vector<16x512xbf16>, vector<512x128xbf16>, vector<16x128xf32> -> vector<16x128xf32>
    %c6_i32 = arith.constant 6 : i32
    %6 = arith.cmpi slt, %arg1, %c6_i32 : i32
    %7 = arith.extui %6 : i1 to i32
    %c0_i32_4 = arith.constant 0 : i32
    %8 = arith.cmpi ne, %7, %c0_i32_4 : i32
    scf.if %8 {
      %c0_7 = arith.constant 0 : index
      %c0_8 = arith.constant 0 : index
      %12 = vector.load %arg5[%c0_7, %c0_8] : memref<16x128xf32, #tpu.memory_space<vmem>>, vector<16x128xf32>
      %13 = arith.mulf %5, %12 : vector<16x128xf32>
      %c64_i32 = arith.constant 64 : i32
      %14 = tpu.dynamic_rotate %5 by %c64_i32 dim 1 : vector<16x128xf32>, i32 -> vector<16x128xf32>
      %c0_9 = arith.constant 0 : index
      %c0_10 = arith.constant 0 : index
      %15 = vector.load %arg6[%c0_9, %c0_10] : memref<16x128xf32, #tpu.memory_space<vmem>>, vector<16x128xf32>
      %16 = arith.mulf %14, %15 : vector<16x128xf32>
      %17 = arith.addf %13, %16 : vector<16x128xf32>
      %18 = arith.truncf %17 : vector<16x128xf32> to vector<16x128xbf16>
      %c0_11 = arith.constant 0 : index
      %c0_12 = arith.constant 0 : index
      %19 = vector.load %arg7[%c0_11, %c0_12] : memref<16x128xbf16, #tpu.memory_space<vmem>>, vector<16x128xbf16>
      tpu.vector_store %arg7[%c0_11, %c0_12], %18 {strides = array<i32>} : memref<16x128xbf16, #tpu.memory_space<vmem>>, vector<16x128xbf16>,
    } else {
    }
    %c6_i32_5 = arith.constant 6 : i32
    %9 = arith.cmpi sge, %arg1, %c6_i32_5 : i32
    %10 = arith.extui %9 : i1 to i32
    %c0_i32_6 = arith.constant 0 : i32
    %11 = arith.cmpi ne, %10, %c0_i32_6 : i32
    scf.if %11 {
      %12 = arith.truncf %5 : vector<16x128xf32> to vector<16x128xbf16>
      %c0_7 = arith.constant 0 : index
      %c0_8 = arith.constant 0 : index
      %13 = vector.load %arg7[%c0_7, %c0_8] : memref<16x128xbf16, #tpu.memory_space<vmem>>, vector<16x128xbf16>
      tpu.vector_store %arg7[%c0_7, %c0_8], %12 {strides = array<i32>} : memref<16x128xbf16, #tpu.memory_space<vmem>>, vector<16x128xbf16>,
    } else {
    }
    return
  }
  func.func @transform_0(%arg0: i32, %arg1: i32) -> (i32, i32) {
    %c0_i32 = arith.constant 0 : i32
    %c0_i32_0 = arith.constant 0 : i32
    return %arg0, %c0_i32 : i32, i32
  }
  func.func @transform_1(%arg0: i32, %arg1: i32) -> (i32, i32) {
    %c0_i32 = arith.constant 0 : i32
    %c0_i32_0 = arith.constant 0 : i32
    %c0_i32_1 = arith.constant 0 : i32
    return %c0_i32, %c0_i32_0 : i32, i32
  }
  func.func @transform_2(%arg0: i32, %arg1: i32) -> (i32, i32) {
    %c0_i32 = arith.constant 0 : i32
    %c0_i32_0 = arith.constant 0 : i32
    return %c0_i32, %arg1 : i32, i32
  }
  func.func @transform_3(%arg0: i32, %arg1: i32) -> (i32, i32) {
    %c0_i32 = arith.constant 0 : i32
    %c0_i32_0 = arith.constant 0 : i32
    return %arg0, %c0_i32 : i32, i32
  }
  func.func @transform_4(%arg0: i32, %arg1: i32) -> (i32, i32) {
    %c0_i32 = arith.constant 0 : i32
    %c0_i32_0 = arith.constant 0 : i32
    return %arg0, %c0_i32 : i32, i32
  }
  func.func @transform_5(%arg0: i32, %arg1: i32) -> (i32, i32) {
    %c0_i32 = arith.constant 0 : i32
    return %arg0, %arg1 : i32, i32
  }
}

module attributes {stable_mosaic.version = 11 : i64} {
  func.func @_flash_attn_kernel(%arg0: i32, %arg1: i32, %arg2: i32, %arg3: i32, %arg4: memref<8x256xbf16, #tpu.memory_space<vmem>>, %arg5: memref<8x128xbf16, #tpu.memory_space<vmem>>, %arg6: memref<8x128xbf16, #tpu.memory_space<vmem>>, %arg7: memref<8x256xbf16, #tpu.memory_space<vmem>>, %arg8: memref<2x8x1xf32, #tpu.memory_space<vmem>>, %arg9: memref<2x8x1xf32, #tpu.memory_space<vmem>>, %arg10: memref<8x256xf32, #tpu.memory_space<vmem>>) attributes {dimension_semantics = [#tpu.dimension_semantics<parallel>, #tpu.dimension_semantics<parallel>, #tpu.dimension_semantics<parallel>, #tpu.dimension_semantics<arbitrary>], iteration_bounds = array<i64: 2, 2, 1, 1>, scalar_prefetch = 0 : i64, scratch_operands = 3 : i64, tpu.core_type = #tpu.core_type<tc>, window_params = [{transform_indices = @transform_0, window_bounds = array<i64: 8, 256>}, {transform_indices = @transform_1, window_bounds = array<i64: 8, 128>}, {transform_indices = @transform_2, window_bounds = array<i64: 8, 128>}, {transform_indices = @transform_3, window_bounds = array<i64: 8, 256>}]} {
    %c0_i32 = arith.constant 0 : i32
    %0 = arith.cmpi eq, %arg3, %c0_i32 : i32
    %1 = arith.extui %0 : i1 to i32
    %c0_i32_0 = arith.constant 0 : i32
    %2 = arith.cmpi ne, %1, %c0_i32_0 : i32
    scf.if %2 {
      %cst_49 = arith.constant 0xFF800000 : f32
      %74 = vector.broadcast %cst_49 : f32 to vector<2x8x1xf32>
      %c0_50 = arith.constant 0 : index
      %c0_51 = arith.constant 0 : index
      %c0_52 = arith.constant 0 : index
      %75 = vector.load %arg8[%c0_50, %c0_51, %c0_52] : memref<2x8x1xf32, #tpu.memory_space<vmem>>, vector<2x8x1xf32>
      tpu.vector_store %arg8[%c0_50, %c0_51, %c0_52], %74 {strides = array<i32>} : memref<2x8x1xf32, #tpu.memory_space<vmem>>, vector<2x8x1xf32>,
      %cst_53 = arith.constant 0.000000e+00 : f32
      %76 = vector.broadcast %cst_53 : f32 to vector<2x8x1xf32>
      %c0_54 = arith.constant 0 : index
      %c0_55 = arith.constant 0 : index
      %c0_56 = arith.constant 0 : index
      %77 = vector.load %arg9[%c0_54, %c0_55, %c0_56] : memref<2x8x1xf32, #tpu.memory_space<vmem>>, vector<2x8x1xf32>
      tpu.vector_store %arg9[%c0_54, %c0_55, %c0_56], %76 {strides = array<i32>} : memref<2x8x1xf32, #tpu.memory_space<vmem>>, vector<2x8x1xf32>,
      %cst_57 = arith.constant 0.000000e+00 : f32
      %78 = vector.broadcast %cst_57 : f32 to vector<8x256xf32>
      %c0_58 = arith.constant 0 : index
      %c0_59 = arith.constant 0 : index
      %79 = vector.load %arg10[%c0_58, %c0_59] : memref<8x256xf32, #tpu.memory_space<vmem>>, vector<8x256xf32>
      tpu.vector_store %arg10[%c0_58, %c0_59], %78 {strides = array<i32>} : memref<8x256xf32, #tpu.memory_space<vmem>>, vector<8x256xf32>,
    } else {
    }
    %c0 = arith.constant 0 : index
    %c0_1 = arith.constant 0 : index
    %3 = vector.load %arg5[%c0, %c0_1] : memref<8x128xbf16, #tpu.memory_space<vmem>>, vector<8x128xbf16>
    %c0_2 = arith.constant 0 : index
    %c0_3 = arith.constant 0 : index
    %4 = vector.load %arg6[%c0_2, %c0_3] : memref<8x128xbf16, #tpu.memory_space<vmem>>, vector<8x128xbf16>
    %c0_4 = arith.constant 0 : index
    %c0_5 = arith.constant 0 : index
    %5 = vector.load %arg4[%c0_4, %c0_5] : memref<8x256xbf16, #tpu.memory_space<vmem>>, vector<8x128xbf16>
    %cst = arith.constant dense<0.000000e+00> : vector<8x8xf32>
    %6 = tpu.matmul %5, %3, %cst {dimension_numbers = #tpu.dot_dimension_numbers<[1], [1], [0], [0], [0, 0, 1, 0], [], []>} : vector<8x128xbf16>, vector<8x128xbf16>, vector<8x8xf32> -> vector<8x8xf32>
    %cst_6 = arith.constant 0.0883883461 : f32
    %7 = vector.broadcast %cst_6 : f32 to vector<8x8xf32>
    %8 = arith.mulf %6, %7 : vector<8x8xf32>
    %c0_7 = arith.constant 0 : index
    %c0_8 = arith.constant 0 : index
    %c0_9 = arith.constant 0 : index
    %9 = vector.load %arg8[%c0_7, %c0_8, %c0_9] : memref<2x8x1xf32, #tpu.memory_space<vmem>>, vector<1x8x1xf32>
    %10 = vector.shape_cast %9 : vector<1x8x1xf32> to vector<8x1xf32>
    %cst_10 = arith.constant dense<0xFF800000> : vector<8xf32>
    %11 = vector.multi_reduction <maximumf>, %8, %cst_10 [1] : vector<8x8xf32> to vector<8xf32>
    %12 = vector.shape_cast %11 : vector<8xf32> to vector<8x1xf32>
    %13 = arith.maximumf %10, %12 : vector<8x1xf32>
    %14 = arith.subf %10, %13 : vector<8x1xf32>
    %15 = math.exp %14 : vector<8x1xf32>
    %16 = vector.broadcast %13 : vector<8x1xf32> to vector<8x8xf32>
    %17 = arith.subf %8, %16 : vector<8x8xf32>
    %18 = math.exp %17 : vector<8x8xf32>
    %c0_11 = arith.constant 0 : index
    %c0_12 = arith.constant 0 : index
    %c0_13 = arith.constant 0 : index
    %19 = vector.load %arg9[%c0_11, %c0_12, %c0_13] : memref<2x8x1xf32, #tpu.memory_space<vmem>>, vector<1x8x1xf32>
    %20 = vector.shape_cast %19 : vector<1x8x1xf32> to vector<8x1xf32>
    %21 = arith.mulf %15, %20 : vector<8x1xf32>
    %cst_14 = arith.constant dense<0.000000e+00> : vector<8xf32>
    %22 = vector.multi_reduction <add>, %18, %cst_14 [1] : vector<8x8xf32> to vector<8xf32>
    %23 = vector.shape_cast %22 : vector<8xf32> to vector<8x1xf32>
    %24 = arith.addf %21, %23 : vector<8x1xf32>
    %c0_15 = arith.constant 0 : index
    %c0_16 = arith.constant 0 : index
    %c0_17 = arith.constant 0 : index
    %25 = vector.load %arg9[%c0_15, %c0_16, %c0_17] : memref<2x8x1xf32, #tpu.memory_space<vmem>>, vector<1x8x1xf32>
    %26 = vector.shape_cast %25 : vector<1x8x1xf32> to vector<8x1xf32>
    %27 = vector.shape_cast %24 : vector<8x1xf32> to vector<1x8x1xf32>
    tpu.vector_store %arg9[%c0_15, %c0_16, %c0_17], %27 {strides = array<i32>} : memref<2x8x1xf32, #tpu.memory_space<vmem>>, vector<1x8x1xf32>,
    %c0_18 = arith.constant 0 : index
    %c0_19 = arith.constant 0 : index
    %28 = vector.load %arg10[%c0_18, %c0_19] : memref<8x256xf32, #tpu.memory_space<vmem>>, vector<8x128xf32>
    %29 = vector.broadcast %15 : vector<8x1xf32> to vector<8x128xf32>
    %30 = arith.mulf %29, %28 : vector<8x128xf32>
    %31 = arith.truncf %18 : vector<8x8xf32> to vector<8x8xbf16>
    %cst_20 = arith.constant dense<0.000000e+00> : vector<8x128xf32>
    %32 = tpu.matmul %31, %4, %cst_20 {dimension_numbers = #tpu.dot_dimension_numbers<[1], [0], [0], [1], [0, 0, 1, 1], [], []>} : vector<8x8xbf16>, vector<8x128xbf16>, vector<8x128xf32> -> vector<8x128xf32>
    %33 = arith.addf %30, %32 : vector<8x128xf32>
    %c0_21 = arith.constant 0 : index
    %c0_22 = arith.constant 0 : index
    %34 = vector.load %arg10[%c0_21, %c0_22] : memref<8x256xf32, #tpu.memory_space<vmem>>, vector<8x128xf32>
    tpu.vector_store %arg10[%c0_21, %c0_22], %33 {strides = array<i32>} : memref<8x256xf32, #tpu.memory_space<vmem>>, vector<8x128xf32>,
    %c0_23 = arith.constant 0 : index
    %c0_24 = arith.constant 0 : index
    %c0_25 = arith.constant 0 : index
    %35 = vector.load %arg8[%c0_23, %c0_24, %c0_25] : memref<2x8x1xf32, #tpu.memory_space<vmem>>, vector<1x8x1xf32>
    %36 = vector.shape_cast %35 : vector<1x8x1xf32> to vector<8x1xf32>
    %37 = vector.shape_cast %13 : vector<8x1xf32> to vector<1x8x1xf32>
    tpu.vector_store %arg8[%c0_23, %c0_24, %c0_25], %37 {strides = array<i32>} : memref<2x8x1xf32, #tpu.memory_space<vmem>>, vector<1x8x1xf32>,
    %c0_26 = arith.constant 0 : index
    %c128 = arith.constant 128 : index
    %38 = vector.load %arg4[%c0_26, %c128] : memref<8x256xbf16, #tpu.memory_space<vmem>>, vector<8x128xbf16>
    %cst_27 = arith.constant dense<0.000000e+00> : vector<8x8xf32>
    %39 = tpu.matmul %38, %3, %cst_27 {dimension_numbers = #tpu.dot_dimension_numbers<[1], [1], [0], [0], [0, 0, 1, 0], [], []>} : vector<8x128xbf16>, vector<8x128xbf16>, vector<8x8xf32> -> vector<8x8xf32>
    %cst_28 = arith.constant 0.0883883461 : f32
    %40 = vector.broadcast %cst_28 : f32 to vector<8x8xf32>
    %41 = arith.mulf %39, %40 : vector<8x8xf32>
    %c1 = arith.constant 1 : index
    %c0_29 = arith.constant 0 : index
    %c0_30 = arith.constant 0 : index
    %42 = vector.load %arg8[%c1, %c0_29, %c0_30] : memref<2x8x1xf32, #tpu.memory_space<vmem>>, vector<1x8x1xf32>
    %43 = vector.shape_cast %42 : vector<1x8x1xf32> to vector<8x1xf32>
    %cst_31 = arith.constant dense<0xFF800000> : vector<8xf32>
    %44 = vector.multi_reduction <maximumf>, %41, %cst_31 [1] : vector<8x8xf32> to vector<8xf32>
    %45 = vector.shape_cast %44 : vector<8xf32> to vector<8x1xf32>
    %46 = arith.maximumf %43, %45 : vector<8x1xf32>
    %47 = arith.subf %43, %46 : vector<8x1xf32>
    %48 = math.exp %47 : vector<8x1xf32>
    %49 = vector.broadcast %46 : vector<8x1xf32> to vector<8x8xf32>
    %50 = arith.subf %41, %49 : vector<8x8xf32>
    %51 = math.exp %50 : vector<8x8xf32>
    %c1_32 = arith.constant 1 : index
    %c0_33 = arith.constant 0 : index
    %c0_34 = arith.constant 0 : index
    %52 = vector.load %arg9[%c1_32, %c0_33, %c0_34] : memref<2x8x1xf32, #tpu.memory_space<vmem>>, vector<1x8x1xf32>
    %53 = vector.shape_cast %52 : vector<1x8x1xf32> to vector<8x1xf32>
    %54 = arith.mulf %48, %53 : vector<8x1xf32>
    %cst_35 = arith.constant dense<0.000000e+00> : vector<8xf32>
    %55 = vector.multi_reduction <add>, %51, %cst_35 [1] : vector<8x8xf32> to vector<8xf32>
    %56 = vector.shape_cast %55 : vector<8xf32> to vector<8x1xf32>
    %57 = arith.addf %54, %56 : vector<8x1xf32>
    %c1_36 = arith.constant 1 : index
    %c0_37 = arith.constant 0 : index
    %c0_38 = arith.constant 0 : index
    %58 = vector.load %arg9[%c1_36, %c0_37, %c0_38] : memref<2x8x1xf32, #tpu.memory_space<vmem>>, vector<1x8x1xf32>
    %59 = vector.shape_cast %58 : vector<1x8x1xf32> to vector<8x1xf32>
    %60 = vector.shape_cast %57 : vector<8x1xf32> to vector<1x8x1xf32>
    tpu.vector_store %arg9[%c1_36, %c0_37, %c0_38], %60 {strides = array<i32>} : memref<2x8x1xf32, #tpu.memory_space<vmem>>, vector<1x8x1xf32>,
    %c0_39 = arith.constant 0 : index
    %c128_40 = arith.constant 128 : index
    %61 = vector.load %arg10[%c0_39, %c128_40] : memref<8x256xf32, #tpu.memory_space<vmem>>, vector<8x128xf32>
    %62 = vector.broadcast %48 : vector<8x1xf32> to vector<8x128xf32>
    %63 = arith.mulf %62, %61 : vector<8x128xf32>
    %64 = arith.truncf %51 : vector<8x8xf32> to vector<8x8xbf16>
    %cst_41 = arith.constant dense<0.000000e+00> : vector<8x128xf32>
    %65 = tpu.matmul %64, %4, %cst_41 {dimension_numbers = #tpu.dot_dimension_numbers<[1], [0], [0], [1], [0, 0, 1, 1], [], []>} : vector<8x8xbf16>, vector<8x128xbf16>, vector<8x128xf32> -> vector<8x128xf32>
    %66 = arith.addf %63, %65 : vector<8x128xf32>
    %c0_42 = arith.constant 0 : index
    %c128_43 = arith.constant 128 : index
    %67 = vector.load %arg10[%c0_42, %c128_43] : memref<8x256xf32, #tpu.memory_space<vmem>>, vector<8x128xf32>
    tpu.vector_store %arg10[%c0_42, %c128_43], %66 {strides = array<i32>} : memref<8x256xf32, #tpu.memory_space<vmem>>, vector<8x128xf32>,
    %c1_44 = arith.constant 1 : index
    %c0_45 = arith.constant 0 : index
    %c0_46 = arith.constant 0 : index
    %68 = vector.load %arg8[%c1_44, %c0_45, %c0_46] : memref<2x8x1xf32, #tpu.memory_space<vmem>>, vector<1x8x1xf32>
    %69 = vector.shape_cast %68 : vector<1x8x1xf32> to vector<8x1xf32>
    %70 = vector.shape_cast %46 : vector<8x1xf32> to vector<1x8x1xf32>
    tpu.vector_store %arg8[%c1_44, %c0_45, %c0_46], %70 {strides = array<i32>} : memref<2x8x1xf32, #tpu.memory_space<vmem>>, vector<1x8x1xf32>,
    %c0_i32_47 = arith.constant 0 : i32
    %71 = arith.cmpi eq, %arg3, %c0_i32_47 : i32
    %72 = arith.extui %71 : i1 to i32
    %c0_i32_48 = arith.constant 0 : i32
    %73 = arith.cmpi ne, %72, %c0_i32_48 : i32
    scf.if %73 {
      %c0_49 = arith.constant 0 : index
      %c0_50 = arith.constant 0 : index
      %c0_51 = arith.constant 0 : index
      %74 = vector.load %arg9[%c0_49, %c0_50, %c0_51] : memref<2x8x1xf32, #tpu.memory_space<vmem>>, vector<1x8x1xf32>
      %75 = vector.shape_cast %74 : vector<1x8x1xf32> to vector<8x1xf32>
      %cst_52 = arith.constant 1.000000e+00 : f32
      %76 = vector.broadcast %cst_52 : f32 to vector<8x1xf32>
      %77 = arith.divf %76, %75 : vector<8x1xf32>
      %c0_53 = arith.constant 0 : index
      %c0_54 = arith.constant 0 : index
      %78 = vector.load %arg10[%c0_53, %c0_54] : memref<8x256xf32, #tpu.memory_space<vmem>>, vector<8x128xf32>
      %79 = vector.broadcast %77 : vector<8x1xf32> to vector<8x128xf32>
      %80 = arith.mulf %78, %79 : vector<8x128xf32>
      %81 = arith.truncf %80 : vector<8x128xf32> to vector<8x128xbf16>
      %c0_55 = arith.constant 0 : index
      %c0_56 = arith.constant 0 : index
      %82 = vector.load %arg7[%c0_55, %c0_56] : memref<8x256xbf16, #tpu.memory_space<vmem>>, vector<8x128xbf16>
      tpu.vector_store %arg7[%c0_55, %c0_56], %81 {strides = array<i32>} : memref<8x256xbf16, #tpu.memory_space<vmem>>, vector<8x128xbf16>,
      %c1_57 = arith.constant 1 : index
      %c0_58 = arith.constant 0 : index
      %c0_59 = arith.constant 0 : index
      %83 = vector.load %arg9[%c1_57, %c0_58, %c0_59] : memref<2x8x1xf32, #tpu.memory_space<vmem>>, vector<1x8x1xf32>
      %84 = vector.shape_cast %83 : vector<1x8x1xf32> to vector<8x1xf32>
      %cst_60 = arith.constant 1.000000e+00 : f32
      %85 = vector.broadcast %cst_60 : f32 to vector<8x1xf32>
      %86 = arith.divf %85, %84 : vector<8x1xf32>
      %c0_61 = arith.constant 0 : index
      %c128_62 = arith.constant 128 : index
      %87 = vector.load %arg10[%c0_61, %c128_62] : memref<8x256xf32, #tpu.memory_space<vmem>>, vector<8x128xf32>
      %88 = vector.broadcast %86 : vector<8x1xf32> to vector<8x128xf32>
      %89 = arith.mulf %87, %88 : vector<8x128xf32>
      %90 = arith.truncf %89 : vector<8x128xf32> to vector<8x128xbf16>
      %c0_63 = arith.constant 0 : index
      %c128_64 = arith.constant 128 : index
      %91 = vector.load %arg7[%c0_63, %c128_64] : memref<8x256xbf16, #tpu.memory_space<vmem>>, vector<8x128xbf16>
      tpu.vector_store %arg7[%c0_63, %c128_64], %90 {strides = array<i32>} : memref<8x256xbf16, #tpu.memory_space<vmem>>, vector<8x128xbf16>,
    } else {
    }
    return
  }
  func.func @transform_0(%arg0: i32, %arg1: i32, %arg2: i32, %arg3: i32) -> (i32, i32) {
    %c1_i32 = arith.constant 1 : i32
    %0 = arith.muli %arg0, %c1_i32 : i32
    %1 = arith.addi %0, %arg2 : i32
    %c0_i32 = arith.constant 0 : i32
    return %1, %arg1 : i32, i32
  }
  func.func @transform_1(%arg0: i32, %arg1: i32, %arg2: i32, %arg3: i32) -> (i32, i32) {
    %c1_i32 = arith.constant 1 : i32
    %0 = arith.muli %arg0, %c1_i32 : i32
    %1 = arith.addi %0, %arg3 : i32
    %c4_i32 = arith.constant 4 : i32
    %2 = arith.addi %c4_i32, %arg1 : i32
    %c0_i32 = arith.constant 0 : i32
    return %1, %2 : i32, i32
  }
  func.func @transform_2(%arg0: i32, %arg1: i32, %arg2: i32, %arg3: i32) -> (i32, i32) {
    %c1_i32 = arith.constant 1 : i32
    %0 = arith.muli %arg0, %c1_i32 : i32
    %1 = arith.addi %0, %arg3 : i32
    %c6_i32 = arith.constant 6 : i32
    %2 = arith.addi %c6_i32, %arg1 : i32
    %c0_i32 = arith.constant 0 : i32
    return %1, %2 : i32, i32
  }
  func.func @transform_3(%arg0: i32, %arg1: i32, %arg2: i32, %arg3: i32) -> (i32, i32) {
    %c1_i32 = arith.constant 1 : i32
    %0 = arith.muli %arg0, %c1_i32 : i32
    %1 = arith.addi %0, %arg2 : i32
    %c0_i32 = arith.constant 0 : i32
    return %1, %arg1 : i32, i32
  }
}

module attributes {stable_mosaic.version = 11 : i64} {
  func.func @_mlp_kernel(%arg0: i32, %arg1: i32, %arg2: memref<16x512xbf16, #tpu.memory_space<vmem>>, %arg3: memref<1x512xf32, #tpu.memory_space<vmem>>, %arg4: memref<512x512xbf16, #tpu.memory_space<vmem>>, %arg5: memref<512x512xbf16, #tpu.memory_space<vmem>>, %arg6: memref<512x512xbf16, #tpu.memory_space<vmem>>, %arg7: memref<16x512xbf16, #tpu.memory_space<vmem>>, %arg8: memref<16x512xbf16, #tpu.memory_space<vmem>>, %arg9: memref<16x512xf32, #tpu.memory_space<vmem>>) attributes {dimension_semantics = [#tpu.dimension_semantics<parallel>, #tpu.dimension_semantics<arbitrary>], iteration_bounds = array<i64: 1, 2>, scalar_prefetch = 0 : i64, scratch_operands = 2 : i64, tpu.core_type = #tpu.core_type<tc>, window_params = [{transform_indices = @transform_0, window_bounds = array<i64: 16, 512>}, {pipeline_mode = #tpu.pipeline_mode<synchronous>, transform_indices = @transform_1, window_bounds = array<i64: 1, 512>}, {transform_indices = @transform_2, window_bounds = array<i64: 512, 512>}, {transform_indices = @transform_3, window_bounds = array<i64: 512, 512>}, {transform_indices = @transform_4, window_bounds = array<i64: 512, 512>}, {transform_indices = @transform_5, window_bounds = array<i64: 16, 512>}]} {
    %c0_i32 = arith.constant 0 : i32
    %0 = arith.cmpi eq, %arg1, %c0_i32 : i32
    %1 = arith.extui %0 : i1 to i32
    %c0_i32_0 = arith.constant 0 : i32
    %2 = arith.cmpi ne, %1, %c0_i32_0 : i32
    scf.if %2 {
      %c0_16 = arith.constant 0 : index
      %c0_17 = arith.constant 0 : index
      %24 = vector.load %arg2[%c0_16, %c0_17] : memref<16x512xbf16, #tpu.memory_space<vmem>>, vector<16x512xbf16>
      %25 = arith.extf %24 : vector<16x512xbf16> to vector<16x512xf32>
      %26 = arith.mulf %25, %25 : vector<16x512xf32>
      %cst_18 = arith.constant dense<0.000000e+00> : vector<16xf32>
      %27 = vector.multi_reduction <add>, %26, %cst_18 [1] : vector<16x512xf32> to vector<16xf32>
      %28 = vector.shape_cast %27 : vector<16xf32> to vector<16x1xf32>
      %cst_19 = arith.constant 5.120000e+02 : f32
      %29 = vector.broadcast %cst_19 : f32 to vector<16x1xf32>
      %30 = arith.divf %28, %29 : vector<16x1xf32>
      %cst_20 = arith.constant 9.99999997E-7 : f32
      %31 = vector.broadcast %cst_20 : f32 to vector<16x1xf32>
      %32 = arith.addf %30, %31 : vector<16x1xf32>
      %33 = math.rsqrt %32 : vector<16x1xf32>
      %34 = vector.broadcast %33 : vector<16x1xf32> to vector<16x512xf32>
      %35 = arith.mulf %25, %34 : vector<16x512xf32>
      %c0_21 = arith.constant 0 : index
      %c0_22 = arith.constant 0 : index
      %36 = vector.load %arg3[%c0_21, %c0_22] : memref<1x512xf32, #tpu.memory_space<vmem>>, vector<1x512xf32>
      %37 = vector.broadcast %36 : vector<1x512xf32> to vector<16x512xf32>
      %38 = arith.mulf %35, %37 : vector<16x512xf32>
      %39 = arith.truncf %38 : vector<16x512xf32> to vector<16x512xbf16>
      %c0_23 = arith.constant 0 : index
      %c0_24 = arith.constant 0 : index
      %40 = vector.load %arg8[%c0_23, %c0_24] : memref<16x512xbf16, #tpu.memory_space<vmem>>, vector<16x512xbf16>
      tpu.vector_store %arg8[%c0_23, %c0_24], %39 {strides = array<i32>} : memref<16x512xbf16, #tpu.memory_space<vmem>>, vector<16x512xbf16>,
      %cst_25 = arith.constant 0.000000e+00 : f32
      %41 = vector.broadcast %cst_25 : f32 to vector<16x512xf32>
      %c0_26 = arith.constant 0 : index
      %c0_27 = arith.constant 0 : index
      %42 = vector.load %arg9[%c0_26, %c0_27] : memref<16x512xf32, #tpu.memory_space<vmem>>, vector<16x512xf32>
      tpu.vector_store %arg9[%c0_26, %c0_27], %41 {strides = array<i32>} : memref<16x512xf32, #tpu.memory_space<vmem>>, vector<16x512xf32>,
    } else {
    }
    %c0 = arith.constant 0 : index
    %c0_1 = arith.constant 0 : index
    %3 = vector.load %arg8[%c0, %c0_1] : memref<16x512xbf16, #tpu.memory_space<vmem>>, vector<16x512xbf16>
    %c0_2 = arith.constant 0 : index
    %c0_3 = arith.constant 0 : index
    %4 = vector.load %arg4[%c0_2, %c0_3] : memref<512x512xbf16, #tpu.memory_space<vmem>>, vector<512x512xbf16>
    %cst = arith.constant dense<0.000000e+00> : vector<16x512xf32>
    %5 = tpu.matmul %3, %4, %cst {dimension_numbers = #tpu.dot_dimension_numbers<[1], [0], [0], [1], [0, 0, 1, 1], [], []>} : vector<16x512xbf16>, vector<512x512xbf16>, vector<16x512xf32> -> vector<16x512xf32>
    %c0_4 = arith.constant 0 : index
    %c0_5 = arith.constant 0 : index
    %6 = vector.load %arg5[%c0_4, %c0_5] : memref<512x512xbf16, #tpu.memory_space<vmem>>, vector<512x512xbf16>
    %cst_6 = arith.constant dense<0.000000e+00> : vector<16x512xf32>
    %7 = tpu.matmul %3, %6, %cst_6 {dimension_numbers = #tpu.dot_dimension_numbers<[1], [0], [0], [1], [0, 0, 1, 1], [], []>} : vector<16x512xbf16>, vector<512x512xbf16>, vector<16x512xf32> -> vector<16x512xf32>
    %8 = arith.negf %5 : vector<16x512xf32>
    %9 = math.exp %8 : vector<16x512xf32>
    %cst_7 = arith.constant 1.000000e+00 : f32
    %10 = vector.broadcast %cst_7 : f32 to vector<16x512xf32>
    %11 = arith.addf %10, %9 : vector<16x512xf32>
    %12 = arith.divf %10, %11 : vector<16x512xf32>
    %13 = arith.mulf %5, %12 : vector<16x512xf32>
    %14 = arith.mulf %13, %7 : vector<16x512xf32>
    %c0_8 = arith.constant 0 : index
    %c0_9 = arith.constant 0 : index
    %15 = vector.load %arg9[%c0_8, %c0_9] : memref<16x512xf32, #tpu.memory_space<vmem>>, vector<16x512xf32>
    %16 = arith.truncf %14 : vector<16x512xf32> to vector<16x512xbf16>
    %c0_10 = arith.constant 0 : index
    %c0_11 = arith.constant 0 : index
    %17 = vector.load %arg6[%c0_10, %c0_11] : memref<512x512xbf16, #tpu.memory_space<vmem>>, vector<512x512xbf16>
    %cst_12 = arith.constant dense<0.000000e+00> : vector<16x512xf32>
    %18 = tpu.matmul %16, %17, %cst_12 {dimension_numbers = #tpu.dot_dimension_numbers<[1], [0], [0], [1], [0, 0, 1, 1], [], []>} : vector<16x512xbf16>, vector<512x512xbf16>, vector<16x512xf32> -> vector<16x512xf32>
    %19 = arith.addf %15, %18 : vector<16x512xf32>
    %c0_13 = arith.constant 0 : index
    %c0_14 = arith.constant 0 : index
    %20 = vector.load %arg9[%c0_13, %c0_14] : memref<16x512xf32, #tpu.memory_space<vmem>>, vector<16x512xf32>
    tpu.vector_store %arg9[%c0_13, %c0_14], %19 {strides = array<i32>} : memref<16x512xf32, #tpu.memory_space<vmem>>, vector<16x512xf32>,
    %c1_i32 = arith.constant 1 : i32
    %21 = arith.cmpi eq, %arg1, %c1_i32 : i32
    %22 = arith.extui %21 : i1 to i32
    %c0_i32_15 = arith.constant 0 : i32
    %23 = arith.cmpi ne, %22, %c0_i32_15 : i32
    scf.if %23 {
      %c0_16 = arith.constant 0 : index
      %c0_17 = arith.constant 0 : index
      %24 = vector.load %arg2[%c0_16, %c0_17] : memref<16x512xbf16, #tpu.memory_space<vmem>>, vector<16x512xbf16>
      %25 = arith.extf %24 : vector<16x512xbf16> to vector<16x512xf32>
      %c0_18 = arith.constant 0 : index
      %c0_19 = arith.constant 0 : index
      %26 = vector.load %arg9[%c0_18, %c0_19] : memref<16x512xf32, #tpu.memory_space<vmem>>, vector<16x512xf32>
      %27 = arith.addf %25, %26 : vector<16x512xf32>
      %28 = arith.truncf %27 : vector<16x512xf32> to vector<16x512xbf16>
      %c0_20 = arith.constant 0 : index
      %c0_21 = arith.constant 0 : index
      %29 = vector.load %arg7[%c0_20, %c0_21] : memref<16x512xbf16, #tpu.memory_space<vmem>>, vector<16x512xbf16>
      tpu.vector_store %arg7[%c0_20, %c0_21], %28 {strides = array<i32>} : memref<16x512xbf16, #tpu.memory_space<vmem>>, vector<16x512xbf16>,
    } else {
    }
    return
  }
  func.func @transform_0(%arg0: i32, %arg1: i32) -> (i32, i32) {
    %c0_i32 = arith.constant 0 : i32
    %c0_i32_0 = arith.constant 0 : i32
    return %arg0, %c0_i32 : i32, i32
  }
  func.func @transform_1(%arg0: i32, %arg1: i32) -> (i32, i32) {
    %c0_i32 = arith.constant 0 : i32
    %c0_i32_0 = arith.constant 0 : i32
    %c0_i32_1 = arith.constant 0 : i32
    return %c0_i32, %c0_i32_0 : i32, i32
  }
  func.func @transform_2(%arg0: i32, %arg1: i32) -> (i32, i32) {
    %c0_i32 = arith.constant 0 : i32
    %c0_i32_0 = arith.constant 0 : i32
    return %c0_i32, %arg1 : i32, i32
  }
  func.func @transform_3(%arg0: i32, %arg1: i32) -> (i32, i32) {
    %c0_i32 = arith.constant 0 : i32
    %c0_i32_0 = arith.constant 0 : i32
    return %c0_i32, %arg1 : i32, i32
  }
  func.func @transform_4(%arg0: i32, %arg1: i32) -> (i32, i32) {
    %c0_i32 = arith.constant 0 : i32
    %c0_i32_0 = arith.constant 0 : i32
    return %arg1, %c0_i32 : i32, i32
  }
  func.func @transform_5(%arg0: i32, %arg1: i32) -> (i32, i32) {
    %c0_i32 = arith.constant 0 : i32
    %c0_i32_0 = arith.constant 0 : i32
    return %arg0, %c0_i32 : i32, i32
  }
}

module attributes {stable_mosaic.version = 11 : i64} {
  func.func @_rms_qkv_rope_kernel(%arg0: i32, %arg1: i32, %arg2: memref<16x512xbf16, #tpu.memory_space<vmem>>, %arg3: memref<1x512xf32, #tpu.memory_space<vmem>>, %arg4: memref<512x128xbf16, #tpu.memory_space<vmem>>, %arg5: memref<16x128xf32, #tpu.memory_space<vmem>>, %arg6: memref<16x128xf32, #tpu.memory_space<vmem>>, %arg7: memref<16x128xbf16, #tpu.memory_space<vmem>>, %arg8: memref<16x512xbf16, #tpu.memory_space<vmem>>) attributes {dimension_semantics = [#tpu.dimension_semantics<parallel>, #tpu.dimension_semantics<arbitrary>], iteration_bounds = array<i64: 1, 8>, scalar_prefetch = 0 : i64, scratch_operands = 1 : i64, tpu.core_type = #tpu.core_type<tc>, window_params = [{transform_indices = @transform_0, window_bounds = array<i64: 16, 512>}, {pipeline_mode = #tpu.pipeline_mode<synchronous>, transform_indices = @transform_1, window_bounds = array<i64: 1, 512>}, {transform_indices = @transform_2, window_bounds = array<i64: 512, 128>}, {transform_indices = @transform_3, window_bounds = array<i64: 16, 128>}, {transform_indices = @transform_4, window_bounds = array<i64: 16, 128>}, {transform_indices = @transform_5, window_bounds = array<i64: 16, 128>}]} {
    %c0_i32 = arith.constant 0 : i32
    %0 = arith.cmpi eq, %arg1, %c0_i32 : i32
    %1 = arith.extui %0 : i1 to i32
    %c0_i32_0 = arith.constant 0 : i32
    %2 = arith.cmpi ne, %1, %c0_i32_0 : i32
    scf.if %2 {
      %c0_7 = arith.constant 0 : index
      %c0_8 = arith.constant 0 : index
      %12 = vector.load %arg2[%c0_7, %c0_8] : memref<16x512xbf16, #tpu.memory_space<vmem>>, vector<16x512xbf16>
      %13 = arith.extf %12 : vector<16x512xbf16> to vector<16x512xf32>
      %14 = arith.mulf %13, %13 : vector<16x512xf32>
      %cst_9 = arith.constant dense<0.000000e+00> : vector<16xf32>
      %15 = vector.multi_reduction <add>, %14, %cst_9 [1] : vector<16x512xf32> to vector<16xf32>
      %16 = vector.shape_cast %15 : vector<16xf32> to vector<16x1xf32>
      %cst_10 = arith.constant 5.120000e+02 : f32
      %17 = vector.broadcast %cst_10 : f32 to vector<16x1xf32>
      %18 = arith.divf %16, %17 : vector<16x1xf32>
      %cst_11 = arith.constant 9.99999997E-7 : f32
      %19 = vector.broadcast %cst_11 : f32 to vector<16x1xf32>
      %20 = arith.addf %18, %19 : vector<16x1xf32>
      %21 = math.rsqrt %20 : vector<16x1xf32>
      %22 = vector.broadcast %21 : vector<16x1xf32> to vector<16x512xf32>
      %23 = arith.mulf %13, %22 : vector<16x512xf32>
      %c0_12 = arith.constant 0 : index
      %c0_13 = arith.constant 0 : index
      %24 = vector.load %arg3[%c0_12, %c0_13] : memref<1x512xf32, #tpu.memory_space<vmem>>, vector<1x512xf32>
      %25 = vector.broadcast %24 : vector<1x512xf32> to vector<16x512xf32>
      %26 = arith.mulf %23, %25 : vector<16x512xf32>
      %27 = arith.truncf %26 : vector<16x512xf32> to vector<16x512xbf16>
      %c0_14 = arith.constant 0 : index
      %c0_15 = arith.constant 0 : index
      %28 = vector.load %arg8[%c0_14, %c0_15] : memref<16x512xbf16, #tpu.memory_space<vmem>>, vector<16x512xbf16>
      tpu.vector_store %arg8[%c0_14, %c0_15], %27 {strides = array<i32>} : memref<16x512xbf16, #tpu.memory_space<vmem>>, vector<16x512xbf16>,
    } else {
    }
    %c0 = arith.constant 0 : index
    %c0_1 = arith.constant 0 : index
    %3 = vector.load %arg8[%c0, %c0_1] : memref<16x512xbf16, #tpu.memory_space<vmem>>, vector<16x512xbf16>
    %c0_2 = arith.constant 0 : index
    %c0_3 = arith.constant 0 : index
    %4 = vector.load %arg4[%c0_2, %c0_3] : memref<512x128xbf16, #tpu.memory_space<vmem>>, vector<512x128xbf16>
    %cst = arith.constant dense<0.000000e+00> : vector<16x128xf32>
    %5 = tpu.matmul %3, %4, %cst {dimension_numbers = #tpu.dot_dimension_numbers<[1], [0], [0], [1], [0, 0, 1, 1], [], []>} : vector<16x512xbf16>, vector<512x128xbf16>, vector<16x128xf32> -> vector<16x128xf32>
    %c6_i32 = arith.constant 6 : i32
    %6 = arith.cmpi slt, %arg1, %c6_i32 : i32
    %7 = arith.extui %6 : i1 to i32
    %c0_i32_4 = arith.constant 0 : i32
    %8 = arith.cmpi ne, %7, %c0_i32_4 : i32
    scf.if %8 {
      %c0_7 = arith.constant 0 : index
      %c0_8 = arith.constant 0 : index
      %12 = vector.load %arg5[%c0_7, %c0_8] : memref<16x128xf32, #tpu.memory_space<vmem>>, vector<16x128xf32>
      %13 = arith.mulf %5, %12 : vector<16x128xf32>
      %c64_i32 = arith.constant 64 : i32
      %14 = tpu.dynamic_rotate %5 by %c64_i32 dim 1 : vector<16x128xf32>, i32 -> vector<16x128xf32>
      %c0_9 = arith.constant 0 : index
      %c0_10 = arith.constant 0 : index
      %15 = vector.load %arg6[%c0_9, %c0_10] : memref<16x128xf32, #tpu.memory_space<vmem>>, vector<16x128xf32>
      %16 = arith.mulf %14, %15 : vector<16x128xf32>
      %17 = arith.addf %13, %16 : vector<16x128xf32>
      %18 = arith.truncf %17 : vector<16x128xf32> to vector<16x128xbf16>
      %c0_11 = arith.constant 0 : index
      %c0_12 = arith.constant 0 : index
      %19 = vector.load %arg7[%c0_11, %c0_12] : memref<16x128xbf16, #tpu.memory_space<vmem>>, vector<16x128xbf16>
      tpu.vector_store %arg7[%c0_11, %c0_12], %18 {strides = array<i32>} : memref<16x128xbf16, #tpu.memory_space<vmem>>, vector<16x128xbf16>,
    } else {
    }
    %c6_i32_5 = arith.constant 6 : i32
    %9 = arith.cmpi sge, %arg1, %c6_i32_5 : i32
    %10 = arith.extui %9 : i1 to i32
    %c0_i32_6 = arith.constant 0 : i32
    %11 = arith.cmpi ne, %10, %c0_i32_6 : i32
    scf.if %11 {
      %12 = arith.truncf %5 : vector<16x128xf32> to vector<16x128xbf16>
      %c0_7 = arith.constant 0 : index
      %c0_8 = arith.constant 0 : index
      %13 = vector.load %arg7[%c0_7, %c0_8] : memref<16x128xbf16, #tpu.memory_space<vmem>>, vector<16x128xbf16>
      tpu.vector_store %arg7[%c0_7, %c0_8], %12 {strides = array<i32>} : memref<16x128xbf16, #tpu.memory_space<vmem>>, vector<16x128xbf16>,
    } else {
    }
    return
  }
  func.func @transform_0(%arg0: i32, %arg1: i32) -> (i32, i32) {
    %c0_i32 = arith.constant 0 : i32
    %c0_i32_0 = arith.constant 0 : i32
    return %arg0, %c0_i32 : i32, i32
  }
  func.func @transform_1(%arg0: i32, %arg1: i32) -> (i32, i32) {
    %c0_i32 = arith.constant 0 : i32
    %c0_i32_0 = arith.constant 0 : i32
    %c0_i32_1 = arith.constant 0 : i32
    return %c0_i32, %c0_i32_0 : i32, i32
  }
  func.func @transform_2(%arg0: i32, %arg1: i32) -> (i32, i32) {
    %c0_i32 = arith.constant 0 : i32
    %c0_i32_0 = arith.constant 0 : i32
    return %c0_i32, %arg1 : i32, i32
  }
  func.func @transform_3(%arg0: i32, %arg1: i32) -> (i32, i32) {
    %c0_i32 = arith.constant 0 : i32
    %c0_i32_0 = arith.constant 0 : i32
    return %arg0, %c0_i32 : i32, i32
  }
  func.func @transform_4(%arg0: i32, %arg1: i32) -> (i32, i32) {
    %c0_i32 = arith.constant 0 : i32
    %c0_i32_0 = arith.constant 0 : i32
    return %arg0, %c0_i32 : i32, i32
  }
  func.func @transform_5(%arg0: i32, %arg1: i32) -> (i32, i32) {
    %c0_i32 = arith.constant 0 : i32
    return %arg0, %arg1 : i32, i32
  }
}

module attributes {stable_mosaic.version = 11 : i64} {
  func.func @_mlp_kernel(%arg0: i32, %arg1: i32, %arg2: memref<16x512xbf16, #tpu.memory_space<vmem>>, %arg3: memref<1x512xf32, #tpu.memory_space<vmem>>, %arg4: memref<512x512xbf16, #tpu.memory_space<vmem>>, %arg5: memref<512x512xbf16, #tpu.memory_space<vmem>>, %arg6: memref<512x512xbf16, #tpu.memory_space<vmem>>, %arg7: memref<16x512xbf16, #tpu.memory_space<vmem>>, %arg8: memref<16x512xbf16, #tpu.memory_space<vmem>>, %arg9: memref<16x512xf32, #tpu.memory_space<vmem>>) attributes {dimension_semantics = [#tpu.dimension_semantics<parallel>, #tpu.dimension_semantics<arbitrary>], iteration_bounds = array<i64: 1, 2>, scalar_prefetch = 0 : i64, scratch_operands = 2 : i64, tpu.core_type = #tpu.core_type<tc>, window_params = [{transform_indices = @transform_0, window_bounds = array<i64: 16, 512>}, {pipeline_mode = #tpu.pipeline_mode<synchronous>, transform_indices = @transform_1, window_bounds = array<i64: 1, 512>}, {transform_indices = @transform_2, window_bounds = array<i64: 512, 512>}, {transform_indices = @transform_3, window_bounds = array<i64: 512, 512>}, {transform_indices = @transform_4, window_bounds = array<i64: 512, 512>}, {transform_indices = @transform_5, window_bounds = array<i64: 16, 512>}]} {
    %c0_i32 = arith.constant 0 : i32
    %0 = arith.cmpi eq, %arg1, %c0_i32 : i32
    %1 = arith.extui %0 : i1 to i32
    %c0_i32_0 = arith.constant 0 : i32
    %2 = arith.cmpi ne, %1, %c0_i32_0 : i32
    scf.if %2 {
      %c0_16 = arith.constant 0 : index
      %c0_17 = arith.constant 0 : index
      %24 = vector.load %arg2[%c0_16, %c0_17] : memref<16x512xbf16, #tpu.memory_space<vmem>>, vector<16x512xbf16>
      %25 = arith.extf %24 : vector<16x512xbf16> to vector<16x512xf32>
      %26 = arith.mulf %25, %25 : vector<16x512xf32>
      %cst_18 = arith.constant dense<0.000000e+00> : vector<16xf32>
      %27 = vector.multi_reduction <add>, %26, %cst_18 [1] : vector<16x512xf32> to vector<16xf32>
      %28 = vector.shape_cast %27 : vector<16xf32> to vector<16x1xf32>
      %cst_19 = arith.constant 5.120000e+02 : f32
      %29 = vector.broadcast %cst_19 : f32 to vector<16x1xf32>
      %30 = arith.divf %28, %29 : vector<16x1xf32>
      %cst_20 = arith.constant 9.99999997E-7 : f32
      %31 = vector.broadcast %cst_20 : f32 to vector<16x1xf32>
      %32 = arith.addf %30, %31 : vector<16x1xf32>
      %33 = math.rsqrt %32 : vector<16x1xf32>
      %34 = vector.broadcast %33 : vector<16x1xf32> to vector<16x512xf32>
      %35 = arith.mulf %25, %34 : vector<16x512xf32>
      %c0_21 = arith.constant 0 : index
      %c0_22 = arith.constant 0 : index
      %36 = vector.load %arg3[%c0_21, %c0_22] : memref<1x512xf32, #tpu.memory_space<vmem>>, vector<1x512xf32>
      %37 = vector.broadcast %36 : vector<1x512xf32> to vector<16x512xf32>
      %38 = arith.mulf %35, %37 : vector<16x512xf32>
      %39 = arith.truncf %38 : vector<16x512xf32> to vector<16x512xbf16>
      %c0_23 = arith.constant 0 : index
      %c0_24 = arith.constant 0 : index
      %40 = vector.load %arg8[%c0_23, %c0_24] : memref<16x512xbf16, #tpu.memory_space<vmem>>, vector<16x512xbf16>
      tpu.vector_store %arg8[%c0_23, %c0_24], %39 {strides = array<i32>} : memref<16x512xbf16, #tpu.memory_space<vmem>>, vector<16x512xbf16>,
      %cst_25 = arith.constant 0.000000e+00 : f32
      %41 = vector.broadcast %cst_25 : f32 to vector<16x512xf32>
      %c0_26 = arith.constant 0 : index
      %c0_27 = arith.constant 0 : index
      %42 = vector.load %arg9[%c0_26, %c0_27] : memref<16x512xf32, #tpu.memory_space<vmem>>, vector<16x512xf32>
      tpu.vector_store %arg9[%c0_26, %c0_27], %41 {strides = array<i32>} : memref<16x512xf32, #tpu.memory_space<vmem>>, vector<16x512xf32>,
    } else {
    }
    %c0 = arith.constant 0 : index
    %c0_1 = arith.constant 0 : index
    %3 = vector.load %arg8[%c0, %c0_1] : memref<16x512xbf16, #tpu.memory_space<vmem>>, vector<16x512xbf16>
    %c0_2 = arith.constant 0 : index
    %c0_3 = arith.constant 0 : index
    %4 = vector.load %arg4[%c0_2, %c0_3] : memref<512x512xbf16, #tpu.memory_space<vmem>>, vector<512x512xbf16>
    %cst = arith.constant dense<0.000000e+00> : vector<16x512xf32>
    %5 = tpu.matmul %3, %4, %cst {dimension_numbers = #tpu.dot_dimension_numbers<[1], [0], [0], [1], [0, 0, 1, 1], [], []>} : vector<16x512xbf16>, vector<512x512xbf16>, vector<16x512xf32> -> vector<16x512xf32>
    %c0_4 = arith.constant 0 : index
    %c0_5 = arith.constant 0 : index
    %6 = vector.load %arg5[%c0_4, %c0_5] : memref<512x512xbf16, #tpu.memory_space<vmem>>, vector<512x512xbf16>
    %cst_6 = arith.constant dense<0.000000e+00> : vector<16x512xf32>
    %7 = tpu.matmul %3, %6, %cst_6 {dimension_numbers = #tpu.dot_dimension_numbers<[1], [0], [0], [1], [0, 0, 1, 1], [], []>} : vector<16x512xbf16>, vector<512x512xbf16>, vector<16x512xf32> -> vector<16x512xf32>
    %8 = arith.negf %5 : vector<16x512xf32>
    %9 = math.exp %8 : vector<16x512xf32>
    %cst_7 = arith.constant 1.000000e+00 : f32
    %10 = vector.broadcast %cst_7 : f32 to vector<16x512xf32>
    %11 = arith.addf %10, %9 : vector<16x512xf32>
    %12 = arith.divf %10, %11 : vector<16x512xf32>
    %13 = arith.mulf %5, %12 : vector<16x512xf32>
    %14 = arith.mulf %13, %7 : vector<16x512xf32>
    %c0_8 = arith.constant 0 : index
    %c0_9 = arith.constant 0 : index
    %15 = vector.load %arg9[%c0_8, %c0_9] : memref<16x512xf32, #tpu.memory_space<vmem>>, vector<16x512xf32>
    %16 = arith.truncf %14 : vector<16x512xf32> to vector<16x512xbf16>
    %c0_10 = arith.constant 0 : index
    %c0_11 = arith.constant 0 : index
    %17 = vector.load %arg6[%c0_10, %c0_11] : memref<512x512xbf16, #tpu.memory_space<vmem>>, vector<512x512xbf16>
    %cst_12 = arith.constant dense<0.000000e+00> : vector<16x512xf32>
    %18 = tpu.matmul %16, %17, %cst_12 {dimension_numbers = #tpu.dot_dimension_numbers<[1], [0], [0], [1], [0, 0, 1, 1], [], []>} : vector<16x512xbf16>, vector<512x512xbf16>, vector<16x512xf32> -> vector<16x512xf32>
    %19 = arith.addf %15, %18 : vector<16x512xf32>
    %c0_13 = arith.constant 0 : index
    %c0_14 = arith.constant 0 : index
    %20 = vector.load %arg9[%c0_13, %c0_14] : memref<16x512xf32, #tpu.memory_space<vmem>>, vector<16x512xf32>
    tpu.vector_store %arg9[%c0_13, %c0_14], %19 {strides = array<i32>} : memref<16x512xf32, #tpu.memory_space<vmem>>, vector<16x512xf32>,
    %c1_i32 = arith.constant 1 : i32
    %21 = arith.cmpi eq, %arg1, %c1_i32 : i32
    %22 = arith.extui %21 : i1 to i32
    %c0_i32_15 = arith.constant 0 : i32
    %23 = arith.cmpi ne, %22, %c0_i32_15 : i32
    scf.if %23 {
      %c0_16 = arith.constant 0 : index
      %c0_17 = arith.constant 0 : index
      %24 = vector.load %arg2[%c0_16, %c0_17] : memref<16x512xbf16, #tpu.memory_space<vmem>>, vector<16x512xbf16>
      %25 = arith.extf %24 : vector<16x512xbf16> to vector<16x512xf32>
      %c0_18 = arith.constant 0 : index
      %c0_19 = arith.constant 0 : index
      %26 = vector.load %arg9[%c0_18, %c0_19] : memref<16x512xf32, #tpu.memory_space<vmem>>, vector<16x512xf32>
      %27 = arith.addf %25, %26 : vector<16x512xf32>
      %28 = arith.truncf %27 : vector<16x512xf32> to vector<16x512xbf16>
      %c0_20 = arith.constant 0 : index
      %c0_21 = arith.constant 0 : index
      %29 = vector.load %arg7[%c0_20, %c0_21] : memref<16x512xbf16, #tpu.memory_space<vmem>>, vector<16x512xbf16>
      tpu.vector_store %arg7[%c0_20, %c0_21], %28 {strides = array<i32>} : memref<16x512xbf16, #tpu.memory_space<vmem>>, vector<16x512xbf16>,
    } else {
    }
    return
  }
  func.func @transform_0(%arg0: i32, %arg1: i32) -> (i32, i32) {
    %c0_i32 = arith.constant 0 : i32
    %c0_i32_0 = arith.constant 0 : i32
    return %arg0, %c0_i32 : i32, i32
  }
  func.func @transform_1(%arg0: i32, %arg1: i32) -> (i32, i32) {
    %c0_i32 = arith.constant 0 : i32
    %c0_i32_0 = arith.constant 0 : i32
    %c0_i32_1 = arith.constant 0 : i32
    return %c0_i32, %c0_i32_0 : i32, i32
  }
  func.func @transform_2(%arg0: i32, %arg1: i32) -> (i32, i32) {
    %c0_i32 = arith.constant 0 : i32
    %c0_i32_0 = arith.constant 0 : i32
    return %c0_i32, %arg1 : i32, i32
  }
  func.func @transform_3(%arg0: i32, %arg1: i32) -> (i32, i32) {
    %c0_i32 = arith.constant 0 : i32
    %c0_i32_0 = arith.constant 0 : i32
    return %c0_i32, %arg1 : i32, i32
  }
  func.func @transform_4(%arg0: i32, %arg1: i32) -> (i32, i32) {
    %c0_i32 = arith.constant 0 : i32
    %c0_i32_0 = arith.constant 0 : i32
    return %arg1, %c0_i32 : i32, i32
  }
  func.func @transform_5(%arg0: i32, %arg1: i32) -> (i32, i32) {
    %c0_i32 = arith.constant 0 : i32
    %c0_i32_0 = arith.constant 0 : i32
    return %arg0, %c0_i32 : i32, i32
  }
}

module attributes {stable_mosaic.version = 11 : i64} {
  func.func @_rms_matmul_kernel(%arg0: i32, %arg1: i32, %arg2: memref<16x512xbf16, #tpu.memory_space<vmem>>, %arg3: memref<1x512xf32, #tpu.memory_space<vmem>>, %arg4: memref<512x256xbf16, #tpu.memory_space<vmem>>, %arg5: memref<16x256xf32, #tpu.memory_space<vmem>>, %arg6: memref<16x512xbf16, #tpu.memory_space<vmem>>) attributes {dimension_semantics = [#tpu.dimension_semantics<parallel>, #tpu.dimension_semantics<arbitrary>], iteration_bounds = array<i64: 1, 1>, scalar_prefetch = 0 : i64, scratch_operands = 1 : i64, tpu.core_type = #tpu.core_type<tc>, window_params = [{transform_indices = @transform_0, window_bounds = array<i64: 16, 512>}, {pipeline_mode = #tpu.pipeline_mode<synchronous>, transform_indices = @transform_1, window_bounds = array<i64: 1, 512>}, {transform_indices = @transform_2, window_bounds = array<i64: 512, 256>}, {transform_indices = @transform_3, window_bounds = array<i64: 16, 256>}]} {
    %c0_i32 = arith.constant 0 : i32
    %0 = arith.cmpi eq, %arg1, %c0_i32 : i32
    %1 = arith.extui %0 : i1 to i32
    %c0_i32_0 = arith.constant 0 : i32
    %2 = arith.cmpi ne, %1, %c0_i32_0 : i32
    scf.if %2 {
      %c0_6 = arith.constant 0 : index
      %c0_7 = arith.constant 0 : index
      %7 = vector.load %arg2[%c0_6, %c0_7] : memref<16x512xbf16, #tpu.memory_space<vmem>>, vector<16x512xbf16>
      %8 = arith.extf %7 : vector<16x512xbf16> to vector<16x512xf32>
      %9 = arith.mulf %8, %8 : vector<16x512xf32>
      %cst_8 = arith.constant dense<0.000000e+00> : vector<16xf32>
      %10 = vector.multi_reduction <add>, %9, %cst_8 [1] : vector<16x512xf32> to vector<16xf32>
      %11 = vector.shape_cast %10 : vector<16xf32> to vector<16x1xf32>
      %cst_9 = arith.constant 5.120000e+02 : f32
      %12 = vector.broadcast %cst_9 : f32 to vector<16x1xf32>
      %13 = arith.divf %11, %12 : vector<16x1xf32>
      %cst_10 = arith.constant 9.99999997E-7 : f32
      %14 = vector.broadcast %cst_10 : f32 to vector<16x1xf32>
      %15 = arith.addf %13, %14 : vector<16x1xf32>
      %16 = math.rsqrt %15 : vector<16x1xf32>
      %17 = vector.broadcast %16 : vector<16x1xf32> to vector<16x512xf32>
      %18 = arith.mulf %8, %17 : vector<16x512xf32>
      %c0_11 = arith.constant 0 : index
      %c0_12 = arith.constant 0 : index
      %19 = vector.load %arg3[%c0_11, %c0_12] : memref<1x512xf32, #tpu.memory_space<vmem>>, vector<1x512xf32>
      %20 = vector.broadcast %19 : vector<1x512xf32> to vector<16x512xf32>
      %21 = arith.mulf %18, %20 : vector<16x512xf32>
      %22 = arith.truncf %21 : vector<16x512xf32> to vector<16x512xbf16>
      %c0_13 = arith.constant 0 : index
      %c0_14 = arith.constant 0 : index
      %23 = vector.load %arg6[%c0_13, %c0_14] : memref<16x512xbf16, #tpu.memory_space<vmem>>, vector<16x512xbf16>
      tpu.vector_store %arg6[%c0_13, %c0_14], %22 {strides = array<i32>} : memref<16x512xbf16, #tpu.memory_space<vmem>>, vector<16x512xbf16>,
    } else {
    }
    %c0 = arith.constant 0 : index
    %c0_1 = arith.constant 0 : index
    %3 = vector.load %arg6[%c0, %c0_1] : memref<16x512xbf16, #tpu.memory_space<vmem>>, vector<16x512xbf16>
    %c0_2 = arith.constant 0 : index
    %c0_3 = arith.constant 0 : index
    %4 = vector.load %arg4[%c0_2, %c0_3] : memref<512x256xbf16, #tpu.memory_space<vmem>>, vector<512x256xbf16>
    %cst = arith.constant dense<0.000000e+00> : vector<16x256xf32>
    %5 = tpu.matmul %3, %4, %cst {dimension_numbers = #tpu.dot_dimension_numbers<[1], [0], [0], [1], [0, 0, 1, 1], [], []>} : vector<16x512xbf16>, vector<512x256xbf16>, vector<16x256xf32> -> vector<16x256xf32>
    %c0_4 = arith.constant 0 : index
    %c0_5 = arith.constant 0 : index
    %6 = vector.load %arg5[%c0_4, %c0_5] : memref<16x256xf32, #tpu.memory_space<vmem>>, vector<16x256xf32>
    tpu.vector_store %arg5[%c0_4, %c0_5], %5 {strides = array<i32>} : memref<16x256xf32, #tpu.memory_space<vmem>>, vector<16x256xf32>,
    return
  }
  func.func @transform_0(%arg0: i32, %arg1: i32) -> (i32, i32) {
    %c0_i32 = arith.constant 0 : i32
    %c0_i32_0 = arith.constant 0 : i32
    return %arg0, %c0_i32 : i32, i32
  }
  func.func @transform_1(%arg0: i32, %arg1: i32) -> (i32, i32) {
    %c0_i32 = arith.constant 0 : i32
    %c0_i32_0 = arith.constant 0 : i32
    %c0_i32_1 = arith.constant 0 : i32
    return %c0_i32, %c0_i32_0 : i32, i32
  }
  func.func @transform_2(%arg0: i32, %arg1: i32) -> (i32, i32) {
    %c0_i32 = arith.constant 0 : i32
    %c0_i32_0 = arith.constant 0 : i32
    return %c0_i32, %arg1 : i32, i32
  }
  func.func @transform_3(%arg0: i32, %arg1: i32) -> (i32, i32) {
    %c0_i32 = arith.constant 0 : i32
    return %arg0, %arg1 : i32, i32
  }
}

</mosaic_0001>

<bundles_post_ra>
// kernel: _lambda_.10
= control target key start
LH: loop header
LB: loop body
LE: loop exit
PB: predicated region body
PF: predicated region fallthrough
CT: control target
= control target key end

     0   :  { %s921_s12 = smov 0   ;;  %s923_s13 = smov 0   ;;  %s1030_s0 = inlined_call_operand.vmem [shape: bf16[16,1024], index: 0, kind: input, shape index: {}, may-alias: {0,1,2}]   ;;  %s1031_s1 = inlined_call_operand.vmem [shape: bf16[16,1024], index: 1, kind: input, shape index: {}, may-alias: {0,1,2}]   ;;  %s1032_s2 = inlined_call_operand.vmem [shape: bf16[16,1024], index: 2, kind: input, shape index: {}, may-alias: {0,1,2}]   ;;  %s1033_s3 = inlined_call_operand.vmem [shape: bf16[16,512], index: 3, kind: output, shape index: {}]  }
   0x1   :  { %s925_s14 = smov 0   ;;  %s927_s15 = smov 0  }
   0x2   :  { %s929_s16 = smov 0  }
   0x3 LB: > { %s35_s17 = sadd.s32 1, %s887_s14  ;;  %s39_s18 = sadd.s32 1, %s891_s15  ;;  %s895_s16 = sphi %s929_s16, %s13_s16   ;;  %s891_s15 = sphi %s927_s15, %s1037_s15   ;;  %s887_s14 = sphi %s925_s14, %s1036_s14   ;;  %s883_s13 = sphi %s923_s13, %s1035_s13   ;;  %s879_s12 = sphi %s921_s12, %s1034_s12  }
   0x4   : > { %p37_p0 = scmp.ge.s32.totalorder %s35_s17, 2  ;;  %p752_p1 = scmp.ge.s32.totalorder %s895_s16, 1 }
   0x5   : > { %p224_p2 = scmp.lt.s32.totalorder %s895_s16, 5 }
   0x6   : > { %s1039_s17 = smov (%p37_p0, %s35_s17), 0  ;;  %s1041_s18 = smov (!%p37_p0, %s39_s18), %s891_s15 }
   0x7   : > { %p225_p3 = pnand %p752_p1, %p224_p2  ;;  %p41_p4 = scmp.ge.s32.totalorder %s1041_s18, 2 }
   0x8   : > { %p280_p5 = scmp.lt.s32.totalorder (!%p225_p3), %s883_s13, 1  ;;  %s291_s19 = sadd.s32 (!%p225_p3), 4, %s879_s12  ;;  %v897_v0 = vmov (!%p225_p3), 0.0   ;;  %vm898_vm0 = vmmov (!%p225_p3), 0   ;;  %vm331_vm1 = vcmask (!%p225_p3), 7168   ;;  %v899_v3 = vmov (!%p225_p3), -inf  }
   0x9   : > { %s1043_s18 = smov (%p41_p4, %s1041_s18), 0  ;;  %228 = sbr.rel (%p225_p3) target bundleno = 1340 (0x53c), region = 32 }
   0xa   : > { %775 = vmatprep.subr.bf16.mxu0 (!%p225_p3), %v897_v0  ;;  %p294_p6 = scmp.lt.s32.totalorder (!%p225_p3), %s291_s19, 7  ;;  %777 = vmatprep.mubr.msk.bf16.mxu0 (!%p225_p3), %vm898_vm0, %v897_v0  ;;  %s958_s20 = sshll.u32 (!%p225_p3), %s879_s12, 1  ;;  %332 = vst.msk [vmem:[#allocation2] sm:$0xff] (!%p225_p3), %vm331_vm1, %v899_v3  ;;  %333 = vst.msk [vmem:[#allocation2 + $0x8] sm:$0xff] (!%p225_p3), %vm331_vm1, %v899_v3  ;;  %vm383_vm2 = vcmask (!%p225_p3), 64512   ;;  %v900_v10 = vmov (!%p225_p3), 0  }
   0xb   : > { %781 = vmatprep.subr.bf16.mxu1 (!%p225_p3), %v897_v0  ;;  %783 = vmatprep.mubr.msk.bf16.mxu1 (!%p225_p3), %vm898_vm0, %v897_v0  ;;  %p282_p7 = scmp.lt.s32.totalorder (!%p225_p3), %s958_s20, 7  ;;  %334 = vst.msk [vmem:[#allocation3] sm:$0xff] (!%p225_p3), %vm331_vm1, %v897_v0  ;;  %335 = vst.msk [vmem:[#allocation3 + $0x8] sm:$0xff] (!%p225_p3), %vm331_vm1, %v897_v0  ;;  %s303_s6 = sadd.s32 (!%p225_p3), 6, %s879_s12  ;;  %vm418_vm3 = vcmask (!%p225_p3), 1043456  }
   0xc   : > { %843 = vset.pattern.permute.xlu0 (!%p225_p3), %v900_v10  ;;  %844 = vset.pattern.permute.xlu1 (!%p225_p3), %v900_v10  ;;  %p306_p8 = scmp.lt.s32.totalorder (!%p225_p3), %s303_s6, 7  ;;  %p318_p9 = scmp.lt.s32.totalorder (!%p225_p3), %s958_s20, 3 }
  0x10   : > { %s1045_s13 = smov (!%p280_p5, %s883_s13), 1  ;;  %s1047_s19 = smov (!%p294_p6, %s291_s19), 7 }
  0x11   : > { %s966_s21 = sshll.u32 %s1045_s13, 3  ;;  %v382_v11 = vld [vmem:[#allocation2] sm:$0xff]  ;;  %s1049_s6 = smov (!%p306_p8, %s303_s6), 7  ;;  %v508_v33 = vld [vmem:[#allocation2 + $0x8] sm:$0xff] }
  0x12   : > { %s297_s22 = sadd.s32 %s966_s21, %s1047_s19  ;;  %s309_s7 = sadd.s32 %s966_s21, %s1049_s6  ;;  %v399_v48 = vld [vmem:[#allocation3] sm:$0xff]  ;;  %v525_v54 = vld [vmem:[#allocation3 + $0x8] sm:$0xff] }
  0x13   : > { %s757_s23 = sshll.u32 %s297_s22, 2  ;;  %s759_s8 = sshll.u32 %s309_s7, 2 }
  0x14   : > { %s299_s26 = scalar_lea.vmem %s1031_s1, %s757_s23  ;;  %s311_s11 = scalar_lea.vmem %s1032_s2, %s759_s8 }
  0x15   : > { %v338_v1 = vld [vmem:[%s299_s26] sm:$0xf]  ;;  %s283_s27 = scalar_select %p282_p7, %s958_s20, 7 }
  0x16   : > { %776 = vmatpush3.bf16.xpose.msra.mxu0 %v338_v1  ;;  %v339_v15 = vld [vmem:[%s311_s11] sm:$0xf]  ;;  %s1051_s20 = smov (!%p318_p9, %s958_s20), 3  ;;  %s761_s12 = sshll.u32 %s1045_s13, 2 }
  0x17   : > { %s285_s28 = sadd.s32 %s966_s21, %s283_s27  ;;  %793 = vmatprep.subr.bf16.mxu0 %v897_v0  ;;  %v420_v16 = vsel %vm418_vm3, %v339_v15, 0  ;;  %s321_s19 = sadd.s32 %s761_s12, %s1051_s20 }
  0x18   : > { %s755_s29 = sshll.u32 %s285_s28, 2  ;;  %782 = vmatpush3.bf16.msra.mxu1 %v420_v16  ;;  %s762_s21 = sshll.u32 %s321_s19, 2 }
  0x19   : > { %s979_s5 = scalar_lea.vmem %s1030_s0, %s755_s29  ;;  %787 = vmatprep.subr.bf16.mxu1 %v897_v0  ;;  %s323_s24 = scalar_lea.vmem %s1033_s3, %s762_s21 }
  0x1a   : > { %v340_v2 = vld [vmem:[%s979_s5] sm:$0xf]  ;;  %v465_v22 = vld [vmem:[%s979_s5 + $0x4] sm:$0xf] }
  0x1d   : > { %778 = vmatmul.mubr.bf16.vlgmr.msra.gmra.mrb[0].mxu0 %v340_v2 }
  0x1e   : > { %795 = vmatprep.mubr.msk.bf16.mxu0 %vm898_vm0, %v897_v0  ;;  %794 = vmatpush3.bf16.msra.mxu0 %v420_v16 }
  0xf0   : > { %v375_v4 = vpop.f32.mrb[0].mxu0 }
  0xf1   : > { %v381_v5 = vmul.f32 0.088388346, %v375_v4  ;;  %v779_v6 = vpop.f32.mrb[1].mxu0 }
  0xf2   : > { %v378_v7 = vpop.f32.mrb[2].mxu0 }
  0xf3   : > { %v780_v8 = vpop.f32.mrb[3].mxu0  ;;  %v384_v9 = vsel %vm383_vm2, %v381_v5, -inf }
  0xf4   : > { %385 = vmax.xlane.f32.xlu0 %v384_v9 }
 0x181   : > { %v386_v12 = vpop.xlane.xlu0 %385 }
 0x182   : > { %v387_v13 = vmax.f32 %v382_v11, %v386_v12 }
 0x184   : > { %v388_v14 = vsub.f32 %v382_v11, %v387_v13  ;;  %464 = vst.msk [vmem:[#allocation2] sm:$0xff] %vm331_vm1, %v387_v13  ;;  %393 = vperm.xlu0 %843, %v387_v13  }
 0x186   : > { %v389_v37 = vmul.f32 1.442695, %v388_v14 }
 0x203   : > { %v394_v17 = vpop.permute.xlu0 %393 }
 0x204   : > { %v396_v18 = vsub.f32 %v381_v5, %v394_v17 }
 0x206   : > { %v397_v19 = vmul.f32 1.442695, %v396_v18 }
 0x208   : > { %845 = vpow2.f32 %v397_v19 }
 0x209   : > { %847 = vpow2.f32 %v389_v37 }
 0x212   : > { %v846_v20 = vpop.eup %845 }
 0x213   : > { %v414_v21 = vpack.c.bf16 %v846_v20, %v846_v20  ;;  %v401_v36 = vsel %vm383_vm2, %v846_v20, 0.0  ;;  %v848_v40 = vpop.eup %847 }
 0x214   : > { %v400_v49 = vmul.f32 %v848_v40, %v399_v48 }
 0x215   : > { %784 = vmatmul.mubr.msk.bf16.vlgmr.msra.gmra.mrb[0].mxu1 %vm383_vm2, %v414_v21 }
 0x216   : > { %788 = vmatpush3.bf16.xpose.msra.mxu1 %v338_v1  ;;  %789 = vmatprep.mubr.msk.bf16.mxu1 %vm898_vm0, %v897_v0 }
 0x21d   : > { %790 = vmatmul.mubr.bf16.vlgmr.msra.gmra.mrb[4].mxu1 %v465_v22 }
 0x2e8   : > { %v456_v23 = vpop.f32.mrb[0].mxu1 }
 0x2e9   : > { %v785_v24 = vpop.f32.mrb[1].mxu1 }
 0x2ea   : > { %v459_v25 = vpop.f32.mrb[2].mxu1 }
 0x2eb   : > { %v786_v26 = vpop.f32.mrb[3].mxu1 }
 0x2f0   : > { %v500_v27 = vpop.f32.mrb[4].mxu1 }
 0x2f1   : > { %v506_v28 = vmul.f32 0.088388346, %v500_v27  ;;  %v791_v29 = vpop.f32.mrb[5].mxu1 }
 0x2f2   : > { %v503_v30 = vpop.f32.mrb[6].mxu1 }
 0x2f3   : > { %v792_v31 = vpop.f32.mrb[7].mxu1  ;;  %v509_v32 = vsel %vm383_vm2, %v506_v28, -inf }
 0x2f4   : > { %510 = vmax.xlane.f32.xlu1 %v509_v32 }
 0x381   : > { %v511_v34 = vpop.xlane.xlu1 %510 }
 0x382   : > { %v512_v35 = vmax.f32 %v508_v33, %v511_v34 }
 0x384   : > { %585 = vst.msk [vmem:[#allocation2 + $0x8] sm:$0xff] %vm331_vm1, %v512_v35  ;;  %518 = vperm.xlu1 %844, %v512_v35   ;;  %v513_v38 = vsub.f32 %v508_v33, %v512_v35 }
 0x386   : > { %v514_v39 = vmul.f32 1.442695, %v513_v38 }
 0x388   : > { %849 = vpow2.f32 %v514_v39 }
 0x392   : > { %v850_v41 = vpop.eup %849 }
 0x393   : > { %v526_v55 = vmul.f32 %v850_v41, %v525_v54 }
 0x3a8   : > { %402 = vadd.xlane.f32.xlu1 %v401_v36 }
 0x3b9   : > { %410 = vperm.xlu1 %844, %v848_v40  }
 0x3bd   : > { %535 = vperm.xlu1 %844, %v850_v41  }
 0x403   : > { %v519_v42 = vpop.permute.xlu1 %518 }
 0x404   : > { %v521_v43 = vsub.f32 %v506_v28, %v519_v42 }
 0x406   : > { %v522_v44 = vmul.f32 1.442695, %v521_v43 }
 0x408   : > { %851 = vpow2.f32 %v522_v44 }
 0x412   : > { %v852_v45 = vpop.eup %851 }
 0x413   : > { %v527_v46 = vsel %vm383_vm2, %v852_v45, 0.0  ;;  %v539_v47 = vpack.c.bf16 %v852_v45, %v852_v45 }
 0x414   : > { %528 = vadd.xlane.f32.xlu0 %v527_v46 }
 0x415   : > { %796 = vmatmul.mubr.msk.bf16.vlgmr.msra.gmra.mrb[4].mxu0 %vm383_vm2, %v539_v47 }
 0x435   : > { %v403_v50 = vpop.xlane.xlu1 %402 }
 0x436   : > { %v404_v51 = vadd.f32 %v403_v50, %v400_v49 }
 0x438   : > { %406 = vst.msk [vmem:[#allocation3] sm:$0xff] %vm331_vm1, %v404_v51 }
 0x439   : > { %v411_v60 = vpop.permute.xlu1 %410 }
 0x43a   : > { %v413_v61 = vmul.f32 0.0, %v411_v60 }
 0x43c   : > { %v462_v63 = vadd.f32 %v456_v23, %v413_v61 }
 0x43d   : > { %v536_v62 = vpop.permute.xlu1 %535 }
 0x43e   : > { %v538_v7 = vmul.f32 0.0, %v536_v62 }
 0x43f   : > { %v589_v52 = vld [vmem:[#allocation3] sm:$0xff] }
 0x440   : > { %853 = vrcp.f32 %v589_v52 }
 0x44a   : > { %v854_v53 = vpop.eup %853 }
 0x44b   : > { %595 = vperm.xlu1 %844, %v854_v53  }
 0x4a1   : > { %v529_v56 = vpop.xlane.xlu0 %528 }
 0x4a2   : > { %v530_v57 = vadd.f32 %v529_v56, %v526_v55 }
 0x4a4   : > { %531 = vst.msk [vmem:[#allocation3 + $0x8] sm:$0xff] %vm331_vm1, %v530_v57 }
 0x4ab   : > { %v601_v58 = vld [vmem:[#allocation3 + $0x8] sm:$0xff] }
 0x4ac   : > { %855 = vrcp.f32 %v601_v58 }
 0x4b6   : > { %v856_v59 = vpop.eup %855 }
 0x4b7   : > { %607 = vperm.xlu0 %843, %v856_v59  }
 0x4ca   : > { %v596_v0 = vpop.permute.xlu1 %595 }
 0x4cb   : > { %v598_v1 = vmul.f32 %v596_v0, %v462_v63 }
 0x4cd   : > { %v599_v2 = vpack.c.bf16 %v598_v1, %v598_v1 }
 0x4cf   : > { %600 = vst [vmem:[%s323_s24] sm:$0xf] %v599_v2 }
 0x4e8   : > { %v577_v3 = vpop.f32.mrb[4].mxu0 }
 0x4e9   : > { %v797_v4 = vpop.f32.mrb[5].mxu0  ;;  %v583_v8 = vadd.f32 %v577_v3, %v538_v7 }
 0x4ea   : > { %v580_v5 = vpop.f32.mrb[6].mxu0 }
 0x4eb   : > { %v798_v6 = vpop.f32.mrb[7].mxu0 }
 0x536   : > { %v608_v9 = vpop.permute.xlu0 %607 }
 0x537   : > { %v610_v10 = vmul.f32 %v608_v9, %v583_v8 }
 0x539   : > { %v611_v11 = vpack.c.bf16 %v610_v10, %v610_v10 }
 0x53b   : > { %612 = vst [vmem:[%s323_s24 + $0x4] sm:$0xf] %v611_v11 }
 0x53c PF: > { %s13_s16 = sadd.s32 1, %s895_s16   ;;  %s1034_s12 = smov %s887_s14 }
 0x53d   : > { %p10_p10 = scmp.ge.s32.totalorder %s13_s16, 6   ;;  %s1035_s13 = smov %s891_s15 }
 0x53e   : > { %s1036_s14 = smov %s1039_s17  ;;  %s1037_s15 = smov %s1043_s18 }
 0x53f   :  { %12 = sbr.rel (!%p10_p10) target bundleno = 3 (0x3), region = 78 }

// kernel: _lambda_.9
= control target key start
LH: loop header
LB: loop body
LE: loop exit
PB: predicated region body
PF: predicated region fallthrough
CT: control target
= control target key end

     0   :  { %10 = vsyncpa [#allocation4], 0  ;;  %s1604_s0 = inlined_call_operand.vmem [shape: bf16[16,512], index: 0, kind: input, shape index: {}]   ;;  %s1605_s1 = inlined_call_operand.hbm [shape: f32[1,512], index: 1, kind: input, shape index: {}]   ;;  %s1606_s2 = inlined_call_operand.hbm [shape: bf16[512,1024], index: 2, kind: input, shape index: {}]   ;;  %s1607_s3 = inlined_call_operand.vmem [shape: f32[16,128], index: 3, kind: input, shape index: {}]   ;;  %s1608_s4 = inlined_call_operand.vmem [shape: f32[16,128], index: 4, kind: input, shape index: {}]   ;;  %s1609_s5 = inlined_call_operand.vmem [shape: bf16[16,1024], index: 5, kind: output, shape index: {}]  }
   0x1   :  { %11 = vsyncpa [#allocation6], 0 }
   0x2   :  { %13 = vsyncpa [#allocation6 + $0x1], 0  ;;  %s1362_s18 = smov 0   ;;  %s1364_s19 = smov 0  }
   0x3   :  { %s1366_s20 = smov 0   ;;  %s1368_s21 = smov 0  }
   0x4   :  { %s1370_s22 = smov 0   ;;  %s1372_s23 = smov 0  }
   0x5 LB: > { %s991_s24 = sadd.s32 4294967295, %s1324_s23   ;;  %s85_s25 = sadd.s32 1, %s1312_s20  ;;  %s1324_s23 = sphi %s1372_s23, %s19_s23   ;;  %s1320_s22 = sphi %s1370_s22, %s1631_s22   ;;  %s1316_s21 = sphi %s1368_s21, %s1630_s21   ;;  %s1312_s20 = sphi %s1366_s20, %s1629_s20   ;;  %s1308_s19 = sphi %s1364_s19, %s1628_s19   ;;  %s1304_s18 = sphi %s1362_s18, %s1627_s18  }
   0x6   : > { %p92_p0 = scmp.ne.s32.totalorder %s1312_s20, %s1308_s19  ;;  %p93_p1 = scmp.eq.s32.totalorder %s1324_s23, 0 }
   0x7   : > { %p98_p2 = scmp.ne.s32.totalorder %s1308_s19, %s1304_s18  ;;  %p1396_p3 = scmp.eq.s32.totalorder %s991_s24, 0 }
   0x8   : > { %p1400_p4 = por %p93_p1, %p92_p0  ;;  %p176_p5 = scmp.eq.s32.totalorder %s991_s24, 7 }
   0x9   : > { %s1615_s26 = scalar_select %p1396_p3, 1, 0 }
   0xa   : > { %p1406_p6 = por %p1396_p3, %p98_p2  ;;  %p993_p7 = scmp.ge.s32.totalorder %s1324_s23, 1 }
   0xb   : > { %p1411_p8 = por %p176_p5, %p92_p0  ;;  %p189_p9 = scmp.lt.s32.totalorder %s1324_s23, 9 }
   0xc   : > { %s1617_s28 = scalar_select %p1406_p6, 1, 0 }
   0xd   : > { %s1618_s29 = scalar_select %p1411_p8, 1, 0 }
   0xe   : > { %p1416_p10 = pnand %p993_p7, %p189_p9  ;;  %s1326_s6 = smov [#allocation3]  }
   0xf   : > { %s212_s7 = sshll.u32 %s1326_s6, 4  ;;  %p1121_p12 = scmp.lt.s32.totalorder %s1324_s23, 8  ;;  %s213_s7 = int_to_ptr.vmem [resolvable:$true] %s212_s7 }
  0x10   : > { %s1619_s30 = scalar_select %p1416_p10, 1, 0 }
  0x11   : > { %p1112_p11 = pneg %p1416_p10  ;;  %s241_s8 = sand.u32 1, %s1312_s20  }
  0x12   : > { %p1432_p0 = pnand %p1121_p12, %p1400_p4  ;;  %s1212_s13 = scalar_lea.hbm %s1605_s1, 64 }
  0x13   : > { %p1426_p13 = pnand %p1112_p11, %p1396_p3  ;;  %p1213_p1 = scmp.ne.s32.totalorder %s1605_s1, %s1212_s13 }
  0x14   : > { %s1621_s10 = scalar_select %p1432_p0, 1, 0 }
  0x15   : > { %p1214_p2 = pneg %p1426_p13  ;;  %p1219_p9 = scmp.lt.u32.totalorder %s1212_s13, %s1605_s1 }
  0x17   : > { %p1215_p5 = pnand %p1214_p2, %p1213_p1 }
  0x19   : > { %p1216_p7 = pneg %p1215_p5 }
  0x1b   : > { %p1221_p4 = pnand %p1219_p9, %p1216_p7 }
  0x1d   : > { %1224 = shalt.err (!%p1221_p4)
}
  0x1e   : > { %s1225_s18 = scalar_lea.vmem %s213_s7, 64  ;;  %p1233_p6 = scmp.lt.s32.totalorder %s213_s7, %s213_s7 }
  0x1f   : > { %p1226_p11 = scmp.ne.s32.totalorder %s213_s7, %s1225_s18  ;;  %p1234_p3 = scmp.lt.s32.totalorder %s1225_s18, %s1225_s18 }
  0x21   : > { %p1228_p12 = pnand %p1226_p11, %p1214_p2  ;;  %p1235_p10 = por %p1234_p3, %p1233_p6 }
  0x23   : > { %p1229_p8 = pneg %p1228_p12 }
  0x25   : > { %p1236_p0 = pnand %p1235_p10, %p1229_p8 }
  0x27   : > { %1239 = shalt.err (!%p1236_p0)
}
  0x28   : > { %1115 = dma.hbm_to_vmem [thread:$0]  (!%p1426_p13), %s1605_s1, 64, %s213_s7, [#allocation4]  }
  0x29   : > { %s28_s6 = sadd.s32 1, %s1320_s22  ;;  %s999_s11 = sshll.u32 %s241_s8, 8 }
  0x2a   : > { %p29_p3 = scmp.ge.s32.totalorder %s28_s6, 8  ;;  %s1000_s12 = sshll.u32 %s1320_s22, 6 }
  0x2b   : > { %s245_s13 = scalar_lea.vmem [#allocation5], %s999_s11  ;;  %s1461_s16 = scalar_lea.hbm %s1606_s2, %s1000_s12 }
  0x2c   : > { %s251_s9 = sshll.u32 %s245_s13, 4  ;;  %s1633_s6 = smov (%p29_p3, %s28_s6), 0  ;;  %s1463_s9 = int_to_ptr.vmem [resolvable:$true] %s251_s9 }
  0x2d   : > { %s82_s7 = ssub.s32 %s1320_s22, %s1633_s6  ;;  %s1474_s18 = scalar_lea.sflag [#allocation6], %s241_s8 }
  0x2e   : > { %p83_p6 = scmp.eq.s32.totalorder %s82_s7, 0  ;;  %s1240_s24 = scalar_lea.hbm %s1461_s16, 4096 }
  0x2f   : > { %p1241_p8 = scmp.ne.s32.totalorder %s1461_s16, %s1240_s24  ;;  %p1622_p10 = scmp.ne.s32.totalorder %s1621_s10, 0 }
  0x30   : > { %s1470_s17 = scalar_select %p83_p6, %s1312_s20, %s85_s25  }
  0x31   : > { %p1242_p13 = pneg %p1622_p10  ;;  %s1245_s12 = scalar_lea.hbm %s1606_s2, 32768 }
  0x32   : > { %p1246_p2 = scmp.lt.u32.totalorder %s1461_s16, %s1606_s2  ;;  %p1247_p5 = scmp.lt.u32.totalorder %s1245_s12, %s1240_s24 }
  0x33   : > { %p1243_p0 = pnand %p1242_p13, %p1241_p8  ;;  %p1249_p9 = scmp.lt.u32.totalorder %s1240_s24, %s1461_s16 }
  0x34   : > { %p1248_p7 = por %p1247_p5, %p1246_p2 }
  0x35   : > { %p1244_p1 = pneg %p1243_p0 }
  0x36   : > { %p1250_p4 = por %p1249_p9, %p1248_p7 }
  0x38   : > { %p1251_p11 = pnand %p1250_p4, %p1244_p1 }
  0x3a   : > { %1254 = shalt.err (!%p1251_p11)
}
  0x3b   : > { %s1255_s25 = scalar_lea.vmem %s1463_s9, 4096  ;;  %s1327_s8 = smov [#allocation5]  }
  0x3c   : > { %p1256_p12 = scmp.ne.s32.totalorder %s1463_s9, %s1255_s25  ;;  %s1260_s15 = sshll.u32 %s1327_s8, 4  ;;  %s1261_s15 = int_to_ptr.vmem [resolvable:$false] %s1260_s15 }
  0x3d   : > { %s1262_s7 = scalar_lea.vmem %s1261_s15, 8192  ;;  %p1263_p8 = scmp.lt.s32.totalorder %s1463_s9, %s1261_s15 }
  0x3e   : > { %p1258_p3 = pnand %p1256_p12, %p1242_p13  ;;  %p1264_p0 = scmp.lt.s32.totalorder %s1262_s7, %s1255_s25 }
  0x40   : > { %p1259_p6 = pneg %p1258_p3  ;;  %p1265_p2 = por %p1264_p0, %p1263_p8 }
  0x42   : > { %p1266_p5 = pnand %p1265_p2, %p1259_p6 }
  0x44   : > { %1269 = shalt.err (!%p1266_p5)
}
  0x45   : > { %s1328_s24 = smov 512   ;;  %s1329_s27 = smov 64  }
  0x46   : > { %s1330_s11 = smov 4   ;;  %p1623_p13 = scmp.ne.s32.totalorder %s1619_s30, 0 }
  0x47   : > { %1119 = dma.hbm_to_vmem [thread:$0]  (!%p1622_p10), %s1461_s16, 4096, %s1463_s9, %s1474_s18, %s1328_s24, %s1329_s27, %s1330_s11  }
  0x48   : > { %263 = sbr.rel (%p1623_p13) target bundleno = 661 (0x295), region = 40  ;;  %p1624_p1 = scmp.ne.s32.totalorder (!%p1623_p13), %s1615_s26, 0 }
  0x4f   : > { %1295 = dma.done.wait (%p1624_p1), [#allocation4], 64  }
  0x50   : > { %1297 = vsyncadd (%p1624_p1), [#allocation4], 4294967232  ;;  %s269_s12 = sand.u32 1, %s1308_s19   ;;  %p1625_p7 = scmp.ne.s32.totalorder %s1617_s28, 0 }
  0x51   : > { %s1003_s13 = sshll.u32 %s269_s12, 8  ;;  %s270_s14 = scalar_lea.sflag [#allocation6], %s269_s12 }
  0x52   : > { %s1509_s25 = scalar_lea.vmem [#allocation5], %s1003_s13 }
  0x53   : > { %1299 = dma.done.wait (%p1625_p7), %s270_s14, 4096  }
  0x54   : > { %1301 = vsyncadd (%p1625_p7), %s270_s14, 4294963200  ;;  %s1004_s30 = sshll.u32 %s269_s12, 3  ;;  %p1005_p10 = scmp.ne.s32.totalorder %s1316_s21, 0 }
  0x55   : > { %s1515_s10 = scalar_lea.vmem [#allocation7], %s1004_s30  ;;  %v340_v0 = vld [vmem:[%s1604_s0] sm:$0xff] (!%p1005_p10)  ;;  %v341_v1 = vld [vmem:[%s1604_s0 + $0x8] sm:$0xff] (!%p1005_p10)  ;;  %v342_v2 = vld [vmem:[%s1604_s0 + $0x10] sm:$0xff] (!%p1005_p10)  ;;  %v387_v29 = vlaneseq (!%p1005_p10) }
  0x56   : > { %339 = sbr.rel (%p1005_p10) target bundleno = 265 (0x109), region = 52  ;;  %v344_v3 = vunpack.c.l.bf16 (!%p1005_p10), %v340_v0  ;;  %v345_v4 = vunpack.c.h.bf16 (!%p1005_p10), %v340_v0  ;;  %v346_v5 = vunpack.c.l.bf16 (!%p1005_p10), %v341_v1  ;;  %v347_v6 = vunpack.c.h.bf16 (!%p1005_p10), %v341_v1  ;;  %v343_v7 = vld [vmem:[%s1604_s0 + $0x18] sm:$0xff] (!%p1005_p10)  ;;  %v385_v38 = vld [vmem:[#allocation3] sm:$0xf] (!%p1005_p10) }
  0x57   : > { %v348_v8 = vunpack.c.l.bf16 (!%p1005_p10), %v342_v2  ;;  %v349_v9 = vunpack.c.h.bf16 (!%p1005_p10), %v342_v2  ;;  %v350_v10 = vunpack.c.l.bf16 (!%p1005_p10), %v343_v7  ;;  %v351_v14 = vunpack.c.h.bf16 (!%p1005_p10), %v343_v7 }
  0x58   : > { %v352_v11 = vmul.f32 (!%p1005_p10), %v344_v3, %v344_v3  ;;  %v353_v12 = vmul.f32 (!%p1005_p10), %v345_v4, %v345_v4  ;;  %v354_v13 = vmul.f32 (!%p1005_p10), %v346_v5, %v346_v5  ;;  %v355_v18 = vmul.f32 (!%p1005_p10), %v347_v6, %v347_v6 }
  0x59   : > { %v356_v15 = vmul.f32 (!%p1005_p10), %v348_v8, %v348_v8  ;;  %v357_v16 = vmul.f32 (!%p1005_p10), %v349_v9, %v349_v9  ;;  %v358_v17 = vmul.f32 (!%p1005_p10), %v350_v10, %v350_v10  ;;  %v359_v22 = vmul.f32 (!%p1005_p10), %v351_v14, %v351_v14 }
  0x5a   : > { %v360_v19 = vadd.f32 (!%p1005_p10), %v353_v12, %v352_v11  ;;  %v388_v33 = vshrl.u32 (!%p1005_p10), %v387_v29, 7 }
  0x5b   : > { %v365_v20 = vadd.f32 (!%p1005_p10), %v357_v16, %v356_v15 }
  0x5c   : > { %v361_v21 = vadd.f32 (!%p1005_p10), %v360_v19, %v354_v13  ;;  %v389_v34 = vsub.s32 (!%p1005_p10), 0, %v388_v33  ;;  %v393_v35 = vsub.s32 (!%p1005_p10), 1, %v388_v33  ;;  %v397_v36 = vsub.s32 (!%p1005_p10), 2, %v388_v33 }
  0x5d   : > { %v366_v23 = vadd.f32 %v365_v20, %v358_v17  ;;  %v401_v37 = vsub.s32 3, %v388_v33 }
  0x5e   : > { %v362_v24 = vadd.f32 %v361_v21, %v355_v18  ;;  %v390_v40 = vrot.slane %v385_v38, %v389_v34  ;;  %v394_v41 = vrot.slane %v385_v38, %v393_v35  ;;  %v398_v42 = vrot.slane %v385_v38, %v397_v36 }
  0x5f   : > { %v367_v25 = vadd.f32 %v366_v23, %v359_v22  ;;  %v402_v43 = vrot.slane %v385_v38, %v401_v37 }
  0x60   : > { %363 = vadd.xlane.f32.xlu0 %v362_v24 }
  0x64   : > { %368 = vadd.xlane.f32.xlu0 %v367_v25 }
  0xed   : > { %v364_v26 = vpop.xlane.xlu0 %363 }
  0xee   : > { %v371_v27 = vmul.f32 0.001953125, %v364_v26 }
  0xf0   : > { %v373_v28 = vadd.f32 1e-06, %v371_v27 }
  0xf1   : > { %v369_v30 = vpop.xlane.xlu0 %368 }
  0xf2   : > { %1176 = vrsqrt.f32 %v373_v28  ;;  %v372_v31 = vmul.f32 0.001953125, %v369_v30 }
  0xf4   : > { %v374_v32 = vadd.f32 1e-06, %v372_v31 }
  0xf6   : > { %1178 = vrsqrt.f32 %v374_v32 }
  0xfc   : > { %v1177_v39 = vpop.eup %1176 }
  0xfd   : > { %v377_v44 = vmul.f32 %v1177_v39, %v344_v3  ;;  %v378_v45 = vmul.f32 %v1177_v39, %v345_v4  ;;  %v379_v46 = vmul.f32 %v1177_v39, %v346_v5  ;;  %v380_v47 = vmul.f32 %v1177_v39, %v347_v6 }
  0xff   : > { %v407_v53 = vmul.f32 %v390_v40, %v377_v44  ;;  %v408_v54 = vmul.f32 %v394_v41, %v378_v45  ;;  %v409_v55 = vmul.f32 %v398_v42, %v379_v46  ;;  %v410_v56 = vmul.f32 %v402_v43, %v380_v47 }
 0x100   : > { %v1179_v48 = vpop.eup %1178 }
 0x101   : > { %v381_v49 = vmul.f32 %v1179_v48, %v348_v8  ;;  %v382_v50 = vmul.f32 %v1179_v48, %v349_v9  ;;  %v383_v51 = vmul.f32 %v1179_v48, %v350_v10  ;;  %v384_v52 = vmul.f32 %v1179_v48, %v351_v14 }
 0x103   : > { %v411_v57 = vmul.f32 %v390_v40, %v381_v49  ;;  %v412_v58 = vmul.f32 %v394_v41, %v382_v50  ;;  %v413_v59 = vmul.f32 %v398_v42, %v383_v51  ;;  %v414_v60 = vmul.f32 %v402_v43, %v384_v52 }
 0x105   : > { %v415_v61 = vpack.c.bf16 %v411_v57, %v407_v53  ;;  %v416_v62 = vpack.c.bf16 %v412_v58, %v408_v54  ;;  %v417_v63 = vpack.c.bf16 %v413_v59, %v409_v55  ;;  %v418_v0 = vpack.c.bf16 %v414_v60, %v410_v56 }
 0x107   : > { %419 = vst [vmem:[#allocation2] sm:$0xff] %v415_v61  ;;  %420 = vst [vmem:[#allocation2 + $0x8] sm:$0xff] %v416_v62 }
 0x108   : > { %421 = vst [vmem:[#allocation2 + $0x10] sm:$0xff] %v417_v63  ;;  %422 = vst [vmem:[#allocation2 + $0x18] sm:$0xff] %v418_v0 }
 0x109 PF: > { %v1180_v1 = vld [vmem:[%s1509_s25 + $0x40] sm:$0xff]   ;;  %v1184_v5 = vld [vmem:[%s1509_s25 + $0x48] sm:$0xff]   ;;  %v1188_v9 = vld [vmem:[%s1509_s25 + $0x50] sm:$0xff]   ;;  %p1038_p9 = scmp.ge.s32.totalorder %s1316_s21, 6 }
 0x10a   : > { %v1181_v2 = vld [vmem:[%s1509_s25 + $0xc0] sm:$0xff]   ;;  %1062 = vmatprep.subr.bf16.mxu0 %v1180_v1  ;;  %v1185_v6 = vld [vmem:[%s1509_s25 + $0xc8] sm:$0xff]   ;;  %v1189_v10 = vld [vmem:[%s1509_s25 + $0xd0] sm:$0xff]   ;;  %s1331_s24 = smov (!%p1038_p9), 64  }
 0x10b   : > { %v1182_v3 = vld [vmem:[%s1509_s25] sm:$0xff]   ;;  %1084 = vmatprep.subr.bf16.mxu1 %v1181_v2  ;;  %v1186_v7 = vld [vmem:[%s1509_s25 + $0x8] sm:$0xff]   ;;  %v1190_v11 = vld [vmem:[%s1509_s25 + $0x10] sm:$0xff]  }
 0x10c   : > { %v1183_v4 = vld [vmem:[%s1509_s25 + $0x80] sm:$0xff]   ;;  %1063 = vmatpush3.bf16.msra.mxu0 %v1182_v3  ;;  %v1187_v8 = vld [vmem:[%s1509_s25 + $0x88] sm:$0xff]   ;;  %v1191_v12 = vld [vmem:[%s1509_s25 + $0x90] sm:$0xff]  }
 0x10d   : > { %1085 = vmatpush3.bf16.msra.mxu1 %v1183_v4  ;;  %1064 = vmatprep.subr.bf16.mxu0 %v1184_v5  ;;  %v1192_v13 = vld [vmem:[%s1509_s25 + $0x58] sm:$0xff]   ;;  %v1196_v17 = vld [vmem:[%s1509_s25 + $0x60] sm:$0xff]   ;;  %v1200_v21 = vld [vmem:[%s1509_s25 + $0x68] sm:$0xff]  }
 0x10e   : > { %1086 = vmatprep.subr.bf16.mxu1 %v1185_v6  ;;  %v1193_v14 = vld [vmem:[%s1509_s25 + $0xd8] sm:$0xff]   ;;  %v1197_v18 = vld [vmem:[%s1509_s25 + $0xe0] sm:$0xff]   ;;  %v1201_v22 = vld [vmem:[%s1509_s25 + $0xe8] sm:$0xff]  }
 0x10f   : > { %v1194_v15 = vld [vmem:[%s1509_s25 + $0x18] sm:$0xff]   ;;  %v1198_v19 = vld [vmem:[%s1509_s25 + $0x20] sm:$0xff]   ;;  %v1202_v23 = vld [vmem:[%s1509_s25 + $0x28] sm:$0xff]  }
 0x110   : > { %1065 = vmatpush3.bf16.msra.mxu0 %v1186_v7  ;;  %v1195_v16 = vld [vmem:[%s1509_s25 + $0x98] sm:$0xff]   ;;  %v1199_v20 = vld [vmem:[%s1509_s25 + $0xa0] sm:$0xff]   ;;  %v1203_v24 = vld [vmem:[%s1509_s25 + $0xa8] sm:$0xff]  }
 0x111   : > { %1087 = vmatpush3.bf16.msra.mxu1 %v1187_v8  ;;  %1066 = vmatprep.subr.bf16.mxu0 %v1188_v9  ;;  %v1204_v25 = vld [vmem:[%s1509_s25 + $0x70] sm:$0xff]   ;;  %v1208_v29 = vld [vmem:[%s1509_s25 + $0x78] sm:$0xff]   ;;  %v424_v33 = vld [vmem:[#allocation2 + $0x8] sm:$0xff] }
 0x112   : > { %1088 = vmatprep.subr.bf16.mxu1 %v1189_v10  ;;  %v1205_v26 = vld [vmem:[%s1509_s25 + $0xf0] sm:$0xff]   ;;  %v1209_v30 = vld [vmem:[%s1509_s25 + $0xf8] sm:$0xff]   ;;  %715 = vmatprep.mubr.bf16.mxu0 %v424_v33  ;;  %v770_v54 = vld [vmem:[%s1607_s3 + $0x8] sm:$0xff] (!%p1038_p9) }
 0x113   : > { %v1206_v27 = vld [vmem:[%s1509_s25 + $0x30] sm:$0xff]   ;;  %v1210_v31 = vld [vmem:[%s1509_s25 + $0x38] sm:$0xff]   ;;  %v778_v55 = vld [vmem:[%s1608_s4 + $0x8] sm:$0xff] (!%p1038_p9) }
 0x114   : > { %1067 = vmatpush3.bf16.msra.mxu0 %v1190_v11  ;;  %v1207_v28 = vld [vmem:[%s1509_s25 + $0xb0] sm:$0xff]   ;;  %v1211_v32 = vld [vmem:[%s1509_s25 + $0xb8] sm:$0xff]  }
 0x115   : > { %1089 = vmatpush3.bf16.msra.mxu1 %v1191_v12  ;;  %1068 = vmatprep.subr.bf16.mxu0 %v1192_v13  ;;  %v426_v34 = vld [vmem:[#allocation2 + $0x18] sm:$0xff]  ;;  %v423_v35 = vld [vmem:[#allocation2] sm:$0xff]  ;;  %v425_v36 = vld [vmem:[#allocation2 + $0x10] sm:$0xff] }
 0x116   : > { %1090 = vmatprep.subr.bf16.mxu1 %v1193_v14  ;;  %756 = vmatprep.mubr.bf16.mxu1 %v426_v34  ;;  %v777_v51 = vld [vmem:[%s1608_s4] sm:$0xff] (!%p1038_p9) }
 0x117   : > { %v769_v53 = vld [vmem:[%s1607_s3] sm:$0xff] (!%p1038_p9) }
 0x118   : > { %1069 = vmatpush3.bf16.msra.mxu0 %v1194_v15 }
 0x119   : > { %1091 = vmatpush3.bf16.msra.mxu1 %v1195_v16  ;;  %1070 = vmatprep.subr.bf16.mxu0 %v1196_v17 }
 0x11a   : > { %1092 = vmatprep.subr.bf16.mxu1 %v1197_v18 }
 0x11c   : > { %1071 = vmatpush3.bf16.msra.mxu0 %v1198_v19 }
 0x11d   : > { %1093 = vmatpush3.bf16.msra.mxu1 %v1199_v20  ;;  %1072 = vmatprep.subr.bf16.mxu0 %v1200_v21 }
 0x11e   : > { %1094 = vmatprep.subr.bf16.mxu1 %v1201_v22 }
 0x120   : > { %1073 = vmatpush3.bf16.msra.mxu0 %v1202_v23 }
 0x121   : > { %1095 = vmatpush3.bf16.msra.mxu1 %v1203_v24  ;;  %1074 = vmatprep.subr.bf16.mxu0 %v1204_v25 }
 0x122   : > { %1096 = vmatprep.subr.bf16.mxu1 %v1205_v26 }
 0x124   : > { %1075 = vmatpush3.bf16.msra.mxu0 %v1206_v27 }
 0x125   : > { %1097 = vmatpush3.bf16.msra.mxu1 %v1207_v28  ;;  %1076 = vmatprep.subr.bf16.mxu0 %v1208_v29 }
 0x126   : > { %1098 = vmatprep.subr.bf16.mxu1 %v1209_v30 }
 0x128   : > { %1077 = vmatpush3.bf16.msra.mxu0 %v1210_v31 }
 0x129   : > { %1099 = vmatpush3.bf16.msra.mxu1 %v1211_v32 }
 0x12b   : > { %716 = vmatmul.mubr.bf16.vlgmr.msra.gmra.mrb[0].mxu0 %v423_v35 }
 0x12c   : > { %757 = vmatmul.mubr.bf16.vlgmr.msra.gmra.mrb[0].mxu1 %v425_v36 }
 0x1fe   : > { %v1078_v37 = vpop.f32.mrb[0].mxu0 }
 0x1ff   : > { %v1100_v38 = vpop.f32.mrb[0].mxu1  ;;  %v1079_v39 = vpop.f32.mrb[1].mxu0  ;;  %768 = sbr.rel (%p1038_p9) target bundleno = 643 (0x283), region = 56 }
 0x200   : > { %v1080_v40 = vadd.f32 %v1079_v39, %v1078_v37  ;;  %v1101_v41 = vpop.f32.mrb[1].mxu1  ;;  %v1081_v42 = vpop.f32.mrb[2].mxu0 }
 0x201   : > { %v1102_v43 = vadd.f32 %v1101_v41, %v1100_v38  ;;  %v1103_v44 = vpop.f32.mrb[2].mxu1  ;;  %v1082_v45 = vpop.f32.mrb[3].mxu0 }
 0x202   : > { %v1083_v46 = vadd.f32 %v1082_v45, %v1081_v42  ;;  %v1104_v47 = vpop.f32.mrb[3].mxu1 }
 0x203   : > { %v759_v48 = vadd.f32 %v1102_v43, %v1080_v40  ;;  %v1105_v49 = vadd.f32 %v1104_v47, %v1103_v44 }
 0x205   : > { %v762_v50 = vadd.f32 %v1105_v49, %v1083_v46  ;;  %773 = vrot.lane.b32.xlu0 (!%p1038_p9), %v759_v48, %s1331_s24  ;;  %v771_v56 = vmul.f32 (!%p1038_p9), %v769_v53, %v759_v48 }
 0x207   : > { %v772_v58 = vmul.f32 %v770_v54, %v762_v50 }
 0x209   : > { %775 = vrot.lane.b32.xlu0 %v762_v50, %s1331_s24 }
 0x277   : > { %v774_v52 = vpop.permute.xlu0 %773 }
 0x278   : > { %v779_v57 = vmul.f32 %v777_v51, %v774_v52 }
 0x27a   : > { %v781_v61 = vadd.f32 %v779_v57, %v771_v56 }
 0x27b   : > { %v776_v59 = vpop.permute.xlu0 %775 }
 0x27c   : > { %v780_v60 = vmul.f32 %v778_v55, %v776_v59 }
 0x27e   : > { %v782_v62 = vadd.f32 %v780_v60, %v772_v58 }
 0x280   : > { %v1055_v63 = vpack.c.bf16 %v782_v62, %v781_v61 }
 0x282   : > { %1056 = vst [vmem:[%s1515_s10] sm:$0xff] %v1055_v63  }
 0x283 PF: > { %p1041_p4 = scmp.lt.s32.totalorder %s1316_s21, 6 }
 0x284   : > { %v1060_v0 = vpack.c.bf16 (!%p1041_p4), %v762_v50, %v759_v48 }
 0x285   : > { %796 = sbr.rel (%p1041_p4) target bundleno = 652 (0x28c), region = 60 }
 0x286   : > { %1061 = vst [vmem:[%s1515_s10] sm:$0xff] (!%p1041_p4), %v1060_v0  }
 0x28c PF: > { %p1626_p11 = scmp.ne.s32.totalorder %s1618_s29, 0 }
 0x28d   : > { %s1045_s9 = sshll.u32 (%p1626_p11), %s1316_s21, 2  ;;  %v834_v1 = vld [vmem:[%s1515_s10] sm:$0xf] (%p1626_p11)  ;;  %v836_v2 = vld [vmem:[%s1515_s10 + $0x4] sm:$0xf] (%p1626_p11) }
 0x28e   : > { %813 = sbr.rel (!%p1626_p11) target bundleno = 661 (0x295), region = 64  ;;  %s818_s8 = scalar_lea.vmem (%p1626_p11), %s1609_s5, %s1045_s9 }
 0x28f   : > { %835 = vst [vmem:[%s818_s8] sm:$0xf] (%p1626_p11), %v834_v1  ;;  %837 = vst [vmem:[%s818_s8 + $0x20] sm:$0xf] (%p1626_p11), %v836_v2 }
 0x295 PF: > { %s19_s23 = sadd.s32 1, %s1324_s23   ;;  %s1627_s18 = smov %s1308_s19 }
 0x296   : > { %p16_p12 = scmp.ge.s32.totalorder %s19_s23, 10   ;;  %s1628_s19 = smov %s1312_s20 }
 0x297   : > { %s1629_s20 = smov %s1470_s17  ;;  %s1630_s21 = smov %s1320_s22 }
 0x298   : > { %s1631_s22 = smov %s1633_s6  ;;  %18 = sbr.rel (!%p16_p12) target bundleno = 5 (0x5), region = 147 }
 0x29f   :  { %874 = vsyncpa [#allocation4], 1 }
 0x2a0   :  { %876 = vsyncpa [#allocation4 + $0x1], 1 }
 0x2a1   :  { %877 = vsyncpa [#allocation6], 1 }
 0x2a2   :  { %879 = vsyncpa [#allocation6 + $0x1], 1 }

// kernel: _lambda_.11
= control target key start
LH: loop header
LB: loop body
LE: loop exit
PB: predicated region body
PF: predicated region fallthrough
CT: control target
= control target key end

     0   :  { %s1816_s1 = inlined_call_operand.vmem [shape: bf16[512,512], index: 1, kind: input, shape index: {}]   ;;  %s1817_s0 = inlined_call_operand.vmem [shape: bf16[16,512], index: 0, kind: input, shape index: {}]   ;;  %s1818_s2 = inlined_call_operand.vmem [shape: bf16[16,512], index: 2, kind: input, shape index: {}, may-alias: {2,3}]   ;;  %s1819_s3 = inlined_call_operand.vmem [shape: bf16[16,512], index: 3, kind: output, shape index: {}, may-alias: {2,3}]  }
   0x1   :  { %v1178_v0 = vld [vmem:[%s1816_s1 + $0x4] ss:$16 sps:$4 sm:$0xff]   ;;  %v1180_v1 = vld [vmem:[%s1816_s1 + $0xc] ss:$16 sps:$4 sm:$0xff]   ;;  %v1182_v2 = vld [vmem:[%s1816_s1] ss:$16 sps:$4 sm:$0xff]  }
   0x2   :  { %806 = vmatprep.subr.bf16.mxu0 %v1178_v0  ;;  %v1183_v3 = vld [vmem:[%s1816_s1 + $0x8] ss:$16 sps:$4 sm:$0xff]   ;;  %892 = vmatprep.subr.bf16.mxu1 %v1180_v1  ;;  %v1184_v4 = vld [vmem:[%s1816_s1 + $0x24] ss:$16 sps:$4 sm:$0xff]   ;;  %v1186_v5 = vld [vmem:[%s1816_s1 + $0x2c] ss:$16 sps:$4 sm:$0xff]  }
   0x3   :  { %807 = vmatpush1.bf16.msra.mxu0 %v1182_v2  ;;  %893 = vmatpush1.bf16.msra.mxu1 %v1183_v3  ;;  %v1188_v6 = vld [vmem:[%s1816_s1 + $0x20] ss:$16 sps:$4 sm:$0xff]   ;;  %v1189_v7 = vld [vmem:[%s1816_s1 + $0x28] ss:$16 sps:$4 sm:$0xff]   ;;  %v1190_v8 = vld [vmem:[%s1816_s1 + $0x44] ss:$16 sps:$4 sm:$0xff]  }
   0x4   :  { %808 = vmatprep.subr.bf16.mxu0 %v1184_v4  ;;  %894 = vmatprep.subr.bf16.mxu1 %v1186_v5  ;;  %v1192_v9 = vld [vmem:[%s1816_s1 + $0x4c] ss:$16 sps:$4 sm:$0xff]   ;;  %v1194_v10 = vld [vmem:[%s1816_s1 + $0x40] ss:$16 sps:$4 sm:$0xff]   ;;  %v1195_v11 = vld [vmem:[%s1816_s1 + $0x48] ss:$16 sps:$4 sm:$0xff]  }
   0x5   :  { %v1196_v12 = vld [vmem:[%s1816_s1 + $0x64] ss:$16 sps:$4 sm:$0xff]   ;;  %v1198_v13 = vld [vmem:[%s1816_s1 + $0x6c] ss:$16 sps:$4 sm:$0xff]   ;;  %v1200_v14 = vld [vmem:[%s1816_s1 + $0x60] ss:$16 sps:$4 sm:$0xff]  }
   0x6   :  { %v1201_v15 = vld [vmem:[%s1816_s1 + $0x68] ss:$16 sps:$4 sm:$0xff]   ;;  %v1202_v16 = vld [vmem:[%s1816_s1 + $0x84] ss:$16 sps:$4 sm:$0xff]   ;;  %v1204_v17 = vld [vmem:[%s1816_s1 + $0x8c] ss:$16 sps:$4 sm:$0xff]  }
   0x7   :  { %809 = vmatpush1.bf16.msra.mxu0 %v1188_v6  ;;  %895 = vmatpush1.bf16.msra.mxu1 %v1189_v7  ;;  %v1206_v18 = vld [vmem:[%s1816_s1 + $0x80] ss:$16 sps:$4 sm:$0xff]   ;;  %v1207_v19 = vld [vmem:[%s1816_s1 + $0x88] ss:$16 sps:$4 sm:$0xff]   ;;  %v1208_v20 = vld [vmem:[%s1816_s1 + $0xa4] ss:$16 sps:$4 sm:$0xff]  }
   0x8   :  { %810 = vmatprep.subr.bf16.mxu0 %v1190_v8  ;;  %896 = vmatprep.subr.bf16.mxu1 %v1192_v9  ;;  %v1210_v21 = vld [vmem:[%s1816_s1 + $0xac] ss:$16 sps:$4 sm:$0xff]   ;;  %v1212_v22 = vld [vmem:[%s1816_s1 + $0xa0] ss:$16 sps:$4 sm:$0xff]   ;;  %v1213_v23 = vld [vmem:[%s1816_s1 + $0xa8] ss:$16 sps:$4 sm:$0xff]  }
   0x9   :  { %v1214_v24 = vld [vmem:[%s1816_s1 + $0xc4] ss:$16 sps:$4 sm:$0xff]   ;;  %v1216_v25 = vld [vmem:[%s1816_s1 + $0xcc] ss:$16 sps:$4 sm:$0xff]   ;;  %v1218_v26 = vld [vmem:[%s1816_s1 + $0xc0] ss:$16 sps:$4 sm:$0xff]  }
   0xa   :  { %v1219_v27 = vld [vmem:[%s1816_s1 + $0xc8] ss:$16 sps:$4 sm:$0xff]   ;;  %v1220_v28 = vld [vmem:[%s1816_s1 + $0xe4] ss:$16 sps:$4 sm:$0xff]   ;;  %v1222_v29 = vld [vmem:[%s1816_s1 + $0xec] ss:$16 sps:$4 sm:$0xff]  }
   0xb   :  { %811 = vmatpush1.bf16.msra.mxu0 %v1194_v10  ;;  %897 = vmatpush1.bf16.msra.mxu1 %v1195_v11  ;;  %v1224_v30 = vld [vmem:[%s1816_s1 + $0xe0] ss:$16 sps:$4 sm:$0xff]   ;;  %v1225_v31 = vld [vmem:[%s1816_s1 + $0xe8] ss:$16 sps:$4 sm:$0xff]   ;;  %v1226_v32 = vld [vmem:[%s1816_s1 + $0x104] ss:$16 sps:$4 sm:$0xff]  }
   0xc   :  { %812 = vmatprep.subr.bf16.mxu0 %v1196_v12  ;;  %898 = vmatprep.subr.bf16.mxu1 %v1198_v13  ;;  %v1228_v33 = vld [vmem:[%s1816_s1 + $0x10c] ss:$16 sps:$4 sm:$0xff]   ;;  %v1230_v34 = vld [vmem:[%s1816_s1 + $0x100] ss:$16 sps:$4 sm:$0xff]   ;;  %v1231_v35 = vld [vmem:[%s1816_s1 + $0x108] ss:$16 sps:$4 sm:$0xff]  }
   0xd   :  { %v1232_v36 = vld [vmem:[%s1816_s1 + $0x124] ss:$16 sps:$4 sm:$0xff]   ;;  %v1234_v37 = vld [vmem:[%s1816_s1 + $0x12c] ss:$16 sps:$4 sm:$0xff]   ;;  %v1236_v38 = vld [vmem:[%s1816_s1 + $0x120] ss:$16 sps:$4 sm:$0xff]  }
   0xe   :  { %v1237_v39 = vld [vmem:[%s1816_s1 + $0x128] ss:$16 sps:$4 sm:$0xff]   ;;  %v1238_v40 = vld [vmem:[%s1816_s1 + $0x144] ss:$16 sps:$4 sm:$0xff]   ;;  %v1240_v41 = vld [vmem:[%s1816_s1 + $0x14c] ss:$16 sps:$4 sm:$0xff]  }
   0xf   :  { %813 = vmatpush1.bf16.msra.mxu0 %v1200_v14  ;;  %899 = vmatpush1.bf16.msra.mxu1 %v1201_v15  ;;  %v1242_v42 = vld [vmem:[%s1816_s1 + $0x140] ss:$16 sps:$4 sm:$0xff]   ;;  %v1243_v43 = vld [vmem:[%s1816_s1 + $0x148] ss:$16 sps:$4 sm:$0xff]   ;;  %v1244_v44 = vld [vmem:[%s1816_s1 + $0x164] ss:$16 sps:$4 sm:$0xff]  }
  0x10   :  { %814 = vmatprep.subr.bf16.mxu0 %v1202_v16  ;;  %900 = vmatprep.subr.bf16.mxu1 %v1204_v17  ;;  %v1246_v45 = vld [vmem:[%s1816_s1 + $0x16c] ss:$16 sps:$4 sm:$0xff]   ;;  %v1248_v46 = vld [vmem:[%s1816_s1 + $0x160] ss:$16 sps:$4 sm:$0xff]   ;;  %v1249_v47 = vld [vmem:[%s1816_s1 + $0x168] ss:$16 sps:$4 sm:$0xff]  }
  0x11   :  { %v1276_v48 = vld [vmem:[%s1817_s0 + $0x4] ss:$16 sps:$4 sm:$0xff]   ;;  %v1252_v50 = vld [vmem:[%s1816_s1 + $0x18c] ss:$16 sps:$4 sm:$0xff]   ;;  %v1254_v51 = vld [vmem:[%s1816_s1 + $0x180] ss:$16 sps:$4 sm:$0xff]  }
  0x12   :  { %v1250_v49 = vld [vmem:[%s1816_s1 + $0x184] ss:$16 sps:$4 sm:$0xff]   ;;  %838 = vmatprep.mubr.bf16.mxu0 %v1276_v48  ;;  %924 = vmatprep.mubr.bf16.mxu1 %v1276_v48  ;;  %v1255_v52 = vld [vmem:[%s1816_s1 + $0x188] ss:$16 sps:$4 sm:$0xff]   ;;  %v1258_v54 = vld [vmem:[%s1816_s1 + $0x1ac] ss:$16 sps:$4 sm:$0xff]  }
  0x13   :  { %815 = vmatpush1.bf16.msra.mxu0 %v1206_v18  ;;  %901 = vmatpush1.bf16.msra.mxu1 %v1207_v19  ;;  %v1256_v53 = vld [vmem:[%s1816_s1 + $0x1a4] ss:$16 sps:$4 sm:$0xff]   ;;  %v1260_v55 = vld [vmem:[%s1816_s1 + $0x1a0] ss:$16 sps:$4 sm:$0xff]   ;;  %v1261_v56 = vld [vmem:[%s1816_s1 + $0x1a8] ss:$16 sps:$4 sm:$0xff]  }
  0x14   :  { %816 = vmatprep.subr.bf16.mxu0 %v1208_v20  ;;  %902 = vmatprep.subr.bf16.mxu1 %v1210_v21  ;;  %v1262_v57 = vld [vmem:[%s1816_s1 + $0x1c4] ss:$16 sps:$4 sm:$0xff]   ;;  %v1264_v58 = vld [vmem:[%s1816_s1 + $0x1cc] ss:$16 sps:$4 sm:$0xff]   ;;  %v1266_v59 = vld [vmem:[%s1816_s1 + $0x1c0] ss:$16 sps:$4 sm:$0xff]  }
  0x15   :  { %v1267_v60 = vld [vmem:[%s1816_s1 + $0x1c8] ss:$16 sps:$4 sm:$0xff]   ;;  %v1268_v61 = vld [vmem:[%s1816_s1 + $0x1e4] ss:$16 sps:$4 sm:$0xff]   ;;  %v1270_v62 = vld [vmem:[%s1816_s1 + $0x1ec] ss:$16 sps:$4 sm:$0xff]  }
  0x16   :  { %v1272_v63 = vld [vmem:[%s1816_s1 + $0x1e0] ss:$16 sps:$4 sm:$0xff]   ;;  %v1273_v0 = vld [vmem:[%s1816_s1 + $0x1e8] ss:$16 sps:$4 sm:$0xff]   ;;  %v1279_v1 = vld [vmem:[%s1816_s1 + $0x204] ss:$16 sps:$4 sm:$0xff]  }
  0x17   :  { %817 = vmatpush1.bf16.msra.mxu0 %v1212_v22  ;;  %903 = vmatpush1.bf16.msra.mxu1 %v1213_v23  ;;  %v1282_v2 = vld [vmem:[%s1816_s1 + $0x20c] ss:$16 sps:$4 sm:$0xff]   ;;  %v1274_v3 = vld [vmem:[%s1817_s0] ss:$16 sps:$4 sm:$0xff]   ;;  %v1280_v5 = vld [vmem:[%s1816_s1 + $0x208] ss:$16 sps:$4 sm:$0xff]  }
  0x18   :  { %818 = vmatprep.subr.bf16.mxu0 %v1214_v24  ;;  %904 = vmatprep.subr.bf16.mxu1 %v1216_v25  ;;  %v1277_v4 = vld [vmem:[%s1816_s1 + $0x200] ss:$16 sps:$4 sm:$0xff]   ;;  %v1285_v6 = vld [vmem:[%s1816_s1 + $0x224] ss:$16 sps:$4 sm:$0xff]   ;;  %v1288_v7 = vld [vmem:[%s1816_s1 + $0x22c] ss:$16 sps:$4 sm:$0xff]  }
  0x19   :  { %v1283_v8 = vld [vmem:[%s1816_s1 + $0x220] ss:$16 sps:$4 sm:$0xff]   ;;  %v1286_v9 = vld [vmem:[%s1816_s1 + $0x228] ss:$16 sps:$4 sm:$0xff]   ;;  %v1291_v10 = vld [vmem:[%s1816_s1 + $0x244] ss:$16 sps:$4 sm:$0xff]  }
  0x1a   :  { %v1294_v11 = vld [vmem:[%s1816_s1 + $0x24c] ss:$16 sps:$4 sm:$0xff]   ;;  %v1289_v12 = vld [vmem:[%s1816_s1 + $0x240] ss:$16 sps:$4 sm:$0xff]   ;;  %v1292_v13 = vld [vmem:[%s1816_s1 + $0x248] ss:$16 sps:$4 sm:$0xff]  }
  0x1b   :  { %819 = vmatpush1.bf16.msra.mxu0 %v1218_v26  ;;  %905 = vmatpush1.bf16.msra.mxu1 %v1219_v27  ;;  %v1297_v14 = vld [vmem:[%s1816_s1 + $0x264] ss:$16 sps:$4 sm:$0xff]   ;;  %v1300_v15 = vld [vmem:[%s1816_s1 + $0x26c] ss:$16 sps:$4 sm:$0xff]   ;;  %v1295_v16 = vld [vmem:[%s1816_s1 + $0x260] ss:$16 sps:$4 sm:$0xff]  }
  0x1c   :  { %820 = vmatprep.subr.bf16.mxu0 %v1220_v28  ;;  %906 = vmatprep.subr.bf16.mxu1 %v1222_v29  ;;  %v1298_v17 = vld [vmem:[%s1816_s1 + $0x268] ss:$16 sps:$4 sm:$0xff]   ;;  %v1303_v18 = vld [vmem:[%s1816_s1 + $0x284] ss:$16 sps:$4 sm:$0xff]   ;;  %v1306_v19 = vld [vmem:[%s1816_s1 + $0x28c] ss:$16 sps:$4 sm:$0xff]  }
  0x1d   :  { %v1301_v20 = vld [vmem:[%s1816_s1 + $0x280] ss:$16 sps:$4 sm:$0xff]   ;;  %v1304_v21 = vld [vmem:[%s1816_s1 + $0x288] ss:$16 sps:$4 sm:$0xff]   ;;  %v1309_v22 = vld [vmem:[%s1816_s1 + $0x2a4] ss:$16 sps:$4 sm:$0xff]  }
  0x1e   :  { %v1312_v23 = vld [vmem:[%s1816_s1 + $0x2ac] ss:$16 sps:$4 sm:$0xff]   ;;  %v1307_v24 = vld [vmem:[%s1816_s1 + $0x2a0] ss:$16 sps:$4 sm:$0xff]   ;;  %v1310_v25 = vld [vmem:[%s1816_s1 + $0x2a8] ss:$16 sps:$4 sm:$0xff]  }
  0x1f   :  { %821 = vmatpush1.bf16.msra.mxu0 %v1224_v30  ;;  %907 = vmatpush1.bf16.msra.mxu1 %v1225_v31  ;;  %v1315_v26 = vld [vmem:[%s1816_s1 + $0x2c4] ss:$16 sps:$4 sm:$0xff]   ;;  %v1318_v27 = vld [vmem:[%s1816_s1 + $0x2cc] ss:$16 sps:$4 sm:$0xff]   ;;  %v1313_v29 = vld [vmem:[%s1816_s1 + $0x2c0] ss:$16 sps:$4 sm:$0xff]  }
  0x20   :  { %822 = vmatprep.subr.bf16.mxu0 %v1226_v32  ;;  %908 = vmatprep.subr.bf16.mxu1 %v1228_v33  ;;  %v1375_v28 = vld [vmem:[%s1817_s0 + $0xc] ss:$16 sps:$4 sm:$0xff]   ;;  %v1316_v30 = vld [vmem:[%s1816_s1 + $0x2c8] ss:$16 sps:$4 sm:$0xff]   ;;  %v1321_v31 = vld [vmem:[%s1816_s1 + $0x2e4] ss:$16 sps:$4 sm:$0xff]  }
  0x21   :  { %v1324_v32 = vld [vmem:[%s1816_s1 + $0x2ec] ss:$16 sps:$4 sm:$0xff]   ;;  %v1319_v33 = vld [vmem:[%s1816_s1 + $0x2e0] ss:$16 sps:$4 sm:$0xff]  }
  0x22   :  { %v1348_v48 = vld [vmem:[%s1816_s1 + $0x36c] ss:$16 sps:$4 sm:$0xff]  }
  0x23   :  { %823 = vmatpush1.bf16.msra.mxu0 %v1230_v34  ;;  %909 = vmatpush1.bf16.msra.mxu1 %v1231_v35  ;;  %v1322_v34 = vld [vmem:[%s1816_s1 + $0x2e8] ss:$16 sps:$4 sm:$0xff]   ;;  %v1327_v35 = vld [vmem:[%s1816_s1 + $0x304] ss:$16 sps:$4 sm:$0xff]  }
  0x24   :  { %824 = vmatprep.subr.bf16.mxu0 %v1232_v36  ;;  %910 = vmatprep.subr.bf16.mxu1 %v1234_v37  ;;  %v1330_v36 = vld [vmem:[%s1816_s1 + $0x30c] ss:$16 sps:$4 sm:$0xff]   ;;  %v1325_v37 = vld [vmem:[%s1816_s1 + $0x300] ss:$16 sps:$4 sm:$0xff]  }
  0x27   :  { %825 = vmatpush1.bf16.msra.mxu0 %v1236_v38  ;;  %911 = vmatpush1.bf16.msra.mxu1 %v1237_v39  ;;  %v1328_v38 = vld [vmem:[%s1816_s1 + $0x308] ss:$16 sps:$4 sm:$0xff]   ;;  %v1333_v39 = vld [vmem:[%s1816_s1 + $0x324] ss:$16 sps:$4 sm:$0xff]  }
  0x28   :  { %826 = vmatprep.subr.bf16.mxu0 %v1238_v40  ;;  %912 = vmatprep.subr.bf16.mxu1 %v1240_v41  ;;  %v1336_v40 = vld [vmem:[%s1816_s1 + $0x32c] ss:$16 sps:$4 sm:$0xff]   ;;  %v1331_v41 = vld [vmem:[%s1816_s1 + $0x320] ss:$16 sps:$4 sm:$0xff]  }
  0x2b   :  { %827 = vmatpush1.bf16.msra.mxu0 %v1242_v42  ;;  %913 = vmatpush1.bf16.msra.mxu1 %v1243_v43  ;;  %v1334_v42 = vld [vmem:[%s1816_s1 + $0x328] ss:$16 sps:$4 sm:$0xff]   ;;  %v1339_v43 = vld [vmem:[%s1816_s1 + $0x344] ss:$16 sps:$4 sm:$0xff]  }
  0x2c   :  { %828 = vmatprep.subr.bf16.mxu0 %v1244_v44  ;;  %914 = vmatprep.subr.bf16.mxu1 %v1246_v45  ;;  %v1342_v44 = vld [vmem:[%s1816_s1 + $0x34c] ss:$16 sps:$4 sm:$0xff]   ;;  %v1337_v45 = vld [vmem:[%s1816_s1 + $0x340] ss:$16 sps:$4 sm:$0xff]  }
  0x2f   :  { %829 = vmatpush1.bf16.msra.mxu0 %v1248_v46  ;;  %915 = vmatpush1.bf16.msra.mxu1 %v1249_v47  ;;  %v1340_v46 = vld [vmem:[%s1816_s1 + $0x348] ss:$16 sps:$4 sm:$0xff]   ;;  %v1345_v47 = vld [vmem:[%s1816_s1 + $0x364] ss:$16 sps:$4 sm:$0xff]  }
  0x30   :  { %830 = vmatprep.subr.bf16.mxu0 %v1250_v49  ;;  %916 = vmatprep.subr.bf16.mxu1 %v1252_v50  ;;  %v1343_v49 = vld [vmem:[%s1816_s1 + $0x360] ss:$16 sps:$4 sm:$0xff]   ;;  %v1346_v50 = vld [vmem:[%s1816_s1 + $0x368] ss:$16 sps:$4 sm:$0xff]  }
  0x33   :  { %831 = vmatpush1.bf16.msra.mxu0 %v1254_v51  ;;  %917 = vmatpush1.bf16.msra.mxu1 %v1255_v52  ;;  %v1351_v51 = vld [vmem:[%s1816_s1 + $0x384] ss:$16 sps:$4 sm:$0xff]   ;;  %v1354_v52 = vld [vmem:[%s1816_s1 + $0x38c] ss:$16 sps:$4 sm:$0xff]  }
  0x34   :  { %832 = vmatprep.subr.bf16.mxu0 %v1256_v53  ;;  %918 = vmatprep.subr.bf16.mxu1 %v1258_v54  ;;  %v1349_v53 = vld [vmem:[%s1816_s1 + $0x380] ss:$16 sps:$4 sm:$0xff]   ;;  %v1352_v54 = vld [vmem:[%s1816_s1 + $0x388] ss:$16 sps:$4 sm:$0xff]  }
  0x37   :  { %833 = vmatpush1.bf16.msra.mxu0 %v1260_v55  ;;  %919 = vmatpush1.bf16.msra.mxu1 %v1261_v56  ;;  %v1357_v55 = vld [vmem:[%s1816_s1 + $0x3a4] ss:$16 sps:$4 sm:$0xff]   ;;  %v1360_v56 = vld [vmem:[%s1816_s1 + $0x3ac] ss:$16 sps:$4 sm:$0xff]  }
  0x38   :  { %834 = vmatprep.subr.bf16.mxu0 %v1262_v57  ;;  %920 = vmatprep.subr.bf16.mxu1 %v1264_v58  ;;  %v1355_v57 = vld [vmem:[%s1816_s1 + $0x3a0] ss:$16 sps:$4 sm:$0xff]   ;;  %v1358_v58 = vld [vmem:[%s1816_s1 + $0x3a8] ss:$16 sps:$4 sm:$0xff]  }
  0x3b   :  { %835 = vmatpush1.bf16.msra.mxu0 %v1266_v59  ;;  %921 = vmatpush1.bf16.msra.mxu1 %v1267_v60  ;;  %v1363_v59 = vld [vmem:[%s1816_s1 + $0x3c4] ss:$16 sps:$4 sm:$0xff]   ;;  %v1366_v60 = vld [vmem:[%s1816_s1 + $0x3cc] ss:$16 sps:$4 sm:$0xff]  }
  0x3c   :  { %836 = vmatprep.subr.bf16.mxu0 %v1268_v61  ;;  %922 = vmatprep.subr.bf16.mxu1 %v1270_v62  ;;  %v1361_v61 = vld [vmem:[%s1816_s1 + $0x3c0] ss:$16 sps:$4 sm:$0xff]   ;;  %v1364_v62 = vld [vmem:[%s1816_s1 + $0x3c8] ss:$16 sps:$4 sm:$0xff]  }
  0x3f   :  { %837 = vmatpush1.bf16.msra.mxu0 %v1272_v63  ;;  %923 = vmatpush1.bf16.msra.mxu1 %v1273_v0  ;;  %v1369_v63 = vld [vmem:[%s1816_s1 + $0x3e4] ss:$16 sps:$4 sm:$0xff]   ;;  %v1372_v0 = vld [vmem:[%s1816_s1 + $0x3ec] ss:$16 sps:$4 sm:$0xff]  }
  0x40   :  { %849 = vmatprep.subr.bf16.mxu0 %v1279_v1  ;;  %935 = vmatprep.subr.bf16.mxu1 %v1282_v2  ;;  %v1367_v1 = vld [vmem:[%s1816_s1 + $0x3e0] ss:$16 sps:$4 sm:$0xff]   ;;  %v1370_v2 = vld [vmem:[%s1816_s1 + $0x3e8] ss:$16 sps:$4 sm:$0xff]  }
  0x42   :  { %839 = vmatmul.mubr.bf16.vlgmr.msra.gmra.mrb[0].mxu0 %v1274_v3  ;;  %925 = vmatmul.mubr.bf16.vlgmr.msra.gmra.mrb[0].mxu1 %v1274_v3  ;;  %v1373_v3 = vld [vmem:[%s1817_s0 + $0x8] ss:$16 sps:$4 sm:$0xff]  }
  0x43   :  { %850 = vmatpush1.bf16.msra.mxu0 %v1277_v4  ;;  %936 = vmatpush1.bf16.msra.mxu1 %v1280_v5  ;;  %v978_v4 = vld [vmem:[%s1818_s2] sm:$0xff]  ;;  %v979_v5 = vld [vmem:[%s1818_s2 + $0x8] sm:$0xff] }
  0x44   :  { %851 = vmatprep.subr.bf16.mxu0 %v1285_v6  ;;  %937 = vmatprep.subr.bf16.mxu1 %v1288_v7  ;;  %v980_v6 = vld [vmem:[%s1818_s2 + $0x10] sm:$0xff]  ;;  %v981_v7 = vld [vmem:[%s1818_s2 + $0x18] sm:$0xff] }
  0x45   :  { %881 = vmatprep.mubr.bf16.mxu0 %v1375_v28  ;;  %967 = vmatprep.mubr.bf16.mxu1 %v1375_v28 }
  0x47   :  { %852 = vmatpush1.bf16.msra.mxu0 %v1283_v8  ;;  %938 = vmatpush1.bf16.msra.mxu1 %v1286_v9  ;;  %v982_v8 = vunpack.c.l.bf16 %v978_v4  ;;  %v984_v9 = vunpack.c.l.bf16 %v979_v5 }
  0x48   :  { %853 = vmatprep.subr.bf16.mxu0 %v1291_v10  ;;  %939 = vmatprep.subr.bf16.mxu1 %v1294_v11  ;;  %v983_v10 = vunpack.c.h.bf16 %v978_v4  ;;  %v985_v11 = vunpack.c.h.bf16 %v979_v5 }
  0x4b   :  { %854 = vmatpush1.bf16.msra.mxu0 %v1289_v12  ;;  %940 = vmatpush1.bf16.msra.mxu1 %v1292_v13  ;;  %v986_v12 = vunpack.c.l.bf16 %v980_v6  ;;  %v988_v13 = vunpack.c.l.bf16 %v981_v7 }
  0x4c   :  { %855 = vmatprep.subr.bf16.mxu0 %v1297_v14  ;;  %941 = vmatprep.subr.bf16.mxu1 %v1300_v15 }
  0x4f   :  { %856 = vmatpush1.bf16.msra.mxu0 %v1295_v16  ;;  %942 = vmatpush1.bf16.msra.mxu1 %v1298_v17  ;;  %v987_v16 = vunpack.c.h.bf16 %v980_v6  ;;  %v989_v17 = vunpack.c.h.bf16 %v981_v7 }
  0x50   :  { %857 = vmatprep.subr.bf16.mxu0 %v1303_v18  ;;  %943 = vmatprep.subr.bf16.mxu1 %v1306_v19 }
  0x53   :  { %858 = vmatpush1.bf16.msra.mxu0 %v1301_v20  ;;  %944 = vmatpush1.bf16.msra.mxu1 %v1304_v21 }
  0x54   :  { %859 = vmatprep.subr.bf16.mxu0 %v1309_v22  ;;  %945 = vmatprep.subr.bf16.mxu1 %v1312_v23 }
  0x57   :  { %860 = vmatpush1.bf16.msra.mxu0 %v1307_v24  ;;  %946 = vmatpush1.bf16.msra.mxu1 %v1310_v25 }
  0x58   :  { %861 = vmatprep.subr.bf16.mxu0 %v1315_v26  ;;  %947 = vmatprep.subr.bf16.mxu1 %v1318_v27 }
  0x5b   :  { %862 = vmatpush1.bf16.msra.mxu0 %v1313_v29  ;;  %948 = vmatpush1.bf16.msra.mxu1 %v1316_v30 }
  0x5c   :  { %863 = vmatprep.subr.bf16.mxu0 %v1321_v31  ;;  %949 = vmatprep.subr.bf16.mxu1 %v1324_v32 }
  0x5f   :  { %864 = vmatpush1.bf16.msra.mxu0 %v1319_v33  ;;  %950 = vmatpush1.bf16.msra.mxu1 %v1322_v34 }
  0x60   :  { %865 = vmatprep.subr.bf16.mxu0 %v1327_v35  ;;  %951 = vmatprep.subr.bf16.mxu1 %v1330_v36 }
  0x63   :  { %866 = vmatpush1.bf16.msra.mxu0 %v1325_v37  ;;  %952 = vmatpush1.bf16.msra.mxu1 %v1328_v38 }
  0x64   :  { %867 = vmatprep.subr.bf16.mxu0 %v1333_v39  ;;  %953 = vmatprep.subr.bf16.mxu1 %v1336_v40 }
  0x67   :  { %868 = vmatpush1.bf16.msra.mxu0 %v1331_v41  ;;  %954 = vmatpush1.bf16.msra.mxu1 %v1334_v42 }
  0x68   :  { %869 = vmatprep.subr.bf16.mxu0 %v1339_v43  ;;  %955 = vmatprep.subr.bf16.mxu1 %v1342_v44 }
  0x6b   :  { %870 = vmatpush1.bf16.msra.mxu0 %v1337_v45  ;;  %956 = vmatpush1.bf16.msra.mxu1 %v1340_v46 }
  0x6c   :  { %871 = vmatprep.subr.bf16.mxu0 %v1345_v47  ;;  %957 = vmatprep.subr.bf16.mxu1 %v1348_v48 }
  0x6f   :  { %872 = vmatpush1.bf16.msra.mxu0 %v1343_v49  ;;  %958 = vmatpush1.bf16.msra.mxu1 %v1346_v50 }
  0x70   :  { %873 = vmatprep.subr.bf16.mxu0 %v1351_v51  ;;  %959 = vmatprep.subr.bf16.mxu1 %v1354_v52 }
  0x73   :  { %874 = vmatpush1.bf16.msra.mxu0 %v1349_v53  ;;  %960 = vmatpush1.bf16.msra.mxu1 %v1352_v54 }
  0x74   :  { %875 = vmatprep.subr.bf16.mxu0 %v1357_v55  ;;  %961 = vmatprep.subr.bf16.mxu1 %v1360_v56 }
  0x77   :  { %876 = vmatpush1.bf16.msra.mxu0 %v1355_v57  ;;  %962 = vmatpush1.bf16.msra.mxu1 %v1358_v58 }
  0x78   :  { %877 = vmatprep.subr.bf16.mxu0 %v1363_v59  ;;  %963 = vmatprep.subr.bf16.mxu1 %v1366_v60 }
  0x7b   :  { %878 = vmatpush1.bf16.msra.mxu0 %v1361_v61  ;;  %964 = vmatpush1.bf16.msra.mxu1 %v1364_v62 }
  0x7c   :  { %879 = vmatprep.subr.bf16.mxu0 %v1369_v63  ;;  %965 = vmatprep.subr.bf16.mxu1 %v1372_v0 }
  0x7f   :  { %880 = vmatpush1.bf16.msra.mxu0 %v1367_v1  ;;  %966 = vmatpush1.bf16.msra.mxu1 %v1370_v2 }
  0x82   :  { %882 = vmatmul.mubr.bf16.vlgmr.msra.gmra.mrb[0].mxu0 %v1373_v3  ;;  %968 = vmatmul.mubr.bf16.vlgmr.msra.gmra.mrb[0].mxu1 %v1373_v3 }
 0x155   :  { %v883_v14 = vpop.f32.mrb[0].mxu0  ;;  %v969_v15 = vpop.f32.mrb[0].mxu1 }
 0x156   :  { %v990_v18 = vadd.f32 %v982_v8, %v883_v14  ;;  %v992_v19 = vadd.f32 %v984_v9, %v969_v15  ;;  %v885_v20 = vpop.f32.mrb[1].mxu0  ;;  %v971_v21 = vpop.f32.mrb[1].mxu1 }
 0x157   :  { %v991_v22 = vadd.f32 %v983_v10, %v885_v20  ;;  %v993_v23 = vadd.f32 %v985_v11, %v971_v21  ;;  %v887_v24 = vpop.f32.mrb[2].mxu0  ;;  %v973_v25 = vpop.f32.mrb[2].mxu1 }
 0x158   :  { %v994_v26 = vadd.f32 %v986_v12, %v887_v24  ;;  %v996_v27 = vadd.f32 %v988_v13, %v973_v25  ;;  %v889_v28 = vpop.f32.mrb[3].mxu0  ;;  %v975_v29 = vpop.f32.mrb[3].mxu1 }
 0x159   :  { %v1166_v30 = vpack.c.bf16 %v991_v22, %v990_v18  ;;  %v1167_v31 = vpack.c.bf16 %v993_v23, %v992_v19  ;;  %v995_v32 = vadd.f32 %v987_v16, %v889_v28  ;;  %v997_v33 = vadd.f32 %v989_v17, %v975_v29 }
 0x15b   :  { %1022 = vst [vmem:[%s1819_s3] sm:$0xff] %v1166_v30  ;;  %1023 = vst [vmem:[%s1819_s3 + $0x8] sm:$0xff] %v1167_v31  ;;  %v1168_v34 = vpack.c.bf16 %v995_v32, %v994_v26  ;;  %v1169_v35 = vpack.c.bf16 %v997_v33, %v996_v27 }
 0x15d   :  { %1024 = vst [vmem:[%s1819_s3 + $0x10] sm:$0xff] %v1168_v34  ;;  %1025 = vst [vmem:[%s1819_s3 + $0x18] sm:$0xff] %v1169_v35 }

// kernel: _lambda_.13
= control target key start
LH: loop header
LB: loop body
LE: loop exit
PB: predicated region body
PF: predicated region fallthrough
CT: control target
= control target key end

     0   :  { %s1496_s18 = smov 0   ;;  %s1498_s19 = smov 0   ;;  %s1770_s0 = inlined_call_operand.vmem [shape: bf16[16,512], index: 0, kind: input, shape index: {}]   ;;  %s1771_s1 = inlined_call_operand.vmem [shape: f32[1,512], index: 1, kind: input, shape index: {}]   ;;  %s1772_s2 = inlined_call_operand.vmem [shape: bf16[512,1024], index: 2, kind: input, shape index: {}]   ;;  %s1773_s3 = inlined_call_operand.vmem [shape: f32[16,128], index: 3, kind: input, shape index: {}]   ;;  %s1774_s4 = inlined_call_operand.vmem [shape: f32[16,128], index: 4, kind: input, shape index: {}]   ;;  %s1775_s5 = inlined_call_operand.vmem [shape: bf16[16,1024], index: 5, kind: output, shape index: {}]  }
   0x1   :  { %s1500_s20 = smov 0   ;;  %s1502_s21 = smov 0  }
   0x2   :  { %s1504_s22 = smov 0  }
   0x3 LB: > { %s24_s23 = sadd.s32 1, %s1459_s21  ;;  %s1235_s24 = sadd.s32 4294967295, %s1463_s22   ;;  %s1463_s22 = sphi %s1504_s22, %s15_s22   ;;  %s1459_s21 = sphi %s1502_s21, %s1780_s21   ;;  %s1455_s20 = sphi %s1500_s20, %s1779_s20   ;;  %s1451_s19 = sphi %s1498_s19, %s1778_s19   ;;  %s1447_s18 = sphi %s1496_s18, %s1777_s18  }
   0x4   : > { %p25_p0 = scmp.ge.s32.totalorder %s24_s23, 8  ;;  %p88_p1 = scmp.ne.s32.totalorder %s1451_s19, %s1447_s18 }
   0x5   : > { %p89_p2 = scmp.eq.s32.totalorder %s1463_s22, 0  ;;  %p172_p4 = scmp.eq.s32.totalorder %s1235_s24, 7 }
   0x6   : > { %s1782_s23 = smov (%p25_p0, %s24_s23), 0  ;;  %s81_s26 = sadd.s32 1, %s1451_s19 }
   0x7   : > { %p90_p3 = por %p89_p2, %p88_p1  ;;  %s78_s25 = ssub.s32 %s1459_s21, %s1782_s23 }
   0x8   : > { %p79_p5 = scmp.eq.s32.totalorder %s78_s25, 0  ;;  %p1531_p6 = por %p172_p4, %p88_p1 }
   0x9   : > { %p1241_p7 = scmp.ge.s32.totalorder %s1463_s22, 8 }
   0xa   : > { %s1536_s28 = scalar_select %p79_p5, %s1451_s19, %s81_s26  }
   0xb   : > { %225 = sbr.rel (%p1241_p7) target bundleno = 86 (0x56), region = 32 }
  0x12   : > { %228 = sbr.rel (!%p90_p3) target bundleno = 86 (0x56), region = 36  ;;  %s230_s29 = sand.u32 (%p90_p3), 1, %s1451_s19  }
  0x13   : > { %s1243_s30 = sshll.u32 (%p90_p3), %s1459_s21, 2  ;;  %s1242_s6 = sshll.u32 (%p90_p3), %s230_s29, 8 }
  0x14   : > { %s1544_s9 = scalar_lea.vmem (%p90_p3), %s1772_s2, %s1243_s30  ;;  %s1548_s10 = scalar_lea.vmem (%p90_p3), [#allocation3], %s1242_s6 }
  0x15   : > { %v250_v0 = vld [vmem:[%s1544_s9] sm:$0xf] (%p90_p3) }
  0x16   : > { %v252_v1 = vld [vmem:[%s1544_s9 + $0x20] sm:$0xf] (%p90_p3)  ;;  %251 = vst [vmem:[%s1548_s10] sm:$0xf] (%p90_p3), %v250_v0 }
  0x17   : > { %253 = vst [vmem:[%s1548_s10 + $0x4] sm:$0xf] (%p90_p3), %v252_v1  ;;  %v254_v2 = vld [vmem:[%s1544_s9 + $0x40] sm:$0xf] (%p90_p3) }
  0x18   : > { %v256_v3 = vld [vmem:[%s1544_s9 + $0x60] sm:$0xf] (%p90_p3)  ;;  %255 = vst [vmem:[%s1548_s10 + $0x8] sm:$0xf] (%p90_p3), %v254_v2 }
  0x19   : > { %v258_v4 = vld [vmem:[%s1544_s9 + $0x80] sm:$0xf]  ;;  %257 = vst [vmem:[%s1548_s10 + $0xc] sm:$0xf] %v256_v3 }
  0x1a   : > { %259 = vst [vmem:[%s1548_s10 + $0x10] sm:$0xf] %v258_v4  ;;  %v260_v5 = vld [vmem:[%s1544_s9 + $0xa0] sm:$0xf] }
  0x1b   : > { %v262_v6 = vld [vmem:[%s1544_s9 + $0xc0] sm:$0xf]  ;;  %261 = vst [vmem:[%s1548_s10 + $0x14] sm:$0xf] %v260_v5 }
  0x1c   : > { %v264_v7 = vld [vmem:[%s1544_s9 + $0xe0] sm:$0xf]  ;;  %263 = vst [vmem:[%s1548_s10 + $0x18] sm:$0xf] %v262_v6 }
  0x1d   : > { %265 = vst [vmem:[%s1548_s10 + $0x1c] sm:$0xf] %v264_v7  ;;  %v266_v8 = vld [vmem:[%s1544_s9 + $0x100] sm:$0xf] }
  0x1e   : > { %v268_v9 = vld [vmem:[%s1544_s9 + $0x120] sm:$0xf]  ;;  %267 = vst [vmem:[%s1548_s10 + $0x20] sm:$0xf] %v266_v8 }
  0x1f   : > { %v270_v10 = vld [vmem:[%s1544_s9 + $0x140] sm:$0xf]  ;;  %269 = vst [vmem:[%s1548_s10 + $0x24] sm:$0xf] %v268_v9 }
  0x20   : > { %271 = vst [vmem:[%s1548_s10 + $0x28] sm:$0xf] %v270_v10  ;;  %v272_v11 = vld [vmem:[%s1544_s9 + $0x160] sm:$0xf] }
  0x21   : > { %v274_v12 = vld [vmem:[%s1544_s9 + $0x180] sm:$0xf]  ;;  %273 = vst [vmem:[%s1548_s10 + $0x2c] sm:$0xf] %v272_v11 }
  0x22   : > { %v276_v13 = vld [vmem:[%s1544_s9 + $0x1a0] sm:$0xf]  ;;  %275 = vst [vmem:[%s1548_s10 + $0x30] sm:$0xf] %v274_v12 }
  0x23   : > { %277 = vst [vmem:[%s1548_s10 + $0x34] sm:$0xf] %v276_v13  ;;  %v278_v14 = vld [vmem:[%s1544_s9 + $0x1c0] sm:$0xf] }
  0x24   : > { %v280_v15 = vld [vmem:[%s1544_s9 + $0x1e0] sm:$0xf]  ;;  %279 = vst [vmem:[%s1548_s10 + $0x38] sm:$0xf] %v278_v14 }
  0x25   : > { %v282_v16 = vld [vmem:[%s1544_s9 + $0x200] sm:$0xf]  ;;  %281 = vst [vmem:[%s1548_s10 + $0x3c] sm:$0xf] %v280_v15 }
  0x26   : > { %283 = vst [vmem:[%s1548_s10 + $0x40] sm:$0xf] %v282_v16  ;;  %v284_v17 = vld [vmem:[%s1544_s9 + $0x220] sm:$0xf] }
  0x27   : > { %v286_v18 = vld [vmem:[%s1544_s9 + $0x240] sm:$0xf]  ;;  %285 = vst [vmem:[%s1548_s10 + $0x44] sm:$0xf] %v284_v17 }
  0x28   : > { %v288_v19 = vld [vmem:[%s1544_s9 + $0x260] sm:$0xf]  ;;  %287 = vst [vmem:[%s1548_s10 + $0x48] sm:$0xf] %v286_v18 }
  0x29   : > { %289 = vst [vmem:[%s1548_s10 + $0x4c] sm:$0xf] %v288_v19  ;;  %v290_v20 = vld [vmem:[%s1544_s9 + $0x280] sm:$0xf] }
  0x2a   : > { %v292_v21 = vld [vmem:[%s1544_s9 + $0x2a0] sm:$0xf]  ;;  %291 = vst [vmem:[%s1548_s10 + $0x50] sm:$0xf] %v290_v20 }
  0x2b   : > { %v294_v22 = vld [vmem:[%s1544_s9 + $0x2c0] sm:$0xf]  ;;  %293 = vst [vmem:[%s1548_s10 + $0x54] sm:$0xf] %v292_v21 }
  0x2c   : > { %295 = vst [vmem:[%s1548_s10 + $0x58] sm:$0xf] %v294_v22  ;;  %v296_v23 = vld [vmem:[%s1544_s9 + $0x2e0] sm:$0xf] }
  0x2d   : > { %v298_v24 = vld [vmem:[%s1544_s9 + $0x300] sm:$0xf]  ;;  %297 = vst [vmem:[%s1548_s10 + $0x5c] sm:$0xf] %v296_v23 }
  0x2e   : > { %v300_v25 = vld [vmem:[%s1544_s9 + $0x320] sm:$0xf]  ;;  %299 = vst [vmem:[%s1548_s10 + $0x60] sm:$0xf] %v298_v24 }
  0x2f   : > { %301 = vst [vmem:[%s1548_s10 + $0x64] sm:$0xf] %v300_v25  ;;  %v302_v26 = vld [vmem:[%s1544_s9 + $0x340] sm:$0xf] }
  0x30   : > { %v304_v27 = vld [vmem:[%s1544_s9 + $0x360] sm:$0xf]  ;;  %303 = vst [vmem:[%s1548_s10 + $0x68] sm:$0xf] %v302_v26 }
  0x31   : > { %v306_v28 = vld [vmem:[%s1544_s9 + $0x380] sm:$0xf]  ;;  %305 = vst [vmem:[%s1548_s10 + $0x6c] sm:$0xf] %v304_v27 }
  0x32   : > { %307 = vst [vmem:[%s1548_s10 + $0x70] sm:$0xf] %v306_v28  ;;  %v308_v29 = vld [vmem:[%s1544_s9 + $0x3a0] sm:$0xf] }
  0x33   : > { %v310_v30 = vld [vmem:[%s1544_s9 + $0x3c0] sm:$0xf]  ;;  %309 = vst [vmem:[%s1548_s10 + $0x74] sm:$0xf] %v308_v29 }
  0x34   : > { %v312_v31 = vld [vmem:[%s1544_s9 + $0x3e0] sm:$0xf]  ;;  %311 = vst [vmem:[%s1548_s10 + $0x78] sm:$0xf] %v310_v30 }
  0x35   : > { %313 = vst [vmem:[%s1548_s10 + $0x7c] sm:$0xf] %v312_v31  ;;  %v314_v32 = vld [vmem:[%s1544_s9 + $0x400] sm:$0xf] }
  0x36   : > { %v316_v33 = vld [vmem:[%s1544_s9 + $0x420] sm:$0xf]  ;;  %315 = vst [vmem:[%s1548_s10 + $0x80] sm:$0xf] %v314_v32 }
  0x37   : > { %v318_v34 = vld [vmem:[%s1544_s9 + $0x440] sm:$0xf]  ;;  %317 = vst [vmem:[%s1548_s10 + $0x84] sm:$0xf] %v316_v33 }
  0x38   : > { %319 = vst [vmem:[%s1548_s10 + $0x88] sm:$0xf] %v318_v34  ;;  %v320_v35 = vld [vmem:[%s1544_s9 + $0x460] sm:$0xf] }
  0x39   : > { %v322_v36 = vld [vmem:[%s1544_s9 + $0x480] sm:$0xf]  ;;  %321 = vst [vmem:[%s1548_s10 + $0x8c] sm:$0xf] %v320_v35 }
  0x3a   : > { %v324_v37 = vld [vmem:[%s1544_s9 + $0x4a0] sm:$0xf]  ;;  %323 = vst [vmem:[%s1548_s10 + $0x90] sm:$0xf] %v322_v36 }
  0x3b   : > { %325 = vst [vmem:[%s1548_s10 + $0x94] sm:$0xf] %v324_v37  ;;  %v326_v38 = vld [vmem:[%s1544_s9 + $0x4c0] sm:$0xf] }
  0x3c   : > { %v328_v39 = vld [vmem:[%s1544_s9 + $0x4e0] sm:$0xf]  ;;  %327 = vst [vmem:[%s1548_s10 + $0x98] sm:$0xf] %v326_v38 }
  0x3d   : > { %v330_v40 = vld [vmem:[%s1544_s9 + $0x500] sm:$0xf]  ;;  %329 = vst [vmem:[%s1548_s10 + $0x9c] sm:$0xf] %v328_v39 }
  0x3e   : > { %331 = vst [vmem:[%s1548_s10 + $0xa0] sm:$0xf] %v330_v40  ;;  %v332_v41 = vld [vmem:[%s1544_s9 + $0x520] sm:$0xf] }
  0x3f   : > { %v334_v42 = vld [vmem:[%s1544_s9 + $0x540] sm:$0xf]  ;;  %333 = vst [vmem:[%s1548_s10 + $0xa4] sm:$0xf] %v332_v41 }
  0x40   : > { %v336_v43 = vld [vmem:[%s1544_s9 + $0x560] sm:$0xf]  ;;  %335 = vst [vmem:[%s1548_s10 + $0xa8] sm:$0xf] %v334_v42 }
  0x41   : > { %337 = vst [vmem:[%s1548_s10 + $0xac] sm:$0xf] %v336_v43  ;;  %v338_v44 = vld [vmem:[%s1544_s9 + $0x580] sm:$0xf] }
  0x42   : > { %v340_v45 = vld [vmem:[%s1544_s9 + $0x5a0] sm:$0xf]  ;;  %339 = vst [vmem:[%s1548_s10 + $0xb0] sm:$0xf] %v338_v44 }
  0x43   : > { %v342_v46 = vld [vmem:[%s1544_s9 + $0x5c0] sm:$0xf]  ;;  %341 = vst [vmem:[%s1548_s10 + $0xb4] sm:$0xf] %v340_v45 }
  0x44   : > { %343 = vst [vmem:[%s1548_s10 + $0xb8] sm:$0xf] %v342_v46  ;;  %v344_v47 = vld [vmem:[%s1544_s9 + $0x5e0] sm:$0xf] }
  0x45   : > { %v346_v48 = vld [vmem:[%s1544_s9 + $0x600] sm:$0xf]  ;;  %345 = vst [vmem:[%s1548_s10 + $0xbc] sm:$0xf] %v344_v47 }
  0x46   : > { %v348_v49 = vld [vmem:[%s1544_s9 + $0x620] sm:$0xf]  ;;  %347 = vst [vmem:[%s1548_s10 + $0xc0] sm:$0xf] %v346_v48 }
  0x47   : > { %349 = vst [vmem:[%s1548_s10 + $0xc4] sm:$0xf] %v348_v49  ;;  %v350_v50 = vld [vmem:[%s1544_s9 + $0x640] sm:$0xf] }
  0x48   : > { %v352_v51 = vld [vmem:[%s1544_s9 + $0x660] sm:$0xf]  ;;  %351 = vst [vmem:[%s1548_s10 + $0xc8] sm:$0xf] %v350_v50 }
  0x49   : > { %v354_v52 = vld [vmem:[%s1544_s9 + $0x680] sm:$0xf]  ;;  %353 = vst [vmem:[%s1548_s10 + $0xcc] sm:$0xf] %v352_v51 }
  0x4a   : > { %355 = vst [vmem:[%s1548_s10 + $0xd0] sm:$0xf] %v354_v52  ;;  %v356_v53 = vld [vmem:[%s1544_s9 + $0x6a0] sm:$0xf] }
  0x4b   : > { %v358_v54 = vld [vmem:[%s1544_s9 + $0x6c0] sm:$0xf]  ;;  %357 = vst [vmem:[%s1548_s10 + $0xd4] sm:$0xf] %v356_v53 }
  0x4c   : > { %v360_v55 = vld [vmem:[%s1544_s9 + $0x6e0] sm:$0xf]  ;;  %359 = vst [vmem:[%s1548_s10 + $0xd8] sm:$0xf] %v358_v54 }
  0x4d   : > { %361 = vst [vmem:[%s1548_s10 + $0xdc] sm:$0xf] %v360_v55  ;;  %v362_v56 = vld [vmem:[%s1544_s9 + $0x700] sm:$0xf] }
  0x4e   : > { %v364_v57 = vld [vmem:[%s1544_s9 + $0x720] sm:$0xf]  ;;  %363 = vst [vmem:[%s1548_s10 + $0xe0] sm:$0xf] %v362_v56 }
  0x4f   : > { %v366_v58 = vld [vmem:[%s1544_s9 + $0x740] sm:$0xf]  ;;  %365 = vst [vmem:[%s1548_s10 + $0xe4] sm:$0xf] %v364_v57 }
  0x50   : > { %367 = vst [vmem:[%s1548_s10 + $0xe8] sm:$0xf] %v366_v58  ;;  %v368_v59 = vld [vmem:[%s1544_s9 + $0x760] sm:$0xf] }
  0x51   : > { %v370_v60 = vld [vmem:[%s1544_s9 + $0x780] sm:$0xf]  ;;  %369 = vst [vmem:[%s1548_s10 + $0xec] sm:$0xf] %v368_v59 }
  0x52   : > { %v372_v61 = vld [vmem:[%s1544_s9 + $0x7a0] sm:$0xf]  ;;  %371 = vst [vmem:[%s1548_s10 + $0xf0] sm:$0xf] %v370_v60 }
  0x53   : > { %373 = vst [vmem:[%s1548_s10 + $0xf4] sm:$0xf] %v372_v61  ;;  %v374_v62 = vld [vmem:[%s1544_s9 + $0x7c0] sm:$0xf] }
  0x54   : > { %v376_v63 = vld [vmem:[%s1544_s9 + $0x7e0] sm:$0xf]  ;;  %375 = vst [vmem:[%s1548_s10 + $0xf8] sm:$0xf] %v374_v62 }
  0x55   : > { %377 = vst [vmem:[%s1548_s10 + $0xfc] sm:$0xf] %v376_v63 }
  0x56 PF: > { %p1244_p8 = scmp.ge.s32.totalorder %s1463_s22, 1  ;;  %p527_p9 = scmp.lt.s32.totalorder %s1463_s22, 9 }
  0x58   : > { %p528_p10 = pnand %p1244_p8, %p527_p9 }
  0x59   : > { %s534_s11 = sand.u32 (!%p528_p10), 1, %s1447_s18   ;;  %p1247_p11 = scmp.ne.s32.totalorder (!%p528_p10), %s1455_s20, 0 }
  0x5a   : > { %531 = sbr.rel (%p528_p10) target bundleno = 671 (0x29f), region = 77  ;;  %s1245_s12 = sshll.u32 (!%p528_p10), %s534_s11, 8 }
  0x5b   : > { %s1246_s13 = sshll.u32 (!%p528_p10), %s534_s11, 3  ;;  %s1679_s14 = scalar_lea.vmem (!%p528_p10), [#allocation3], %s1245_s12 }
  0x5c   : > { %s1681_s15 = scalar_lea.vmem (!%p528_p10), [#allocation4], %s1246_s13 }
  0x61   : > { %600 = sbr.rel (%p1247_p11) target bundleno = 277 (0x115), region = 85  ;;  %v601_v0 = vld [vmem:[%s1770_s0] sm:$0xff] (!%p1247_p11)  ;;  %v602_v1 = vld [vmem:[%s1770_s0 + $0x8] sm:$0xff] (!%p1247_p11)  ;;  %v603_v2 = vld [vmem:[%s1770_s0 + $0x10] sm:$0xff] (!%p1247_p11)  ;;  %v648_v29 = vlaneseq (!%p1247_p11) }
  0x62   : > { %v605_v3 = vunpack.c.l.bf16 (!%p1247_p11), %v601_v0  ;;  %v606_v4 = vunpack.c.h.bf16 (!%p1247_p11), %v601_v0  ;;  %v607_v5 = vunpack.c.l.bf16 (!%p1247_p11), %v602_v1  ;;  %v608_v6 = vunpack.c.h.bf16 (!%p1247_p11), %v602_v1  ;;  %v604_v7 = vld [vmem:[%s1770_s0 + $0x18] sm:$0xff] (!%p1247_p11)  ;;  %v646_v38 = vld [vmem:[%s1771_s1] sm:$0xf] (!%p1247_p11) }
  0x63   : > { %v609_v8 = vunpack.c.l.bf16 (!%p1247_p11), %v603_v2  ;;  %v610_v9 = vunpack.c.h.bf16 (!%p1247_p11), %v603_v2  ;;  %v611_v10 = vunpack.c.l.bf16 (!%p1247_p11), %v604_v7  ;;  %v612_v14 = vunpack.c.h.bf16 (!%p1247_p11), %v604_v7 }
  0x64   : > { %v613_v11 = vmul.f32 (!%p1247_p11), %v605_v3, %v605_v3  ;;  %v614_v12 = vmul.f32 (!%p1247_p11), %v606_v4, %v606_v4  ;;  %v615_v13 = vmul.f32 (!%p1247_p11), %v607_v5, %v607_v5  ;;  %v616_v18 = vmul.f32 (!%p1247_p11), %v608_v6, %v608_v6 }
  0x65   : > { %v617_v15 = vmul.f32 (!%p1247_p11), %v609_v8, %v609_v8  ;;  %v618_v16 = vmul.f32 (!%p1247_p11), %v610_v9, %v610_v9  ;;  %v619_v17 = vmul.f32 (!%p1247_p11), %v611_v10, %v611_v10  ;;  %v620_v22 = vmul.f32 (!%p1247_p11), %v612_v14, %v612_v14 }
  0x66   : > { %v621_v19 = vadd.f32 (!%p1247_p11), %v614_v12, %v613_v11  ;;  %v649_v33 = vshrl.u32 (!%p1247_p11), %v648_v29, 7 }
  0x67   : > { %v626_v20 = vadd.f32 (!%p1247_p11), %v618_v16, %v617_v15 }
  0x68   : > { %v622_v21 = vadd.f32 %v621_v19, %v615_v13  ;;  %v650_v34 = vsub.s32 0, %v649_v33  ;;  %v654_v35 = vsub.s32 1, %v649_v33  ;;  %v658_v36 = vsub.s32 2, %v649_v33 }
  0x69   : > { %v627_v23 = vadd.f32 %v626_v20, %v619_v17  ;;  %v662_v37 = vsub.s32 3, %v649_v33 }
  0x6a   : > { %v623_v24 = vadd.f32 %v622_v21, %v616_v18  ;;  %v651_v40 = vrot.slane %v646_v38, %v650_v34  ;;  %v655_v41 = vrot.slane %v646_v38, %v654_v35  ;;  %v659_v42 = vrot.slane %v646_v38, %v658_v36 }
  0x6b   : > { %v628_v25 = vadd.f32 %v627_v23, %v620_v22  ;;  %v663_v43 = vrot.slane %v646_v38, %v662_v37 }
  0x6c   : > { %624 = vadd.xlane.f32.xlu0 %v623_v24 }
  0x70   : > { %629 = vadd.xlane.f32.xlu0 %v628_v25 }
  0xf9   : > { %v625_v26 = vpop.xlane.xlu0 %624 }
  0xfa   : > { %v632_v27 = vmul.f32 0.001953125, %v625_v26 }
  0xfc   : > { %v634_v28 = vadd.f32 1e-06, %v632_v27 }
  0xfd   : > { %v630_v30 = vpop.xlane.xlu0 %629 }
  0xfe   : > { %1389 = vrsqrt.f32 %v634_v28  ;;  %v633_v31 = vmul.f32 0.001953125, %v630_v30 }
 0x100   : > { %v635_v32 = vadd.f32 1e-06, %v633_v31 }
 0x102   : > { %1391 = vrsqrt.f32 %v635_v32 }
 0x108   : > { %v1390_v39 = vpop.eup %1389 }
 0x109   : > { %v638_v44 = vmul.f32 %v1390_v39, %v605_v3  ;;  %v639_v45 = vmul.f32 %v1390_v39, %v606_v4  ;;  %v640_v46 = vmul.f32 %v1390_v39, %v607_v5  ;;  %v641_v47 = vmul.f32 %v1390_v39, %v608_v6 }
 0x10b   : > { %v668_v53 = vmul.f32 %v651_v40, %v638_v44  ;;  %v669_v54 = vmul.f32 %v655_v41, %v639_v45  ;;  %v670_v55 = vmul.f32 %v659_v42, %v640_v46  ;;  %v671_v56 = vmul.f32 %v663_v43, %v641_v47 }
 0x10c   : > { %v1392_v48 = vpop.eup %1391 }
 0x10d   : > { %v642_v49 = vmul.f32 %v1392_v48, %v609_v8  ;;  %v643_v50 = vmul.f32 %v1392_v48, %v610_v9  ;;  %v644_v51 = vmul.f32 %v1392_v48, %v611_v10  ;;  %v645_v52 = vmul.f32 %v1392_v48, %v612_v14 }
 0x10f   : > { %v672_v57 = vmul.f32 %v651_v40, %v642_v49  ;;  %v673_v58 = vmul.f32 %v655_v41, %v643_v50  ;;  %v674_v59 = vmul.f32 %v659_v42, %v644_v51  ;;  %v675_v60 = vmul.f32 %v663_v43, %v645_v52 }
 0x111   : > { %v676_v61 = vpack.c.bf16 %v672_v57, %v668_v53  ;;  %v677_v62 = vpack.c.bf16 %v673_v58, %v669_v54  ;;  %v678_v63 = vpack.c.bf16 %v674_v59, %v670_v55  ;;  %v679_v0 = vpack.c.bf16 %v675_v60, %v671_v56 }
 0x113   : > { %680 = vst [vmem:[#allocation2] sm:$0xff] %v676_v61  ;;  %681 = vst [vmem:[#allocation2 + $0x8] sm:$0xff] %v677_v62 }
 0x114   : > { %682 = vst [vmem:[#allocation2 + $0x10] sm:$0xff] %v678_v63  ;;  %683 = vst [vmem:[#allocation2 + $0x18] sm:$0xff] %v679_v0 }
 0x115 PF: > { %v1393_v1 = vld [vmem:[%s1679_s14 + $0x40] sm:$0xff]   ;;  %v1397_v5 = vld [vmem:[%s1679_s14 + $0x48] sm:$0xff]   ;;  %v1401_v9 = vld [vmem:[%s1679_s14 + $0x50] sm:$0xff]   ;;  %p1280_p12 = scmp.ge.s32.totalorder %s1455_s20, 6 }
 0x116   : > { %v1394_v2 = vld [vmem:[%s1679_s14 + $0xc0] sm:$0xff]   ;;  %1304 = vmatprep.subr.bf16.mxu0 %v1393_v1  ;;  %v1398_v6 = vld [vmem:[%s1679_s14 + $0xc8] sm:$0xff]   ;;  %v1402_v10 = vld [vmem:[%s1679_s14 + $0xd0] sm:$0xff]   ;;  %s1465_s8 = smov (!%p1280_p12), 64  }
 0x117   : > { %v1395_v3 = vld [vmem:[%s1679_s14] sm:$0xff]   ;;  %1326 = vmatprep.subr.bf16.mxu1 %v1394_v2  ;;  %v1399_v7 = vld [vmem:[%s1679_s14 + $0x8] sm:$0xff]   ;;  %v1403_v11 = vld [vmem:[%s1679_s14 + $0x10] sm:$0xff]  }
 0x118   : > { %v1396_v4 = vld [vmem:[%s1679_s14 + $0x80] sm:$0xff]   ;;  %1305 = vmatpush3.bf16.msra.mxu0 %v1395_v3  ;;  %v1400_v8 = vld [vmem:[%s1679_s14 + $0x88] sm:$0xff]   ;;  %v1404_v12 = vld [vmem:[%s1679_s14 + $0x90] sm:$0xff]  }
 0x119   : > { %1327 = vmatpush3.bf16.msra.mxu1 %v1396_v4  ;;  %1306 = vmatprep.subr.bf16.mxu0 %v1397_v5  ;;  %v1405_v13 = vld [vmem:[%s1679_s14 + $0x58] sm:$0xff]   ;;  %v1409_v17 = vld [vmem:[%s1679_s14 + $0x60] sm:$0xff]   ;;  %v1413_v21 = vld [vmem:[%s1679_s14 + $0x68] sm:$0xff]  }
 0x11a   : > { %1328 = vmatprep.subr.bf16.mxu1 %v1398_v6  ;;  %v1406_v14 = vld [vmem:[%s1679_s14 + $0xd8] sm:$0xff]   ;;  %v1410_v18 = vld [vmem:[%s1679_s14 + $0xe0] sm:$0xff]   ;;  %v1414_v22 = vld [vmem:[%s1679_s14 + $0xe8] sm:$0xff]  }
 0x11b   : > { %v1407_v15 = vld [vmem:[%s1679_s14 + $0x18] sm:$0xff]   ;;  %v1411_v19 = vld [vmem:[%s1679_s14 + $0x20] sm:$0xff]   ;;  %v1415_v23 = vld [vmem:[%s1679_s14 + $0x28] sm:$0xff]  }
 0x11c   : > { %1307 = vmatpush3.bf16.msra.mxu0 %v1399_v7  ;;  %v1408_v16 = vld [vmem:[%s1679_s14 + $0x98] sm:$0xff]   ;;  %v1412_v20 = vld [vmem:[%s1679_s14 + $0xa0] sm:$0xff]   ;;  %v1416_v24 = vld [vmem:[%s1679_s14 + $0xa8] sm:$0xff]  }
 0x11d   : > { %1329 = vmatpush3.bf16.msra.mxu1 %v1400_v8  ;;  %1308 = vmatprep.subr.bf16.mxu0 %v1401_v9  ;;  %v1417_v25 = vld [vmem:[%s1679_s14 + $0x70] sm:$0xff]   ;;  %v1421_v29 = vld [vmem:[%s1679_s14 + $0x78] sm:$0xff]   ;;  %v685_v33 = vld [vmem:[#allocation2 + $0x8] sm:$0xff] }
 0x11e   : > { %1330 = vmatprep.subr.bf16.mxu1 %v1402_v10  ;;  %v1418_v26 = vld [vmem:[%s1679_s14 + $0xf0] sm:$0xff]   ;;  %v1422_v30 = vld [vmem:[%s1679_s14 + $0xf8] sm:$0xff]   ;;  %v684_v35 = vld [vmem:[#allocation2] sm:$0xff]  ;;  %976 = vmatprep.mubr.bf16.mxu0 %v685_v33 }
 0x11f   : > { %v1419_v27 = vld [vmem:[%s1679_s14 + $0x30] sm:$0xff]   ;;  %v1423_v31 = vld [vmem:[%s1679_s14 + $0x38] sm:$0xff]   ;;  %v1038_v51 = vld [vmem:[%s1774_s4] sm:$0xff] (!%p1280_p12) }
 0x120   : > { %1309 = vmatpush3.bf16.msra.mxu0 %v1403_v11  ;;  %v1420_v28 = vld [vmem:[%s1679_s14 + $0xb0] sm:$0xff]   ;;  %v1424_v32 = vld [vmem:[%s1679_s14 + $0xb8] sm:$0xff]   ;;  %v1030_v53 = vld [vmem:[%s1773_s3] sm:$0xff] (!%p1280_p12) }
 0x121   : > { %1331 = vmatpush3.bf16.msra.mxu1 %v1404_v12  ;;  %1310 = vmatprep.subr.bf16.mxu0 %v1405_v13  ;;  %v687_v34 = vld [vmem:[#allocation2 + $0x18] sm:$0xff]  ;;  %v686_v36 = vld [vmem:[#allocation2 + $0x10] sm:$0xff]  ;;  %v1031_v54 = vld [vmem:[%s1773_s3 + $0x8] sm:$0xff] (!%p1280_p12) }
 0x122   : > { %1332 = vmatprep.subr.bf16.mxu1 %v1406_v14  ;;  %1017 = vmatprep.mubr.bf16.mxu1 %v687_v34  ;;  %v1039_v55 = vld [vmem:[%s1774_s4 + $0x8] sm:$0xff] (!%p1280_p12) }
 0x124   : > { %1311 = vmatpush3.bf16.msra.mxu0 %v1407_v15 }
 0x125   : > { %1333 = vmatpush3.bf16.msra.mxu1 %v1408_v16  ;;  %1312 = vmatprep.subr.bf16.mxu0 %v1409_v17 }
 0x126   : > { %1334 = vmatprep.subr.bf16.mxu1 %v1410_v18 }
 0x128   : > { %1313 = vmatpush3.bf16.msra.mxu0 %v1411_v19 }
 0x129   : > { %1335 = vmatpush3.bf16.msra.mxu1 %v1412_v20  ;;  %1314 = vmatprep.subr.bf16.mxu0 %v1413_v21 }
 0x12a   : > { %1336 = vmatprep.subr.bf16.mxu1 %v1414_v22 }
 0x12c   : > { %1315 = vmatpush3.bf16.msra.mxu0 %v1415_v23 }
 0x12d   : > { %1337 = vmatpush3.bf16.msra.mxu1 %v1416_v24  ;;  %1316 = vmatprep.subr.bf16.mxu0 %v1417_v25 }
 0x12e   : > { %1338 = vmatprep.subr.bf16.mxu1 %v1418_v26 }
 0x130   : > { %1317 = vmatpush3.bf16.msra.mxu0 %v1419_v27 }
 0x131   : > { %1339 = vmatpush3.bf16.msra.mxu1 %v1420_v28  ;;  %1318 = vmatprep.subr.bf16.mxu0 %v1421_v29 }
 0x132   : > { %1340 = vmatprep.subr.bf16.mxu1 %v1422_v30 }
 0x134   : > { %1319 = vmatpush3.bf16.msra.mxu0 %v1423_v31 }
 0x135   : > { %1341 = vmatpush3.bf16.msra.mxu1 %v1424_v32 }
 0x137   : > { %977 = vmatmul.mubr.bf16.vlgmr.msra.gmra.mrb[0].mxu0 %v684_v35 }
 0x138   : > { %1018 = vmatmul.mubr.bf16.vlgmr.msra.gmra.mrb[0].mxu1 %v686_v36 }
 0x20a   : > { %v1320_v37 = vpop.f32.mrb[0].mxu0 }
 0x20b   : > { %v1342_v38 = vpop.f32.mrb[0].mxu1  ;;  %v1321_v39 = vpop.f32.mrb[1].mxu0  ;;  %1029 = sbr.rel (%p1280_p12) target bundleno = 655 (0x28f), region = 89 }
 0x20c   : > { %v1322_v40 = vadd.f32 %v1321_v39, %v1320_v37  ;;  %v1343_v41 = vpop.f32.mrb[1].mxu1  ;;  %v1323_v42 = vpop.f32.mrb[2].mxu0 }
 0x20d   : > { %v1344_v43 = vadd.f32 %v1343_v41, %v1342_v38  ;;  %v1345_v44 = vpop.f32.mrb[2].mxu1  ;;  %v1324_v45 = vpop.f32.mrb[3].mxu0 }
 0x20e   : > { %v1325_v46 = vadd.f32 %v1324_v45, %v1323_v42  ;;  %v1346_v47 = vpop.f32.mrb[3].mxu1 }
 0x20f   : > { %v1020_v48 = vadd.f32 %v1344_v43, %v1322_v40  ;;  %v1347_v49 = vadd.f32 %v1346_v47, %v1345_v44 }
 0x211   : > { %v1023_v50 = vadd.f32 %v1347_v49, %v1325_v46  ;;  %1034 = vrot.lane.b32.xlu0 (!%p1280_p12), %v1020_v48, %s1465_s8  ;;  %v1032_v56 = vmul.f32 (!%p1280_p12), %v1030_v53, %v1020_v48 }
 0x213   : > { %v1033_v58 = vmul.f32 %v1031_v54, %v1023_v50 }
 0x215   : > { %1036 = vrot.lane.b32.xlu0 %v1023_v50, %s1465_s8 }
 0x283   : > { %v1035_v52 = vpop.permute.xlu0 %1034 }
 0x284   : > { %v1040_v57 = vmul.f32 %v1038_v51, %v1035_v52 }
 0x286   : > { %v1042_v61 = vadd.f32 %v1040_v57, %v1032_v56 }
 0x287   : > { %v1037_v59 = vpop.permute.xlu0 %1036 }
 0x288   : > { %v1041_v60 = vmul.f32 %v1039_v55, %v1037_v59 }
 0x28a   : > { %v1043_v62 = vadd.f32 %v1041_v60, %v1033_v58 }
 0x28c   : > { %v1297_v63 = vpack.c.bf16 %v1043_v62, %v1042_v61 }
 0x28e   : > { %1298 = vst [vmem:[%s1681_s15] sm:$0xff] %v1297_v63  }
 0x28f PF: > { %p1283_p13 = scmp.lt.s32.totalorder %s1455_s20, 6 }
 0x290   : > { %v1302_v0 = vpack.c.bf16 (!%p1283_p13), %v1023_v50, %v1020_v48 }
 0x291   : > { %1057 = sbr.rel (%p1283_p13) target bundleno = 664 (0x298), region = 93 }
 0x292   : > { %1303 = vst [vmem:[%s1681_s15] sm:$0xff] (!%p1283_p13), %v1302_v0  }
 0x298 PF: > { %1074 = sbr.rel (!%p1531_p6) target bundleno = 671 (0x29f), region = 97  ;;  %s1287_s24 = sshll.u32 (%p1531_p6), %s1455_s20, 2 }
 0x299   : > { %v1095_v1 = vld [vmem:[%s1681_s15] sm:$0xf] (%p1531_p6)  ;;  %v1097_v2 = vld [vmem:[%s1681_s15 + $0x4] sm:$0xf] (%p1531_p6)  ;;  %s1079_s29 = scalar_lea.vmem (%p1531_p6), %s1775_s5, %s1287_s24 }
 0x29a   : > { %1096 = vst [vmem:[%s1079_s29] sm:$0xf] (%p1531_p6), %v1095_v1  ;;  %1098 = vst [vmem:[%s1079_s29 + $0x20] sm:$0xf] (%p1531_p6), %v1097_v2 }
 0x29f PF: > { %s15_s22 = sadd.s32 1, %s1463_s22   ;;  %s1777_s18 = smov %s1451_s19 }
 0x2a0   : > { %p12_p0 = scmp.ge.s32.totalorder %s15_s22, 10   ;;  %s1778_s19 = smov %s1536_s28 }
 0x2a1   : > { %s1779_s20 = smov %s1459_s21  ;;  %s1780_s21 = smov %s1782_s23 }
 0x2a2   :  { %14 = sbr.rel (!%p12_p0) target bundleno = 3 (0x3), region = 178 }

// kernel: _lambda_.17
= control target key start
LH: loop header
LB: loop body
LE: loop exit
PB: predicated region body
PF: predicated region fallthrough
CT: control target
= control target key end

     0   :  { %s1073_s0 = inlined_call_operand.vmem [shape: bf16[16,512], index: 0, kind: input, shape index: {}]   ;;  %s1074_s1 = inlined_call_operand.vmem [shape: f32[1,512], index: 1, kind: input, shape index: {}]   ;;  %s1075_s2 = inlined_call_operand.vmem [shape: bf16[512,256], index: 2, kind: input, shape index: {}]   ;;  %s1076_s3 = inlined_call_operand.hbm [shape: f32[16,256], index: 3, kind: output, shape index: {}]  }
   0x1   :  { %v19_v0 = vld [vmem:[%s1073_s0] sm:$0xff]  ;;  %v20_v1 = vld [vmem:[%s1073_s0 + $0x8] sm:$0xff]  ;;  %v21_v2 = vld [vmem:[%s1073_s0 + $0x10] sm:$0xff] }
   0x2   :  { %v823_v3 = vunpack.c.l.bf16 %v19_v0  ;;  %v825_v4 = vunpack.c.h.bf16 %v19_v0  ;;  %v827_v5 = vunpack.c.l.bf16 %v20_v1  ;;  %v829_v6 = vunpack.c.h.bf16 %v20_v1  ;;  %v22_v7 = vld [vmem:[%s1073_s0 + $0x18] sm:$0xff]  ;;  %v667_v11 = vld [vmem:[%s1075_s2 + $0x4] ss:$8 sps:$4 sm:$0xff]   ;;  %v671_v17 = vld [vmem:[%s1075_s2] ss:$8 sps:$4 sm:$0xff]  }
   0x3   :  { %v834_v8 = vunpack.c.l.bf16 %v21_v2  ;;  %v836_v9 = vunpack.c.h.bf16 %v21_v2  ;;  %v838_v10 = vunpack.c.l.bf16 %v22_v7  ;;  %v849_v15 = vunpack.c.h.bf16 %v22_v7  ;;  %v669_v16 = vld [vmem:[%s1075_s2 + $0x104] ss:$8 sps:$4 sm:$0xff]   ;;  %v672_v18 = vld [vmem:[%s1075_s2 + $0x100] ss:$8 sps:$4 sm:$0xff]   ;;  %490 = vmatprep.subr.bf16.mxu1 %v667_v11  ;;  %v673_v22 = vld [vmem:[%s1075_s2 + $0x14] ss:$8 sps:$4 sm:$0xff]  }
   0x4   :  { %v31_v12 = vmul.f32 %v823_v3, %v823_v3  ;;  %v32_v13 = vmul.f32 %v825_v4, %v825_v4  ;;  %v33_v14 = vmul.f32 %v827_v5, %v827_v5  ;;  %v34_v23 = vmul.f32 %v829_v6, %v829_v6  ;;  %533 = vmatprep.subr.bf16.mxu0 %v669_v16  ;;  %v675_v25 = vld [vmem:[%s1075_s2 + $0x114] ss:$8 sps:$4 sm:$0xff]   ;;  %v677_v27 = vld [vmem:[%s1075_s2 + $0x10] ss:$8 sps:$4 sm:$0xff]   ;;  %v679_v31 = vld [vmem:[%s1075_s2 + $0x24] ss:$8 sps:$4 sm:$0xff]  }
   0x5   :  { %v35_v19 = vmul.f32 %v834_v8, %v834_v8  ;;  %v36_v20 = vmul.f32 %v836_v9, %v836_v9  ;;  %v37_v21 = vmul.f32 %v838_v10, %v838_v10  ;;  %491 = vmatpush1.bf16.msra.mxu1 %v671_v17  ;;  %534 = vmatpush1.bf16.msra.mxu0 %v672_v18  ;;  %v678_v28 = vld [vmem:[%s1075_s2 + $0x110] ss:$8 sps:$4 sm:$0xff]   ;;  %v681_v33 = vld [vmem:[%s1075_s2 + $0x124] ss:$8 sps:$4 sm:$0xff]   ;;  %v683_v34 = vld [vmem:[%s1075_s2 + $0x20] ss:$8 sps:$4 sm:$0xff]  }
   0x6   :  { %v39_v24 = vadd.f32 %v32_v13, %v31_v12  ;;  %492 = vmatprep.subr.bf16.mxu1 %v673_v22  ;;  %v38_v30 = vmul.f32 %v849_v15, %v849_v15  ;;  %535 = vmatprep.subr.bf16.mxu0 %v675_v25  ;;  %v684_v36 = vld [vmem:[%s1075_s2 + $0x120] ss:$8 sps:$4 sm:$0xff]   ;;  %v685_v37 = vld [vmem:[%s1075_s2 + $0x34] ss:$8 sps:$4 sm:$0xff]   ;;  %v689_v40 = vld [vmem:[%s1075_s2 + $0x30] ss:$8 sps:$4 sm:$0xff]  }
   0x7   :  { %v44_v26 = vadd.f32 %v36_v20, %v35_v19  ;;  %v687_v39 = vld [vmem:[%s1075_s2 + $0x134] ss:$8 sps:$4 sm:$0xff]   ;;  %v690_v41 = vld [vmem:[%s1075_s2 + $0x130] ss:$8 sps:$4 sm:$0xff]   ;;  %v691_v42 = vld [vmem:[%s1075_s2 + $0x44] ss:$8 sps:$4 sm:$0xff]  }
   0x8   :  { %v40_v29 = vadd.f32 %v39_v24, %v33_v14  ;;  %v693_v43 = vld [vmem:[%s1075_s2 + $0x144] ss:$8 sps:$4 sm:$0xff]   ;;  %v695_v44 = vld [vmem:[%s1075_s2 + $0x40] ss:$8 sps:$4 sm:$0xff]   ;;  %v697_v46 = vld [vmem:[%s1075_s2 + $0x54] ss:$8 sps:$4 sm:$0xff]  }
   0x9   :  { %v45_v32 = vadd.f32 %v44_v26, %v37_v21  ;;  %493 = vmatpush1.bf16.msra.mxu1 %v677_v27  ;;  %536 = vmatpush1.bf16.msra.mxu0 %v678_v28  ;;  %v696_v45 = vld [vmem:[%s1075_s2 + $0x140] ss:$8 sps:$4 sm:$0xff]   ;;  %v699_v47 = vld [vmem:[%s1075_s2 + $0x154] ss:$8 sps:$4 sm:$0xff]   ;;  %v701_v48 = vld [vmem:[%s1075_s2 + $0x50] ss:$8 sps:$4 sm:$0xff]  }
   0xa   :  { %v41_v35 = vadd.f32 %v40_v29, %v34_v23  ;;  %494 = vmatprep.subr.bf16.mxu1 %v679_v31  ;;  %537 = vmatprep.subr.bf16.mxu0 %v681_v33  ;;  %v702_v49 = vld [vmem:[%s1075_s2 + $0x150] ss:$8 sps:$4 sm:$0xff]   ;;  %v703_v50 = vld [vmem:[%s1075_s2 + $0x64] ss:$8 sps:$4 sm:$0xff]   ;;  %v707_v52 = vld [vmem:[%s1075_s2 + $0x60] ss:$8 sps:$4 sm:$0xff]  }
   0xb   :  { %v46_v38 = vadd.f32 %v45_v32, %v38_v30  ;;  %v705_v51 = vld [vmem:[%s1075_s2 + $0x164] ss:$8 sps:$4 sm:$0xff]   ;;  %v708_v53 = vld [vmem:[%s1075_s2 + $0x160] ss:$8 sps:$4 sm:$0xff]   ;;  %v709_v54 = vld [vmem:[%s1075_s2 + $0x74] ss:$8 sps:$4 sm:$0xff]  }
   0xc   :  { %42 = vadd.xlane.f32.xlu0 %v41_v35  ;;  %v711_v55 = vld [vmem:[%s1075_s2 + $0x174] ss:$8 sps:$4 sm:$0xff]   ;;  %v713_v56 = vld [vmem:[%s1075_s2 + $0x70] ss:$8 sps:$4 sm:$0xff]   ;;  %v715_v58 = vld [vmem:[%s1075_s2 + $0x84] ss:$8 sps:$4 sm:$0xff]  }
   0xd   :  { %495 = vmatpush1.bf16.msra.mxu1 %v683_v34  ;;  %538 = vmatpush1.bf16.msra.mxu0 %v684_v36  ;;  %v714_v57 = vld [vmem:[%s1075_s2 + $0x170] ss:$8 sps:$4 sm:$0xff]   ;;  %v717_v59 = vld [vmem:[%s1075_s2 + $0x184] ss:$8 sps:$4 sm:$0xff]   ;;  %v719_v60 = vld [vmem:[%s1075_s2 + $0x80] ss:$8 sps:$4 sm:$0xff]  }
   0xe   :  { %496 = vmatprep.subr.bf16.mxu1 %v685_v37  ;;  %539 = vmatprep.subr.bf16.mxu0 %v687_v39  ;;  %v720_v61 = vld [vmem:[%s1075_s2 + $0x180] ss:$8 sps:$4 sm:$0xff]   ;;  %v721_v62 = vld [vmem:[%s1075_s2 + $0x94] ss:$8 sps:$4 sm:$0xff]   ;;  %v725_v0 = vld [vmem:[%s1075_s2 + $0x90] ss:$8 sps:$4 sm:$0xff]  }
   0xf   :  { %v723_v63 = vld [vmem:[%s1075_s2 + $0x194] ss:$8 sps:$4 sm:$0xff]   ;;  %v726_v1 = vld [vmem:[%s1075_s2 + $0x190] ss:$8 sps:$4 sm:$0xff]   ;;  %v727_v2 = vld [vmem:[%s1075_s2 + $0xa4] ss:$8 sps:$4 sm:$0xff]  }
  0x10   :  { %47 = vadd.xlane.f32.xlu0 %v46_v38  ;;  %v729_v7 = vld [vmem:[%s1075_s2 + $0x1a4] ss:$8 sps:$4 sm:$0xff]   ;;  %v731_v11 = vld [vmem:[%s1075_s2 + $0xa0] ss:$8 sps:$4 sm:$0xff]   ;;  %v733_v13 = vld [vmem:[%s1075_s2 + $0xb4] ss:$8 sps:$4 sm:$0xff]  }
  0x11   :  { %497 = vmatpush1.bf16.msra.mxu1 %v689_v40  ;;  %540 = vmatpush1.bf16.msra.mxu0 %v690_v41  ;;  %v732_v12 = vld [vmem:[%s1075_s2 + $0x1a0] ss:$8 sps:$4 sm:$0xff]   ;;  %v735_v14 = vld [vmem:[%s1075_s2 + $0x1b4] ss:$8 sps:$4 sm:$0xff]  }
  0x12   :  { %498 = vmatprep.subr.bf16.mxu1 %v691_v42  ;;  %541 = vmatprep.subr.bf16.mxu0 %v693_v43 }
  0x15   :  { %499 = vmatpush1.bf16.msra.mxu1 %v695_v44  ;;  %542 = vmatpush1.bf16.msra.mxu0 %v696_v45 }
  0x16   :  { %500 = vmatprep.subr.bf16.mxu1 %v697_v46  ;;  %543 = vmatprep.subr.bf16.mxu0 %v699_v47 }
  0x19   :  { %501 = vmatpush1.bf16.msra.mxu1 %v701_v48  ;;  %544 = vmatpush1.bf16.msra.mxu0 %v702_v49 }
  0x1a   :  { %502 = vmatprep.subr.bf16.mxu1 %v703_v50  ;;  %545 = vmatprep.subr.bf16.mxu0 %v705_v51 }
  0x1d   :  { %503 = vmatpush1.bf16.msra.mxu1 %v707_v52  ;;  %546 = vmatpush1.bf16.msra.mxu0 %v708_v53 }
  0x1e   :  { %504 = vmatprep.subr.bf16.mxu1 %v709_v54  ;;  %547 = vmatprep.subr.bf16.mxu0 %v711_v55 }
  0x21   :  { %505 = vmatpush1.bf16.msra.mxu1 %v713_v56  ;;  %548 = vmatpush1.bf16.msra.mxu0 %v714_v57 }
  0x22   :  { %506 = vmatprep.subr.bf16.mxu1 %v715_v58  ;;  %549 = vmatprep.subr.bf16.mxu0 %v717_v59 }
  0x25   :  { %507 = vmatpush1.bf16.msra.mxu1 %v719_v60  ;;  %550 = vmatpush1.bf16.msra.mxu0 %v720_v61 }
  0x26   :  { %508 = vmatprep.subr.bf16.mxu1 %v721_v62  ;;  %551 = vmatprep.subr.bf16.mxu0 %v723_v63 }
  0x29   :  { %509 = vmatpush1.bf16.msra.mxu1 %v725_v0  ;;  %552 = vmatpush1.bf16.msra.mxu0 %v726_v1 }
  0x2a   :  { %510 = vmatprep.subr.bf16.mxu1 %v727_v2  ;;  %553 = vmatprep.subr.bf16.mxu0 %v729_v7 }
  0x2b   :  { %8 = vsyncpa [#allocation4], 0  ;;  %v737_v16 = vld [vmem:[%s1075_s2 + $0xb0] ss:$8 sps:$4 sm:$0xff]   ;;  %v739_v18 = vld [vmem:[%s1075_s2 + $0xc4] ss:$8 sps:$4 sm:$0xff]   ;;  %v66_v38 = vlaneseq }
  0x2c   :  { %v738_v17 = vld [vmem:[%s1075_s2 + $0x1b0] ss:$8 sps:$4 sm:$0xff]   ;;  %v741_v19 = vld [vmem:[%s1075_s2 + $0x1c4] ss:$8 sps:$4 sm:$0xff]   ;;  %v743_v20 = vld [vmem:[%s1075_s2 + $0xc0] ss:$8 sps:$4 sm:$0xff]  }
  0x2d   :  { %511 = vmatpush1.bf16.msra.mxu1 %v731_v11  ;;  %554 = vmatpush1.bf16.msra.mxu0 %v732_v12  ;;  %v744_v21 = vld [vmem:[%s1075_s2 + $0x1c0] ss:$8 sps:$4 sm:$0xff]   ;;  %v745_v22 = vld [vmem:[%s1075_s2 + $0xd4] ss:$8 sps:$4 sm:$0xff]   ;;  %v749_v24 = vld [vmem:[%s1075_s2 + $0xd0] ss:$8 sps:$4 sm:$0xff]  }
  0x2e   :  { %512 = vmatprep.subr.bf16.mxu1 %v733_v13  ;;  %555 = vmatprep.subr.bf16.mxu0 %v735_v14  ;;  %v747_v23 = vld [vmem:[%s1075_s2 + $0x1d4] ss:$8 sps:$4 sm:$0xff]   ;;  %v750_v25 = vld [vmem:[%s1075_s2 + $0x1d0] ss:$8 sps:$4 sm:$0xff]   ;;  %v751_v26 = vld [vmem:[%s1075_s2 + $0xe4] ss:$8 sps:$4 sm:$0xff]  }
  0x2f   :  { %v753_v27 = vld [vmem:[%s1075_s2 + $0x1e4] ss:$8 sps:$4 sm:$0xff]   ;;  %v755_v28 = vld [vmem:[%s1075_s2 + $0xe0] ss:$8 sps:$4 sm:$0xff]   ;;  %v757_v30 = vld [vmem:[%s1075_s2 + $0xf4] ss:$8 sps:$4 sm:$0xff]  }
  0x30   :  { %v756_v29 = vld [vmem:[%s1075_s2 + $0x1e0] ss:$8 sps:$4 sm:$0xff]   ;;  %v759_v31 = vld [vmem:[%s1075_s2 + $0x1f4] ss:$8 sps:$4 sm:$0xff]   ;;  %v761_v32 = vld [vmem:[%s1075_s2 + $0xf0] ss:$8 sps:$4 sm:$0xff]  }
  0x31   :  { %513 = vmatpush1.bf16.msra.mxu1 %v737_v16  ;;  %556 = vmatpush1.bf16.msra.mxu0 %v738_v17  ;;  %v762_v33 = vld [vmem:[%s1075_s2 + $0x1f0] ss:$8 sps:$4 sm:$0xff]   ;;  %v67_v41 = vshrl.u32 %v66_v38, 7  ;;  %v64_v46 = vld [vmem:[%s1074_s1] sm:$0xf]  ;;  %s791_s1 = smov [#allocation3]  }
  0x32   :  { %514 = vmatprep.subr.bf16.mxu1 %v739_v18  ;;  %557 = vmatprep.subr.bf16.mxu0 %v741_v19  ;;  %s585_s2 = sshll.u32 %s791_s1, 4  ;;  %s586_s2 = int_to_ptr.vmem [resolvable:$true] %s585_s2 }
  0x33   :  { %v72_v42 = vsub.s32 1, %v67_v41  ;;  %v80_v43 = vsub.s32 3, %v67_v41  ;;  %v68_v44 = vsub.s32 0, %v67_v41  ;;  %v76_v45 = vsub.s32 2, %v67_v41  ;;  %s767_s10 = scalar_lea.vmem %s586_s2, 512  ;;  %p772_p1 = scmp.lt.s32.totalorder %s586_s2, %s586_s2 }
  0x34   :  { %p768_p0 = scmp.ne.s32.totalorder %s586_s2, %s767_s10  ;;  %p773_p2 = scmp.lt.s32.totalorder %s767_s10, %s767_s10 }
  0x35   :  { %515 = vmatpush1.bf16.msra.mxu1 %v743_v20  ;;  %558 = vmatpush1.bf16.msra.mxu0 %v744_v21  ;;  %v73_v48 = vrot.slane %v64_v46, %v72_v42  ;;  %v81_v49 = vrot.slane %v64_v46, %v80_v43  ;;  %v69_v50 = vrot.slane %v64_v46, %v68_v44 }
  0x36   :  { %516 = vmatprep.subr.bf16.mxu1 %v745_v22  ;;  %559 = vmatprep.subr.bf16.mxu0 %v747_v23  ;;  %v77_v51 = vrot.slane %v64_v46, %v76_v45  ;;  %p774_p3 = por %p773_p2, %p772_p1 }
  0x38   :  { %p775_p4 = pnand %p774_p3, %p768_p0 }
  0x39   :  { %517 = vmatpush1.bf16.msra.mxu1 %v749_v24  ;;  %560 = vmatpush1.bf16.msra.mxu0 %v750_v25 }
  0x3a   :  { %518 = vmatprep.subr.bf16.mxu1 %v751_v26  ;;  %561 = vmatprep.subr.bf16.mxu0 %v753_v27 }
  0x3d   :  { %519 = vmatpush1.bf16.msra.mxu1 %v755_v28  ;;  %562 = vmatpush1.bf16.msra.mxu0 %v756_v29 }
  0x3e   :  { %520 = vmatprep.subr.bf16.mxu1 %v757_v30  ;;  %563 = vmatprep.subr.bf16.mxu0 %v759_v31 }
  0x41   :  { %521 = vmatpush1.bf16.msra.mxu1 %v761_v32  ;;  %564 = vmatpush1.bf16.msra.mxu0 %v762_v33 }
  0x99   :  { %v43_v34 = vpop.xlane.xlu0 %42 }
  0x9a   :  { %v50_v35 = vmul.f32 0.001953125, %v43_v34 }
  0x9c   :  { %v52_v36 = vadd.f32 1e-06, %v50_v35 }
  0x9d   :  { %v48_v37 = vpop.xlane.xlu0 %47 }
  0x9e   :  { %763 = vrsqrt.f32 %v52_v36  ;;  %v51_v39 = vmul.f32 0.001953125, %v48_v37 }
  0xa0   :  { %v53_v40 = vadd.f32 1e-06, %v51_v39 }
  0xa2   :  { %765 = vrsqrt.f32 %v53_v40 }
  0xa8   :  { %v764_v47 = vpop.eup %763 }
  0xa9   :  { %v57_v52 = vmul.f32 %v764_v47, %v825_v4  ;;  %v59_v53 = vmul.f32 %v764_v47, %v829_v6  ;;  %v56_v54 = vmul.f32 %v764_v47, %v823_v3  ;;  %v58_v55 = vmul.f32 %v764_v47, %v827_v5 }
  0xab   :  { %v87_v61 = vmul.f32 %v73_v48, %v57_v52  ;;  %v89_v62 = vmul.f32 %v81_v49, %v59_v53  ;;  %v86_v63 = vmul.f32 %v69_v50, %v56_v54  ;;  %v88_v0 = vmul.f32 %v77_v51, %v58_v55 }
  0xac   :  { %v766_v56 = vpop.eup %765 }
  0xad   :  { %v61_v57 = vmul.f32 %v766_v56, %v836_v9  ;;  %v63_v58 = vmul.f32 %v766_v56, %v849_v15  ;;  %v60_v59 = vmul.f32 %v766_v56, %v834_v8  ;;  %v62_v60 = vmul.f32 %v766_v56, %v838_v10 }
  0xaf   :  { %v91_v4 = vmul.f32 %v73_v48, %v61_v57  ;;  %v93_v1 = vmul.f32 %v81_v49, %v63_v58  ;;  %v90_v6 = vmul.f32 %v69_v50, %v60_v59  ;;  %v92_v2 = vmul.f32 %v77_v51, %v62_v60 }
  0xb1   :  { %v95_v3 = vpack.c.bf16 %v91_v4, %v87_v61  ;;  %v97_v7 = vpack.c.bf16 %v93_v1, %v89_v62  ;;  %v94_v5 = vpack.c.bf16 %v90_v6, %v86_v63  ;;  %v96_v11 = vpack.c.bf16 %v92_v2, %v88_v0 }
  0xb3   :  { %522 = vmatprep.mubr.bf16.mxu1 %v95_v3  ;;  %565 = vmatprep.mubr.bf16.mxu0 %v97_v7 }
  0xb4   :  { %523 = vmatmul.mubr.bf16.vlgmr.msra.gmra.mrb[0].mxu1 %v94_v5  ;;  %566 = vmatmul.mubr.bf16.vlgmr.msra.gmra.mrb[0].mxu0 %v96_v11 }
 0x187   :  { %v524_v9 = vpop.f32.mrb[0].mxu1  ;;  %v567_v8 = vpop.f32.mrb[0].mxu0 }
 0x188   :  { %v568_v10 = vadd.f32 %v567_v8, %v524_v9  ;;  %v526_v15 = vpop.f32.mrb[1].mxu1  ;;  %v569_v12 = vpop.f32.mrb[1].mxu0 }
 0x189   :  { %v570_v13 = vadd.f32 %v569_v12, %v526_v15  ;;  %v528_v14 = vpop.f32.mrb[2].mxu1  ;;  %v571_v16 = vpop.f32.mrb[2].mxu0 }
 0x18a   :  { %576 = vst [vmem:[#allocation3] sm:$0xff] %v568_v10  ;;  %v572_v17 = vadd.f32 %v571_v16, %v528_v14  ;;  %v530_v18 = vpop.f32.mrb[3].mxu1  ;;  %v573_v19 = vpop.f32.mrb[3].mxu0 }
 0x18b   :  { %577 = vst [vmem:[#allocation3 + $0x8] sm:$0xff] %v570_v13  ;;  %v574_v20 = vadd.f32 %v573_v19, %v530_v18 }
 0x18c   :  { %578 = vst [vmem:[#allocation3 + $0x10] sm:$0xff] %v572_v17 }
 0x18d   :  { %579 = vst [vmem:[#allocation3 + $0x18] sm:$0xff] %v574_v20 }
 0x18e   :  { %778 = shalt.err (!%p775_p4)
}
 0x18f   :  { %s779_s13 = scalar_lea.hbm %s1076_s3, 512 }
 0x190   :  { %p780_p5 = scmp.ne.s32.totalorder %s1076_s3, %s779_s13  ;;  %p783_p6 = scmp.lt.u32.totalorder %s779_s13, %s1076_s3 }
 0x192   :  { %p785_p7 = pnand %p783_p6, %p780_p5 }
 0x194   :  { %788 = shalt.err (!%p785_p7)
}
 0x195   :  { %s792_s18 = smov 256   ;;  %s793_s19 = smov 16  }
 0x196   :  { %591 = dma.vmem_to_hbm [thread:$0]  %s586_s2, 512, %s1076_s3, [#allocation4], %s792_s18, %s792_s18, %s793_s19  }
 0x197   :  { %789 = dma.done.wait [#allocation4], 512  }
 0x198   :  { %790 = vsyncadd [#allocation4], 4294966784 }
 0x199   :  { %595 = vsyncpa [#allocation4], 1 }

// kernel: _lambda_.12
= control target key start
LH: loop header
LB: loop body
LE: loop exit
PB: predicated region body
PF: predicated region fallthrough
CT: control target
= control target key end

     0   :  { %10 = vsyncpa [#allocation6], 0  ;;  %s6008_s0 = inlined_call_operand.vmem [shape: bf16[16,512], index: 0, kind: input, shape index: {}]   ;;  %s6009_s1 = inlined_call_operand.vmem [shape: f32[1,512], index: 1, kind: input, shape index: {}]   ;;  %s6010_s2 = inlined_call_operand.vmem [shape: bf16[512,1024], index: 2, kind: input, shape index: {}]   ;;  %s6011_s3 = inlined_call_operand.hbm [shape: bf16[512,1024], index: 3, kind: input, shape index: {}]   ;;  %s6012_s4 = inlined_call_operand.hbm [shape: bf16[1024,512], index: 4, kind: input, shape index: {}]   ;;  %s6013_s5 = inlined_call_operand.vmem [shape: bf16[16,512], index: 5, kind: output, shape index: {}]  }
   0x1   :  { %12 = vsyncpa [#allocation6 + $0x1], 0 }
   0x2   :  { %13 = vsyncpa [#allocation8], 0 }
   0x3   :  { %15 = vsyncpa [#allocation8 + $0x1], 0  ;;  %s5093_s18 = smov 0   ;;  %s5095_s19 = smov 0  }
   0x4   :  { %s5097_s20 = smov 0   ;;  %s5099_s21 = smov 0  }
   0x5   :  { %s5101_s22 = smov 0   ;;  %s5103_s23 = smov 0  }
   0x6 LB: > { %s3825_s24 = sadd.s32 4294967295, %s5055_s23   ;;  %s30_s25 = sadd.s32 1, %s5051_s22  ;;  %s5055_s23 = sphi %s5103_s23, %s21_s23   ;;  %s5051_s22 = sphi %s5101_s22, %s6020_s22   ;;  %s5047_s21 = sphi %s5099_s21, %s6019_s21   ;;  %s5043_s20 = sphi %s5097_s20, %s6018_s20   ;;  %s5039_s19 = sphi %s5095_s19, %s6017_s19   ;;  %s5035_s18 = sphi %s5093_s18, %s6016_s18  }
   0x7   : > { %p31_p0 = scmp.ge.s32.totalorder %s30_s25, 2  ;;  %s87_s26 = sadd.s32 1, %s5043_s20 }
   0x8   : > { %p94_p1 = scmp.ne.s32.totalorder %s5043_s20, %s5039_s19  ;;  %p95_p2 = scmp.eq.s32.totalorder %s5055_s23, 0 }
   0x9   : > { %s6022_s25 = smov (%p31_p0, %s30_s25), 0  ;;  %p126_p4 = scmp.ne.s32.totalorder %s5039_s19, %s5035_s18 }
   0xa   : > { %p5129_p3 = por %p95_p2, %p94_p1  ;;  %s84_s28 = ssub.s32 %s5051_s22, %s6022_s25 }
   0xb   : > { %p127_p5 = scmp.eq.s32.totalorder %s3825_s24, 0  ;;  %p85_p6 = scmp.eq.s32.totalorder %s84_s28, 0 }
   0xc   : > { %p3828_p8 = scmp.ge.s32.totalorder %s5055_s23, 2 }
   0xd   : > { %p5136_p7 = por %p127_p5, %p126_p4 }
   0xe   : > { %s5141_s30 = scalar_select %p85_p6, %s5043_s20, %s87_s26  }
   0xf   : > { %211 = sbr.rel (%p3828_p8) target bundleno = 141 (0x8d), region = 24 }
  0x16   : > { %214 = sbr.rel (!%p5129_p3) target bundleno = 90 (0x5a), region = 28  ;;  %s216_s6 = sand.u32 (%p5129_p3), 1, %s5043_s20  }
  0x17   : > { %s4245_s7 = sshll.u32 (%p5129_p3), %s5051_s22, 4  ;;  %s3829_s8 = sshll.u32 (%p5129_p3), %s216_s6, 10 }
  0x18   : > { %s5151_s11 = scalar_lea.vmem (%p5129_p3), %s6010_s2, %s4245_s7  ;;  %s5156_s12 = scalar_lea.vmem (%p5129_p3), [#allocation4], %s3829_s8 }
  0x19   : > { %v234_v0 = vld [vmem:[%s5151_s11] sm:$0xff] (%p5129_p3)  ;;  %v236_v1 = vld [vmem:[%s5151_s11 + $0x8] sm:$0xff] (%p5129_p3) }
  0x1a   : > { %v238_v2 = vld [vmem:[%s5151_s11 + $0x20] sm:$0xff] (%p5129_p3)  ;;  %235 = vst [vmem:[%s5156_s12] sm:$0xff] (%p5129_p3), %v234_v0  ;;  %237 = vst [vmem:[%s5156_s12 + $0x8] sm:$0xff] (%p5129_p3), %v236_v1  ;;  %v240_v3 = vld [vmem:[%s5151_s11 + $0x28] sm:$0xff] (%p5129_p3) }
  0x1b   : > { %239 = vst [vmem:[%s5156_s12 + $0x10] sm:$0xff] (%p5129_p3), %v238_v2  ;;  %v242_v4 = vld [vmem:[%s5151_s11 + $0x40] sm:$0xff] (%p5129_p3)  ;;  %v244_v5 = vld [vmem:[%s5151_s11 + $0x48] sm:$0xff] (%p5129_p3)  ;;  %241 = vst [vmem:[%s5156_s12 + $0x18] sm:$0xff] (%p5129_p3), %v240_v3 }
  0x1c   : > { %243 = vst [vmem:[%s5156_s12 + $0x20] sm:$0xff] (%p5129_p3), %v242_v4  ;;  %245 = vst [vmem:[%s5156_s12 + $0x28] sm:$0xff] (%p5129_p3), %v244_v5  ;;  %v246_v6 = vld [vmem:[%s5151_s11 + $0x60] sm:$0xff] (%p5129_p3)  ;;  %v248_v7 = vld [vmem:[%s5151_s11 + $0x68] sm:$0xff] (%p5129_p3) }
  0x1d   : > { %v250_v8 = vld [vmem:[%s5151_s11 + $0x80] sm:$0xff]  ;;  %247 = vst [vmem:[%s5156_s12 + $0x30] sm:$0xff] %v246_v6  ;;  %249 = vst [vmem:[%s5156_s12 + $0x38] sm:$0xff] %v248_v7  ;;  %v252_v9 = vld [vmem:[%s5151_s11 + $0x88] sm:$0xff] }
  0x1e   : > { %251 = vst [vmem:[%s5156_s12 + $0x40] sm:$0xff] %v250_v8  ;;  %v254_v10 = vld [vmem:[%s5151_s11 + $0xa0] sm:$0xff]  ;;  %v256_v11 = vld [vmem:[%s5151_s11 + $0xa8] sm:$0xff]  ;;  %253 = vst [vmem:[%s5156_s12 + $0x48] sm:$0xff] %v252_v9 }
  0x1f   : > { %255 = vst [vmem:[%s5156_s12 + $0x50] sm:$0xff] %v254_v10  ;;  %257 = vst [vmem:[%s5156_s12 + $0x58] sm:$0xff] %v256_v11  ;;  %v258_v12 = vld [vmem:[%s5151_s11 + $0xc0] sm:$0xff]  ;;  %v260_v13 = vld [vmem:[%s5151_s11 + $0xc8] sm:$0xff] }
  0x20   : > { %v262_v14 = vld [vmem:[%s5151_s11 + $0xe0] sm:$0xff]  ;;  %259 = vst [vmem:[%s5156_s12 + $0x60] sm:$0xff] %v258_v12  ;;  %261 = vst [vmem:[%s5156_s12 + $0x68] sm:$0xff] %v260_v13  ;;  %v264_v15 = vld [vmem:[%s5151_s11 + $0xe8] sm:$0xff] }
  0x21   : > { %263 = vst [vmem:[%s5156_s12 + $0x70] sm:$0xff] %v262_v14  ;;  %v266_v16 = vld [vmem:[%s5151_s11 + $0x100] sm:$0xff]  ;;  %v268_v17 = vld [vmem:[%s5151_s11 + $0x108] sm:$0xff]  ;;  %265 = vst [vmem:[%s5156_s12 + $0x78] sm:$0xff] %v264_v15 }
  0x22   : > { %267 = vst [vmem:[%s5156_s12 + $0x80] sm:$0xff] %v266_v16  ;;  %269 = vst [vmem:[%s5156_s12 + $0x88] sm:$0xff] %v268_v17  ;;  %v270_v18 = vld [vmem:[%s5151_s11 + $0x120] sm:$0xff]  ;;  %v272_v19 = vld [vmem:[%s5151_s11 + $0x128] sm:$0xff] }
  0x23   : > { %v274_v20 = vld [vmem:[%s5151_s11 + $0x140] sm:$0xff]  ;;  %271 = vst [vmem:[%s5156_s12 + $0x90] sm:$0xff] %v270_v18  ;;  %273 = vst [vmem:[%s5156_s12 + $0x98] sm:$0xff] %v272_v19  ;;  %v276_v21 = vld [vmem:[%s5151_s11 + $0x148] sm:$0xff] }
  0x24   : > { %275 = vst [vmem:[%s5156_s12 + $0xa0] sm:$0xff] %v274_v20  ;;  %v278_v22 = vld [vmem:[%s5151_s11 + $0x160] sm:$0xff]  ;;  %v280_v23 = vld [vmem:[%s5151_s11 + $0x168] sm:$0xff]  ;;  %277 = vst [vmem:[%s5156_s12 + $0xa8] sm:$0xff] %v276_v21 }
  0x25   : > { %279 = vst [vmem:[%s5156_s12 + $0xb0] sm:$0xff] %v278_v22  ;;  %281 = vst [vmem:[%s5156_s12 + $0xb8] sm:$0xff] %v280_v23  ;;  %v282_v24 = vld [vmem:[%s5151_s11 + $0x180] sm:$0xff]  ;;  %v284_v25 = vld [vmem:[%s5151_s11 + $0x188] sm:$0xff] }
  0x26   : > { %v286_v26 = vld [vmem:[%s5151_s11 + $0x1a0] sm:$0xff]  ;;  %283 = vst [vmem:[%s5156_s12 + $0xc0] sm:$0xff] %v282_v24  ;;  %285 = vst [vmem:[%s5156_s12 + $0xc8] sm:$0xff] %v284_v25  ;;  %v288_v27 = vld [vmem:[%s5151_s11 + $0x1a8] sm:$0xff] }
  0x27   : > { %287 = vst [vmem:[%s5156_s12 + $0xd0] sm:$0xff] %v286_v26  ;;  %v290_v28 = vld [vmem:[%s5151_s11 + $0x1c0] sm:$0xff]  ;;  %v292_v29 = vld [vmem:[%s5151_s11 + $0x1c8] sm:$0xff]  ;;  %289 = vst [vmem:[%s5156_s12 + $0xd8] sm:$0xff] %v288_v27 }
  0x28   : > { %291 = vst [vmem:[%s5156_s12 + $0xe0] sm:$0xff] %v290_v28  ;;  %293 = vst [vmem:[%s5156_s12 + $0xe8] sm:$0xff] %v292_v29  ;;  %v294_v30 = vld [vmem:[%s5151_s11 + $0x1e0] sm:$0xff]  ;;  %v296_v31 = vld [vmem:[%s5151_s11 + $0x1e8] sm:$0xff] }
  0x29   : > { %v298_v32 = vld [vmem:[%s5151_s11 + $0x200] sm:$0xff]  ;;  %295 = vst [vmem:[%s5156_s12 + $0xf0] sm:$0xff] %v294_v30  ;;  %297 = vst [vmem:[%s5156_s12 + $0xf8] sm:$0xff] %v296_v31  ;;  %v300_v33 = vld [vmem:[%s5151_s11 + $0x208] sm:$0xff] }
  0x2a   : > { %299 = vst [vmem:[%s5156_s12 + $0x100] sm:$0xff] %v298_v32  ;;  %v302_v34 = vld [vmem:[%s5151_s11 + $0x220] sm:$0xff]  ;;  %v304_v35 = vld [vmem:[%s5151_s11 + $0x228] sm:$0xff]  ;;  %301 = vst [vmem:[%s5156_s12 + $0x108] sm:$0xff] %v300_v33 }
  0x2b   : > { %303 = vst [vmem:[%s5156_s12 + $0x110] sm:$0xff] %v302_v34  ;;  %305 = vst [vmem:[%s5156_s12 + $0x118] sm:$0xff] %v304_v35  ;;  %v306_v36 = vld [vmem:[%s5151_s11 + $0x240] sm:$0xff]  ;;  %v308_v37 = vld [vmem:[%s5151_s11 + $0x248] sm:$0xff] }
  0x2c   : > { %v310_v38 = vld [vmem:[%s5151_s11 + $0x260] sm:$0xff]  ;;  %307 = vst [vmem:[%s5156_s12 + $0x120] sm:$0xff] %v306_v36  ;;  %309 = vst [vmem:[%s5156_s12 + $0x128] sm:$0xff] %v308_v37  ;;  %v312_v39 = vld [vmem:[%s5151_s11 + $0x268] sm:$0xff] }
  0x2d   : > { %311 = vst [vmem:[%s5156_s12 + $0x130] sm:$0xff] %v310_v38  ;;  %v314_v40 = vld [vmem:[%s5151_s11 + $0x280] sm:$0xff]  ;;  %v316_v41 = vld [vmem:[%s5151_s11 + $0x288] sm:$0xff]  ;;  %313 = vst [vmem:[%s5156_s12 + $0x138] sm:$0xff] %v312_v39 }
  0x2e   : > { %315 = vst [vmem:[%s5156_s12 + $0x140] sm:$0xff] %v314_v40  ;;  %317 = vst [vmem:[%s5156_s12 + $0x148] sm:$0xff] %v316_v41  ;;  %v318_v42 = vld [vmem:[%s5151_s11 + $0x2a0] sm:$0xff]  ;;  %v320_v43 = vld [vmem:[%s5151_s11 + $0x2a8] sm:$0xff] }
  0x2f   : > { %v322_v44 = vld [vmem:[%s5151_s11 + $0x2c0] sm:$0xff]  ;;  %319 = vst [vmem:[%s5156_s12 + $0x150] sm:$0xff] %v318_v42  ;;  %321 = vst [vmem:[%s5156_s12 + $0x158] sm:$0xff] %v320_v43  ;;  %v324_v45 = vld [vmem:[%s5151_s11 + $0x2c8] sm:$0xff] }
  0x30   : > { %323 = vst [vmem:[%s5156_s12 + $0x160] sm:$0xff] %v322_v44  ;;  %v326_v46 = vld [vmem:[%s5151_s11 + $0x2e0] sm:$0xff]  ;;  %v328_v47 = vld [vmem:[%s5151_s11 + $0x2e8] sm:$0xff]  ;;  %325 = vst [vmem:[%s5156_s12 + $0x168] sm:$0xff] %v324_v45 }
  0x31   : > { %327 = vst [vmem:[%s5156_s12 + $0x170] sm:$0xff] %v326_v46  ;;  %329 = vst [vmem:[%s5156_s12 + $0x178] sm:$0xff] %v328_v47  ;;  %v330_v48 = vld [vmem:[%s5151_s11 + $0x300] sm:$0xff]  ;;  %v332_v49 = vld [vmem:[%s5151_s11 + $0x308] sm:$0xff] }
  0x32   : > { %v334_v50 = vld [vmem:[%s5151_s11 + $0x320] sm:$0xff]  ;;  %331 = vst [vmem:[%s5156_s12 + $0x180] sm:$0xff] %v330_v48  ;;  %333 = vst [vmem:[%s5156_s12 + $0x188] sm:$0xff] %v332_v49  ;;  %v336_v51 = vld [vmem:[%s5151_s11 + $0x328] sm:$0xff] }
  0x33   : > { %335 = vst [vmem:[%s5156_s12 + $0x190] sm:$0xff] %v334_v50  ;;  %v338_v52 = vld [vmem:[%s5151_s11 + $0x340] sm:$0xff]  ;;  %v340_v53 = vld [vmem:[%s5151_s11 + $0x348] sm:$0xff]  ;;  %337 = vst [vmem:[%s5156_s12 + $0x198] sm:$0xff] %v336_v51 }
  0x34   : > { %339 = vst [vmem:[%s5156_s12 + $0x1a0] sm:$0xff] %v338_v52  ;;  %341 = vst [vmem:[%s5156_s12 + $0x1a8] sm:$0xff] %v340_v53  ;;  %v342_v54 = vld [vmem:[%s5151_s11 + $0x360] sm:$0xff]  ;;  %v344_v55 = vld [vmem:[%s5151_s11 + $0x368] sm:$0xff] }
  0x35   : > { %v346_v56 = vld [vmem:[%s5151_s11 + $0x380] sm:$0xff]  ;;  %343 = vst [vmem:[%s5156_s12 + $0x1b0] sm:$0xff] %v342_v54  ;;  %345 = vst [vmem:[%s5156_s12 + $0x1b8] sm:$0xff] %v344_v55  ;;  %v348_v57 = vld [vmem:[%s5151_s11 + $0x388] sm:$0xff] }
  0x36   : > { %347 = vst [vmem:[%s5156_s12 + $0x1c0] sm:$0xff] %v346_v56  ;;  %v350_v58 = vld [vmem:[%s5151_s11 + $0x3a0] sm:$0xff]  ;;  %v352_v59 = vld [vmem:[%s5151_s11 + $0x3a8] sm:$0xff]  ;;  %349 = vst [vmem:[%s5156_s12 + $0x1c8] sm:$0xff] %v348_v57 }
  0x37   : > { %351 = vst [vmem:[%s5156_s12 + $0x1d0] sm:$0xff] %v350_v58  ;;  %353 = vst [vmem:[%s5156_s12 + $0x1d8] sm:$0xff] %v352_v59  ;;  %v354_v60 = vld [vmem:[%s5151_s11 + $0x3c0] sm:$0xff]  ;;  %v356_v61 = vld [vmem:[%s5151_s11 + $0x3c8] sm:$0xff] }
  0x38   : > { %v358_v62 = vld [vmem:[%s5151_s11 + $0x3e0] sm:$0xff]  ;;  %355 = vst [vmem:[%s5156_s12 + $0x1e0] sm:$0xff] %v354_v60  ;;  %357 = vst [vmem:[%s5156_s12 + $0x1e8] sm:$0xff] %v356_v61  ;;  %v360_v63 = vld [vmem:[%s5151_s11 + $0x3e8] sm:$0xff] }
  0x39   : > { %359 = vst [vmem:[%s5156_s12 + $0x1f0] sm:$0xff] %v358_v62  ;;  %v362_v0 = vld [vmem:[%s5151_s11 + $0x400] sm:$0xff]  ;;  %v364_v1 = vld [vmem:[%s5151_s11 + $0x408] sm:$0xff]  ;;  %361 = vst [vmem:[%s5156_s12 + $0x1f8] sm:$0xff] %v360_v63 }
  0x3a   : > { %363 = vst [vmem:[%s5156_s12 + $0x200] sm:$0xff] %v362_v0  ;;  %365 = vst [vmem:[%s5156_s12 + $0x208] sm:$0xff] %v364_v1  ;;  %v366_v2 = vld [vmem:[%s5151_s11 + $0x420] sm:$0xff]  ;;  %v368_v3 = vld [vmem:[%s5151_s11 + $0x428] sm:$0xff] }
  0x3b   : > { %v370_v4 = vld [vmem:[%s5151_s11 + $0x440] sm:$0xff]  ;;  %367 = vst [vmem:[%s5156_s12 + $0x210] sm:$0xff] %v366_v2  ;;  %369 = vst [vmem:[%s5156_s12 + $0x218] sm:$0xff] %v368_v3  ;;  %v372_v5 = vld [vmem:[%s5151_s11 + $0x448] sm:$0xff] }
  0x3c   : > { %371 = vst [vmem:[%s5156_s12 + $0x220] sm:$0xff] %v370_v4  ;;  %v374_v6 = vld [vmem:[%s5151_s11 + $0x460] sm:$0xff]  ;;  %v376_v7 = vld [vmem:[%s5151_s11 + $0x468] sm:$0xff]  ;;  %373 = vst [vmem:[%s5156_s12 + $0x228] sm:$0xff] %v372_v5 }
  0x3d   : > { %375 = vst [vmem:[%s5156_s12 + $0x230] sm:$0xff] %v374_v6  ;;  %377 = vst [vmem:[%s5156_s12 + $0x238] sm:$0xff] %v376_v7  ;;  %v378_v8 = vld [vmem:[%s5151_s11 + $0x480] sm:$0xff]  ;;  %v380_v9 = vld [vmem:[%s5151_s11 + $0x488] sm:$0xff] }
  0x3e   : > { %v382_v10 = vld [vmem:[%s5151_s11 + $0x4a0] sm:$0xff]  ;;  %379 = vst [vmem:[%s5156_s12 + $0x240] sm:$0xff] %v378_v8  ;;  %381 = vst [vmem:[%s5156_s12 + $0x248] sm:$0xff] %v380_v9  ;;  %v384_v11 = vld [vmem:[%s5151_s11 + $0x4a8] sm:$0xff] }
  0x3f   : > { %383 = vst [vmem:[%s5156_s12 + $0x250] sm:$0xff] %v382_v10  ;;  %v386_v12 = vld [vmem:[%s5151_s11 + $0x4c0] sm:$0xff]  ;;  %v388_v13 = vld [vmem:[%s5151_s11 + $0x4c8] sm:$0xff]  ;;  %385 = vst [vmem:[%s5156_s12 + $0x258] sm:$0xff] %v384_v11 }
  0x40   : > { %387 = vst [vmem:[%s5156_s12 + $0x260] sm:$0xff] %v386_v12  ;;  %389 = vst [vmem:[%s5156_s12 + $0x268] sm:$0xff] %v388_v13  ;;  %v390_v14 = vld [vmem:[%s5151_s11 + $0x4e0] sm:$0xff]  ;;  %v392_v15 = vld [vmem:[%s5151_s11 + $0x4e8] sm:$0xff] }
  0x41   : > { %v394_v16 = vld [vmem:[%s5151_s11 + $0x500] sm:$0xff]  ;;  %391 = vst [vmem:[%s5156_s12 + $0x270] sm:$0xff] %v390_v14  ;;  %393 = vst [vmem:[%s5156_s12 + $0x278] sm:$0xff] %v392_v15  ;;  %v396_v17 = vld [vmem:[%s5151_s11 + $0x508] sm:$0xff] }
  0x42   : > { %395 = vst [vmem:[%s5156_s12 + $0x280] sm:$0xff] %v394_v16  ;;  %v398_v18 = vld [vmem:[%s5151_s11 + $0x520] sm:$0xff]  ;;  %v400_v19 = vld [vmem:[%s5151_s11 + $0x528] sm:$0xff]  ;;  %397 = vst [vmem:[%s5156_s12 + $0x288] sm:$0xff] %v396_v17 }
  0x43   : > { %399 = vst [vmem:[%s5156_s12 + $0x290] sm:$0xff] %v398_v18  ;;  %401 = vst [vmem:[%s5156_s12 + $0x298] sm:$0xff] %v400_v19  ;;  %v402_v20 = vld [vmem:[%s5151_s11 + $0x540] sm:$0xff]  ;;  %v404_v21 = vld [vmem:[%s5151_s11 + $0x548] sm:$0xff] }
  0x44   : > { %v406_v22 = vld [vmem:[%s5151_s11 + $0x560] sm:$0xff]  ;;  %403 = vst [vmem:[%s5156_s12 + $0x2a0] sm:$0xff] %v402_v20  ;;  %405 = vst [vmem:[%s5156_s12 + $0x2a8] sm:$0xff] %v404_v21  ;;  %v408_v23 = vld [vmem:[%s5151_s11 + $0x568] sm:$0xff] }
  0x45   : > { %407 = vst [vmem:[%s5156_s12 + $0x2b0] sm:$0xff] %v406_v22  ;;  %v410_v24 = vld [vmem:[%s5151_s11 + $0x580] sm:$0xff]  ;;  %v412_v25 = vld [vmem:[%s5151_s11 + $0x588] sm:$0xff]  ;;  %409 = vst [vmem:[%s5156_s12 + $0x2b8] sm:$0xff] %v408_v23 }
  0x46   : > { %411 = vst [vmem:[%s5156_s12 + $0x2c0] sm:$0xff] %v410_v24  ;;  %413 = vst [vmem:[%s5156_s12 + $0x2c8] sm:$0xff] %v412_v25  ;;  %v414_v26 = vld [vmem:[%s5151_s11 + $0x5a0] sm:$0xff]  ;;  %v416_v27 = vld [vmem:[%s5151_s11 + $0x5a8] sm:$0xff] }
  0x47   : > { %v418_v28 = vld [vmem:[%s5151_s11 + $0x5c0] sm:$0xff]  ;;  %415 = vst [vmem:[%s5156_s12 + $0x2d0] sm:$0xff] %v414_v26  ;;  %417 = vst [vmem:[%s5156_s12 + $0x2d8] sm:$0xff] %v416_v27  ;;  %v420_v29 = vld [vmem:[%s5151_s11 + $0x5c8] sm:$0xff] }
  0x48   : > { %419 = vst [vmem:[%s5156_s12 + $0x2e0] sm:$0xff] %v418_v28  ;;  %v422_v30 = vld [vmem:[%s5151_s11 + $0x5e0] sm:$0xff]  ;;  %v424_v31 = vld [vmem:[%s5151_s11 + $0x5e8] sm:$0xff]  ;;  %421 = vst [vmem:[%s5156_s12 + $0x2e8] sm:$0xff] %v420_v29 }
  0x49   : > { %423 = vst [vmem:[%s5156_s12 + $0x2f0] sm:$0xff] %v422_v30  ;;  %425 = vst [vmem:[%s5156_s12 + $0x2f8] sm:$0xff] %v424_v31  ;;  %v426_v32 = vld [vmem:[%s5151_s11 + $0x600] sm:$0xff]  ;;  %v428_v33 = vld [vmem:[%s5151_s11 + $0x608] sm:$0xff] }
  0x4a   : > { %v430_v34 = vld [vmem:[%s5151_s11 + $0x620] sm:$0xff]  ;;  %427 = vst [vmem:[%s5156_s12 + $0x300] sm:$0xff] %v426_v32  ;;  %429 = vst [vmem:[%s5156_s12 + $0x308] sm:$0xff] %v428_v33  ;;  %v432_v35 = vld [vmem:[%s5151_s11 + $0x628] sm:$0xff] }
  0x4b   : > { %431 = vst [vmem:[%s5156_s12 + $0x310] sm:$0xff] %v430_v34  ;;  %v434_v36 = vld [vmem:[%s5151_s11 + $0x640] sm:$0xff]  ;;  %v436_v37 = vld [vmem:[%s5151_s11 + $0x648] sm:$0xff]  ;;  %433 = vst [vmem:[%s5156_s12 + $0x318] sm:$0xff] %v432_v35 }
  0x4c   : > { %435 = vst [vmem:[%s5156_s12 + $0x320] sm:$0xff] %v434_v36  ;;  %437 = vst [vmem:[%s5156_s12 + $0x328] sm:$0xff] %v436_v37  ;;  %v438_v38 = vld [vmem:[%s5151_s11 + $0x660] sm:$0xff]  ;;  %v440_v39 = vld [vmem:[%s5151_s11 + $0x668] sm:$0xff] }
  0x4d   : > { %v442_v40 = vld [vmem:[%s5151_s11 + $0x680] sm:$0xff]  ;;  %439 = vst [vmem:[%s5156_s12 + $0x330] sm:$0xff] %v438_v38  ;;  %441 = vst [vmem:[%s5156_s12 + $0x338] sm:$0xff] %v440_v39  ;;  %v444_v41 = vld [vmem:[%s5151_s11 + $0x688] sm:$0xff] }
  0x4e   : > { %443 = vst [vmem:[%s5156_s12 + $0x340] sm:$0xff] %v442_v40  ;;  %v446_v42 = vld [vmem:[%s5151_s11 + $0x6a0] sm:$0xff]  ;;  %v448_v43 = vld [vmem:[%s5151_s11 + $0x6a8] sm:$0xff]  ;;  %445 = vst [vmem:[%s5156_s12 + $0x348] sm:$0xff] %v444_v41 }
  0x4f   : > { %447 = vst [vmem:[%s5156_s12 + $0x350] sm:$0xff] %v446_v42  ;;  %449 = vst [vmem:[%s5156_s12 + $0x358] sm:$0xff] %v448_v43  ;;  %v450_v44 = vld [vmem:[%s5151_s11 + $0x6c0] sm:$0xff]  ;;  %v452_v45 = vld [vmem:[%s5151_s11 + $0x6c8] sm:$0xff] }
  0x50   : > { %v454_v46 = vld [vmem:[%s5151_s11 + $0x6e0] sm:$0xff]  ;;  %451 = vst [vmem:[%s5156_s12 + $0x360] sm:$0xff] %v450_v44  ;;  %453 = vst [vmem:[%s5156_s12 + $0x368] sm:$0xff] %v452_v45  ;;  %v456_v47 = vld [vmem:[%s5151_s11 + $0x6e8] sm:$0xff] }
  0x51   : > { %455 = vst [vmem:[%s5156_s12 + $0x370] sm:$0xff] %v454_v46  ;;  %v458_v48 = vld [vmem:[%s5151_s11 + $0x700] sm:$0xff]  ;;  %v460_v49 = vld [vmem:[%s5151_s11 + $0x708] sm:$0xff]  ;;  %457 = vst [vmem:[%s5156_s12 + $0x378] sm:$0xff] %v456_v47 }
  0x52   : > { %459 = vst [vmem:[%s5156_s12 + $0x380] sm:$0xff] %v458_v48  ;;  %461 = vst [vmem:[%s5156_s12 + $0x388] sm:$0xff] %v460_v49  ;;  %v462_v50 = vld [vmem:[%s5151_s11 + $0x720] sm:$0xff]  ;;  %v464_v51 = vld [vmem:[%s5151_s11 + $0x728] sm:$0xff] }
  0x53   : > { %v466_v52 = vld [vmem:[%s5151_s11 + $0x740] sm:$0xff]  ;;  %463 = vst [vmem:[%s5156_s12 + $0x390] sm:$0xff] %v462_v50  ;;  %465 = vst [vmem:[%s5156_s12 + $0x398] sm:$0xff] %v464_v51  ;;  %v468_v53 = vld [vmem:[%s5151_s11 + $0x748] sm:$0xff] }
  0x54   : > { %467 = vst [vmem:[%s5156_s12 + $0x3a0] sm:$0xff] %v466_v52  ;;  %v470_v54 = vld [vmem:[%s5151_s11 + $0x760] sm:$0xff]  ;;  %v472_v55 = vld [vmem:[%s5151_s11 + $0x768] sm:$0xff]  ;;  %469 = vst [vmem:[%s5156_s12 + $0x3a8] sm:$0xff] %v468_v53 }
  0x55   : > { %471 = vst [vmem:[%s5156_s12 + $0x3b0] sm:$0xff] %v470_v54  ;;  %473 = vst [vmem:[%s5156_s12 + $0x3b8] sm:$0xff] %v472_v55  ;;  %v474_v56 = vld [vmem:[%s5151_s11 + $0x780] sm:$0xff]  ;;  %v476_v57 = vld [vmem:[%s5151_s11 + $0x788] sm:$0xff] }
  0x56   : > { %v478_v58 = vld [vmem:[%s5151_s11 + $0x7a0] sm:$0xff]  ;;  %475 = vst [vmem:[%s5156_s12 + $0x3c0] sm:$0xff] %v474_v56  ;;  %477 = vst [vmem:[%s5156_s12 + $0x3c8] sm:$0xff] %v476_v57  ;;  %v480_v59 = vld [vmem:[%s5151_s11 + $0x7a8] sm:$0xff] }
  0x57   : > { %479 = vst [vmem:[%s5156_s12 + $0x3d0] sm:$0xff] %v478_v58  ;;  %v482_v60 = vld [vmem:[%s5151_s11 + $0x7c0] sm:$0xff]  ;;  %v484_v61 = vld [vmem:[%s5151_s11 + $0x7c8] sm:$0xff]  ;;  %481 = vst [vmem:[%s5156_s12 + $0x3d8] sm:$0xff] %v480_v59 }
  0x58   : > { %483 = vst [vmem:[%s5156_s12 + $0x3e0] sm:$0xff] %v482_v60  ;;  %485 = vst [vmem:[%s5156_s12 + $0x3e8] sm:$0xff] %v484_v61  ;;  %v486_v62 = vld [vmem:[%s5151_s11 + $0x7e0] sm:$0xff]  ;;  %v488_v63 = vld [vmem:[%s5151_s11 + $0x7e8] sm:$0xff] }
  0x59   : > { %487 = vst [vmem:[%s5156_s12 + $0x3f0] sm:$0xff] %v486_v62  ;;  %489 = vst [vmem:[%s5156_s12 + $0x3f8] sm:$0xff] %v488_v63 }
  0x5a PF: > { %s5412_s13 = sand.u32 1, %s5043_s20   ;;  %s4246_s14 = sshll.u32 %s5051_s22, 8 }
  0x5b   : > { %s3832_s15 = sshll.u32 %s5412_s13, 10  ;;  %s5419_s18 = scalar_lea.hbm %s6011_s3, %s4246_s14 }
  0x5c   : > { %s500_s24 = scalar_lea.vmem [#allocation5], %s3832_s15  ;;  %s497_s28 = scalar_lea.sflag [#allocation6], %s5412_s13 }
  0x5d   : > { %s507_s26 = sshll.u32 %s500_s24, 4  ;;  %s4945_s6 = scalar_lea.hbm %s5419_s18, 16384  ;;  %s5423_s26 = int_to_ptr.vmem [resolvable:$true] %s507_s26 }
  0x5e   : > { %p4946_p9 = scmp.ne.s32.totalorder %s5419_s18, %s4945_s6  ;;  %s4949_s9 = scalar_lea.hbm %s6011_s3, 32768 }
  0x5f   : > { %p4950_p12 = scmp.lt.u32.totalorder %s5419_s18, %s6011_s3  ;;  %p4951_p13 = scmp.lt.u32.totalorder %s4949_s9, %s4945_s6 }
  0x60   : > { %p4947_p10 = pnand %p4946_p9, %p5129_p3  ;;  %p4953_p1 = scmp.lt.u32.totalorder %s4945_s6, %s5419_s18 }
  0x61   : > { %p4952_p0 = por %p4951_p13, %p4950_p12 }
  0x62   : > { %p4948_p11 = pneg %p4947_p10 }
  0x63   : > { %p4954_p2 = por %p4953_p1, %p4952_p0 }
  0x65   : > { %p4955_p4 = pnand %p4954_p2, %p4948_p11 }
  0x67   : > { %4958 = shalt.err (!%p4955_p4)
}
  0x68   : > { %s4959_s12 = scalar_lea.vmem %s5423_s26, 16384  ;;  %s5057_s14 = smov [#allocation5]  }
  0x69   : > { %p4960_p5 = scmp.ne.s32.totalorder %s5423_s26, %s4959_s12  ;;  %s4963_s16 = sshll.u32 %s5057_s14, 4  ;;  %s4964_s16 = int_to_ptr.vmem [resolvable:$false] %s4963_s16 }
  0x6a   : > { %s4965_s17 = scalar_lea.vmem %s4964_s16, 32768  ;;  %p4966_p9 = scmp.lt.s32.totalorder %s5423_s26, %s4964_s16 }
  0x6b   : > { %p4961_p6 = pnand %p4960_p5, %p5129_p3  ;;  %p4967_p10 = scmp.lt.s32.totalorder %s4965_s17, %s4959_s12 }
  0x6d   : > { %p4962_p8 = pneg %p4961_p6  ;;  %p4968_p12 = por %p4967_p10, %p4966_p9 }
  0x6f   : > { %p4969_p13 = pnand %p4968_p12, %p4962_p8 }
  0x71   : > { %4972 = shalt.err (!%p4969_p13)
}
  0x72   : > { %s5058_s24 = smov 512   ;;  %s5059_s6 = smov 256  }
  0x73   : > { %s5060_s7 = smov 16   ;;  %s4248_s8 = sshll.u32 %s5051_s22, 14 }
  0x74   : > { %4277 = dma.hbm_to_vmem [thread:$0]  (%p5129_p3), %s5419_s18, 16384, %s5423_s26, %s497_s28, %s5058_s24, %s5059_s6, %s5060_s7  }
  0x75   : > { %s5455_s11 = scalar_lea.hbm %s6012_s4, %s4248_s8  ;;  %s521_s12 = scalar_lea.vmem [#allocation7], %s3832_s15 }
  0x76   : > { %s529_s14 = sshll.u32 %s521_s12, 4  ;;  %s518_s16 = scalar_lea.sflag [#allocation8], %s5412_s13  ;;  %s5459_s14 = int_to_ptr.vmem [resolvable:$true] %s529_s14 }
  0x77   : > { %s4973_s17 = scalar_lea.hbm %s5455_s11, 16384  ;;  %s4977_s28 = scalar_lea.hbm %s6012_s4, 32768 }
  0x78   : > { %p4974_p11 = scmp.ne.s32.totalorder %s5455_s11, %s4973_s17  ;;  %p4978_p2 = scmp.lt.u32.totalorder %s5455_s11, %s6012_s4 }
  0x79   : > { %p4979_p4 = scmp.lt.u32.totalorder %s4977_s28, %s4973_s17  ;;  %p4981_p6 = scmp.lt.u32.totalorder %s4973_s17, %s5455_s11 }
  0x7a   : > { %p4975_p0 = pnand %p4974_p11, %p5129_p3 }
  0x7b   : > { %p4980_p5 = por %p4979_p4, %p4978_p2 }
  0x7c   : > { %p4976_p1 = pneg %p4975_p0 }
  0x7d   : > { %p4982_p8 = por %p4981_p6, %p4980_p5 }
  0x7f   : > { %p4983_p9 = pnand %p4982_p8, %p4976_p1 }
  0x81   : > { %4986 = shalt.err (!%p4983_p9)
}
  0x82   : > { %s4987_s15 = scalar_lea.vmem %s5459_s14, 16384  ;;  %s5061_s9 = smov [#allocation7]  }
  0x83   : > { %p4988_p10 = scmp.ne.s32.totalorder %s5459_s14, %s4987_s15  ;;  %s4991_s10 = sshll.u32 %s5061_s9, 4  ;;  %s4992_s10 = int_to_ptr.vmem [resolvable:$false] %s4991_s10 }
  0x84   : > { %s4993_s12 = scalar_lea.vmem %s4992_s10, 32768  ;;  %p4994_p11 = scmp.lt.s32.totalorder %s5459_s14, %s4992_s10 }
  0x85   : > { %p4989_p12 = pnand %p4988_p10, %p5129_p3  ;;  %p4995_p0 = scmp.lt.s32.totalorder %s4993_s12, %s4987_s15 }
  0x87   : > { %p4990_p13 = pneg %p4989_p12  ;;  %p4996_p2 = por %p4995_p0, %p4994_p11 }
  0x89   : > { %p4997_p4 = pnand %p4996_p2, %p4990_p13 }
  0x8b   : > { %5000 = shalt.err (!%p4997_p4)
}
  0x8c   : > { %4278 = dma.hbm_to_vmem [thread:$0]  (%p5129_p3), %s5455_s11, 16384, %s5459_s14, %s518_s16, %s5059_s6, %s5059_s6, %s5060_s7  }
  0x8d PF: > { %p3839_p1 = scmp.ge.s32.totalorder %s5055_s23, 1  ;;  %p537_p5 = scmp.lt.s32.totalorder %s5055_s23, 3 }
  0x8f   : > { %p538_p6 = pnand %p3839_p1, %p537_p5 }
  0x90   : > { %s544_s17 = sand.u32 (!%p538_p6), 1, %s5039_s19  }
  0x91   : > { %541 = sbr.rel (%p538_p6) target bundleno = 1107 (0x453), region = 59  ;;  %s3840_s18 = sshll.u32 (!%p538_p6), %s544_s17, 10 }
  0x92   : > { %s5491_s27 = scalar_lea.vmem (!%p538_p6), [#allocation4], %s3840_s18  ;;  %s551_s26 = scalar_lea.sflag (!%p538_p6), [#allocation6], %s544_s17 }
  0x93   : > { %s5493_s28 = scalar_lea.vmem (!%p538_p6), [#allocation5], %s3840_s18 }
  0x98   : > { %5026 = dma.done.wait (%p5136_p7), %s551_s26, 16384  }
  0x99   : > { %5028 = vsyncadd (%p5136_p7), %s551_s26, 4294950912  ;;  %s560_s13 = scalar_lea.sflag [#allocation8], %s544_s17  ;;  %s5499_s6 = scalar_lea.vmem [#allocation7], %s3840_s18 }
  0x9a   : > { %5030 = dma.done.wait (%p5136_p7), %s560_s13, 16384  }
  0x9b   : > { %5032 = vsyncadd (%p5136_p7), %s560_s13, 4294950912  ;;  %p3843_p3 = scmp.ne.s32.totalorder %s5047_s21, 0 }
  0x9c   : > { %v627_v0 = vld [vmem:[%s6008_s0] sm:$0xff] (!%p3843_p3)  ;;  %v628_v1 = vld [vmem:[%s6008_s0 + $0x8] sm:$0xff] (!%p3843_p3)  ;;  %v629_v2 = vld [vmem:[%s6008_s0 + $0x10] sm:$0xff] (!%p3843_p3)  ;;  %v5062_v26 = vmov (!%p3843_p3), 0.0   ;;  %v674_v30 = vlaneseq (!%p3843_p3) }
  0x9d   : > { %626 = sbr.rel (%p3843_p3) target bundleno = 336 (0x150), region = 75  ;;  %v631_v3 = vunpack.c.l.bf16 (!%p3843_p3), %v627_v0  ;;  %v632_v4 = vunpack.c.h.bf16 (!%p3843_p3), %v627_v0  ;;  %v633_v5 = vunpack.c.l.bf16 (!%p3843_p3), %v628_v1  ;;  %v634_v6 = vunpack.c.h.bf16 (!%p3843_p3), %v628_v1  ;;  %v630_v7 = vld [vmem:[%s6008_s0 + $0x18] sm:$0xff] (!%p3843_p3)  ;;  %710 = vst [vmem:[#allocation3] sm:$0xff] (!%p3843_p3), %v5062_v26  ;;  %711 = vst [vmem:[#allocation3 + $0x8] sm:$0xff] (!%p3843_p3), %v5062_v26  ;;  %v672_v39 = vld [vmem:[%s6009_s1] sm:$0xf] (!%p3843_p3) }
  0x9e   : > { %v635_v8 = vunpack.c.l.bf16 (!%p3843_p3), %v629_v2  ;;  %v636_v9 = vunpack.c.h.bf16 (!%p3843_p3), %v629_v2  ;;  %v637_v10 = vunpack.c.l.bf16 (!%p3843_p3), %v630_v7  ;;  %v638_v14 = vunpack.c.h.bf16 (!%p3843_p3), %v630_v7  ;;  %712 = vst [vmem:[#allocation3 + $0x10] sm:$0xff] (!%p3843_p3), %v5062_v26  ;;  %713 = vst [vmem:[#allocation3 + $0x18] sm:$0xff] (!%p3843_p3), %v5062_v26 }
  0x9f   : > { %v639_v11 = vmul.f32 (!%p3843_p3), %v631_v3, %v631_v3  ;;  %v640_v12 = vmul.f32 (!%p3843_p3), %v632_v4, %v632_v4  ;;  %v641_v13 = vmul.f32 (!%p3843_p3), %v633_v5, %v633_v5  ;;  %v642_v18 = vmul.f32 (!%p3843_p3), %v634_v6, %v634_v6  ;;  %714 = vst [vmem:[#allocation3 + $0x20] sm:$0xff] (!%p3843_p3), %v5062_v26 }
  0xa0   : > { %v643_v15 = vmul.f32 (!%p3843_p3), %v635_v8, %v635_v8  ;;  %v644_v16 = vmul.f32 (!%p3843_p3), %v636_v9, %v636_v9  ;;  %v645_v17 = vmul.f32 (!%p3843_p3), %v637_v10, %v637_v10  ;;  %v646_v22 = vmul.f32 (!%p3843_p3), %v638_v14, %v638_v14  ;;  %715 = vst [vmem:[#allocation3 + $0x28] sm:$0xff] (!%p3843_p3), %v5062_v26 }
  0xa1   : > { %v647_v19 = vadd.f32 (!%p3843_p3), %v640_v12, %v639_v11  ;;  %716 = vst [vmem:[#allocation3 + $0x30] sm:$0xff] (!%p3843_p3), %v5062_v26  ;;  %717 = vst [vmem:[#allocation3 + $0x38] sm:$0xff] (!%p3843_p3), %v5062_v26  ;;  %v675_v34 = vshrl.u32 (!%p3843_p3), %v674_v30, 7 }
  0xa2   : > { %v652_v20 = vadd.f32 (!%p3843_p3), %v644_v16, %v643_v15 }
  0xa3   : > { %v648_v21 = vadd.f32 (!%p3843_p3), %v647_v19, %v641_v13  ;;  %v676_v35 = vsub.s32 (!%p3843_p3), 0, %v675_v34  ;;  %v680_v36 = vsub.s32 (!%p3843_p3), 1, %v675_v34  ;;  %v684_v37 = vsub.s32 (!%p3843_p3), 2, %v675_v34 }
  0xa4   : > { %v653_v23 = vadd.f32 %v652_v20, %v645_v17  ;;  %v688_v38 = vsub.s32 3, %v675_v34 }
  0xa5   : > { %v649_v24 = vadd.f32 %v648_v21, %v642_v18  ;;  %v677_v41 = vrot.slane %v672_v39, %v676_v35  ;;  %v681_v42 = vrot.slane %v672_v39, %v680_v36  ;;  %v685_v43 = vrot.slane %v672_v39, %v684_v37 }
  0xa6   : > { %v654_v25 = vadd.f32 %v653_v23, %v646_v22  ;;  %v689_v44 = vrot.slane %v672_v39, %v688_v38 }
  0xa7   : > { %650 = vadd.xlane.f32.xlu0 %v649_v24 }
  0xab   : > { %655 = vadd.xlane.f32.xlu0 %v654_v25 }
 0x134   : > { %v651_v27 = vpop.xlane.xlu0 %650 }
 0x135   : > { %v658_v28 = vmul.f32 0.001953125, %v651_v27 }
 0x137   : > { %v660_v29 = vadd.f32 1e-06, %v658_v28 }
 0x138   : > { %v656_v31 = vpop.xlane.xlu0 %655 }
 0x139   : > { %4333 = vrsqrt.f32 %v660_v29  ;;  %v659_v32 = vmul.f32 0.001953125, %v656_v31 }
 0x13b   : > { %v661_v33 = vadd.f32 1e-06, %v659_v32 }
 0x13d   : > { %4335 = vrsqrt.f32 %v661_v33 }
 0x143   : > { %v4334_v40 = vpop.eup %4333 }
 0x144   : > { %v664_v45 = vmul.f32 %v4334_v40, %v631_v3  ;;  %v665_v46 = vmul.f32 %v4334_v40, %v632_v4  ;;  %v666_v47 = vmul.f32 %v4334_v40, %v633_v5  ;;  %v667_v48 = vmul.f32 %v4334_v40, %v634_v6 }
 0x146   : > { %v694_v54 = vmul.f32 %v677_v41, %v664_v45  ;;  %v695_v55 = vmul.f32 %v681_v42, %v665_v46  ;;  %v696_v56 = vmul.f32 %v685_v43, %v666_v47  ;;  %v697_v57 = vmul.f32 %v689_v44, %v667_v48 }
 0x147   : > { %v4336_v49 = vpop.eup %4335 }
 0x148   : > { %v668_v50 = vmul.f32 %v4336_v49, %v635_v8  ;;  %v669_v51 = vmul.f32 %v4336_v49, %v636_v9  ;;  %v670_v52 = vmul.f32 %v4336_v49, %v637_v10  ;;  %v671_v53 = vmul.f32 %v4336_v49, %v638_v14 }
 0x14a   : > { %v698_v58 = vmul.f32 %v677_v41, %v668_v50  ;;  %v699_v59 = vmul.f32 %v681_v42, %v669_v51  ;;  %v700_v60 = vmul.f32 %v685_v43, %v670_v52  ;;  %v701_v61 = vmul.f32 %v689_v44, %v671_v53 }
 0x14c   : > { %v702_v62 = vpack.c.bf16 %v698_v58, %v694_v54  ;;  %v703_v63 = vpack.c.bf16 %v699_v59, %v695_v55  ;;  %v704_v0 = vpack.c.bf16 %v700_v60, %v696_v56  ;;  %v705_v1 = vpack.c.bf16 %v701_v61, %v697_v57 }
 0x14e   : > { %706 = vst [vmem:[#allocation2] sm:$0xff] %v702_v62  ;;  %707 = vst [vmem:[#allocation2 + $0x8] sm:$0xff] %v703_v63 }
 0x14f   : > { %708 = vst [vmem:[#allocation2 + $0x10] sm:$0xff] %v704_v0  ;;  %709 = vst [vmem:[#allocation2 + $0x18] sm:$0xff] %v705_v1 }
 0x150 PF: > { %v4337_v2 = vld [vmem:[%s5491_s27 + $0x4] ss:$16 sps:$4 sm:$0xff]   ;;  %v4339_v3 = vld [vmem:[%s5491_s27 + $0xc] ss:$16 sps:$4 sm:$0xff]   ;;  %v4341_v4 = vld [vmem:[%s5491_s27] ss:$16 sps:$4 sm:$0xff]  }
 0x151   : > { %1490 = vmatprep.subr.bf16.mxu0 %v4337_v2  ;;  %v4342_v5 = vld [vmem:[%s5491_s27 + $0x8] ss:$16 sps:$4 sm:$0xff]   ;;  %1576 = vmatprep.subr.bf16.mxu1 %v4339_v3  ;;  %v4343_v6 = vld [vmem:[%s5491_s27 + $0x24] ss:$16 sps:$4 sm:$0xff]   ;;  %v4345_v7 = vld [vmem:[%s5491_s27 + $0x2c] ss:$16 sps:$4 sm:$0xff]  }
 0x152   : > { %1491 = vmatpush1.bf16.msra.mxu0 %v4341_v4  ;;  %1577 = vmatpush1.bf16.msra.mxu1 %v4342_v5  ;;  %v4347_v8 = vld [vmem:[%s5491_s27 + $0x20] ss:$16 sps:$4 sm:$0xff]   ;;  %v4348_v9 = vld [vmem:[%s5491_s27 + $0x28] ss:$16 sps:$4 sm:$0xff]   ;;  %v4349_v10 = vld [vmem:[%s5491_s27 + $0x44] ss:$16 sps:$4 sm:$0xff]  }
 0x153   : > { %1492 = vmatprep.subr.bf16.mxu0 %v4343_v6  ;;  %1578 = vmatprep.subr.bf16.mxu1 %v4345_v7  ;;  %v4351_v11 = vld [vmem:[%s5491_s27 + $0x4c] ss:$16 sps:$4 sm:$0xff]   ;;  %v4353_v12 = vld [vmem:[%s5491_s27 + $0x40] ss:$16 sps:$4 sm:$0xff]   ;;  %v4354_v13 = vld [vmem:[%s5491_s27 + $0x48] ss:$16 sps:$4 sm:$0xff]  }
 0x154   : > { %v4355_v14 = vld [vmem:[%s5491_s27 + $0x64] ss:$16 sps:$4 sm:$0xff]   ;;  %v4357_v15 = vld [vmem:[%s5491_s27 + $0x6c] ss:$16 sps:$4 sm:$0xff]   ;;  %v4359_v16 = vld [vmem:[%s5491_s27 + $0x60] ss:$16 sps:$4 sm:$0xff]  }
 0x155   : > { %v4360_v17 = vld [vmem:[%s5491_s27 + $0x68] ss:$16 sps:$4 sm:$0xff]   ;;  %v4361_v18 = vld [vmem:[%s5491_s27 + $0x84] ss:$16 sps:$4 sm:$0xff]   ;;  %v4363_v19 = vld [vmem:[%s5491_s27 + $0x8c] ss:$16 sps:$4 sm:$0xff]  }
 0x156   : > { %1493 = vmatpush1.bf16.msra.mxu0 %v4347_v8  ;;  %1579 = vmatpush1.bf16.msra.mxu1 %v4348_v9  ;;  %v4365_v20 = vld [vmem:[%s5491_s27 + $0x80] ss:$16 sps:$4 sm:$0xff]   ;;  %v4366_v21 = vld [vmem:[%s5491_s27 + $0x88] ss:$16 sps:$4 sm:$0xff]   ;;  %v4367_v22 = vld [vmem:[%s5491_s27 + $0xa4] ss:$16 sps:$4 sm:$0xff]  }
 0x157   : > { %1494 = vmatprep.subr.bf16.mxu0 %v4349_v10  ;;  %1580 = vmatprep.subr.bf16.mxu1 %v4351_v11  ;;  %v4369_v23 = vld [vmem:[%s5491_s27 + $0xac] ss:$16 sps:$4 sm:$0xff]   ;;  %v4371_v24 = vld [vmem:[%s5491_s27 + $0xa0] ss:$16 sps:$4 sm:$0xff]   ;;  %v4372_v25 = vld [vmem:[%s5491_s27 + $0xa8] ss:$16 sps:$4 sm:$0xff]  }
 0x158   : > { %v4373_v26 = vld [vmem:[%s5491_s27 + $0xc4] ss:$16 sps:$4 sm:$0xff]   ;;  %v4375_v27 = vld [vmem:[%s5491_s27 + $0xcc] ss:$16 sps:$4 sm:$0xff]   ;;  %v4377_v28 = vld [vmem:[%s5491_s27 + $0xc0] ss:$16 sps:$4 sm:$0xff]  }
 0x159   : > { %v4378_v29 = vld [vmem:[%s5491_s27 + $0xc8] ss:$16 sps:$4 sm:$0xff]   ;;  %v4379_v30 = vld [vmem:[%s5491_s27 + $0xe4] ss:$16 sps:$4 sm:$0xff]   ;;  %v4381_v31 = vld [vmem:[%s5491_s27 + $0xec] ss:$16 sps:$4 sm:$0xff]  }
 0x15a   : > { %1495 = vmatpush1.bf16.msra.mxu0 %v4353_v12  ;;  %1581 = vmatpush1.bf16.msra.mxu1 %v4354_v13  ;;  %v4383_v32 = vld [vmem:[%s5491_s27 + $0xe0] ss:$16 sps:$4 sm:$0xff]   ;;  %v4384_v33 = vld [vmem:[%s5491_s27 + $0xe8] ss:$16 sps:$4 sm:$0xff]   ;;  %v4385_v34 = vld [vmem:[%s5491_s27 + $0x104] ss:$16 sps:$4 sm:$0xff]  }
 0x15b   : > { %1496 = vmatprep.subr.bf16.mxu0 %v4355_v14  ;;  %1582 = vmatprep.subr.bf16.mxu1 %v4357_v15  ;;  %v4387_v35 = vld [vmem:[%s5491_s27 + $0x10c] ss:$16 sps:$4 sm:$0xff]   ;;  %v4389_v36 = vld [vmem:[%s5491_s27 + $0x100] ss:$16 sps:$4 sm:$0xff]   ;;  %v4390_v37 = vld [vmem:[%s5491_s27 + $0x108] ss:$16 sps:$4 sm:$0xff]  }
 0x15c   : > { %v4391_v38 = vld [vmem:[%s5491_s27 + $0x124] ss:$16 sps:$4 sm:$0xff]   ;;  %v4393_v39 = vld [vmem:[%s5491_s27 + $0x12c] ss:$16 sps:$4 sm:$0xff]   ;;  %v4395_v40 = vld [vmem:[%s5491_s27 + $0x120] ss:$16 sps:$4 sm:$0xff]  }
 0x15d   : > { %v4396_v41 = vld [vmem:[%s5491_s27 + $0x128] ss:$16 sps:$4 sm:$0xff]   ;;  %v4397_v42 = vld [vmem:[%s5491_s27 + $0x144] ss:$16 sps:$4 sm:$0xff]   ;;  %v4399_v43 = vld [vmem:[%s5491_s27 + $0x14c] ss:$16 sps:$4 sm:$0xff]  }
 0x15e   : > { %1497 = vmatpush1.bf16.msra.mxu0 %v4359_v16  ;;  %1583 = vmatpush1.bf16.msra.mxu1 %v4360_v17  ;;  %v4401_v44 = vld [vmem:[%s5491_s27 + $0x140] ss:$16 sps:$4 sm:$0xff]   ;;  %v4402_v45 = vld [vmem:[%s5491_s27 + $0x148] ss:$16 sps:$4 sm:$0xff]   ;;  %v4403_v46 = vld [vmem:[%s5491_s27 + $0x164] ss:$16 sps:$4 sm:$0xff]  }
 0x15f   : > { %1498 = vmatprep.subr.bf16.mxu0 %v4361_v18  ;;  %1584 = vmatprep.subr.bf16.mxu1 %v4363_v19  ;;  %v4405_v47 = vld [vmem:[%s5491_s27 + $0x16c] ss:$16 sps:$4 sm:$0xff]   ;;  %v4407_v49 = vld [vmem:[%s5491_s27 + $0x160] ss:$16 sps:$4 sm:$0xff]   ;;  %v4408_v50 = vld [vmem:[%s5491_s27 + $0x168] ss:$16 sps:$4 sm:$0xff]  }
 0x160   : > { %v5567_v48 = vld [vmem:[#allocation2 + $0x8] sm:$0xff]  ;;  %v4409_v51 = vld [vmem:[%s5491_s27 + $0x184] ss:$16 sps:$4 sm:$0xff]   ;;  %v4413_v53 = vld [vmem:[%s5491_s27 + $0x180] ss:$16 sps:$4 sm:$0xff]   ;;  %p4236_p7 = scmp.ne.s32.totalorder %s5047_s21, 1 }
 0x161   : > { %1522 = vmatprep.mubr.bf16.mxu0 %v5567_v48  ;;  %1608 = vmatprep.mubr.bf16.mxu1 %v5567_v48  ;;  %v4411_v52 = vld [vmem:[%s5491_s27 + $0x18c] ss:$16 sps:$4 sm:$0xff]   ;;  %v4414_v54 = vld [vmem:[%s5491_s27 + $0x188] ss:$16 sps:$4 sm:$0xff]   ;;  %v4415_v55 = vld [vmem:[%s5491_s27 + $0x1a4] ss:$16 sps:$4 sm:$0xff]  }
 0x162   : > { %1499 = vmatpush1.bf16.msra.mxu0 %v4365_v20  ;;  %1585 = vmatpush1.bf16.msra.mxu1 %v4366_v21  ;;  %v4417_v56 = vld [vmem:[%s5491_s27 + $0x1ac] ss:$16 sps:$4 sm:$0xff]   ;;  %v4419_v57 = vld [vmem:[%s5491_s27 + $0x1a0] ss:$16 sps:$4 sm:$0xff]   ;;  %v4420_v58 = vld [vmem:[%s5491_s27 + $0x1a8] ss:$16 sps:$4 sm:$0xff]  }
 0x163   : > { %1500 = vmatprep.subr.bf16.mxu0 %v4367_v22  ;;  %1586 = vmatprep.subr.bf16.mxu1 %v4369_v23  ;;  %v4421_v59 = vld [vmem:[%s5491_s27 + $0x1c4] ss:$16 sps:$4 sm:$0xff]   ;;  %v4423_v60 = vld [vmem:[%s5491_s27 + $0x1cc] ss:$16 sps:$4 sm:$0xff]   ;;  %v4425_v61 = vld [vmem:[%s5491_s27 + $0x1c0] ss:$16 sps:$4 sm:$0xff]  }
 0x164   : > { %v4426_v62 = vld [vmem:[%s5491_s27 + $0x1c8] ss:$16 sps:$4 sm:$0xff]   ;;  %v4427_v63 = vld [vmem:[%s5491_s27 + $0x1e4] ss:$16 sps:$4 sm:$0xff]   ;;  %v4429_v0 = vld [vmem:[%s5491_s27 + $0x1ec] ss:$16 sps:$4 sm:$0xff]  }
 0x165   : > { %v4431_v1 = vld [vmem:[%s5491_s27 + $0x1e0] ss:$16 sps:$4 sm:$0xff]   ;;  %v4432_v2 = vld [vmem:[%s5491_s27 + $0x1e8] ss:$16 sps:$4 sm:$0xff]   ;;  %v4435_v3 = vld [vmem:[%s5491_s27 + $0x204] ss:$16 sps:$4 sm:$0xff]  }
 0x166   : > { %1501 = vmatpush1.bf16.msra.mxu0 %v4371_v24  ;;  %1587 = vmatpush1.bf16.msra.mxu1 %v4372_v25  ;;  %v4438_v4 = vld [vmem:[%s5491_s27 + $0x20c] ss:$16 sps:$4 sm:$0xff]   ;;  %v4433_v5 = vld [vmem:[%s5491_s27 + $0x200] ss:$16 sps:$4 sm:$0xff]   ;;  %v4436_v6 = vld [vmem:[%s5491_s27 + $0x208] ss:$16 sps:$4 sm:$0xff]  }
 0x167   : > { %1502 = vmatprep.subr.bf16.mxu0 %v4373_v26  ;;  %1588 = vmatprep.subr.bf16.mxu1 %v4375_v27  ;;  %v5593_v7 = vld [vmem:[#allocation2] sm:$0xff]  ;;  %v4444_v9 = vld [vmem:[%s5491_s27 + $0x22c] ss:$16 sps:$4 sm:$0xff]   ;;  %v4442_v11 = vld [vmem:[%s5491_s27 + $0x228] ss:$16 sps:$4 sm:$0xff]  }
 0x168   : > { %v4441_v8 = vld [vmem:[%s5491_s27 + $0x224] ss:$16 sps:$4 sm:$0xff]   ;;  %v4439_v10 = vld [vmem:[%s5491_s27 + $0x220] ss:$16 sps:$4 sm:$0xff]   ;;  %v4450_v13 = vld [vmem:[%s5491_s27 + $0x24c] ss:$16 sps:$4 sm:$0xff]  }
 0x169   : > { %v4447_v12 = vld [vmem:[%s5491_s27 + $0x244] ss:$16 sps:$4 sm:$0xff]   ;;  %v4445_v14 = vld [vmem:[%s5491_s27 + $0x240] ss:$16 sps:$4 sm:$0xff]   ;;  %v4448_v15 = vld [vmem:[%s5491_s27 + $0x248] ss:$16 sps:$4 sm:$0xff]  }
 0x16a   : > { %1503 = vmatpush1.bf16.msra.mxu0 %v4377_v28  ;;  %1589 = vmatpush1.bf16.msra.mxu1 %v4378_v29  ;;  %v4453_v16 = vld [vmem:[%s5491_s27 + $0x264] ss:$16 sps:$4 sm:$0xff]   ;;  %v4456_v17 = vld [vmem:[%s5491_s27 + $0x26c] ss:$16 sps:$4 sm:$0xff]   ;;  %v4451_v18 = vld [vmem:[%s5491_s27 + $0x260] ss:$16 sps:$4 sm:$0xff]  }
 0x16b   : > { %1504 = vmatprep.subr.bf16.mxu0 %v4379_v30  ;;  %1590 = vmatprep.subr.bf16.mxu1 %v4381_v31  ;;  %v4454_v19 = vld [vmem:[%s5491_s27 + $0x268] ss:$16 sps:$4 sm:$0xff]   ;;  %v4459_v20 = vld [vmem:[%s5491_s27 + $0x284] ss:$16 sps:$4 sm:$0xff]   ;;  %v4462_v21 = vld [vmem:[%s5491_s27 + $0x28c] ss:$16 sps:$4 sm:$0xff]  }
 0x16c   : > { %v4457_v22 = vld [vmem:[%s5491_s27 + $0x280] ss:$16 sps:$4 sm:$0xff]   ;;  %v4460_v23 = vld [vmem:[%s5491_s27 + $0x288] ss:$16 sps:$4 sm:$0xff]   ;;  %v4465_v24 = vld [vmem:[%s5491_s27 + $0x2a4] ss:$16 sps:$4 sm:$0xff]  }
 0x16d   : > { %v4468_v25 = vld [vmem:[%s5491_s27 + $0x2ac] ss:$16 sps:$4 sm:$0xff]   ;;  %v4463_v26 = vld [vmem:[%s5491_s27 + $0x2a0] ss:$16 sps:$4 sm:$0xff]   ;;  %v4466_v27 = vld [vmem:[%s5491_s27 + $0x2a8] ss:$16 sps:$4 sm:$0xff]  }
 0x16e   : > { %1505 = vmatpush1.bf16.msra.mxu0 %v4383_v32  ;;  %1591 = vmatpush1.bf16.msra.mxu1 %v4384_v33  ;;  %v4471_v28 = vld [vmem:[%s5491_s27 + $0x2c4] ss:$16 sps:$4 sm:$0xff]   ;;  %v4474_v29 = vld [vmem:[%s5491_s27 + $0x2cc] ss:$16 sps:$4 sm:$0xff]   ;;  %v4469_v31 = vld [vmem:[%s5491_s27 + $0x2c0] ss:$16 sps:$4 sm:$0xff]  }
 0x16f   : > { %1506 = vmatprep.subr.bf16.mxu0 %v4385_v34  ;;  %1592 = vmatprep.subr.bf16.mxu1 %v4387_v35  ;;  %v5619_v30 = vld [vmem:[#allocation2 + $0x18] sm:$0xff]  ;;  %v4477_v33 = vld [vmem:[%s5491_s27 + $0x2e4] ss:$16 sps:$4 sm:$0xff]   ;;  %v4475_v35 = vld [vmem:[%s5491_s27 + $0x2e0] ss:$16 sps:$4 sm:$0xff]  }
 0x170   : > { %v4472_v32 = vld [vmem:[%s5491_s27 + $0x2c8] ss:$16 sps:$4 sm:$0xff]   ;;  %v4480_v34 = vld [vmem:[%s5491_s27 + $0x2ec] ss:$16 sps:$4 sm:$0xff]  }
 0x172   : > { %1507 = vmatpush1.bf16.msra.mxu0 %v4389_v36  ;;  %1593 = vmatpush1.bf16.msra.mxu1 %v4390_v37  ;;  %v4478_v36 = vld [vmem:[%s5491_s27 + $0x2e8] ss:$16 sps:$4 sm:$0xff]   ;;  %v4483_v37 = vld [vmem:[%s5491_s27 + $0x304] ss:$16 sps:$4 sm:$0xff]  }
 0x173   : > { %1508 = vmatprep.subr.bf16.mxu0 %v4391_v38  ;;  %1594 = vmatprep.subr.bf16.mxu1 %v4393_v39  ;;  %v4486_v38 = vld [vmem:[%s5491_s27 + $0x30c] ss:$16 sps:$4 sm:$0xff]   ;;  %v4481_v39 = vld [vmem:[%s5491_s27 + $0x300] ss:$16 sps:$4 sm:$0xff]  }
 0x176   : > { %1509 = vmatpush1.bf16.msra.mxu0 %v4395_v40  ;;  %1595 = vmatpush1.bf16.msra.mxu1 %v4396_v41  ;;  %v4484_v40 = vld [vmem:[%s5491_s27 + $0x308] ss:$16 sps:$4 sm:$0xff]   ;;  %v4489_v41 = vld [vmem:[%s5491_s27 + $0x324] ss:$16 sps:$4 sm:$0xff]  }
 0x177   : > { %1510 = vmatprep.subr.bf16.mxu0 %v4397_v42  ;;  %1596 = vmatprep.subr.bf16.mxu1 %v4399_v43  ;;  %v4492_v42 = vld [vmem:[%s5491_s27 + $0x32c] ss:$16 sps:$4 sm:$0xff]   ;;  %v4487_v43 = vld [vmem:[%s5491_s27 + $0x320] ss:$16 sps:$4 sm:$0xff]  }
 0x17a   : > { %1511 = vmatpush1.bf16.msra.mxu0 %v4401_v44  ;;  %1597 = vmatpush1.bf16.msra.mxu1 %v4402_v45  ;;  %v4490_v44 = vld [vmem:[%s5491_s27 + $0x328] ss:$16 sps:$4 sm:$0xff]   ;;  %v4495_v45 = vld [vmem:[%s5491_s27 + $0x344] ss:$16 sps:$4 sm:$0xff]  }
 0x17b   : > { %1512 = vmatprep.subr.bf16.mxu0 %v4403_v46  ;;  %1598 = vmatprep.subr.bf16.mxu1 %v4405_v47  ;;  %v4498_v46 = vld [vmem:[%s5491_s27 + $0x34c] ss:$16 sps:$4 sm:$0xff]   ;;  %v4493_v47 = vld [vmem:[%s5491_s27 + $0x340] ss:$16 sps:$4 sm:$0xff]  }
 0x17e   : > { %1513 = vmatpush1.bf16.msra.mxu0 %v4407_v49  ;;  %1599 = vmatpush1.bf16.msra.mxu1 %v4408_v50  ;;  %v4496_v49 = vld [vmem:[%s5491_s27 + $0x348] ss:$16 sps:$4 sm:$0xff]   ;;  %v4501_v50 = vld [vmem:[%s5491_s27 + $0x364] ss:$16 sps:$4 sm:$0xff]  }
 0x17f   : > { %1514 = vmatprep.subr.bf16.mxu0 %v4409_v51  ;;  %1600 = vmatprep.subr.bf16.mxu1 %v4411_v52  ;;  %v4504_v51 = vld [vmem:[%s5491_s27 + $0x36c] ss:$16 sps:$4 sm:$0xff]   ;;  %v4499_v52 = vld [vmem:[%s5491_s27 + $0x360] ss:$16 sps:$4 sm:$0xff]  }
 0x182   : > { %1515 = vmatpush1.bf16.msra.mxu0 %v4413_v53  ;;  %1601 = vmatpush1.bf16.msra.mxu1 %v4414_v54  ;;  %v4502_v53 = vld [vmem:[%s5491_s27 + $0x368] ss:$16 sps:$4 sm:$0xff]   ;;  %v4507_v54 = vld [vmem:[%s5491_s27 + $0x384] ss:$16 sps:$4 sm:$0xff]  }
 0x183   : > { %1516 = vmatprep.subr.bf16.mxu0 %v4415_v55  ;;  %1602 = vmatprep.subr.bf16.mxu1 %v4417_v56  ;;  %v4510_v55 = vld [vmem:[%s5491_s27 + $0x38c] ss:$16 sps:$4 sm:$0xff]   ;;  %v4505_v56 = vld [vmem:[%s5491_s27 + $0x380] ss:$16 sps:$4 sm:$0xff]  }
 0x186   : > { %1517 = vmatpush1.bf16.msra.mxu0 %v4419_v57  ;;  %1603 = vmatpush1.bf16.msra.mxu1 %v4420_v58  ;;  %v4508_v57 = vld [vmem:[%s5491_s27 + $0x388] ss:$16 sps:$4 sm:$0xff]   ;;  %v4513_v58 = vld [vmem:[%s5491_s27 + $0x3a4] ss:$16 sps:$4 sm:$0xff]  }
 0x187   : > { %1518 = vmatprep.subr.bf16.mxu0 %v4421_v59  ;;  %1604 = vmatprep.subr.bf16.mxu1 %v4423_v60  ;;  %v4516_v59 = vld [vmem:[%s5491_s27 + $0x3ac] ss:$16 sps:$4 sm:$0xff]   ;;  %v4511_v60 = vld [vmem:[%s5491_s27 + $0x3a0] ss:$16 sps:$4 sm:$0xff]  }
 0x18a   : > { %1519 = vmatpush1.bf16.msra.mxu0 %v4425_v61  ;;  %1605 = vmatpush1.bf16.msra.mxu1 %v4426_v62  ;;  %v4514_v61 = vld [vmem:[%s5491_s27 + $0x3a8] ss:$16 sps:$4 sm:$0xff]   ;;  %v4519_v62 = vld [vmem:[%s5491_s27 + $0x3c4] ss:$16 sps:$4 sm:$0xff]  }
 0x18b   : > { %1520 = vmatprep.subr.bf16.mxu0 %v4427_v63  ;;  %1606 = vmatprep.subr.bf16.mxu1 %v4429_v0  ;;  %v4522_v63 = vld [vmem:[%s5491_s27 + $0x3cc] ss:$16 sps:$4 sm:$0xff]   ;;  %v4517_v0 = vld [vmem:[%s5491_s27 + $0x3c0] ss:$16 sps:$4 sm:$0xff]  }
 0x18e   : > { %1521 = vmatpush1.bf16.msra.mxu0 %v4431_v1  ;;  %1607 = vmatpush1.bf16.msra.mxu1 %v4432_v2  ;;  %v4520_v1 = vld [vmem:[%s5491_s27 + $0x3c8] ss:$16 sps:$4 sm:$0xff]   ;;  %v4525_v2 = vld [vmem:[%s5491_s27 + $0x3e4] ss:$16 sps:$4 sm:$0xff]  }
 0x18f   : > { %1533 = vmatprep.subr.bf16.mxu0 %v4435_v3  ;;  %1619 = vmatprep.subr.bf16.mxu1 %v4438_v4  ;;  %v4528_v3 = vld [vmem:[%s5491_s27 + $0x3ec] ss:$16 sps:$4 sm:$0xff]   ;;  %v4523_v4 = vld [vmem:[%s5491_s27 + $0x3e0] ss:$16 sps:$4 sm:$0xff]  }
 0x191   : > { %1523 = vmatmul.mubr.bf16.vlgmr.msra.gmra.mrb[0].mxu0 %v5593_v7  ;;  %1609 = vmatmul.mubr.bf16.vlgmr.msra.gmra.mrb[0].mxu1 %v5593_v7 }
 0x192   : > { %1534 = vmatpush1.bf16.msra.mxu0 %v4433_v5  ;;  %1620 = vmatpush1.bf16.msra.mxu1 %v4436_v6  ;;  %v4526_v5 = vld [vmem:[%s5491_s27 + $0x3e8] ss:$16 sps:$4 sm:$0xff]   ;;  %v4531_v6 = vld [vmem:[%s5493_s28 + $0x4] ss:$16 sps:$4 sm:$0xff]  }
 0x193   : > { %1535 = vmatprep.subr.bf16.mxu0 %v4441_v8  ;;  %1621 = vmatprep.subr.bf16.mxu1 %v4444_v9  ;;  %v4534_v8 = vld [vmem:[%s5493_s28 + $0xc] ss:$16 sps:$4 sm:$0xff]   ;;  %v5663_v9 = vld [vmem:[#allocation2 + $0x10] sm:$0xff] }
 0x194   : > { %1565 = vmatprep.mubr.bf16.mxu0 %v5619_v30  ;;  %1651 = vmatprep.mubr.bf16.mxu1 %v5619_v30 }
 0x196   : > { %1536 = vmatpush1.bf16.msra.mxu0 %v4439_v10  ;;  %1622 = vmatpush1.bf16.msra.mxu1 %v4442_v11  ;;  %v4529_v10 = vld [vmem:[%s5493_s28] ss:$16 sps:$4 sm:$0xff]   ;;  %v4532_v11 = vld [vmem:[%s5493_s28 + $0x8] ss:$16 sps:$4 sm:$0xff]  }
 0x197   : > { %1537 = vmatprep.subr.bf16.mxu0 %v4447_v12  ;;  %1623 = vmatprep.subr.bf16.mxu1 %v4450_v13  ;;  %v4537_v12 = vld [vmem:[%s5493_s28 + $0x24] ss:$16 sps:$4 sm:$0xff]   ;;  %v4540_v13 = vld [vmem:[%s5493_s28 + $0x2c] ss:$16 sps:$4 sm:$0xff]  }
 0x19a   : > { %1538 = vmatpush1.bf16.msra.mxu0 %v4445_v14  ;;  %1624 = vmatpush1.bf16.msra.mxu1 %v4448_v15  ;;  %v4535_v14 = vld [vmem:[%s5493_s28 + $0x20] ss:$16 sps:$4 sm:$0xff]   ;;  %v4538_v15 = vld [vmem:[%s5493_s28 + $0x28] ss:$16 sps:$4 sm:$0xff]  }
 0x19b   : > { %1539 = vmatprep.subr.bf16.mxu0 %v4453_v16  ;;  %1625 = vmatprep.subr.bf16.mxu1 %v4456_v17  ;;  %v4543_v16 = vld [vmem:[%s5493_s28 + $0x44] ss:$16 sps:$4 sm:$0xff]   ;;  %v4546_v17 = vld [vmem:[%s5493_s28 + $0x4c] ss:$16 sps:$4 sm:$0xff]  }
 0x19e   : > { %1540 = vmatpush1.bf16.msra.mxu0 %v4451_v18  ;;  %1626 = vmatpush1.bf16.msra.mxu1 %v4454_v19  ;;  %v4541_v18 = vld [vmem:[%s5493_s28 + $0x40] ss:$16 sps:$4 sm:$0xff]   ;;  %v4544_v19 = vld [vmem:[%s5493_s28 + $0x48] ss:$16 sps:$4 sm:$0xff]  }
 0x19f   : > { %1541 = vmatprep.subr.bf16.mxu0 %v4459_v20  ;;  %1627 = vmatprep.subr.bf16.mxu1 %v4462_v21  ;;  %v4549_v20 = vld [vmem:[%s5493_s28 + $0x64] ss:$16 sps:$4 sm:$0xff]   ;;  %v4552_v21 = vld [vmem:[%s5493_s28 + $0x6c] ss:$16 sps:$4 sm:$0xff]  }
 0x1a2   : > { %1542 = vmatpush1.bf16.msra.mxu0 %v4457_v22  ;;  %1628 = vmatpush1.bf16.msra.mxu1 %v4460_v23  ;;  %v4547_v22 = vld [vmem:[%s5493_s28 + $0x60] ss:$16 sps:$4 sm:$0xff]   ;;  %v4550_v23 = vld [vmem:[%s5493_s28 + $0x68] ss:$16 sps:$4 sm:$0xff]  }
 0x1a3   : > { %1543 = vmatprep.subr.bf16.mxu0 %v4465_v24  ;;  %1629 = vmatprep.subr.bf16.mxu1 %v4468_v25  ;;  %v4558_v24 = vld [vmem:[%s5493_s28 + $0x8c] ss:$16 sps:$4 sm:$0xff]   ;;  %v4553_v25 = vld [vmem:[%s5493_s28 + $0x80] ss:$16 sps:$4 sm:$0xff]  }
 0x1a6   : > { %1544 = vmatpush1.bf16.msra.mxu0 %v4463_v26  ;;  %1630 = vmatpush1.bf16.msra.mxu1 %v4466_v27  ;;  %v4556_v26 = vld [vmem:[%s5493_s28 + $0x88] ss:$16 sps:$4 sm:$0xff]   ;;  %v4561_v27 = vld [vmem:[%s5493_s28 + $0xa4] ss:$16 sps:$4 sm:$0xff]  }
 0x1a7   : > { %1545 = vmatprep.subr.bf16.mxu0 %v4471_v28  ;;  %1631 = vmatprep.subr.bf16.mxu1 %v4474_v29  ;;  %v4564_v28 = vld [vmem:[%s5493_s28 + $0xac] ss:$16 sps:$4 sm:$0xff]   ;;  %v4559_v29 = vld [vmem:[%s5493_s28 + $0xa0] ss:$16 sps:$4 sm:$0xff]  }
 0x1aa   : > { %1546 = vmatpush1.bf16.msra.mxu0 %v4469_v31  ;;  %1632 = vmatpush1.bf16.msra.mxu1 %v4472_v32  ;;  %v4562_v31 = vld [vmem:[%s5493_s28 + $0xa8] ss:$16 sps:$4 sm:$0xff]   ;;  %v4567_v32 = vld [vmem:[%s5493_s28 + $0xc4] ss:$16 sps:$4 sm:$0xff]  }
 0x1ab   : > { %1547 = vmatprep.subr.bf16.mxu0 %v4477_v33  ;;  %1633 = vmatprep.subr.bf16.mxu1 %v4480_v34  ;;  %v4570_v33 = vld [vmem:[%s5493_s28 + $0xcc] ss:$16 sps:$4 sm:$0xff]   ;;  %v4565_v34 = vld [vmem:[%s5493_s28 + $0xc0] ss:$16 sps:$4 sm:$0xff]  }
 0x1ae   : > { %1548 = vmatpush1.bf16.msra.mxu0 %v4475_v35  ;;  %1634 = vmatpush1.bf16.msra.mxu1 %v4478_v36  ;;  %v4568_v35 = vld [vmem:[%s5493_s28 + $0xc8] ss:$16 sps:$4 sm:$0xff]   ;;  %v4573_v36 = vld [vmem:[%s5493_s28 + $0xe4] ss:$16 sps:$4 sm:$0xff]  }
 0x1af   : > { %1549 = vmatprep.subr.bf16.mxu0 %v4483_v37  ;;  %1635 = vmatprep.subr.bf16.mxu1 %v4486_v38  ;;  %v4576_v37 = vld [vmem:[%s5493_s28 + $0xec] ss:$16 sps:$4 sm:$0xff]   ;;  %v4571_v38 = vld [vmem:[%s5493_s28 + $0xe0] ss:$16 sps:$4 sm:$0xff]  }
 0x1b2   : > { %1550 = vmatpush1.bf16.msra.mxu0 %v4481_v39  ;;  %1636 = vmatpush1.bf16.msra.mxu1 %v4484_v40  ;;  %v4574_v39 = vld [vmem:[%s5493_s28 + $0xe8] ss:$16 sps:$4 sm:$0xff]   ;;  %v4579_v40 = vld [vmem:[%s5493_s28 + $0x104] ss:$16 sps:$4 sm:$0xff]  }
 0x1b3   : > { %1551 = vmatprep.subr.bf16.mxu0 %v4489_v41  ;;  %1637 = vmatprep.subr.bf16.mxu1 %v4492_v42  ;;  %v4582_v41 = vld [vmem:[%s5493_s28 + $0x10c] ss:$16 sps:$4 sm:$0xff]   ;;  %v4577_v42 = vld [vmem:[%s5493_s28 + $0x100] ss:$16 sps:$4 sm:$0xff]  }
 0x1b6   : > { %1552 = vmatpush1.bf16.msra.mxu0 %v4487_v43  ;;  %1638 = vmatpush1.bf16.msra.mxu1 %v4490_v44  ;;  %v4580_v43 = vld [vmem:[%s5493_s28 + $0x108] ss:$16 sps:$4 sm:$0xff]   ;;  %v4585_v44 = vld [vmem:[%s5493_s28 + $0x124] ss:$16 sps:$4 sm:$0xff]  }
 0x1b7   : > { %1553 = vmatprep.subr.bf16.mxu0 %v4495_v45  ;;  %1639 = vmatprep.subr.bf16.mxu1 %v4498_v46  ;;  %v4588_v45 = vld [vmem:[%s5493_s28 + $0x12c] ss:$16 sps:$4 sm:$0xff]   ;;  %v4583_v46 = vld [vmem:[%s5493_s28 + $0x120] ss:$16 sps:$4 sm:$0xff]  }
 0x1ba   : > { %1554 = vmatpush1.bf16.msra.mxu0 %v4493_v47  ;;  %1640 = vmatpush1.bf16.msra.mxu1 %v4496_v49  ;;  %v4586_v47 = vld [vmem:[%s5493_s28 + $0x128] ss:$16 sps:$4 sm:$0xff]   ;;  %v4591_v49 = vld [vmem:[%s5493_s28 + $0x144] ss:$16 sps:$4 sm:$0xff]  }
 0x1bb   : > { %1555 = vmatprep.subr.bf16.mxu0 %v4501_v50  ;;  %1641 = vmatprep.subr.bf16.mxu1 %v4504_v51  ;;  %v4594_v50 = vld [vmem:[%s5493_s28 + $0x14c] ss:$16 sps:$4 sm:$0xff]   ;;  %v4589_v51 = vld [vmem:[%s5493_s28 + $0x140] ss:$16 sps:$4 sm:$0xff]  }
 0x1be   : > { %1556 = vmatpush1.bf16.msra.mxu0 %v4499_v52  ;;  %1642 = vmatpush1.bf16.msra.mxu1 %v4502_v53  ;;  %v4592_v52 = vld [vmem:[%s5493_s28 + $0x148] ss:$16 sps:$4 sm:$0xff]   ;;  %v4597_v53 = vld [vmem:[%s5493_s28 + $0x164] ss:$16 sps:$4 sm:$0xff]  }
 0x1bf   : > { %1557 = vmatprep.subr.bf16.mxu0 %v4507_v54  ;;  %1643 = vmatprep.subr.bf16.mxu1 %v4510_v55  ;;  %v4600_v54 = vld [vmem:[%s5493_s28 + $0x16c] ss:$16 sps:$4 sm:$0xff]   ;;  %v4595_v55 = vld [vmem:[%s5493_s28 + $0x160] ss:$16 sps:$4 sm:$0xff]  }
 0x1c2   : > { %1558 = vmatpush1.bf16.msra.mxu0 %v4505_v56  ;;  %1644 = vmatpush1.bf16.msra.mxu1 %v4508_v57  ;;  %v4598_v56 = vld [vmem:[%s5493_s28 + $0x168] ss:$16 sps:$4 sm:$0xff]   ;;  %v4603_v57 = vld [vmem:[%s5493_s28 + $0x184] ss:$16 sps:$4 sm:$0xff]  }
 0x1c3   : > { %1559 = vmatprep.subr.bf16.mxu0 %v4513_v58  ;;  %1645 = vmatprep.subr.bf16.mxu1 %v4516_v59  ;;  %v4606_v58 = vld [vmem:[%s5493_s28 + $0x18c] ss:$16 sps:$4 sm:$0xff]   ;;  %v4601_v59 = vld [vmem:[%s5493_s28 + $0x180] ss:$16 sps:$4 sm:$0xff]  }
 0x1c6   : > { %1560 = vmatpush1.bf16.msra.mxu0 %v4511_v60  ;;  %1646 = vmatpush1.bf16.msra.mxu1 %v4514_v61  ;;  %v4604_v60 = vld [vmem:[%s5493_s28 + $0x188] ss:$16 sps:$4 sm:$0xff]   ;;  %v4609_v61 = vld [vmem:[%s5493_s28 + $0x1a4] ss:$16 sps:$4 sm:$0xff]  }
 0x1c7   : > { %1561 = vmatprep.subr.bf16.mxu0 %v4519_v62  ;;  %1647 = vmatprep.subr.bf16.mxu1 %v4522_v63  ;;  %v4612_v62 = vld [vmem:[%s5493_s28 + $0x1ac] ss:$16 sps:$4 sm:$0xff]   ;;  %v4607_v63 = vld [vmem:[%s5493_s28 + $0x1a0] ss:$16 sps:$4 sm:$0xff]  }
 0x1ca   : > { %1562 = vmatpush1.bf16.msra.mxu0 %v4517_v0  ;;  %1648 = vmatpush1.bf16.msra.mxu1 %v4520_v1  ;;  %v4610_v0 = vld [vmem:[%s5493_s28 + $0x1a8] ss:$16 sps:$4 sm:$0xff]   ;;  %v4615_v1 = vld [vmem:[%s5493_s28 + $0x1c4] ss:$16 sps:$4 sm:$0xff]  }
 0x1cb   : > { %1563 = vmatprep.subr.bf16.mxu0 %v4525_v2  ;;  %1649 = vmatprep.subr.bf16.mxu1 %v4528_v3  ;;  %v4618_v2 = vld [vmem:[%s5493_s28 + $0x1cc] ss:$16 sps:$4 sm:$0xff]   ;;  %v4613_v3 = vld [vmem:[%s5493_s28 + $0x1c0] ss:$16 sps:$4 sm:$0xff]  }
 0x1ce   : > { %1564 = vmatpush1.bf16.msra.mxu0 %v4523_v4  ;;  %1650 = vmatpush1.bf16.msra.mxu1 %v4526_v5  ;;  %v4616_v4 = vld [vmem:[%s5493_s28 + $0x1c8] ss:$16 sps:$4 sm:$0xff]   ;;  %v4621_v5 = vld [vmem:[%s5493_s28 + $0x1e4] ss:$16 sps:$4 sm:$0xff]  }
 0x1cf   : > { %2430 = vmatprep.subr.bf16.mxu0 %v4531_v6  ;;  %2516 = vmatprep.subr.bf16.mxu1 %v4534_v8  ;;  %v4624_v6 = vld [vmem:[%s5493_s28 + $0x1ec] ss:$16 sps:$4 sm:$0xff]   ;;  %v4619_v8 = vld [vmem:[%s5493_s28 + $0x1e0] ss:$16 sps:$4 sm:$0xff]  }
 0x1d1   : > { %1566 = vmatmul.mubr.bf16.vlgmr.msra.gmra.mrb[0].mxu0 %v5663_v9  ;;  %1652 = vmatmul.mubr.bf16.vlgmr.msra.gmra.mrb[0].mxu1 %v5663_v9 }
 0x1d2   : > { %2431 = vmatpush1.bf16.msra.mxu0 %v4529_v10  ;;  %2517 = vmatpush1.bf16.msra.mxu1 %v4532_v11  ;;  %v4622_v10 = vld [vmem:[%s5493_s28 + $0x1e8] ss:$16 sps:$4 sm:$0xff]   ;;  %v4627_v11 = vld [vmem:[%s5493_s28 + $0x204] ss:$16 sps:$4 sm:$0xff]  }
 0x1d3   : > { %2432 = vmatprep.subr.bf16.mxu0 %v4537_v12  ;;  %2518 = vmatprep.subr.bf16.mxu1 %v4540_v13  ;;  %v4630_v12 = vld [vmem:[%s5493_s28 + $0x20c] ss:$16 sps:$4 sm:$0xff]   ;;  %v4625_v13 = vld [vmem:[%s5493_s28 + $0x200] ss:$16 sps:$4 sm:$0xff]  }
 0x1d4   : > { %2462 = vmatprep.mubr.bf16.mxu0 %v5567_v48  ;;  %2548 = vmatprep.mubr.bf16.mxu1 %v5567_v48  ;;  %v4555_v48 = vld [vmem:[%s5493_s28 + $0x84] ss:$16 sps:$4 sm:$0xff]  }
 0x1d6   : > { %2433 = vmatpush1.bf16.msra.mxu0 %v4535_v14  ;;  %2519 = vmatpush1.bf16.msra.mxu1 %v4538_v15  ;;  %v4628_v14 = vld [vmem:[%s5493_s28 + $0x208] ss:$16 sps:$4 sm:$0xff]   ;;  %v4633_v15 = vld [vmem:[%s5493_s28 + $0x224] ss:$16 sps:$4 sm:$0xff]  }
 0x1d7   : > { %2434 = vmatprep.subr.bf16.mxu0 %v4543_v16  ;;  %2520 = vmatprep.subr.bf16.mxu1 %v4546_v17  ;;  %v4636_v16 = vld [vmem:[%s5493_s28 + $0x22c] ss:$16 sps:$4 sm:$0xff]   ;;  %v4631_v17 = vld [vmem:[%s5493_s28 + $0x220] ss:$16 sps:$4 sm:$0xff]  }
 0x1da   : > { %2435 = vmatpush1.bf16.msra.mxu0 %v4541_v18  ;;  %2521 = vmatpush1.bf16.msra.mxu1 %v4544_v19  ;;  %v4634_v18 = vld [vmem:[%s5493_s28 + $0x228] ss:$16 sps:$4 sm:$0xff]   ;;  %v4639_v19 = vld [vmem:[%s5493_s28 + $0x244] ss:$16 sps:$4 sm:$0xff]  }
 0x1db   : > { %2436 = vmatprep.subr.bf16.mxu0 %v4549_v20  ;;  %2522 = vmatprep.subr.bf16.mxu1 %v4552_v21  ;;  %v4642_v20 = vld [vmem:[%s5493_s28 + $0x24c] ss:$16 sps:$4 sm:$0xff]   ;;  %v4637_v21 = vld [vmem:[%s5493_s28 + $0x240] ss:$16 sps:$4 sm:$0xff]  }
 0x1de   : > { %2437 = vmatpush1.bf16.msra.mxu0 %v4547_v22  ;;  %2523 = vmatpush1.bf16.msra.mxu1 %v4550_v23  ;;  %v4640_v22 = vld [vmem:[%s5493_s28 + $0x248] ss:$16 sps:$4 sm:$0xff]   ;;  %v4645_v23 = vld [vmem:[%s5493_s28 + $0x264] ss:$16 sps:$4 sm:$0xff]  }
 0x1df   : > { %2438 = vmatprep.subr.bf16.mxu0 %v4555_v48  ;;  %2524 = vmatprep.subr.bf16.mxu1 %v4558_v24  ;;  %v4643_v48 = vld [vmem:[%s5493_s28 + $0x260] ss:$16 sps:$4 sm:$0xff]   ;;  %v4646_v24 = vld [vmem:[%s5493_s28 + $0x268] ss:$16 sps:$4 sm:$0xff]  }
 0x1e2   : > { %2439 = vmatpush1.bf16.msra.mxu0 %v4553_v25  ;;  %2525 = vmatpush1.bf16.msra.mxu1 %v4556_v26  ;;  %v4651_v25 = vld [vmem:[%s5493_s28 + $0x284] ss:$16 sps:$4 sm:$0xff]   ;;  %v4654_v26 = vld [vmem:[%s5493_s28 + $0x28c] ss:$16 sps:$4 sm:$0xff]  }
 0x1e3   : > { %2440 = vmatprep.subr.bf16.mxu0 %v4561_v27  ;;  %2526 = vmatprep.subr.bf16.mxu1 %v4564_v28  ;;  %v4652_v27 = vld [vmem:[%s5493_s28 + $0x288] ss:$16 sps:$4 sm:$0xff]   ;;  %v4657_v28 = vld [vmem:[%s5493_s28 + $0x2a4] ss:$16 sps:$4 sm:$0xff]  }
 0x1e6   : > { %2441 = vmatpush1.bf16.msra.mxu0 %v4559_v29  ;;  %2527 = vmatpush1.bf16.msra.mxu1 %v4562_v31  ;;  %v4660_v29 = vld [vmem:[%s5493_s28 + $0x2ac] ss:$16 sps:$4 sm:$0xff]   ;;  %v4655_v31 = vld [vmem:[%s5493_s28 + $0x2a0] ss:$16 sps:$4 sm:$0xff]  }
 0x1e7   : > { %2442 = vmatprep.subr.bf16.mxu0 %v4567_v32  ;;  %2528 = vmatprep.subr.bf16.mxu1 %v4570_v33  ;;  %v4658_v32 = vld [vmem:[%s5493_s28 + $0x2a8] ss:$16 sps:$4 sm:$0xff]   ;;  %v4663_v33 = vld [vmem:[%s5493_s28 + $0x2c4] ss:$16 sps:$4 sm:$0xff]  }
 0x1ea   : > { %2443 = vmatpush1.bf16.msra.mxu0 %v4565_v34  ;;  %2529 = vmatpush1.bf16.msra.mxu1 %v4568_v35  ;;  %v4666_v34 = vld [vmem:[%s5493_s28 + $0x2cc] ss:$16 sps:$4 sm:$0xff]   ;;  %v4661_v35 = vld [vmem:[%s5493_s28 + $0x2c0] ss:$16 sps:$4 sm:$0xff]  }
 0x1eb   : > { %2444 = vmatprep.subr.bf16.mxu0 %v4573_v36  ;;  %2530 = vmatprep.subr.bf16.mxu1 %v4576_v37  ;;  %v4664_v36 = vld [vmem:[%s5493_s28 + $0x2c8] ss:$16 sps:$4 sm:$0xff]   ;;  %v4669_v37 = vld [vmem:[%s5493_s28 + $0x2e4] ss:$16 sps:$4 sm:$0xff]  }
 0x1ee   : > { %2445 = vmatpush1.bf16.msra.mxu0 %v4571_v38  ;;  %2531 = vmatpush1.bf16.msra.mxu1 %v4574_v39  ;;  %v4672_v38 = vld [vmem:[%s5493_s28 + $0x2ec] ss:$16 sps:$4 sm:$0xff]   ;;  %v4667_v39 = vld [vmem:[%s5493_s28 + $0x2e0] ss:$16 sps:$4 sm:$0xff]  }
 0x1ef   : > { %2446 = vmatprep.subr.bf16.mxu0 %v4579_v40  ;;  %2532 = vmatprep.subr.bf16.mxu1 %v4582_v41  ;;  %v4670_v40 = vld [vmem:[%s5493_s28 + $0x2e8] ss:$16 sps:$4 sm:$0xff]   ;;  %v4675_v41 = vld [vmem:[%s5493_s28 + $0x304] ss:$16 sps:$4 sm:$0xff]  }
 0x1f2   : > { %2447 = vmatpush1.bf16.msra.mxu0 %v4577_v42  ;;  %2533 = vmatpush1.bf16.msra.mxu1 %v4580_v43  ;;  %v4678_v42 = vld [vmem:[%s5493_s28 + $0x30c] ss:$16 sps:$4 sm:$0xff]   ;;  %v4673_v43 = vld [vmem:[%s5493_s28 + $0x300] ss:$16 sps:$4 sm:$0xff]  }
 0x1f3   : > { %2448 = vmatprep.subr.bf16.mxu0 %v4585_v44  ;;  %2534 = vmatprep.subr.bf16.mxu1 %v4588_v45  ;;  %v4676_v44 = vld [vmem:[%s5493_s28 + $0x308] ss:$16 sps:$4 sm:$0xff]   ;;  %v4681_v45 = vld [vmem:[%s5493_s28 + $0x324] ss:$16 sps:$4 sm:$0xff]  }
 0x1f6   : > { %2449 = vmatpush1.bf16.msra.mxu0 %v4583_v46  ;;  %2535 = vmatpush1.bf16.msra.mxu1 %v4586_v47  ;;  %v4684_v46 = vld [vmem:[%s5493_s28 + $0x32c] ss:$16 sps:$4 sm:$0xff]   ;;  %v4679_v47 = vld [vmem:[%s5493_s28 + $0x320] ss:$16 sps:$4 sm:$0xff]  }
 0x1f7   : > { %2450 = vmatprep.subr.bf16.mxu0 %v4591_v49  ;;  %2536 = vmatprep.subr.bf16.mxu1 %v4594_v50  ;;  %v4682_v49 = vld [vmem:[%s5493_s28 + $0x328] ss:$16 sps:$4 sm:$0xff]   ;;  %v4687_v50 = vld [vmem:[%s5493_s28 + $0x344] ss:$16 sps:$4 sm:$0xff]  }
 0x1fa   : > { %2451 = vmatpush1.bf16.msra.mxu0 %v4589_v51  ;;  %2537 = vmatpush1.bf16.msra.mxu1 %v4592_v52  ;;  %v4690_v51 = vld [vmem:[%s5493_s28 + $0x34c] ss:$16 sps:$4 sm:$0xff]   ;;  %v4685_v52 = vld [vmem:[%s5493_s28 + $0x340] ss:$16 sps:$4 sm:$0xff]  }
 0x1fb   : > { %2452 = vmatprep.subr.bf16.mxu0 %v4597_v53  ;;  %2538 = vmatprep.subr.bf16.mxu1 %v4600_v54  ;;  %v4688_v53 = vld [vmem:[%s5493_s28 + $0x348] ss:$16 sps:$4 sm:$0xff]   ;;  %v4693_v54 = vld [vmem:[%s5493_s28 + $0x364] ss:$16 sps:$4 sm:$0xff]  }
 0x1fe   : > { %2453 = vmatpush1.bf16.msra.mxu0 %v4595_v55  ;;  %2539 = vmatpush1.bf16.msra.mxu1 %v4598_v56  ;;  %v4696_v55 = vld [vmem:[%s5493_s28 + $0x36c] ss:$16 sps:$4 sm:$0xff]   ;;  %v4691_v56 = vld [vmem:[%s5493_s28 + $0x360] ss:$16 sps:$4 sm:$0xff]  }
 0x1ff   : > { %2454 = vmatprep.subr.bf16.mxu0 %v4603_v57  ;;  %2540 = vmatprep.subr.bf16.mxu1 %v4606_v58  ;;  %v4694_v57 = vld [vmem:[%s5493_s28 + $0x368] ss:$16 sps:$4 sm:$0xff]   ;;  %v4699_v58 = vld [vmem:[%s5493_s28 + $0x384] ss:$16 sps:$4 sm:$0xff]  }
 0x202   : > { %2455 = vmatpush1.bf16.msra.mxu0 %v4601_v59  ;;  %2541 = vmatpush1.bf16.msra.mxu1 %v4604_v60  ;;  %v4702_v59 = vld [vmem:[%s5493_s28 + $0x38c] ss:$16 sps:$4 sm:$0xff]   ;;  %v4697_v60 = vld [vmem:[%s5493_s28 + $0x380] ss:$16 sps:$4 sm:$0xff]  }
 0x203   : > { %2456 = vmatprep.subr.bf16.mxu0 %v4609_v61  ;;  %2542 = vmatprep.subr.bf16.mxu1 %v4612_v62  ;;  %v4700_v61 = vld [vmem:[%s5493_s28 + $0x388] ss:$16 sps:$4 sm:$0xff]   ;;  %v4705_v62 = vld [vmem:[%s5493_s28 + $0x3a4] ss:$16 sps:$4 sm:$0xff]  }
 0x206   : > { %2457 = vmatpush1.bf16.msra.mxu0 %v4607_v63  ;;  %2543 = vmatpush1.bf16.msra.mxu1 %v4610_v0  ;;  %v4708_v63 = vld [vmem:[%s5493_s28 + $0x3ac] ss:$16 sps:$4 sm:$0xff]   ;;  %v4703_v0 = vld [vmem:[%s5493_s28 + $0x3a0] ss:$16 sps:$4 sm:$0xff]  }
 0x207   : > { %2458 = vmatprep.subr.bf16.mxu0 %v4615_v1  ;;  %2544 = vmatprep.subr.bf16.mxu1 %v4618_v2  ;;  %v4706_v1 = vld [vmem:[%s5493_s28 + $0x3a8] ss:$16 sps:$4 sm:$0xff]   ;;  %v4711_v2 = vld [vmem:[%s5493_s28 + $0x3c4] ss:$16 sps:$4 sm:$0xff]  }
 0x20a   : > { %2459 = vmatpush1.bf16.msra.mxu0 %v4613_v3  ;;  %2545 = vmatpush1.bf16.msra.mxu1 %v4616_v4  ;;  %v4714_v3 = vld [vmem:[%s5493_s28 + $0x3cc] ss:$16 sps:$4 sm:$0xff]   ;;  %v4709_v4 = vld [vmem:[%s5493_s28 + $0x3c0] ss:$16 sps:$4 sm:$0xff]  }
 0x20b   : > { %2460 = vmatprep.subr.bf16.mxu0 %v4621_v5  ;;  %2546 = vmatprep.subr.bf16.mxu1 %v4624_v6  ;;  %v4712_v5 = vld [vmem:[%s5493_s28 + $0x3c8] ss:$16 sps:$4 sm:$0xff]   ;;  %v4717_v6 = vld [vmem:[%s5493_s28 + $0x3e4] ss:$16 sps:$4 sm:$0xff]  }
 0x20e   : > { %2461 = vmatpush1.bf16.msra.mxu0 %v4619_v8  ;;  %2547 = vmatpush1.bf16.msra.mxu1 %v4622_v10  ;;  %v4720_v8 = vld [vmem:[%s5493_s28 + $0x3ec] ss:$16 sps:$4 sm:$0xff]   ;;  %v4715_v10 = vld [vmem:[%s5493_s28 + $0x3e0] ss:$16 sps:$4 sm:$0xff]  }
 0x20f   : > { %2473 = vmatprep.subr.bf16.mxu0 %v4627_v11  ;;  %2559 = vmatprep.subr.bf16.mxu1 %v4630_v12  ;;  %v4718_v11 = vld [vmem:[%s5493_s28 + $0x3e8] ss:$16 sps:$4 sm:$0xff]   ;;  %v4723_v12 = vld [vmem:[%s5499_s6 + $0x4] ss:$16 sps:$4 sm:$0xff]  }
 0x211   : > { %2463 = vmatmul.mubr.bf16.vlgmr.msra.gmra.mrb[4].mxu0 %v5593_v7  ;;  %2549 = vmatmul.mubr.bf16.vlgmr.msra.gmra.mrb[4].mxu1 %v5593_v7  ;;  %v4648_v7 = vld [vmem:[%s5493_s28 + $0x26c] ss:$16 sps:$4 sm:$0xff]  }
 0x212   : > { %2474 = vmatpush1.bf16.msra.mxu0 %v4625_v13  ;;  %2560 = vmatpush1.bf16.msra.mxu1 %v4628_v14  ;;  %v4726_v13 = vld [vmem:[%s5499_s6 + $0xc] ss:$16 sps:$4 sm:$0xff]   ;;  %v4721_v14 = vld [vmem:[%s5499_s6] ss:$16 sps:$4 sm:$0xff]  }
 0x213   : > { %2475 = vmatprep.subr.bf16.mxu0 %v4633_v15  ;;  %2561 = vmatprep.subr.bf16.mxu1 %v4636_v16  ;;  %v4724_v15 = vld [vmem:[%s5499_s6 + $0x8] ss:$16 sps:$4 sm:$0xff]   ;;  %v4729_v16 = vld [vmem:[%s5499_s6 + $0x24] ss:$16 sps:$4 sm:$0xff]  }
 0x214   : > { %2505 = vmatprep.mubr.bf16.mxu0 %v5619_v30  ;;  %2591 = vmatprep.mubr.bf16.mxu1 %v5619_v30  ;;  %v4649_v30 = vld [vmem:[%s5493_s28 + $0x280] ss:$16 sps:$4 sm:$0xff]  }
 0x216   : > { %2476 = vmatpush1.bf16.msra.mxu0 %v4631_v17  ;;  %2562 = vmatpush1.bf16.msra.mxu1 %v4634_v18  ;;  %v4732_v17 = vld [vmem:[%s5499_s6 + $0x2c] ss:$16 sps:$4 sm:$0xff]   ;;  %v4727_v18 = vld [vmem:[%s5499_s6 + $0x20] ss:$16 sps:$4 sm:$0xff]  }
 0x217   : > { %2477 = vmatprep.subr.bf16.mxu0 %v4639_v19  ;;  %2563 = vmatprep.subr.bf16.mxu1 %v4642_v20  ;;  %v4730_v19 = vld [vmem:[%s5499_s6 + $0x28] ss:$16 sps:$4 sm:$0xff]   ;;  %v4735_v20 = vld [vmem:[%s5499_s6 + $0x44] ss:$16 sps:$4 sm:$0xff]  }
 0x21a   : > { %2478 = vmatpush1.bf16.msra.mxu0 %v4637_v21  ;;  %2564 = vmatpush1.bf16.msra.mxu1 %v4640_v22  ;;  %v4738_v21 = vld [vmem:[%s5499_s6 + $0x4c] ss:$16 sps:$4 sm:$0xff]   ;;  %v4733_v22 = vld [vmem:[%s5499_s6 + $0x40] ss:$16 sps:$4 sm:$0xff]  }
 0x21b   : > { %2479 = vmatprep.subr.bf16.mxu0 %v4645_v23  ;;  %2565 = vmatprep.subr.bf16.mxu1 %v4648_v7  ;;  %v4736_v23 = vld [vmem:[%s5499_s6 + $0x48] ss:$16 sps:$4 sm:$0xff]   ;;  %v4744_v7 = vld [vmem:[%s5499_s6 + $0x6c] ss:$16 sps:$4 sm:$0xff]  }
 0x21e   : > { %2480 = vmatpush1.bf16.msra.mxu0 %v4643_v48  ;;  %2566 = vmatpush1.bf16.msra.mxu1 %v4646_v24  ;;  %v4739_v48 = vld [vmem:[%s5499_s6 + $0x60] ss:$16 sps:$4 sm:$0xff]   ;;  %v4742_v24 = vld [vmem:[%s5499_s6 + $0x68] ss:$16 sps:$4 sm:$0xff]  }
 0x21f   : > { %2481 = vmatprep.subr.bf16.mxu0 %v4651_v25  ;;  %2567 = vmatprep.subr.bf16.mxu1 %v4654_v26  ;;  %v4747_v25 = vld [vmem:[%s5499_s6 + $0x84] ss:$16 sps:$4 sm:$0xff]   ;;  %v4750_v26 = vld [vmem:[%s5499_s6 + $0x8c] ss:$16 sps:$4 sm:$0xff]  }
 0x222   : > { %2482 = vmatpush1.bf16.msra.mxu0 %v4649_v30  ;;  %2568 = vmatpush1.bf16.msra.mxu1 %v4652_v27  ;;  %v4745_v30 = vld [vmem:[%s5499_s6 + $0x80] ss:$16 sps:$4 sm:$0xff]   ;;  %v4748_v27 = vld [vmem:[%s5499_s6 + $0x88] ss:$16 sps:$4 sm:$0xff]  }
 0x223   : > { %2483 = vmatprep.subr.bf16.mxu0 %v4657_v28  ;;  %2569 = vmatprep.subr.bf16.mxu1 %v4660_v29  ;;  %v4753_v28 = vld [vmem:[%s5499_s6 + $0xa4] ss:$16 sps:$4 sm:$0xff]   ;;  %v4756_v29 = vld [vmem:[%s5499_s6 + $0xac] ss:$16 sps:$4 sm:$0xff]  }
 0x226   : > { %2484 = vmatpush1.bf16.msra.mxu0 %v4655_v31  ;;  %2570 = vmatpush1.bf16.msra.mxu1 %v4658_v32  ;;  %v4751_v31 = vld [vmem:[%s5499_s6 + $0xa0] ss:$16 sps:$4 sm:$0xff]   ;;  %v4754_v32 = vld [vmem:[%s5499_s6 + $0xa8] ss:$16 sps:$4 sm:$0xff]  }
 0x227   : > { %2485 = vmatprep.subr.bf16.mxu0 %v4663_v33  ;;  %2571 = vmatprep.subr.bf16.mxu1 %v4666_v34  ;;  %v4759_v33 = vld [vmem:[%s5499_s6 + $0xc4] ss:$16 sps:$4 sm:$0xff]   ;;  %v4762_v34 = vld [vmem:[%s5499_s6 + $0xcc] ss:$16 sps:$4 sm:$0xff]  }
 0x22a   : > { %2486 = vmatpush1.bf16.msra.mxu0 %v4661_v35  ;;  %2572 = vmatpush1.bf16.msra.mxu1 %v4664_v36  ;;  %v4757_v35 = vld [vmem:[%s5499_s6 + $0xc0] ss:$16 sps:$4 sm:$0xff]   ;;  %v4760_v36 = vld [vmem:[%s5499_s6 + $0xc8] ss:$16 sps:$4 sm:$0xff]  }
 0x22b   : > { %2487 = vmatprep.subr.bf16.mxu0 %v4669_v37  ;;  %2573 = vmatprep.subr.bf16.mxu1 %v4672_v38  ;;  %v4765_v37 = vld [vmem:[%s5499_s6 + $0xe4] ss:$16 sps:$4 sm:$0xff]   ;;  %v4768_v38 = vld [vmem:[%s5499_s6 + $0xec] ss:$16 sps:$4 sm:$0xff]  }
 0x22e   : > { %2488 = vmatpush1.bf16.msra.mxu0 %v4667_v39  ;;  %2574 = vmatpush1.bf16.msra.mxu1 %v4670_v40  ;;  %v4763_v39 = vld [vmem:[%s5499_s6 + $0xe0] ss:$16 sps:$4 sm:$0xff]   ;;  %v4766_v40 = vld [vmem:[%s5499_s6 + $0xe8] ss:$16 sps:$4 sm:$0xff]  }
 0x22f   : > { %2489 = vmatprep.subr.bf16.mxu0 %v4675_v41  ;;  %2575 = vmatprep.subr.bf16.mxu1 %v4678_v42  ;;  %v4771_v41 = vld [vmem:[%s5499_s6 + $0x104] ss:$16 sps:$4 sm:$0xff]   ;;  %v4774_v42 = vld [vmem:[%s5499_s6 + $0x10c] ss:$16 sps:$4 sm:$0xff]  }
 0x232   : > { %2490 = vmatpush1.bf16.msra.mxu0 %v4673_v43  ;;  %2576 = vmatpush1.bf16.msra.mxu1 %v4676_v44  ;;  %v4769_v43 = vld [vmem:[%s5499_s6 + $0x100] ss:$16 sps:$4 sm:$0xff]   ;;  %v4772_v44 = vld [vmem:[%s5499_s6 + $0x108] ss:$16 sps:$4 sm:$0xff]  }
 0x233   : > { %2491 = vmatprep.subr.bf16.mxu0 %v4681_v45  ;;  %2577 = vmatprep.subr.bf16.mxu1 %v4684_v46  ;;  %v4777_v45 = vld [vmem:[%s5499_s6 + $0x124] ss:$16 sps:$4 sm:$0xff]   ;;  %v4780_v46 = vld [vmem:[%s5499_s6 + $0x12c] ss:$16 sps:$4 sm:$0xff]  }
 0x236   : > { %2492 = vmatpush1.bf16.msra.mxu0 %v4679_v47  ;;  %2578 = vmatpush1.bf16.msra.mxu1 %v4682_v49  ;;  %v4775_v47 = vld [vmem:[%s5499_s6 + $0x120] ss:$16 sps:$4 sm:$0xff]   ;;  %v4778_v49 = vld [vmem:[%s5499_s6 + $0x128] ss:$16 sps:$4 sm:$0xff]  }
 0x237   : > { %2493 = vmatprep.subr.bf16.mxu0 %v4687_v50  ;;  %2579 = vmatprep.subr.bf16.mxu1 %v4690_v51  ;;  %v4783_v50 = vld [vmem:[%s5499_s6 + $0x144] ss:$16 sps:$4 sm:$0xff]   ;;  %v4786_v51 = vld [vmem:[%s5499_s6 + $0x14c] ss:$16 sps:$4 sm:$0xff]  }
 0x23a   : > { %2494 = vmatpush1.bf16.msra.mxu0 %v4685_v52  ;;  %2580 = vmatpush1.bf16.msra.mxu1 %v4688_v53  ;;  %v4781_v52 = vld [vmem:[%s5499_s6 + $0x140] ss:$16 sps:$4 sm:$0xff]   ;;  %v4784_v53 = vld [vmem:[%s5499_s6 + $0x148] ss:$16 sps:$4 sm:$0xff]  }
 0x23b   : > { %2495 = vmatprep.subr.bf16.mxu0 %v4693_v54  ;;  %2581 = vmatprep.subr.bf16.mxu1 %v4696_v55  ;;  %v4789_v54 = vld [vmem:[%s5499_s6 + $0x164] ss:$16 sps:$4 sm:$0xff]   ;;  %v4792_v55 = vld [vmem:[%s5499_s6 + $0x16c] ss:$16 sps:$4 sm:$0xff]  }
 0x23e   : > { %2496 = vmatpush1.bf16.msra.mxu0 %v4691_v56  ;;  %2582 = vmatpush1.bf16.msra.mxu1 %v4694_v57  ;;  %v4787_v56 = vld [vmem:[%s5499_s6 + $0x160] ss:$16 sps:$4 sm:$0xff]   ;;  %v4790_v57 = vld [vmem:[%s5499_s6 + $0x168] ss:$16 sps:$4 sm:$0xff]  }
 0x23f   : > { %2497 = vmatprep.subr.bf16.mxu0 %v4699_v58  ;;  %2583 = vmatprep.subr.bf16.mxu1 %v4702_v59  ;;  %v4795_v58 = vld [vmem:[%s5499_s6 + $0x184] ss:$16 sps:$4 sm:$0xff]   ;;  %v4798_v59 = vld [vmem:[%s5499_s6 + $0x18c] ss:$16 sps:$4 sm:$0xff]  }
 0x242   : > { %2498 = vmatpush1.bf16.msra.mxu0 %v4697_v60  ;;  %2584 = vmatpush1.bf16.msra.mxu1 %v4700_v61  ;;  %v4793_v60 = vld [vmem:[%s5499_s6 + $0x180] ss:$16 sps:$4 sm:$0xff]   ;;  %v4796_v61 = vld [vmem:[%s5499_s6 + $0x188] ss:$16 sps:$4 sm:$0xff]  }
 0x243   : > { %2499 = vmatprep.subr.bf16.mxu0 %v4705_v62  ;;  %2585 = vmatprep.subr.bf16.mxu1 %v4708_v63  ;;  %v4801_v62 = vld [vmem:[%s5499_s6 + $0x1a4] ss:$16 sps:$4 sm:$0xff]   ;;  %v4804_v63 = vld [vmem:[%s5499_s6 + $0x1ac] ss:$16 sps:$4 sm:$0xff]  }
 0x246   : > { %2500 = vmatpush1.bf16.msra.mxu0 %v4703_v0  ;;  %2586 = vmatpush1.bf16.msra.mxu1 %v4706_v1  ;;  %v4799_v0 = vld [vmem:[%s5499_s6 + $0x1a0] ss:$16 sps:$4 sm:$0xff]   ;;  %v4802_v1 = vld [vmem:[%s5499_s6 + $0x1a8] ss:$16 sps:$4 sm:$0xff]  }
 0x247   : > { %2501 = vmatprep.subr.bf16.mxu0 %v4711_v2  ;;  %2587 = vmatprep.subr.bf16.mxu1 %v4714_v3 }
 0x24a   : > { %2502 = vmatpush1.bf16.msra.mxu0 %v4709_v4  ;;  %2588 = vmatpush1.bf16.msra.mxu1 %v4712_v5 }
 0x24b   : > { %2503 = vmatprep.subr.bf16.mxu0 %v4717_v6  ;;  %2589 = vmatprep.subr.bf16.mxu1 %v4720_v8 }
 0x24e   : > { %2504 = vmatpush1.bf16.msra.mxu0 %v4715_v10  ;;  %2590 = vmatpush1.bf16.msra.mxu1 %v4718_v11 }
 0x24f   : > { %3446 = vmatprep.subr.bf16.mxu0 %v4723_v12  ;;  %3532 = vmatprep.subr.bf16.mxu1 %v4726_v13  ;;  %v4805_v12 = vld [vmem:[%s5499_s6 + $0x1c0] ss:$16 sps:$4 sm:$0xff]   ;;  %v4807_v13 = vld [vmem:[%s5499_s6 + $0x1c4] ss:$16 sps:$4 sm:$0xff]  }
 0x251   : > { %2506 = vmatmul.mubr.bf16.vlgmr.msra.gmra.mrb[4].mxu0 %v5663_v9  ;;  %2592 = vmatmul.mubr.bf16.vlgmr.msra.gmra.mrb[4].mxu1 %v5663_v9  ;;  %v4741_v9 = vld [vmem:[%s5499_s6 + $0x64] ss:$16 sps:$4 sm:$0xff]  }
 0x252   : > { %3447 = vmatpush1.bf16.msra.mxu0 %v4721_v14  ;;  %3533 = vmatpush1.bf16.msra.mxu1 %v4724_v15  ;;  %v4808_v14 = vld [vmem:[%s5499_s6 + $0x1c8] ss:$16 sps:$4 sm:$0xff]   ;;  %v4810_v15 = vld [vmem:[%s5499_s6 + $0x1cc] ss:$16 sps:$4 sm:$0xff]  }
 0x253   : > { %3448 = vmatprep.subr.bf16.mxu0 %v4729_v16  ;;  %3534 = vmatprep.subr.bf16.mxu1 %v4732_v17  ;;  %v4813_v16 = vld [vmem:[%s5499_s6 + $0x1e4] ss:$16 sps:$4 sm:$0xff]   ;;  %v4816_v17 = vld [vmem:[%s5499_s6 + $0x1ec] ss:$16 sps:$4 sm:$0xff]  }
 0x256   : > { %3449 = vmatpush1.bf16.msra.mxu0 %v4727_v18  ;;  %3535 = vmatpush1.bf16.msra.mxu1 %v4730_v19  ;;  %v4811_v18 = vld [vmem:[%s5499_s6 + $0x1e0] ss:$16 sps:$4 sm:$0xff]   ;;  %v4814_v19 = vld [vmem:[%s5499_s6 + $0x1e8] ss:$16 sps:$4 sm:$0xff]  }
 0x257   : > { %3450 = vmatprep.subr.bf16.mxu0 %v4735_v20  ;;  %3536 = vmatprep.subr.bf16.mxu1 %v4738_v21  ;;  %v4819_v20 = vld [vmem:[%s5499_s6 + $0x204] ss:$16 sps:$4 sm:$0xff]   ;;  %v4822_v21 = vld [vmem:[%s5499_s6 + $0x20c] ss:$16 sps:$4 sm:$0xff]  }
 0x25a   : > { %3451 = vmatpush1.bf16.msra.mxu0 %v4733_v22  ;;  %3537 = vmatpush1.bf16.msra.mxu1 %v4736_v23 }
 0x25b   : > { %3452 = vmatprep.subr.bf16.mxu0 %v4741_v9  ;;  %3538 = vmatprep.subr.bf16.mxu1 %v4744_v7 }
 0x25e   : > { %3453 = vmatpush1.bf16.msra.mxu0 %v4739_v48  ;;  %3539 = vmatpush1.bf16.msra.mxu1 %v4742_v24 }
 0x25f   : > { %3454 = vmatprep.subr.bf16.mxu0 %v4747_v25  ;;  %3540 = vmatprep.subr.bf16.mxu1 %v4750_v26 }
 0x262   : > { %3455 = vmatpush1.bf16.msra.mxu0 %v4745_v30  ;;  %3541 = vmatpush1.bf16.msra.mxu1 %v4748_v27 }
 0x263   : > { %3456 = vmatprep.subr.bf16.mxu0 %v4753_v28  ;;  %3542 = vmatprep.subr.bf16.mxu1 %v4756_v29 }
 0x266   : > { %3457 = vmatpush1.bf16.msra.mxu0 %v4751_v31  ;;  %3543 = vmatpush1.bf16.msra.mxu1 %v4754_v32 }
 0x267   : > { %3458 = vmatprep.subr.bf16.mxu0 %v4759_v33  ;;  %3544 = vmatprep.subr.bf16.mxu1 %v4762_v34 }
 0x26a   : > { %3459 = vmatpush1.bf16.msra.mxu0 %v4757_v35  ;;  %3545 = vmatpush1.bf16.msra.mxu1 %v4760_v36 }
 0x26b   : > { %3460 = vmatprep.subr.bf16.mxu0 %v4765_v37  ;;  %3546 = vmatprep.subr.bf16.mxu1 %v4768_v38 }
 0x26e   : > { %3461 = vmatpush1.bf16.msra.mxu0 %v4763_v39  ;;  %3547 = vmatpush1.bf16.msra.mxu1 %v4766_v40 }
 0x26f   : > { %3462 = vmatprep.subr.bf16.mxu0 %v4771_v41  ;;  %3548 = vmatprep.subr.bf16.mxu1 %v4774_v42 }
 0x272   : > { %3463 = vmatpush1.bf16.msra.mxu0 %v4769_v43  ;;  %3549 = vmatpush1.bf16.msra.mxu1 %v4772_v44 }
 0x273   : > { %3464 = vmatprep.subr.bf16.mxu0 %v4777_v45  ;;  %3550 = vmatprep.subr.bf16.mxu1 %v4780_v46 }
 0x276   : > { %3465 = vmatpush1.bf16.msra.mxu0 %v4775_v47  ;;  %3551 = vmatpush1.bf16.msra.mxu1 %v4778_v49 }
 0x277   : > { %3466 = vmatprep.subr.bf16.mxu0 %v4783_v50  ;;  %3552 = vmatprep.subr.bf16.mxu1 %v4786_v51 }
 0x27a   : > { %3467 = vmatpush1.bf16.msra.mxu0 %v4781_v52  ;;  %3553 = vmatpush1.bf16.msra.mxu1 %v4784_v53 }
 0x27b   : > { %3468 = vmatprep.subr.bf16.mxu0 %v4789_v54  ;;  %3554 = vmatprep.subr.bf16.mxu1 %v4792_v55 }
 0x27e   : > { %3469 = vmatpush1.bf16.msra.mxu0 %v4787_v56  ;;  %3555 = vmatpush1.bf16.msra.mxu1 %v4790_v57 }
 0x27f   : > { %3470 = vmatprep.subr.bf16.mxu0 %v4795_v58  ;;  %3556 = vmatprep.subr.bf16.mxu1 %v4798_v59 }
 0x282   : > { %3471 = vmatpush1.bf16.msra.mxu0 %v4793_v60  ;;  %3557 = vmatpush1.bf16.msra.mxu1 %v4796_v61 }
 0x283   : > { %3472 = vmatprep.subr.bf16.mxu0 %v4801_v62  ;;  %3558 = vmatprep.subr.bf16.mxu1 %v4804_v63 }
 0x286   : > { %3473 = vmatpush1.bf16.msra.mxu0 %v4799_v0  ;;  %3559 = vmatpush1.bf16.msra.mxu1 %v4802_v1 }
 0x287   : > { %3474 = vmatprep.subr.bf16.mxu0 %v4807_v13  ;;  %3560 = vmatprep.subr.bf16.mxu1 %v4810_v15 }
 0x28a   : > { %3475 = vmatpush1.bf16.msra.mxu0 %v4805_v12  ;;  %3561 = vmatpush1.bf16.msra.mxu1 %v4808_v14 }
 0x28b   : > { %3476 = vmatprep.subr.bf16.mxu0 %v4813_v16  ;;  %3562 = vmatprep.subr.bf16.mxu1 %v4816_v17 }
 0x28e   : > { %3477 = vmatpush1.bf16.msra.mxu0 %v4811_v18  ;;  %3563 = vmatpush1.bf16.msra.mxu1 %v4814_v19  ;;  %v4817_v18 = vld [vmem:[%s5499_s6 + $0x200] ss:$16 sps:$4 sm:$0xff]   ;;  %v4820_v19 = vld [vmem:[%s5499_s6 + $0x208] ss:$16 sps:$4 sm:$0xff]  }
 0x28f   : > { %3489 = vmatprep.subr.bf16.mxu0 %v4819_v20  ;;  %3575 = vmatprep.subr.bf16.mxu1 %v4822_v21  ;;  %v4825_v20 = vld [vmem:[%s5499_s6 + $0x224] ss:$16 sps:$4 sm:$0xff]   ;;  %v4828_v21 = vld [vmem:[%s5499_s6 + $0x22c] ss:$16 sps:$4 sm:$0xff]  }
 0x2a4   : > { %v5857_v2 = vpop.f32.mrb[0].mxu0  ;;  %v5859_v3 = vpop.f32.mrb[0].mxu1 }
 0x2a5   : > { %v5861_v4 = vpop.f32.mrb[1].mxu0  ;;  %v5863_v5 = vpop.f32.mrb[1].mxu1  ;;  %v4100_v22 = vmul.f32 -1.442695, %v5857_v2  ;;  %v4102_v23 = vmul.f32 -1.442695, %v5859_v3 }
 0x2a6   : > { %v5865_v6 = vpop.f32.mrb[2].mxu0  ;;  %v5867_v8 = vpop.f32.mrb[2].mxu1  ;;  %v4101_v9 = vmul.f32 -1.442695, %v5861_v4  ;;  %v4103_v7 = vmul.f32 -1.442695, %v5863_v5 }
 0x2a7   : > { %v5869_v10 = vpop.f32.mrb[3].mxu0  ;;  %v5871_v11 = vpop.f32.mrb[3].mxu1  ;;  %4913 = vpow2.f32 %v4100_v22  ;;  %v4104_v48 = vmul.f32 -1.442695, %v5865_v6  ;;  %v4106_v24 = vmul.f32 -1.442695, %v5867_v8 }
 0x2a8   : > { %4915 = vpow2.f32 %v4102_v23  ;;  %v4105_v25 = vmul.f32 -1.442695, %v5869_v10  ;;  %v4107_v26 = vmul.f32 -1.442695, %v5871_v11  ;;  %v4823_v22 = vld [vmem:[%s5499_s6 + $0x220] ss:$16 sps:$4 sm:$0xff]  }
 0x2a9   : > { %4917 = vpow2.f32 %v4101_v9  ;;  %v4826_v23 = vld [vmem:[%s5499_s6 + $0x228] ss:$16 sps:$4 sm:$0xff]   ;;  %v4831_v9 = vld [vmem:[%s5499_s6 + $0x244] ss:$16 sps:$4 sm:$0xff]  }
 0x2aa   : > { %4919 = vpow2.f32 %v4103_v7  ;;  %v4834_v7 = vld [vmem:[%s5499_s6 + $0x24c] ss:$16 sps:$4 sm:$0xff]  }
 0x2ab   : > { %4921 = vpow2.f32 %v4104_v48  ;;  %v4829_v48 = vld [vmem:[%s5499_s6 + $0x240] ss:$16 sps:$4 sm:$0xff]  }
 0x2ac   : > { %4923 = vpow2.f32 %v4106_v24  ;;  %v4832_v24 = vld [vmem:[%s5499_s6 + $0x248] ss:$16 sps:$4 sm:$0xff]  }
 0x2ad   : > { %4925 = vpow2.f32 %v4105_v25  ;;  %v4837_v25 = vld [vmem:[%s5499_s6 + $0x264] ss:$16 sps:$4 sm:$0xff]  }
 0x2ae   : > { %4927 = vpow2.f32 %v4107_v26  ;;  %v4840_v26 = vld [vmem:[%s5499_s6 + $0x26c] ss:$16 sps:$4 sm:$0xff]  }
 0x2b1   : > { %v4914_v30 = vpop.eup %4913 }
 0x2b2   : > { %v4916_v27 = vpop.eup %4915  ;;  %v2626_v31 = vadd.f32 1.0, %v4914_v30  ;;  %v4835_v30 = vld [vmem:[%s5499_s6 + $0x260] ss:$16 sps:$4 sm:$0xff]  }
 0x2b3   : > { %v4918_v28 = vpop.eup %4917  ;;  %v2628_v33 = vadd.f32 1.0, %v4916_v27  ;;  %v4838_v27 = vld [vmem:[%s5499_s6 + $0x268] ss:$16 sps:$4 sm:$0xff]  }
 0x2b4   : > { %v4920_v29 = vpop.eup %4919  ;;  %v2627_v35 = vadd.f32 1.0, %v4918_v28  ;;  %4929 = vrcp.f32 %v2626_v31  ;;  %v4843_v28 = vld [vmem:[%s5499_s6 + $0x284] ss:$16 sps:$4 sm:$0xff]   ;;  %v4841_v31 = vld [vmem:[%s5499_s6 + $0x280] ss:$16 sps:$4 sm:$0xff]  }
 0x2b5   : > { %v4922_v32 = vpop.eup %4921  ;;  %v2629_v37 = vadd.f32 1.0, %v4920_v29  ;;  %4931 = vrcp.f32 %v2628_v33  ;;  %v4846_v29 = vld [vmem:[%s5499_s6 + $0x28c] ss:$16 sps:$4 sm:$0xff]   ;;  %v4849_v33 = vld [vmem:[%s5499_s6 + $0x2a4] ss:$16 sps:$4 sm:$0xff]  }
 0x2b6   : > { %v4924_v34 = vpop.eup %4923  ;;  %v2630_v39 = vadd.f32 1.0, %v4922_v32  ;;  %4933 = vrcp.f32 %v2627_v35  ;;  %v4844_v32 = vld [vmem:[%s5499_s6 + $0x288] ss:$16 sps:$4 sm:$0xff]   ;;  %v4847_v35 = vld [vmem:[%s5499_s6 + $0x2a0] ss:$16 sps:$4 sm:$0xff]  }
 0x2b7   : > { %v4926_v36 = vpop.eup %4925  ;;  %v2632_v40 = vadd.f32 1.0, %v4924_v34  ;;  %4935 = vrcp.f32 %v2629_v37  ;;  %v4852_v34 = vld [vmem:[%s5499_s6 + $0x2ac] ss:$16 sps:$4 sm:$0xff]   ;;  %v4855_v37 = vld [vmem:[%s5499_s6 + $0x2c4] ss:$16 sps:$4 sm:$0xff]  }
 0x2b8   : > { %v4928_v38 = vpop.eup %4927  ;;  %v2631_v41 = vadd.f32 1.0, %v4926_v36  ;;  %4937 = vrcp.f32 %v2630_v39  ;;  %v4850_v36 = vld [vmem:[%s5499_s6 + $0x2a8] ss:$16 sps:$4 sm:$0xff]   ;;  %v4853_v39 = vld [vmem:[%s5499_s6 + $0x2c0] ss:$16 sps:$4 sm:$0xff]  }
 0x2b9   : > { %v2633_v42 = vadd.f32 1.0, %v4928_v38  ;;  %4939 = vrcp.f32 %v2632_v40  ;;  %v4858_v38 = vld [vmem:[%s5499_s6 + $0x2cc] ss:$16 sps:$4 sm:$0xff]   ;;  %v4856_v40 = vld [vmem:[%s5499_s6 + $0x2c8] ss:$16 sps:$4 sm:$0xff]  }
 0x2ba   : > { %4941 = vrcp.f32 %v2631_v41  ;;  %v4861_v41 = vld [vmem:[%s5499_s6 + $0x2e4] ss:$16 sps:$4 sm:$0xff]  }
 0x2bb   : > { %4943 = vrcp.f32 %v2633_v42  ;;  %v4864_v42 = vld [vmem:[%s5499_s6 + $0x2ec] ss:$16 sps:$4 sm:$0xff]  }
 0x2be   : > { %v4930_v43 = vpop.eup %4929 }
 0x2bf   : > { %v4932_v44 = vpop.eup %4931  ;;  %v2650_v52 = vmul.f32 %v4930_v43, %v5857_v2  ;;  %v4859_v43 = vld [vmem:[%s5499_s6 + $0x2e0] ss:$16 sps:$4 sm:$0xff]  }
 0x2c0   : > { %v4934_v45 = vpop.eup %4933  ;;  %v2652_v53 = vmul.f32 %v4932_v44, %v5859_v3  ;;  %v4862_v44 = vld [vmem:[%s5499_s6 + $0x2e8] ss:$16 sps:$4 sm:$0xff]  }
 0x2c1   : > { %v4936_v46 = vpop.eup %4935  ;;  %v2651_v54 = vmul.f32 %v4934_v45, %v5861_v4  ;;  %v4867_v45 = vld [vmem:[%s5499_s6 + $0x304] ss:$16 sps:$4 sm:$0xff]  }
 0x2c2   : > { %v4938_v47 = vpop.eup %4937  ;;  %v2653_v55 = vmul.f32 %v4936_v46, %v5863_v5  ;;  %v4870_v46 = vld [vmem:[%s5499_s6 + $0x30c] ss:$16 sps:$4 sm:$0xff]  }
 0x2c3   : > { %v4940_v49 = vpop.eup %4939  ;;  %v2654_v58 = vmul.f32 %v4938_v47, %v5865_v6  ;;  %v4865_v47 = vld [vmem:[%s5499_s6 + $0x300] ss:$16 sps:$4 sm:$0xff]  }
 0x2c4   : > { %v4942_v50 = vpop.eup %4941  ;;  %v2656_v59 = vmul.f32 %v4940_v49, %v5867_v8  ;;  %v4868_v49 = vld [vmem:[%s5499_s6 + $0x308] ss:$16 sps:$4 sm:$0xff]  }
 0x2c5   : > { %v4944_v51 = vpop.eup %4943  ;;  %v2655_v0 = vmul.f32 %v4942_v50, %v5869_v10  ;;  %v4873_v50 = vld [vmem:[%s5499_s6 + $0x324] ss:$16 sps:$4 sm:$0xff]  }
 0x2c6   : > { %v2657_v1 = vmul.f32 %v4944_v51, %v5871_v11  ;;  %v4876_v51 = vld [vmem:[%s5499_s6 + $0x32c] ss:$16 sps:$4 sm:$0xff]  }
 0x324   : > { %v2507_v56 = vpop.f32.mrb[4].mxu0  ;;  %v2593_v57 = vpop.f32.mrb[4].mxu1 }
 0x325   : > { %v2658_v60 = vmul.f32 %v2650_v52, %v2507_v56  ;;  %v2660_v61 = vmul.f32 %v2652_v53, %v2593_v57  ;;  %v2509_v62 = vpop.f32.mrb[5].mxu0  ;;  %v2595_v63 = vpop.f32.mrb[5].mxu1  ;;  %v4871_v52 = vld [vmem:[%s5499_s6 + $0x320] ss:$16 sps:$4 sm:$0xff]   ;;  %v4874_v53 = vld [vmem:[%s5499_s6 + $0x328] ss:$16 sps:$4 sm:$0xff]  }
 0x326   : > { %v2659_v2 = vmul.f32 %v2651_v54, %v2509_v62  ;;  %v2661_v3 = vmul.f32 %v2653_v55, %v2595_v63  ;;  %v2511_v4 = vpop.f32.mrb[6].mxu0  ;;  %v2597_v5 = vpop.f32.mrb[6].mxu1  ;;  %v4879_v54 = vld [vmem:[%s5499_s6 + $0x344] ss:$16 sps:$4 sm:$0xff]   ;;  %v4882_v55 = vld [vmem:[%s5499_s6 + $0x34c] ss:$16 sps:$4 sm:$0xff]  }
 0x327   : > { %v2662_v12 = vmul.f32 %v2654_v58, %v2511_v4  ;;  %v2664_v6 = vmul.f32 %v2656_v59, %v2597_v5  ;;  %v2513_v13 = vpop.f32.mrb[7].mxu0  ;;  %v2599_v8 = vpop.f32.mrb[7].mxu1  ;;  %v4877_v56 = vld [vmem:[%s5499_s6 + $0x340] ss:$16 sps:$4 sm:$0xff]   ;;  %v4880_v57 = vld [vmem:[%s5499_s6 + $0x348] ss:$16 sps:$4 sm:$0xff]  }
 0x328   : > { %v2663_v14 = vmul.f32 %v2655_v0, %v2513_v13  ;;  %v2665_v15 = vmul.f32 %v2657_v1, %v2599_v8  ;;  %v4885_v58 = vld [vmem:[%s5499_s6 + $0x364] ss:$16 sps:$4 sm:$0xff]   ;;  %v4888_v59 = vld [vmem:[%s5499_s6 + $0x36c] ss:$16 sps:$4 sm:$0xff]   ;;  %v4889_v0 = vld [vmem:[%s5499_s6 + $0x380] ss:$16 sps:$4 sm:$0xff]  }
 0x329   : > { %v2674_v16 = vpack.c.bf16 %v2662_v12, %v2658_v60  ;;  %v5899_v10 = vpack.c.bf16 %v2664_v6, %v2660_v61  ;;  %v4883_v60 = vld [vmem:[%s5499_s6 + $0x360] ss:$16 sps:$4 sm:$0xff]   ;;  %v4886_v61 = vld [vmem:[%s5499_s6 + $0x368] ss:$16 sps:$4 sm:$0xff]   ;;  %v4891_v62 = vld [vmem:[%s5499_s6 + $0x384] ss:$16 sps:$4 sm:$0xff]  }
 0x32a   : > { %v2675_v17 = vpack.c.bf16 %v2663_v14, %v2659_v2  ;;  %v2677_v11 = vpack.c.bf16 %v2665_v15, %v2661_v3  ;;  %v4894_v63 = vld [vmem:[%s5499_s6 + $0x38c] ss:$16 sps:$4 sm:$0xff]   ;;  %v4892_v1 = vld [vmem:[%s5499_s6 + $0x388] ss:$16 sps:$4 sm:$0xff]   ;;  %v4897_v2 = vld [vmem:[%s5499_s6 + $0x3a4] ss:$16 sps:$4 sm:$0xff]  }
 0x32b   : > { %v4900_v3 = vld [vmem:[%s5499_s6 + $0x3ac] ss:$16 sps:$4 sm:$0xff]   ;;  %v4895_v4 = vld [vmem:[%s5499_s6 + $0x3a0] ss:$16 sps:$4 sm:$0xff]   ;;  %v4898_v5 = vld [vmem:[%s5499_s6 + $0x3a8] ss:$16 sps:$4 sm:$0xff]  }
 0x32c   : > { %3478 = vmatprep.mubr.bf16.mxu0 %v2675_v17  ;;  %3564 = vmatprep.mubr.bf16.mxu1 %v2675_v17  ;;  %v4903_v12 = vld [vmem:[%s5499_s6 + $0x3c4] ss:$16 sps:$4 sm:$0xff]   ;;  %v4906_v6 = vld [vmem:[%s5499_s6 + $0x3cc] ss:$16 sps:$4 sm:$0xff]   ;;  %v4901_v13 = vld [vmem:[%s5499_s6 + $0x3c0] ss:$16 sps:$4 sm:$0xff]  }
 0x32d   : > { %3479 = vmatmul.mubr.bf16.vlgmr.msra.gmra.mrb[8].mxu0 %v2674_v16  ;;  %3565 = vmatmul.mubr.bf16.vlgmr.msra.gmra.mrb[8].mxu1 %v2674_v16  ;;  %v4904_v8 = vld [vmem:[%s5499_s6 + $0x3c8] ss:$16 sps:$4 sm:$0xff]   ;;  %v4909_v14 = vld [vmem:[%s5499_s6 + $0x3e4] ss:$16 sps:$4 sm:$0xff]   ;;  %v4912_v15 = vld [vmem:[%s5499_s6 + $0x3ec] ss:$16 sps:$4 sm:$0xff]  }
 0x32e   : > { %3490 = vmatpush1.bf16.msra.mxu0 %v4817_v18  ;;  %3576 = vmatpush1.bf16.msra.mxu1 %v4820_v19  ;;  %v4907_v16 = vld [vmem:[%s5499_s6 + $0x3e0] ss:$16 sps:$4 sm:$0xff]   ;;  %v4910_v17 = vld [vmem:[%s5499_s6 + $0x3e8] ss:$16 sps:$4 sm:$0xff]  }
 0x32f   : > { %3521 = vmatprep.mubr.bf16.mxu0 %v2677_v11  ;;  %3607 = vmatprep.mubr.bf16.mxu1 %v2677_v11  ;;  %v2666_v11 = vld [vmem:[#allocation3] sm:$0xff]  ;;  %v2668_v18 = vld [vmem:[#allocation3 + $0x10] sm:$0xff]  ;;  %v2667_v19 = vld [vmem:[#allocation3 + $0x8] sm:$0xff] }
 0x330   : > { %3491 = vmatprep.subr.bf16.mxu0 %v4825_v20  ;;  %3577 = vmatprep.subr.bf16.mxu1 %v4828_v21  ;;  %v2669_v20 = vld [vmem:[#allocation3 + $0x18] sm:$0xff] }
 0x332   : > { %3492 = vmatpush1.bf16.msra.mxu0 %v4823_v22  ;;  %3578 = vmatpush1.bf16.msra.mxu1 %v4826_v23  ;;  %v2670_v23 = vld [vmem:[#allocation3 + $0x20] sm:$0xff] }
 0x333   : > { %3493 = vmatprep.subr.bf16.mxu0 %v4831_v9  ;;  %3579 = vmatprep.subr.bf16.mxu1 %v4834_v7  ;;  %v2672_v9 = vld [vmem:[#allocation3 + $0x30] sm:$0xff] }
 0x336   : > { %3494 = vmatpush1.bf16.msra.mxu0 %v4829_v48  ;;  %3580 = vmatpush1.bf16.msra.mxu1 %v4832_v24 }
 0x337   : > { %3495 = vmatprep.subr.bf16.mxu0 %v4837_v25  ;;  %3581 = vmatprep.subr.bf16.mxu1 %v4840_v26  ;;  %v2671_v26 = vld [vmem:[#allocation3 + $0x28] sm:$0xff] }
 0x33a   : > { %3496 = vmatpush1.bf16.msra.mxu0 %v4835_v30  ;;  %3582 = vmatpush1.bf16.msra.mxu1 %v4838_v27  ;;  %v2673_v30 = vld [vmem:[#allocation3 + $0x38] sm:$0xff] }
 0x33b   : > { %3497 = vmatprep.subr.bf16.mxu0 %v4843_v28  ;;  %3583 = vmatprep.subr.bf16.mxu1 %v4846_v29 }
 0x33e   : > { %3498 = vmatpush1.bf16.msra.mxu0 %v4841_v31  ;;  %3584 = vmatpush1.bf16.msra.mxu1 %v4844_v32 }
 0x33f   : > { %3499 = vmatprep.subr.bf16.mxu0 %v4849_v33  ;;  %3585 = vmatprep.subr.bf16.mxu1 %v4852_v34 }
 0x342   : > { %3500 = vmatpush1.bf16.msra.mxu0 %v4847_v35  ;;  %3586 = vmatpush1.bf16.msra.mxu1 %v4850_v36 }
 0x343   : > { %3501 = vmatprep.subr.bf16.mxu0 %v4855_v37  ;;  %3587 = vmatprep.subr.bf16.mxu1 %v4858_v38  ;;  %v3638_v37 = vld [vmem:[%s6008_s0] sm:$0xff] (!%p4236_p7) }
 0x346   : > { %3502 = vmatpush1.bf16.msra.mxu0 %v4853_v39  ;;  %3588 = vmatpush1.bf16.msra.mxu1 %v4856_v40  ;;  %v3642_v40 = vunpack.c.l.bf16 (!%p4236_p7), %v3638_v37 }
 0x347   : > { %3503 = vmatprep.subr.bf16.mxu0 %v4861_v41  ;;  %3589 = vmatprep.subr.bf16.mxu1 %v4864_v42  ;;  %v3643_v41 = vunpack.c.h.bf16 (!%p4236_p7), %v3638_v37  ;;  %v3639_v42 = vld [vmem:[%s6008_s0 + $0x8] sm:$0xff] (!%p4236_p7) }
 0x34a   : > { %3504 = vmatpush1.bf16.msra.mxu0 %v4859_v43  ;;  %3590 = vmatpush1.bf16.msra.mxu1 %v4862_v44 }
 0x34b   : > { %3505 = vmatprep.subr.bf16.mxu0 %v4867_v45  ;;  %3591 = vmatprep.subr.bf16.mxu1 %v4870_v46  ;;  %v3644_v45 = vunpack.c.l.bf16 (!%p4236_p7), %v3639_v42  ;;  %v3645_v46 = vunpack.c.h.bf16 (!%p4236_p7), %v3639_v42 }
 0x34e   : > { %3506 = vmatpush1.bf16.msra.mxu0 %v4865_v47  ;;  %3592 = vmatpush1.bf16.msra.mxu1 %v4868_v49  ;;  %v3640_v47 = vld [vmem:[%s6008_s0 + $0x10] sm:$0xff] (!%p4236_p7) }
 0x34f   : > { %3507 = vmatprep.subr.bf16.mxu0 %v4873_v50  ;;  %3593 = vmatprep.subr.bf16.mxu1 %v4876_v51 }
 0x352   : > { %3508 = vmatpush1.bf16.msra.mxu0 %v4871_v52  ;;  %3594 = vmatpush1.bf16.msra.mxu1 %v4874_v53  ;;  %v3646_v53 = vunpack.c.l.bf16 (!%p4236_p7), %v3640_v47 }
 0x353   : > { %3509 = vmatprep.subr.bf16.mxu0 %v4879_v54  ;;  %3595 = vmatprep.subr.bf16.mxu1 %v4882_v55  ;;  %v3647_v54 = vunpack.c.h.bf16 (!%p4236_p7), %v3640_v47  ;;  %v3641_v55 = vld [vmem:[%s6008_s0 + $0x18] sm:$0xff] (!%p4236_p7) }
 0x356   : > { %3510 = vmatpush1.bf16.msra.mxu0 %v4877_v56  ;;  %3596 = vmatpush1.bf16.msra.mxu1 %v4880_v57 }
 0x357   : > { %3511 = vmatprep.subr.bf16.mxu0 %v4885_v58  ;;  %3597 = vmatprep.subr.bf16.mxu1 %v4888_v59 }
 0x35a   : > { %3512 = vmatpush1.bf16.msra.mxu0 %v4883_v60  ;;  %3598 = vmatpush1.bf16.msra.mxu1 %v4886_v61  ;;  %v3648_v60 = vunpack.c.l.bf16 (!%p4236_p7), %v3641_v55  ;;  %v3649_v61 = vunpack.c.h.bf16 (!%p4236_p7), %v3641_v55 }
 0x35b   : > { %3513 = vmatprep.subr.bf16.mxu0 %v4891_v62  ;;  %3599 = vmatprep.subr.bf16.mxu1 %v4894_v63 }
 0x35e   : > { %3514 = vmatpush1.bf16.msra.mxu0 %v4889_v0  ;;  %3600 = vmatpush1.bf16.msra.mxu1 %v4892_v1 }
 0x35f   : > { %3515 = vmatprep.subr.bf16.mxu0 %v4897_v2  ;;  %3601 = vmatprep.subr.bf16.mxu1 %v4900_v3 }
 0x362   : > { %3516 = vmatpush1.bf16.msra.mxu0 %v4895_v4  ;;  %3602 = vmatpush1.bf16.msra.mxu1 %v4898_v5 }
 0x363   : > { %3517 = vmatprep.subr.bf16.mxu0 %v4903_v12  ;;  %3603 = vmatprep.subr.bf16.mxu1 %v4906_v6 }
 0x366   : > { %3518 = vmatpush1.bf16.msra.mxu0 %v4901_v13  ;;  %3604 = vmatpush1.bf16.msra.mxu1 %v4904_v8 }
 0x367   : > { %3519 = vmatprep.subr.bf16.mxu0 %v4909_v14  ;;  %3605 = vmatprep.subr.bf16.mxu1 %v4912_v15 }
 0x36a   : > { %3520 = vmatpush1.bf16.msra.mxu0 %v4907_v16  ;;  %3606 = vmatpush1.bf16.msra.mxu1 %v4910_v17 }
 0x36d   : > { %3522 = vmatmul.mubr.bf16.vlgmr.msra.gmra.mrb[8].mxu0 %v5899_v10  ;;  %3608 = vmatmul.mubr.bf16.vlgmr.msra.gmra.mrb[8].mxu1 %v5899_v10 }
 0x440   : > { %v3523_v21 = vpop.f32.mrb[8].mxu0  ;;  %v3609_v22 = vpop.f32.mrb[8].mxu1  ;;  %3637 = sbr.rel (%p4236_p7) target bundleno = 1107 (0x453), region = 79 }
 0x441   : > { %v3618_v7 = vadd.f32 %v3523_v21, %v2666_v11  ;;  %v3620_v48 = vadd.f32 %v3609_v22, %v2668_v18  ;;  %v3525_v24 = vpop.f32.mrb[9].mxu0  ;;  %v3611_v25 = vpop.f32.mrb[9].mxu1 }
 0x442   : > { %v3619_v27 = vadd.f32 %v3525_v24, %v2667_v19  ;;  %v3621_v28 = vadd.f32 %v3611_v25, %v2669_v20  ;;  %v3527_v29 = vpop.f32.mrb[10].mxu0  ;;  %v3613_v31 = vpop.f32.mrb[10].mxu1 }
 0x443   : > { %3626 = vst [vmem:[#allocation3] sm:$0xff] %v3618_v7  ;;  %3628 = vst [vmem:[#allocation3 + $0x10] sm:$0xff] %v3620_v48  ;;  %v3622_v10 = vadd.f32 %v3527_v29, %v2670_v23  ;;  %v3624_v32 = vadd.f32 %v3613_v31, %v2672_v9  ;;  %v3529_v33 = vpop.f32.mrb[11].mxu0  ;;  %v3615_v34 = vpop.f32.mrb[11].mxu1 }
 0x444   : > { %3627 = vst [vmem:[#allocation3 + $0x8] sm:$0xff] %v3619_v27  ;;  %3629 = vst [vmem:[#allocation3 + $0x18] sm:$0xff] %v3621_v28  ;;  %v3623_v35 = vadd.f32 %v3529_v33, %v2671_v26  ;;  %v3625_v36 = vadd.f32 %v3615_v34, %v2673_v30 }
 0x445   : > { %3630 = vst [vmem:[#allocation3 + $0x20] sm:$0xff] %v3622_v10  ;;  %3632 = vst [vmem:[#allocation3 + $0x30] sm:$0xff] %v3624_v32 }
 0x446   : > { %3631 = vst [vmem:[#allocation3 + $0x28] sm:$0xff] %v3623_v35  ;;  %3633 = vst [vmem:[#allocation3 + $0x38] sm:$0xff] %v3625_v36 }
 0x44a   : > { %v3650_v38 = vld [vmem:[#allocation3] sm:$0xff]  ;;  %v3652_v43 = vld [vmem:[#allocation3 + $0x10] sm:$0xff] }
 0x44b   : > { %v3651_v39 = vld [vmem:[#allocation3 + $0x8] sm:$0xff]  ;;  %v3653_v44 = vld [vmem:[#allocation3 + $0x18] sm:$0xff]  ;;  %v3658_v51 = vadd.f32 %v3650_v38, %v3642_v40  ;;  %v3660_v58 = vadd.f32 %v3652_v43, %v3644_v45 }
 0x44c   : > { %v3654_v49 = vld [vmem:[#allocation3 + $0x20] sm:$0xff]  ;;  %v3659_v52 = vadd.f32 %v3651_v39, %v3643_v41  ;;  %v3656_v56 = vld [vmem:[#allocation3 + $0x30] sm:$0xff]  ;;  %v3661_v59 = vadd.f32 %v3653_v44, %v3645_v46 }
 0x44d   : > { %v3655_v50 = vld [vmem:[#allocation3 + $0x28] sm:$0xff]  ;;  %v3657_v57 = vld [vmem:[#allocation3 + $0x38] sm:$0xff]  ;;  %v3662_v63 = vadd.f32 %v3654_v49, %v3646_v53  ;;  %v3664_v2 = vadd.f32 %v3656_v56, %v3648_v60 }
 0x44e   : > { %v4249_v62 = vpack.c.bf16 %v3659_v52, %v3658_v51  ;;  %v3663_v0 = vadd.f32 %v3655_v50, %v3647_v54  ;;  %v4250_v1 = vpack.c.bf16 %v3661_v59, %v3660_v58  ;;  %v3665_v3 = vadd.f32 %v3657_v57, %v3649_v61 }
 0x450   : > { %3690 = vst [vmem:[%s6013_s5] sm:$0xff] %v4249_v62  ;;  %v4251_v4 = vpack.c.bf16 %v3663_v0, %v3662_v63  ;;  %3691 = vst [vmem:[%s6013_s5 + $0x8] sm:$0xff] %v4250_v1  ;;  %v4252_v5 = vpack.c.bf16 %v3665_v3, %v3664_v2 }
 0x452   : > { %3692 = vst [vmem:[%s6013_s5 + $0x10] sm:$0xff] %v4251_v4  ;;  %3693 = vst [vmem:[%s6013_s5 + $0x18] sm:$0xff] %v4252_v5 }
 0x453 PF: > { %s21_s23 = sadd.s32 1, %s5055_s23   ;;  %s6016_s18 = smov %s5039_s19 }
 0x454   : > { %p18_p8 = scmp.ge.s32.totalorder %s21_s23, 4   ;;  %s6017_s19 = smov %s5043_s20 }
 0x455   : > { %s6018_s20 = smov %s5141_s30  ;;  %s6019_s21 = smov %s5051_s22 }
 0x456   : > { %s6020_s22 = smov %s6022_s25  ;;  %20 = sbr.rel (!%p18_p8) target bundleno = 6 (0x6), region = 135 }
 0x45d   :  { %3718 = vsyncpa [#allocation6], 1 }
 0x45e   :  { %3720 = vsyncpa [#allocation6 + $0x1], 1 }
 0x45f   :  { %3721 = vsyncpa [#allocation8], 1 }
 0x460   :  { %3723 = vsyncpa [#allocation8 + $0x1], 1 }

// kernel: _lambda_.16
= control target key start
LH: loop header
LB: loop body
LE: loop exit
PB: predicated region body
PF: predicated region fallthrough
CT: control target
= control target key end

     0   :  { %s5219_s18 = smov 0   ;;  %s5221_s19 = smov 0   ;;  %s6308_s0 = inlined_call_operand.vmem [shape: bf16[16,512], index: 0, kind: input, shape index: {}]   ;;  %s6309_s1 = inlined_call_operand.vmem [shape: f32[1,512], index: 1, kind: input, shape index: {}]   ;;  %s6310_s2 = inlined_call_operand.vmem [shape: bf16[512,1024], index: 2, kind: input, shape index: {}]   ;;  %s6311_s3 = inlined_call_operand.vmem [shape: bf16[512,1024], index: 3, kind: input, shape index: {}]   ;;  %s6312_s4 = inlined_call_operand.vmem [shape: bf16[1024,512], index: 4, kind: input, shape index: {}]   ;;  %s6313_s5 = inlined_call_operand.vmem [shape: bf16[16,512], index: 5, kind: output, shape index: {}]  }
   0x1   :  { %s5223_s20 = smov 0   ;;  %s5225_s21 = smov 0  }
   0x2   :  { %s5227_s22 = smov 0  }
   0x3 LB: > { %s24_s23 = sadd.s32 1, %s5182_s21  ;;  %p88_p1 = scmp.ne.s32.totalorder %s5174_s19, %s5170_s18  ;;  %s5186_s22 = sphi %s5227_s22, %s15_s22   ;;  %s5182_s21 = sphi %s5225_s21, %s6318_s21   ;;  %s5178_s20 = sphi %s5223_s20, %s6317_s20   ;;  %s5174_s19 = sphi %s5221_s19, %s6316_s19   ;;  %s5170_s18 = sphi %s5219_s18, %s6315_s18  }
   0x4   : > { %p25_p0 = scmp.ge.s32.totalorder %s24_s23, 2  ;;  %p89_p2 = scmp.eq.s32.totalorder %s5186_s22, 0 }
   0x5   : > { %s81_s26 = sadd.s32 1, %s5174_s19  ;;  %p4049_p5 = scmp.ge.s32.totalorder %s5186_s22, 2 }
   0x6   : > { %s6320_s23 = smov (%p25_p0, %s24_s23), 0  ;;  %p5250_p3 = por %p89_p2, %p88_p1 }
   0x7   : > { %s78_s25 = ssub.s32 %s5182_s21, %s6320_s23  ;;  %205 = sbr.rel (%p4049_p5) target bundleno = 150 (0x96), region = 24 }
   0x8   : > { %p79_p4 = scmp.eq.s32.totalorder %s78_s25, 0 }
   0xa   : > { %s5258_s27 = scalar_select %p79_p4, %s5174_s19, %s81_s26  }
   0xe   : > { %208 = sbr.rel (!%p5250_p3) target bundleno = 82 (0x52), region = 28  ;;  %s210_s28 = sand.u32 (%p5250_p3), 1, %s5174_s19  }
   0xf   : > { %s4464_s29 = sshll.u32 (%p5250_p3), %s5182_s21, 4  ;;  %s4050_s30 = sshll.u32 (%p5250_p3), %s210_s28, 10 }
  0x10   : > { %s5268_s8 = scalar_lea.vmem (%p5250_p3), %s6310_s2, %s4464_s29  ;;  %s5273_s9 = scalar_lea.vmem (%p5250_p3), [#allocation4], %s4050_s30 }
  0x11   : > { %v228_v0 = vld [vmem:[%s5268_s8] sm:$0xff] (%p5250_p3)  ;;  %v230_v1 = vld [vmem:[%s5268_s8 + $0x8] sm:$0xff] (%p5250_p3) }
  0x12   : > { %v232_v2 = vld [vmem:[%s5268_s8 + $0x20] sm:$0xff] (%p5250_p3)  ;;  %229 = vst [vmem:[%s5273_s9] sm:$0xff] (%p5250_p3), %v228_v0  ;;  %231 = vst [vmem:[%s5273_s9 + $0x8] sm:$0xff] (%p5250_p3), %v230_v1  ;;  %v234_v3 = vld [vmem:[%s5268_s8 + $0x28] sm:$0xff] (%p5250_p3) }
  0x13   : > { %233 = vst [vmem:[%s5273_s9 + $0x10] sm:$0xff] (%p5250_p3), %v232_v2  ;;  %v236_v4 = vld [vmem:[%s5268_s8 + $0x40] sm:$0xff] (%p5250_p3)  ;;  %v238_v5 = vld [vmem:[%s5268_s8 + $0x48] sm:$0xff] (%p5250_p3)  ;;  %235 = vst [vmem:[%s5273_s9 + $0x18] sm:$0xff] (%p5250_p3), %v234_v3 }
  0x14   : > { %237 = vst [vmem:[%s5273_s9 + $0x20] sm:$0xff] (%p5250_p3), %v236_v4  ;;  %239 = vst [vmem:[%s5273_s9 + $0x28] sm:$0xff] (%p5250_p3), %v238_v5  ;;  %v240_v6 = vld [vmem:[%s5268_s8 + $0x60] sm:$0xff] (%p5250_p3)  ;;  %v242_v7 = vld [vmem:[%s5268_s8 + $0x68] sm:$0xff] (%p5250_p3) }
  0x15   : > { %v244_v8 = vld [vmem:[%s5268_s8 + $0x80] sm:$0xff]  ;;  %241 = vst [vmem:[%s5273_s9 + $0x30] sm:$0xff] %v240_v6  ;;  %243 = vst [vmem:[%s5273_s9 + $0x38] sm:$0xff] %v242_v7  ;;  %v246_v9 = vld [vmem:[%s5268_s8 + $0x88] sm:$0xff] }
  0x16   : > { %245 = vst [vmem:[%s5273_s9 + $0x40] sm:$0xff] %v244_v8  ;;  %v248_v10 = vld [vmem:[%s5268_s8 + $0xa0] sm:$0xff]  ;;  %v250_v11 = vld [vmem:[%s5268_s8 + $0xa8] sm:$0xff]  ;;  %247 = vst [vmem:[%s5273_s9 + $0x48] sm:$0xff] %v246_v9 }
  0x17   : > { %249 = vst [vmem:[%s5273_s9 + $0x50] sm:$0xff] %v248_v10  ;;  %251 = vst [vmem:[%s5273_s9 + $0x58] sm:$0xff] %v250_v11  ;;  %v252_v12 = vld [vmem:[%s5268_s8 + $0xc0] sm:$0xff]  ;;  %v254_v13 = vld [vmem:[%s5268_s8 + $0xc8] sm:$0xff] }
  0x18   : > { %v256_v14 = vld [vmem:[%s5268_s8 + $0xe0] sm:$0xff]  ;;  %253 = vst [vmem:[%s5273_s9 + $0x60] sm:$0xff] %v252_v12  ;;  %255 = vst [vmem:[%s5273_s9 + $0x68] sm:$0xff] %v254_v13  ;;  %v258_v15 = vld [vmem:[%s5268_s8 + $0xe8] sm:$0xff] }
  0x19   : > { %257 = vst [vmem:[%s5273_s9 + $0x70] sm:$0xff] %v256_v14  ;;  %v260_v16 = vld [vmem:[%s5268_s8 + $0x100] sm:$0xff]  ;;  %v262_v17 = vld [vmem:[%s5268_s8 + $0x108] sm:$0xff]  ;;  %259 = vst [vmem:[%s5273_s9 + $0x78] sm:$0xff] %v258_v15 }
  0x1a   : > { %261 = vst [vmem:[%s5273_s9 + $0x80] sm:$0xff] %v260_v16  ;;  %263 = vst [vmem:[%s5273_s9 + $0x88] sm:$0xff] %v262_v17  ;;  %v264_v18 = vld [vmem:[%s5268_s8 + $0x120] sm:$0xff]  ;;  %v266_v19 = vld [vmem:[%s5268_s8 + $0x128] sm:$0xff] }
  0x1b   : > { %v268_v20 = vld [vmem:[%s5268_s8 + $0x140] sm:$0xff]  ;;  %265 = vst [vmem:[%s5273_s9 + $0x90] sm:$0xff] %v264_v18  ;;  %267 = vst [vmem:[%s5273_s9 + $0x98] sm:$0xff] %v266_v19  ;;  %v270_v21 = vld [vmem:[%s5268_s8 + $0x148] sm:$0xff] }
  0x1c   : > { %269 = vst [vmem:[%s5273_s9 + $0xa0] sm:$0xff] %v268_v20  ;;  %v272_v22 = vld [vmem:[%s5268_s8 + $0x160] sm:$0xff]  ;;  %v274_v23 = vld [vmem:[%s5268_s8 + $0x168] sm:$0xff]  ;;  %271 = vst [vmem:[%s5273_s9 + $0xa8] sm:$0xff] %v270_v21 }
  0x1d   : > { %273 = vst [vmem:[%s5273_s9 + $0xb0] sm:$0xff] %v272_v22  ;;  %275 = vst [vmem:[%s5273_s9 + $0xb8] sm:$0xff] %v274_v23  ;;  %v276_v24 = vld [vmem:[%s5268_s8 + $0x180] sm:$0xff]  ;;  %v278_v25 = vld [vmem:[%s5268_s8 + $0x188] sm:$0xff] }
  0x1e   : > { %v280_v26 = vld [vmem:[%s5268_s8 + $0x1a0] sm:$0xff]  ;;  %277 = vst [vmem:[%s5273_s9 + $0xc0] sm:$0xff] %v276_v24  ;;  %279 = vst [vmem:[%s5273_s9 + $0xc8] sm:$0xff] %v278_v25  ;;  %v282_v27 = vld [vmem:[%s5268_s8 + $0x1a8] sm:$0xff] }
  0x1f   : > { %281 = vst [vmem:[%s5273_s9 + $0xd0] sm:$0xff] %v280_v26  ;;  %v284_v28 = vld [vmem:[%s5268_s8 + $0x1c0] sm:$0xff]  ;;  %v286_v29 = vld [vmem:[%s5268_s8 + $0x1c8] sm:$0xff]  ;;  %283 = vst [vmem:[%s5273_s9 + $0xd8] sm:$0xff] %v282_v27 }
  0x20   : > { %285 = vst [vmem:[%s5273_s9 + $0xe0] sm:$0xff] %v284_v28  ;;  %287 = vst [vmem:[%s5273_s9 + $0xe8] sm:$0xff] %v286_v29  ;;  %v288_v30 = vld [vmem:[%s5268_s8 + $0x1e0] sm:$0xff]  ;;  %v290_v31 = vld [vmem:[%s5268_s8 + $0x1e8] sm:$0xff] }
  0x21   : > { %v292_v32 = vld [vmem:[%s5268_s8 + $0x200] sm:$0xff]  ;;  %289 = vst [vmem:[%s5273_s9 + $0xf0] sm:$0xff] %v288_v30  ;;  %291 = vst [vmem:[%s5273_s9 + $0xf8] sm:$0xff] %v290_v31  ;;  %v294_v33 = vld [vmem:[%s5268_s8 + $0x208] sm:$0xff] }
  0x22   : > { %293 = vst [vmem:[%s5273_s9 + $0x100] sm:$0xff] %v292_v32  ;;  %v296_v34 = vld [vmem:[%s5268_s8 + $0x220] sm:$0xff]  ;;  %v298_v35 = vld [vmem:[%s5268_s8 + $0x228] sm:$0xff]  ;;  %295 = vst [vmem:[%s5273_s9 + $0x108] sm:$0xff] %v294_v33 }
  0x23   : > { %297 = vst [vmem:[%s5273_s9 + $0x110] sm:$0xff] %v296_v34  ;;  %299 = vst [vmem:[%s5273_s9 + $0x118] sm:$0xff] %v298_v35  ;;  %v300_v36 = vld [vmem:[%s5268_s8 + $0x240] sm:$0xff]  ;;  %v302_v37 = vld [vmem:[%s5268_s8 + $0x248] sm:$0xff] }
  0x24   : > { %v304_v38 = vld [vmem:[%s5268_s8 + $0x260] sm:$0xff]  ;;  %301 = vst [vmem:[%s5273_s9 + $0x120] sm:$0xff] %v300_v36  ;;  %303 = vst [vmem:[%s5273_s9 + $0x128] sm:$0xff] %v302_v37  ;;  %v306_v39 = vld [vmem:[%s5268_s8 + $0x268] sm:$0xff] }
  0x25   : > { %305 = vst [vmem:[%s5273_s9 + $0x130] sm:$0xff] %v304_v38  ;;  %v308_v40 = vld [vmem:[%s5268_s8 + $0x280] sm:$0xff]  ;;  %v310_v41 = vld [vmem:[%s5268_s8 + $0x288] sm:$0xff]  ;;  %307 = vst [vmem:[%s5273_s9 + $0x138] sm:$0xff] %v306_v39 }
  0x26   : > { %309 = vst [vmem:[%s5273_s9 + $0x140] sm:$0xff] %v308_v40  ;;  %311 = vst [vmem:[%s5273_s9 + $0x148] sm:$0xff] %v310_v41  ;;  %v312_v42 = vld [vmem:[%s5268_s8 + $0x2a0] sm:$0xff]  ;;  %v314_v43 = vld [vmem:[%s5268_s8 + $0x2a8] sm:$0xff] }
  0x27   : > { %v316_v44 = vld [vmem:[%s5268_s8 + $0x2c0] sm:$0xff]  ;;  %313 = vst [vmem:[%s5273_s9 + $0x150] sm:$0xff] %v312_v42  ;;  %315 = vst [vmem:[%s5273_s9 + $0x158] sm:$0xff] %v314_v43  ;;  %v318_v45 = vld [vmem:[%s5268_s8 + $0x2c8] sm:$0xff] }
  0x28   : > { %317 = vst [vmem:[%s5273_s9 + $0x160] sm:$0xff] %v316_v44  ;;  %v320_v46 = vld [vmem:[%s5268_s8 + $0x2e0] sm:$0xff]  ;;  %v322_v47 = vld [vmem:[%s5268_s8 + $0x2e8] sm:$0xff]  ;;  %319 = vst [vmem:[%s5273_s9 + $0x168] sm:$0xff] %v318_v45 }
  0x29   : > { %321 = vst [vmem:[%s5273_s9 + $0x170] sm:$0xff] %v320_v46  ;;  %323 = vst [vmem:[%s5273_s9 + $0x178] sm:$0xff] %v322_v47  ;;  %v324_v48 = vld [vmem:[%s5268_s8 + $0x300] sm:$0xff]  ;;  %v326_v49 = vld [vmem:[%s5268_s8 + $0x308] sm:$0xff] }
  0x2a   : > { %v328_v50 = vld [vmem:[%s5268_s8 + $0x320] sm:$0xff]  ;;  %325 = vst [vmem:[%s5273_s9 + $0x180] sm:$0xff] %v324_v48  ;;  %327 = vst [vmem:[%s5273_s9 + $0x188] sm:$0xff] %v326_v49  ;;  %v330_v51 = vld [vmem:[%s5268_s8 + $0x328] sm:$0xff] }
  0x2b   : > { %329 = vst [vmem:[%s5273_s9 + $0x190] sm:$0xff] %v328_v50  ;;  %v332_v52 = vld [vmem:[%s5268_s8 + $0x340] sm:$0xff]  ;;  %v334_v53 = vld [vmem:[%s5268_s8 + $0x348] sm:$0xff]  ;;  %331 = vst [vmem:[%s5273_s9 + $0x198] sm:$0xff] %v330_v51 }
  0x2c   : > { %333 = vst [vmem:[%s5273_s9 + $0x1a0] sm:$0xff] %v332_v52  ;;  %335 = vst [vmem:[%s5273_s9 + $0x1a8] sm:$0xff] %v334_v53  ;;  %v336_v54 = vld [vmem:[%s5268_s8 + $0x360] sm:$0xff]  ;;  %v338_v55 = vld [vmem:[%s5268_s8 + $0x368] sm:$0xff] }
  0x2d   : > { %v340_v56 = vld [vmem:[%s5268_s8 + $0x380] sm:$0xff]  ;;  %337 = vst [vmem:[%s5273_s9 + $0x1b0] sm:$0xff] %v336_v54  ;;  %339 = vst [vmem:[%s5273_s9 + $0x1b8] sm:$0xff] %v338_v55  ;;  %v342_v57 = vld [vmem:[%s5268_s8 + $0x388] sm:$0xff] }
  0x2e   : > { %341 = vst [vmem:[%s5273_s9 + $0x1c0] sm:$0xff] %v340_v56  ;;  %v344_v58 = vld [vmem:[%s5268_s8 + $0x3a0] sm:$0xff]  ;;  %v346_v59 = vld [vmem:[%s5268_s8 + $0x3a8] sm:$0xff]  ;;  %343 = vst [vmem:[%s5273_s9 + $0x1c8] sm:$0xff] %v342_v57 }
  0x2f   : > { %345 = vst [vmem:[%s5273_s9 + $0x1d0] sm:$0xff] %v344_v58  ;;  %347 = vst [vmem:[%s5273_s9 + $0x1d8] sm:$0xff] %v346_v59  ;;  %v348_v60 = vld [vmem:[%s5268_s8 + $0x3c0] sm:$0xff]  ;;  %v350_v61 = vld [vmem:[%s5268_s8 + $0x3c8] sm:$0xff] }
  0x30   : > { %v352_v62 = vld [vmem:[%s5268_s8 + $0x3e0] sm:$0xff]  ;;  %349 = vst [vmem:[%s5273_s9 + $0x1e0] sm:$0xff] %v348_v60  ;;  %351 = vst [vmem:[%s5273_s9 + $0x1e8] sm:$0xff] %v350_v61  ;;  %v354_v63 = vld [vmem:[%s5268_s8 + $0x3e8] sm:$0xff] }
  0x31   : > { %353 = vst [vmem:[%s5273_s9 + $0x1f0] sm:$0xff] %v352_v62  ;;  %v356_v0 = vld [vmem:[%s5268_s8 + $0x400] sm:$0xff]  ;;  %v358_v1 = vld [vmem:[%s5268_s8 + $0x408] sm:$0xff]  ;;  %355 = vst [vmem:[%s5273_s9 + $0x1f8] sm:$0xff] %v354_v63 }
  0x32   : > { %357 = vst [vmem:[%s5273_s9 + $0x200] sm:$0xff] %v356_v0  ;;  %359 = vst [vmem:[%s5273_s9 + $0x208] sm:$0xff] %v358_v1  ;;  %v360_v2 = vld [vmem:[%s5268_s8 + $0x420] sm:$0xff]  ;;  %v362_v3 = vld [vmem:[%s5268_s8 + $0x428] sm:$0xff] }
  0x33   : > { %v364_v4 = vld [vmem:[%s5268_s8 + $0x440] sm:$0xff]  ;;  %361 = vst [vmem:[%s5273_s9 + $0x210] sm:$0xff] %v360_v2  ;;  %363 = vst [vmem:[%s5273_s9 + $0x218] sm:$0xff] %v362_v3  ;;  %v366_v5 = vld [vmem:[%s5268_s8 + $0x448] sm:$0xff] }
  0x34   : > { %365 = vst [vmem:[%s5273_s9 + $0x220] sm:$0xff] %v364_v4  ;;  %v368_v6 = vld [vmem:[%s5268_s8 + $0x460] sm:$0xff]  ;;  %v370_v7 = vld [vmem:[%s5268_s8 + $0x468] sm:$0xff]  ;;  %367 = vst [vmem:[%s5273_s9 + $0x228] sm:$0xff] %v366_v5 }
  0x35   : > { %369 = vst [vmem:[%s5273_s9 + $0x230] sm:$0xff] %v368_v6  ;;  %371 = vst [vmem:[%s5273_s9 + $0x238] sm:$0xff] %v370_v7  ;;  %v372_v8 = vld [vmem:[%s5268_s8 + $0x480] sm:$0xff]  ;;  %v374_v9 = vld [vmem:[%s5268_s8 + $0x488] sm:$0xff] }
  0x36   : > { %v376_v10 = vld [vmem:[%s5268_s8 + $0x4a0] sm:$0xff]  ;;  %373 = vst [vmem:[%s5273_s9 + $0x240] sm:$0xff] %v372_v8  ;;  %375 = vst [vmem:[%s5273_s9 + $0x248] sm:$0xff] %v374_v9  ;;  %v378_v11 = vld [vmem:[%s5268_s8 + $0x4a8] sm:$0xff] }
  0x37   : > { %377 = vst [vmem:[%s5273_s9 + $0x250] sm:$0xff] %v376_v10  ;;  %v380_v12 = vld [vmem:[%s5268_s8 + $0x4c0] sm:$0xff]  ;;  %v382_v13 = vld [vmem:[%s5268_s8 + $0x4c8] sm:$0xff]  ;;  %379 = vst [vmem:[%s5273_s9 + $0x258] sm:$0xff] %v378_v11 }
  0x38   : > { %381 = vst [vmem:[%s5273_s9 + $0x260] sm:$0xff] %v380_v12  ;;  %383 = vst [vmem:[%s5273_s9 + $0x268] sm:$0xff] %v382_v13  ;;  %v384_v14 = vld [vmem:[%s5268_s8 + $0x4e0] sm:$0xff]  ;;  %v386_v15 = vld [vmem:[%s5268_s8 + $0x4e8] sm:$0xff] }
  0x39   : > { %v388_v16 = vld [vmem:[%s5268_s8 + $0x500] sm:$0xff]  ;;  %385 = vst [vmem:[%s5273_s9 + $0x270] sm:$0xff] %v384_v14  ;;  %387 = vst [vmem:[%s5273_s9 + $0x278] sm:$0xff] %v386_v15  ;;  %v390_v17 = vld [vmem:[%s5268_s8 + $0x508] sm:$0xff] }
  0x3a   : > { %389 = vst [vmem:[%s5273_s9 + $0x280] sm:$0xff] %v388_v16  ;;  %v392_v18 = vld [vmem:[%s5268_s8 + $0x520] sm:$0xff]  ;;  %v394_v19 = vld [vmem:[%s5268_s8 + $0x528] sm:$0xff]  ;;  %391 = vst [vmem:[%s5273_s9 + $0x288] sm:$0xff] %v390_v17 }
  0x3b   : > { %393 = vst [vmem:[%s5273_s9 + $0x290] sm:$0xff] %v392_v18  ;;  %395 = vst [vmem:[%s5273_s9 + $0x298] sm:$0xff] %v394_v19  ;;  %v396_v20 = vld [vmem:[%s5268_s8 + $0x540] sm:$0xff]  ;;  %v398_v21 = vld [vmem:[%s5268_s8 + $0x548] sm:$0xff] }
  0x3c   : > { %v400_v22 = vld [vmem:[%s5268_s8 + $0x560] sm:$0xff]  ;;  %397 = vst [vmem:[%s5273_s9 + $0x2a0] sm:$0xff] %v396_v20  ;;  %399 = vst [vmem:[%s5273_s9 + $0x2a8] sm:$0xff] %v398_v21  ;;  %v402_v23 = vld [vmem:[%s5268_s8 + $0x568] sm:$0xff] }
  0x3d   : > { %401 = vst [vmem:[%s5273_s9 + $0x2b0] sm:$0xff] %v400_v22  ;;  %v404_v24 = vld [vmem:[%s5268_s8 + $0x580] sm:$0xff]  ;;  %v406_v25 = vld [vmem:[%s5268_s8 + $0x588] sm:$0xff]  ;;  %403 = vst [vmem:[%s5273_s9 + $0x2b8] sm:$0xff] %v402_v23 }
  0x3e   : > { %405 = vst [vmem:[%s5273_s9 + $0x2c0] sm:$0xff] %v404_v24  ;;  %407 = vst [vmem:[%s5273_s9 + $0x2c8] sm:$0xff] %v406_v25  ;;  %v408_v26 = vld [vmem:[%s5268_s8 + $0x5a0] sm:$0xff]  ;;  %v410_v27 = vld [vmem:[%s5268_s8 + $0x5a8] sm:$0xff] }
  0x3f   : > { %v412_v28 = vld [vmem:[%s5268_s8 + $0x5c0] sm:$0xff]  ;;  %409 = vst [vmem:[%s5273_s9 + $0x2d0] sm:$0xff] %v408_v26  ;;  %411 = vst [vmem:[%s5273_s9 + $0x2d8] sm:$0xff] %v410_v27  ;;  %v414_v29 = vld [vmem:[%s5268_s8 + $0x5c8] sm:$0xff] }
  0x40   : > { %413 = vst [vmem:[%s5273_s9 + $0x2e0] sm:$0xff] %v412_v28  ;;  %v416_v30 = vld [vmem:[%s5268_s8 + $0x5e0] sm:$0xff]  ;;  %v418_v31 = vld [vmem:[%s5268_s8 + $0x5e8] sm:$0xff]  ;;  %415 = vst [vmem:[%s5273_s9 + $0x2e8] sm:$0xff] %v414_v29 }
  0x41   : > { %417 = vst [vmem:[%s5273_s9 + $0x2f0] sm:$0xff] %v416_v30  ;;  %419 = vst [vmem:[%s5273_s9 + $0x2f8] sm:$0xff] %v418_v31  ;;  %v420_v32 = vld [vmem:[%s5268_s8 + $0x600] sm:$0xff]  ;;  %v422_v33 = vld [vmem:[%s5268_s8 + $0x608] sm:$0xff] }
  0x42   : > { %v424_v34 = vld [vmem:[%s5268_s8 + $0x620] sm:$0xff]  ;;  %421 = vst [vmem:[%s5273_s9 + $0x300] sm:$0xff] %v420_v32  ;;  %423 = vst [vmem:[%s5273_s9 + $0x308] sm:$0xff] %v422_v33  ;;  %v426_v35 = vld [vmem:[%s5268_s8 + $0x628] sm:$0xff] }
  0x43   : > { %425 = vst [vmem:[%s5273_s9 + $0x310] sm:$0xff] %v424_v34  ;;  %v428_v36 = vld [vmem:[%s5268_s8 + $0x640] sm:$0xff]  ;;  %v430_v37 = vld [vmem:[%s5268_s8 + $0x648] sm:$0xff]  ;;  %427 = vst [vmem:[%s5273_s9 + $0x318] sm:$0xff] %v426_v35 }
  0x44   : > { %429 = vst [vmem:[%s5273_s9 + $0x320] sm:$0xff] %v428_v36  ;;  %431 = vst [vmem:[%s5273_s9 + $0x328] sm:$0xff] %v430_v37  ;;  %v432_v38 = vld [vmem:[%s5268_s8 + $0x660] sm:$0xff]  ;;  %v434_v39 = vld [vmem:[%s5268_s8 + $0x668] sm:$0xff] }
  0x45   : > { %v436_v40 = vld [vmem:[%s5268_s8 + $0x680] sm:$0xff]  ;;  %433 = vst [vmem:[%s5273_s9 + $0x330] sm:$0xff] %v432_v38  ;;  %435 = vst [vmem:[%s5273_s9 + $0x338] sm:$0xff] %v434_v39  ;;  %v438_v41 = vld [vmem:[%s5268_s8 + $0x688] sm:$0xff] }
  0x46   : > { %437 = vst [vmem:[%s5273_s9 + $0x340] sm:$0xff] %v436_v40  ;;  %v440_v42 = vld [vmem:[%s5268_s8 + $0x6a0] sm:$0xff]  ;;  %v442_v43 = vld [vmem:[%s5268_s8 + $0x6a8] sm:$0xff]  ;;  %439 = vst [vmem:[%s5273_s9 + $0x348] sm:$0xff] %v438_v41 }
  0x47   : > { %441 = vst [vmem:[%s5273_s9 + $0x350] sm:$0xff] %v440_v42  ;;  %443 = vst [vmem:[%s5273_s9 + $0x358] sm:$0xff] %v442_v43  ;;  %v444_v44 = vld [vmem:[%s5268_s8 + $0x6c0] sm:$0xff]  ;;  %v446_v45 = vld [vmem:[%s5268_s8 + $0x6c8] sm:$0xff] }
  0x48   : > { %v448_v46 = vld [vmem:[%s5268_s8 + $0x6e0] sm:$0xff]  ;;  %445 = vst [vmem:[%s5273_s9 + $0x360] sm:$0xff] %v444_v44  ;;  %447 = vst [vmem:[%s5273_s9 + $0x368] sm:$0xff] %v446_v45  ;;  %v450_v47 = vld [vmem:[%s5268_s8 + $0x6e8] sm:$0xff] }
  0x49   : > { %449 = vst [vmem:[%s5273_s9 + $0x370] sm:$0xff] %v448_v46  ;;  %v452_v48 = vld [vmem:[%s5268_s8 + $0x700] sm:$0xff]  ;;  %v454_v49 = vld [vmem:[%s5268_s8 + $0x708] sm:$0xff]  ;;  %451 = vst [vmem:[%s5273_s9 + $0x378] sm:$0xff] %v450_v47 }
  0x4a   : > { %453 = vst [vmem:[%s5273_s9 + $0x380] sm:$0xff] %v452_v48  ;;  %455 = vst [vmem:[%s5273_s9 + $0x388] sm:$0xff] %v454_v49  ;;  %v456_v50 = vld [vmem:[%s5268_s8 + $0x720] sm:$0xff]  ;;  %v458_v51 = vld [vmem:[%s5268_s8 + $0x728] sm:$0xff] }
  0x4b   : > { %v460_v52 = vld [vmem:[%s5268_s8 + $0x740] sm:$0xff]  ;;  %457 = vst [vmem:[%s5273_s9 + $0x390] sm:$0xff] %v456_v50  ;;  %459 = vst [vmem:[%s5273_s9 + $0x398] sm:$0xff] %v458_v51  ;;  %v462_v53 = vld [vmem:[%s5268_s8 + $0x748] sm:$0xff] }
  0x4c   : > { %461 = vst [vmem:[%s5273_s9 + $0x3a0] sm:$0xff] %v460_v52  ;;  %v464_v54 = vld [vmem:[%s5268_s8 + $0x760] sm:$0xff]  ;;  %v466_v55 = vld [vmem:[%s5268_s8 + $0x768] sm:$0xff]  ;;  %463 = vst [vmem:[%s5273_s9 + $0x3a8] sm:$0xff] %v462_v53 }
  0x4d   : > { %465 = vst [vmem:[%s5273_s9 + $0x3b0] sm:$0xff] %v464_v54  ;;  %467 = vst [vmem:[%s5273_s9 + $0x3b8] sm:$0xff] %v466_v55  ;;  %v468_v56 = vld [vmem:[%s5268_s8 + $0x780] sm:$0xff]  ;;  %v470_v57 = vld [vmem:[%s5268_s8 + $0x788] sm:$0xff] }
  0x4e   : > { %v472_v58 = vld [vmem:[%s5268_s8 + $0x7a0] sm:$0xff]  ;;  %469 = vst [vmem:[%s5273_s9 + $0x3c0] sm:$0xff] %v468_v56  ;;  %471 = vst [vmem:[%s5273_s9 + $0x3c8] sm:$0xff] %v470_v57  ;;  %v474_v59 = vld [vmem:[%s5268_s8 + $0x7a8] sm:$0xff] }
  0x4f   : > { %473 = vst [vmem:[%s5273_s9 + $0x3d0] sm:$0xff] %v472_v58  ;;  %v476_v60 = vld [vmem:[%s5268_s8 + $0x7c0] sm:$0xff]  ;;  %v478_v61 = vld [vmem:[%s5268_s8 + $0x7c8] sm:$0xff]  ;;  %475 = vst [vmem:[%s5273_s9 + $0x3d8] sm:$0xff] %v474_v59 }
  0x50   : > { %477 = vst [vmem:[%s5273_s9 + $0x3e0] sm:$0xff] %v476_v60  ;;  %479 = vst [vmem:[%s5273_s9 + $0x3e8] sm:$0xff] %v478_v61  ;;  %v480_v62 = vld [vmem:[%s5268_s8 + $0x7e0] sm:$0xff]  ;;  %v482_v63 = vld [vmem:[%s5268_s8 + $0x7e8] sm:$0xff] }
  0x51   : > { %481 = vst [vmem:[%s5273_s9 + $0x3f0] sm:$0xff] %v480_v62  ;;  %483 = vst [vmem:[%s5273_s9 + $0x3f8] sm:$0xff] %v482_v63 }
  0x52 PF: > { %489 = sbr.rel (!%p5250_p3) target bundleno = 150 (0x96), region = 51  ;;  %s491_s10 = sand.u32 (%p5250_p3), 1, %s5174_s19  }
  0x53   : > { %s4465_s11 = sshll.u32 (%p5250_p3), %s5182_s21, 4  ;;  %s4053_s12 = sshll.u32 (%p5250_p3), %s491_s10, 10 }
  0x54   : > { %s5535_s15 = scalar_lea.vmem (%p5250_p3), %s6311_s3, %s4465_s11  ;;  %s5540_s16 = scalar_lea.vmem (%p5250_p3), [#allocation5], %s4053_s12 }
  0x55   : > { %v509_v0 = vld [vmem:[%s5535_s15] sm:$0xff] (%p5250_p3)  ;;  %v511_v1 = vld [vmem:[%s5535_s15 + $0x8] sm:$0xff] (%p5250_p3) }
  0x56   : > { %v513_v2 = vld [vmem:[%s5535_s15 + $0x20] sm:$0xff] (%p5250_p3)  ;;  %510 = vst [vmem:[%s5540_s16] sm:$0xff] (%p5250_p3), %v509_v0  ;;  %512 = vst [vmem:[%s5540_s16 + $0x8] sm:$0xff] (%p5250_p3), %v511_v1  ;;  %v515_v3 = vld [vmem:[%s5535_s15 + $0x28] sm:$0xff] (%p5250_p3) }
  0x57   : > { %514 = vst [vmem:[%s5540_s16 + $0x10] sm:$0xff] (%p5250_p3), %v513_v2  ;;  %v517_v4 = vld [vmem:[%s5535_s15 + $0x40] sm:$0xff] (%p5250_p3)  ;;  %v519_v5 = vld [vmem:[%s5535_s15 + $0x48] sm:$0xff] (%p5250_p3)  ;;  %516 = vst [vmem:[%s5540_s16 + $0x18] sm:$0xff] (%p5250_p3), %v515_v3 }
  0x58   : > { %518 = vst [vmem:[%s5540_s16 + $0x20] sm:$0xff] (%p5250_p3), %v517_v4  ;;  %520 = vst [vmem:[%s5540_s16 + $0x28] sm:$0xff] (%p5250_p3), %v519_v5  ;;  %v521_v6 = vld [vmem:[%s5535_s15 + $0x60] sm:$0xff] (%p5250_p3)  ;;  %v523_v7 = vld [vmem:[%s5535_s15 + $0x68] sm:$0xff] (%p5250_p3) }
  0x59   : > { %v525_v8 = vld [vmem:[%s5535_s15 + $0x80] sm:$0xff]  ;;  %522 = vst [vmem:[%s5540_s16 + $0x30] sm:$0xff] %v521_v6  ;;  %524 = vst [vmem:[%s5540_s16 + $0x38] sm:$0xff] %v523_v7  ;;  %v527_v9 = vld [vmem:[%s5535_s15 + $0x88] sm:$0xff] }
  0x5a   : > { %526 = vst [vmem:[%s5540_s16 + $0x40] sm:$0xff] %v525_v8  ;;  %v529_v10 = vld [vmem:[%s5535_s15 + $0xa0] sm:$0xff]  ;;  %v531_v11 = vld [vmem:[%s5535_s15 + $0xa8] sm:$0xff]  ;;  %528 = vst [vmem:[%s5540_s16 + $0x48] sm:$0xff] %v527_v9 }
  0x5b   : > { %530 = vst [vmem:[%s5540_s16 + $0x50] sm:$0xff] %v529_v10  ;;  %532 = vst [vmem:[%s5540_s16 + $0x58] sm:$0xff] %v531_v11  ;;  %v533_v12 = vld [vmem:[%s5535_s15 + $0xc0] sm:$0xff]  ;;  %v535_v13 = vld [vmem:[%s5535_s15 + $0xc8] sm:$0xff] }
  0x5c   : > { %v537_v14 = vld [vmem:[%s5535_s15 + $0xe0] sm:$0xff]  ;;  %534 = vst [vmem:[%s5540_s16 + $0x60] sm:$0xff] %v533_v12  ;;  %536 = vst [vmem:[%s5540_s16 + $0x68] sm:$0xff] %v535_v13  ;;  %v539_v15 = vld [vmem:[%s5535_s15 + $0xe8] sm:$0xff] }
  0x5d   : > { %538 = vst [vmem:[%s5540_s16 + $0x70] sm:$0xff] %v537_v14  ;;  %v541_v16 = vld [vmem:[%s5535_s15 + $0x100] sm:$0xff]  ;;  %v543_v17 = vld [vmem:[%s5535_s15 + $0x108] sm:$0xff]  ;;  %540 = vst [vmem:[%s5540_s16 + $0x78] sm:$0xff] %v539_v15 }
  0x5e   : > { %542 = vst [vmem:[%s5540_s16 + $0x80] sm:$0xff] %v541_v16  ;;  %544 = vst [vmem:[%s5540_s16 + $0x88] sm:$0xff] %v543_v17  ;;  %v545_v18 = vld [vmem:[%s5535_s15 + $0x120] sm:$0xff]  ;;  %v547_v19 = vld [vmem:[%s5535_s15 + $0x128] sm:$0xff] }
  0x5f   : > { %v549_v20 = vld [vmem:[%s5535_s15 + $0x140] sm:$0xff]  ;;  %546 = vst [vmem:[%s5540_s16 + $0x90] sm:$0xff] %v545_v18  ;;  %548 = vst [vmem:[%s5540_s16 + $0x98] sm:$0xff] %v547_v19  ;;  %v551_v21 = vld [vmem:[%s5535_s15 + $0x148] sm:$0xff] }
  0x60   : > { %550 = vst [vmem:[%s5540_s16 + $0xa0] sm:$0xff] %v549_v20  ;;  %v553_v22 = vld [vmem:[%s5535_s15 + $0x160] sm:$0xff]  ;;  %v555_v23 = vld [vmem:[%s5535_s15 + $0x168] sm:$0xff]  ;;  %552 = vst [vmem:[%s5540_s16 + $0xa8] sm:$0xff] %v551_v21 }
  0x61   : > { %554 = vst [vmem:[%s5540_s16 + $0xb0] sm:$0xff] %v553_v22  ;;  %556 = vst [vmem:[%s5540_s16 + $0xb8] sm:$0xff] %v555_v23  ;;  %v557_v24 = vld [vmem:[%s5535_s15 + $0x180] sm:$0xff]  ;;  %v559_v25 = vld [vmem:[%s5535_s15 + $0x188] sm:$0xff] }
  0x62   : > { %v561_v26 = vld [vmem:[%s5535_s15 + $0x1a0] sm:$0xff]  ;;  %558 = vst [vmem:[%s5540_s16 + $0xc0] sm:$0xff] %v557_v24  ;;  %560 = vst [vmem:[%s5540_s16 + $0xc8] sm:$0xff] %v559_v25  ;;  %v563_v27 = vld [vmem:[%s5535_s15 + $0x1a8] sm:$0xff] }
  0x63   : > { %562 = vst [vmem:[%s5540_s16 + $0xd0] sm:$0xff] %v561_v26  ;;  %v565_v28 = vld [vmem:[%s5535_s15 + $0x1c0] sm:$0xff]  ;;  %v567_v29 = vld [vmem:[%s5535_s15 + $0x1c8] sm:$0xff]  ;;  %564 = vst [vmem:[%s5540_s16 + $0xd8] sm:$0xff] %v563_v27 }
  0x64   : > { %566 = vst [vmem:[%s5540_s16 + $0xe0] sm:$0xff] %v565_v28  ;;  %568 = vst [vmem:[%s5540_s16 + $0xe8] sm:$0xff] %v567_v29  ;;  %v569_v30 = vld [vmem:[%s5535_s15 + $0x1e0] sm:$0xff]  ;;  %v571_v31 = vld [vmem:[%s5535_s15 + $0x1e8] sm:$0xff] }
  0x65   : > { %v573_v32 = vld [vmem:[%s5535_s15 + $0x200] sm:$0xff]  ;;  %570 = vst [vmem:[%s5540_s16 + $0xf0] sm:$0xff] %v569_v30  ;;  %572 = vst [vmem:[%s5540_s16 + $0xf8] sm:$0xff] %v571_v31  ;;  %v575_v33 = vld [vmem:[%s5535_s15 + $0x208] sm:$0xff] }
  0x66   : > { %574 = vst [vmem:[%s5540_s16 + $0x100] sm:$0xff] %v573_v32  ;;  %v577_v34 = vld [vmem:[%s5535_s15 + $0x220] sm:$0xff]  ;;  %v579_v35 = vld [vmem:[%s5535_s15 + $0x228] sm:$0xff]  ;;  %576 = vst [vmem:[%s5540_s16 + $0x108] sm:$0xff] %v575_v33 }
  0x67   : > { %578 = vst [vmem:[%s5540_s16 + $0x110] sm:$0xff] %v577_v34  ;;  %580 = vst [vmem:[%s5540_s16 + $0x118] sm:$0xff] %v579_v35  ;;  %v581_v36 = vld [vmem:[%s5535_s15 + $0x240] sm:$0xff]  ;;  %v583_v37 = vld [vmem:[%s5535_s15 + $0x248] sm:$0xff] }
  0x68   : > { %v585_v38 = vld [vmem:[%s5535_s15 + $0x260] sm:$0xff]  ;;  %582 = vst [vmem:[%s5540_s16 + $0x120] sm:$0xff] %v581_v36  ;;  %584 = vst [vmem:[%s5540_s16 + $0x128] sm:$0xff] %v583_v37  ;;  %v587_v39 = vld [vmem:[%s5535_s15 + $0x268] sm:$0xff] }
  0x69   : > { %586 = vst [vmem:[%s5540_s16 + $0x130] sm:$0xff] %v585_v38  ;;  %v589_v40 = vld [vmem:[%s5535_s15 + $0x280] sm:$0xff]  ;;  %v591_v41 = vld [vmem:[%s5535_s15 + $0x288] sm:$0xff]  ;;  %588 = vst [vmem:[%s5540_s16 + $0x138] sm:$0xff] %v587_v39 }
  0x6a   : > { %590 = vst [vmem:[%s5540_s16 + $0x140] sm:$0xff] %v589_v40  ;;  %592 = vst [vmem:[%s5540_s16 + $0x148] sm:$0xff] %v591_v41  ;;  %v593_v42 = vld [vmem:[%s5535_s15 + $0x2a0] sm:$0xff]  ;;  %v595_v43 = vld [vmem:[%s5535_s15 + $0x2a8] sm:$0xff] }
  0x6b   : > { %v597_v44 = vld [vmem:[%s5535_s15 + $0x2c0] sm:$0xff]  ;;  %594 = vst [vmem:[%s5540_s16 + $0x150] sm:$0xff] %v593_v42  ;;  %596 = vst [vmem:[%s5540_s16 + $0x158] sm:$0xff] %v595_v43  ;;  %v599_v45 = vld [vmem:[%s5535_s15 + $0x2c8] sm:$0xff] }
  0x6c   : > { %598 = vst [vmem:[%s5540_s16 + $0x160] sm:$0xff] %v597_v44  ;;  %v601_v46 = vld [vmem:[%s5535_s15 + $0x2e0] sm:$0xff]  ;;  %v603_v47 = vld [vmem:[%s5535_s15 + $0x2e8] sm:$0xff]  ;;  %600 = vst [vmem:[%s5540_s16 + $0x168] sm:$0xff] %v599_v45 }
  0x6d   : > { %602 = vst [vmem:[%s5540_s16 + $0x170] sm:$0xff] %v601_v46  ;;  %604 = vst [vmem:[%s5540_s16 + $0x178] sm:$0xff] %v603_v47  ;;  %v605_v48 = vld [vmem:[%s5535_s15 + $0x300] sm:$0xff]  ;;  %v607_v49 = vld [vmem:[%s5535_s15 + $0x308] sm:$0xff] }
  0x6e   : > { %v609_v50 = vld [vmem:[%s5535_s15 + $0x320] sm:$0xff]  ;;  %606 = vst [vmem:[%s5540_s16 + $0x180] sm:$0xff] %v605_v48  ;;  %608 = vst [vmem:[%s5540_s16 + $0x188] sm:$0xff] %v607_v49  ;;  %v611_v51 = vld [vmem:[%s5535_s15 + $0x328] sm:$0xff] }
  0x6f   : > { %610 = vst [vmem:[%s5540_s16 + $0x190] sm:$0xff] %v609_v50  ;;  %v613_v52 = vld [vmem:[%s5535_s15 + $0x340] sm:$0xff]  ;;  %v615_v53 = vld [vmem:[%s5535_s15 + $0x348] sm:$0xff]  ;;  %612 = vst [vmem:[%s5540_s16 + $0x198] sm:$0xff] %v611_v51 }
  0x70   : > { %614 = vst [vmem:[%s5540_s16 + $0x1a0] sm:$0xff] %v613_v52  ;;  %616 = vst [vmem:[%s5540_s16 + $0x1a8] sm:$0xff] %v615_v53  ;;  %v617_v54 = vld [vmem:[%s5535_s15 + $0x360] sm:$0xff]  ;;  %v619_v55 = vld [vmem:[%s5535_s15 + $0x368] sm:$0xff] }
  0x71   : > { %v621_v56 = vld [vmem:[%s5535_s15 + $0x380] sm:$0xff]  ;;  %618 = vst [vmem:[%s5540_s16 + $0x1b0] sm:$0xff] %v617_v54  ;;  %620 = vst [vmem:[%s5540_s16 + $0x1b8] sm:$0xff] %v619_v55  ;;  %v623_v57 = vld [vmem:[%s5535_s15 + $0x388] sm:$0xff] }
  0x72   : > { %622 = vst [vmem:[%s5540_s16 + $0x1c0] sm:$0xff] %v621_v56  ;;  %v625_v58 = vld [vmem:[%s5535_s15 + $0x3a0] sm:$0xff]  ;;  %v627_v59 = vld [vmem:[%s5535_s15 + $0x3a8] sm:$0xff]  ;;  %624 = vst [vmem:[%s5540_s16 + $0x1c8] sm:$0xff] %v623_v57 }
  0x73   : > { %626 = vst [vmem:[%s5540_s16 + $0x1d0] sm:$0xff] %v625_v58  ;;  %628 = vst [vmem:[%s5540_s16 + $0x1d8] sm:$0xff] %v627_v59  ;;  %v629_v60 = vld [vmem:[%s5535_s15 + $0x3c0] sm:$0xff]  ;;  %v631_v61 = vld [vmem:[%s5535_s15 + $0x3c8] sm:$0xff] }
  0x74   : > { %v633_v62 = vld [vmem:[%s5535_s15 + $0x3e0] sm:$0xff]  ;;  %630 = vst [vmem:[%s5540_s16 + $0x1e0] sm:$0xff] %v629_v60  ;;  %632 = vst [vmem:[%s5540_s16 + $0x1e8] sm:$0xff] %v631_v61  ;;  %v635_v63 = vld [vmem:[%s5535_s15 + $0x3e8] sm:$0xff] }
  0x75   : > { %634 = vst [vmem:[%s5540_s16 + $0x1f0] sm:$0xff] %v633_v62  ;;  %v637_v0 = vld [vmem:[%s5535_s15 + $0x400] sm:$0xff]  ;;  %v639_v1 = vld [vmem:[%s5535_s15 + $0x408] sm:$0xff]  ;;  %636 = vst [vmem:[%s5540_s16 + $0x1f8] sm:$0xff] %v635_v63 }
  0x76   : > { %638 = vst [vmem:[%s5540_s16 + $0x200] sm:$0xff] %v637_v0  ;;  %640 = vst [vmem:[%s5540_s16 + $0x208] sm:$0xff] %v639_v1  ;;  %v641_v2 = vld [vmem:[%s5535_s15 + $0x420] sm:$0xff]  ;;  %v643_v3 = vld [vmem:[%s5535_s15 + $0x428] sm:$0xff] }
  0x77   : > { %v645_v4 = vld [vmem:[%s5535_s15 + $0x440] sm:$0xff]  ;;  %642 = vst [vmem:[%s5540_s16 + $0x210] sm:$0xff] %v641_v2  ;;  %644 = vst [vmem:[%s5540_s16 + $0x218] sm:$0xff] %v643_v3  ;;  %v647_v5 = vld [vmem:[%s5535_s15 + $0x448] sm:$0xff] }
  0x78   : > { %646 = vst [vmem:[%s5540_s16 + $0x220] sm:$0xff] %v645_v4  ;;  %v649_v6 = vld [vmem:[%s5535_s15 + $0x460] sm:$0xff]  ;;  %v651_v7 = vld [vmem:[%s5535_s15 + $0x468] sm:$0xff]  ;;  %648 = vst [vmem:[%s5540_s16 + $0x228] sm:$0xff] %v647_v5 }
  0x79   : > { %650 = vst [vmem:[%s5540_s16 + $0x230] sm:$0xff] %v649_v6  ;;  %652 = vst [vmem:[%s5540_s16 + $0x238] sm:$0xff] %v651_v7  ;;  %v653_v8 = vld [vmem:[%s5535_s15 + $0x480] sm:$0xff]  ;;  %v655_v9 = vld [vmem:[%s5535_s15 + $0x488] sm:$0xff] }
  0x7a   : > { %v657_v10 = vld [vmem:[%s5535_s15 + $0x4a0] sm:$0xff]  ;;  %654 = vst [vmem:[%s5540_s16 + $0x240] sm:$0xff] %v653_v8  ;;  %656 = vst [vmem:[%s5540_s16 + $0x248] sm:$0xff] %v655_v9  ;;  %v659_v11 = vld [vmem:[%s5535_s15 + $0x4a8] sm:$0xff] }
  0x7b   : > { %658 = vst [vmem:[%s5540_s16 + $0x250] sm:$0xff] %v657_v10  ;;  %v661_v12 = vld [vmem:[%s5535_s15 + $0x4c0] sm:$0xff]  ;;  %v663_v13 = vld [vmem:[%s5535_s15 + $0x4c8] sm:$0xff]  ;;  %660 = vst [vmem:[%s5540_s16 + $0x258] sm:$0xff] %v659_v11 }
  0x7c   : > { %662 = vst [vmem:[%s5540_s16 + $0x260] sm:$0xff] %v661_v12  ;;  %664 = vst [vmem:[%s5540_s16 + $0x268] sm:$0xff] %v663_v13  ;;  %v665_v14 = vld [vmem:[%s5535_s15 + $0x4e0] sm:$0xff]  ;;  %v667_v15 = vld [vmem:[%s5535_s15 + $0x4e8] sm:$0xff] }
  0x7d   : > { %v669_v16 = vld [vmem:[%s5535_s15 + $0x500] sm:$0xff]  ;;  %666 = vst [vmem:[%s5540_s16 + $0x270] sm:$0xff] %v665_v14  ;;  %668 = vst [vmem:[%s5540_s16 + $0x278] sm:$0xff] %v667_v15  ;;  %v671_v17 = vld [vmem:[%s5535_s15 + $0x508] sm:$0xff] }
  0x7e   : > { %670 = vst [vmem:[%s5540_s16 + $0x280] sm:$0xff] %v669_v16  ;;  %v673_v18 = vld [vmem:[%s5535_s15 + $0x520] sm:$0xff]  ;;  %v675_v19 = vld [vmem:[%s5535_s15 + $0x528] sm:$0xff]  ;;  %672 = vst [vmem:[%s5540_s16 + $0x288] sm:$0xff] %v671_v17 }
  0x7f   : > { %674 = vst [vmem:[%s5540_s16 + $0x290] sm:$0xff] %v673_v18  ;;  %676 = vst [vmem:[%s5540_s16 + $0x298] sm:$0xff] %v675_v19  ;;  %v677_v20 = vld [vmem:[%s5535_s15 + $0x540] sm:$0xff]  ;;  %v679_v21 = vld [vmem:[%s5535_s15 + $0x548] sm:$0xff] }
  0x80   : > { %v681_v22 = vld [vmem:[%s5535_s15 + $0x560] sm:$0xff]  ;;  %678 = vst [vmem:[%s5540_s16 + $0x2a0] sm:$0xff] %v677_v20  ;;  %680 = vst [vmem:[%s5540_s16 + $0x2a8] sm:$0xff] %v679_v21  ;;  %v683_v23 = vld [vmem:[%s5535_s15 + $0x568] sm:$0xff] }
  0x81   : > { %682 = vst [vmem:[%s5540_s16 + $0x2b0] sm:$0xff] %v681_v22  ;;  %v685_v24 = vld [vmem:[%s5535_s15 + $0x580] sm:$0xff]  ;;  %v687_v25 = vld [vmem:[%s5535_s15 + $0x588] sm:$0xff]  ;;  %684 = vst [vmem:[%s5540_s16 + $0x2b8] sm:$0xff] %v683_v23 }
  0x82   : > { %686 = vst [vmem:[%s5540_s16 + $0x2c0] sm:$0xff] %v685_v24  ;;  %688 = vst [vmem:[%s5540_s16 + $0x2c8] sm:$0xff] %v687_v25  ;;  %v689_v26 = vld [vmem:[%s5535_s15 + $0x5a0] sm:$0xff]  ;;  %v691_v27 = vld [vmem:[%s5535_s15 + $0x5a8] sm:$0xff] }
  0x83   : > { %v693_v28 = vld [vmem:[%s5535_s15 + $0x5c0] sm:$0xff]  ;;  %690 = vst [vmem:[%s5540_s16 + $0x2d0] sm:$0xff] %v689_v26  ;;  %692 = vst [vmem:[%s5540_s16 + $0x2d8] sm:$0xff] %v691_v27  ;;  %v695_v29 = vld [vmem:[%s5535_s15 + $0x5c8] sm:$0xff] }
  0x84   : > { %694 = vst [vmem:[%s5540_s16 + $0x2e0] sm:$0xff] %v693_v28  ;;  %v697_v30 = vld [vmem:[%s5535_s15 + $0x5e0] sm:$0xff]  ;;  %v699_v31 = vld [vmem:[%s5535_s15 + $0x5e8] sm:$0xff]  ;;  %696 = vst [vmem:[%s5540_s16 + $0x2e8] sm:$0xff] %v695_v29 }
  0x85   : > { %698 = vst [vmem:[%s5540_s16 + $0x2f0] sm:$0xff] %v697_v30  ;;  %700 = vst [vmem:[%s5540_s16 + $0x2f8] sm:$0xff] %v699_v31  ;;  %v701_v32 = vld [vmem:[%s5535_s15 + $0x600] sm:$0xff]  ;;  %v703_v33 = vld [vmem:[%s5535_s15 + $0x608] sm:$0xff] }
  0x86   : > { %v705_v34 = vld [vmem:[%s5535_s15 + $0x620] sm:$0xff]  ;;  %702 = vst [vmem:[%s5540_s16 + $0x300] sm:$0xff] %v701_v32  ;;  %704 = vst [vmem:[%s5540_s16 + $0x308] sm:$0xff] %v703_v33  ;;  %v707_v35 = vld [vmem:[%s5535_s15 + $0x628] sm:$0xff] }
  0x87   : > { %706 = vst [vmem:[%s5540_s16 + $0x310] sm:$0xff] %v705_v34  ;;  %v709_v36 = vld [vmem:[%s5535_s15 + $0x640] sm:$0xff]  ;;  %v711_v37 = vld [vmem:[%s5535_s15 + $0x648] sm:$0xff]  ;;  %708 = vst [vmem:[%s5540_s16 + $0x318] sm:$0xff] %v707_v35 }
  0x88   : > { %710 = vst [vmem:[%s5540_s16 + $0x320] sm:$0xff] %v709_v36  ;;  %712 = vst [vmem:[%s5540_s16 + $0x328] sm:$0xff] %v711_v37  ;;  %v713_v38 = vld [vmem:[%s5535_s15 + $0x660] sm:$0xff]  ;;  %v715_v39 = vld [vmem:[%s5535_s15 + $0x668] sm:$0xff] }
  0x89   : > { %v717_v40 = vld [vmem:[%s5535_s15 + $0x680] sm:$0xff]  ;;  %714 = vst [vmem:[%s5540_s16 + $0x330] sm:$0xff] %v713_v38  ;;  %716 = vst [vmem:[%s5540_s16 + $0x338] sm:$0xff] %v715_v39  ;;  %v719_v41 = vld [vmem:[%s5535_s15 + $0x688] sm:$0xff] }
  0x8a   : > { %718 = vst [vmem:[%s5540_s16 + $0x340] sm:$0xff] %v717_v40  ;;  %v721_v42 = vld [vmem:[%s5535_s15 + $0x6a0] sm:$0xff]  ;;  %v723_v43 = vld [vmem:[%s5535_s15 + $0x6a8] sm:$0xff]  ;;  %720 = vst [vmem:[%s5540_s16 + $0x348] sm:$0xff] %v719_v41 }
  0x8b   : > { %722 = vst [vmem:[%s5540_s16 + $0x350] sm:$0xff] %v721_v42  ;;  %724 = vst [vmem:[%s5540_s16 + $0x358] sm:$0xff] %v723_v43  ;;  %v725_v44 = vld [vmem:[%s5535_s15 + $0x6c0] sm:$0xff]  ;;  %v727_v45 = vld [vmem:[%s5535_s15 + $0x6c8] sm:$0xff] }
  0x8c   : > { %v729_v46 = vld [vmem:[%s5535_s15 + $0x6e0] sm:$0xff]  ;;  %726 = vst [vmem:[%s5540_s16 + $0x360] sm:$0xff] %v725_v44  ;;  %728 = vst [vmem:[%s5540_s16 + $0x368] sm:$0xff] %v727_v45  ;;  %v731_v47 = vld [vmem:[%s5535_s15 + $0x6e8] sm:$0xff] }
  0x8d   : > { %730 = vst [vmem:[%s5540_s16 + $0x370] sm:$0xff] %v729_v46  ;;  %v733_v48 = vld [vmem:[%s5535_s15 + $0x700] sm:$0xff]  ;;  %v735_v49 = vld [vmem:[%s5535_s15 + $0x708] sm:$0xff]  ;;  %732 = vst [vmem:[%s5540_s16 + $0x378] sm:$0xff] %v731_v47 }
  0x8e   : > { %734 = vst [vmem:[%s5540_s16 + $0x380] sm:$0xff] %v733_v48  ;;  %736 = vst [vmem:[%s5540_s16 + $0x388] sm:$0xff] %v735_v49  ;;  %v737_v50 = vld [vmem:[%s5535_s15 + $0x720] sm:$0xff]  ;;  %v739_v51 = vld [vmem:[%s5535_s15 + $0x728] sm:$0xff] }
  0x8f   : > { %v741_v52 = vld [vmem:[%s5535_s15 + $0x740] sm:$0xff]  ;;  %738 = vst [vmem:[%s5540_s16 + $0x390] sm:$0xff] %v737_v50  ;;  %740 = vst [vmem:[%s5540_s16 + $0x398] sm:$0xff] %v739_v51  ;;  %v743_v53 = vld [vmem:[%s5535_s15 + $0x748] sm:$0xff] }
  0x90   : > { %742 = vst [vmem:[%s5540_s16 + $0x3a0] sm:$0xff] %v741_v52  ;;  %v745_v54 = vld [vmem:[%s5535_s15 + $0x760] sm:$0xff]  ;;  %v747_v55 = vld [vmem:[%s5535_s15 + $0x768] sm:$0xff]  ;;  %744 = vst [vmem:[%s5540_s16 + $0x3a8] sm:$0xff] %v743_v53 }
  0x91   : > { %746 = vst [vmem:[%s5540_s16 + $0x3b0] sm:$0xff] %v745_v54  ;;  %748 = vst [vmem:[%s5540_s16 + $0x3b8] sm:$0xff] %v747_v55  ;;  %v749_v56 = vld [vmem:[%s5535_s15 + $0x780] sm:$0xff]  ;;  %v751_v57 = vld [vmem:[%s5535_s15 + $0x788] sm:$0xff] }
  0x92   : > { %v753_v58 = vld [vmem:[%s5535_s15 + $0x7a0] sm:$0xff]  ;;  %750 = vst [vmem:[%s5540_s16 + $0x3c0] sm:$0xff] %v749_v56  ;;  %752 = vst [vmem:[%s5540_s16 + $0x3c8] sm:$0xff] %v751_v57  ;;  %v755_v59 = vld [vmem:[%s5535_s15 + $0x7a8] sm:$0xff] }
  0x93   : > { %754 = vst [vmem:[%s5540_s16 + $0x3d0] sm:$0xff] %v753_v58  ;;  %v757_v60 = vld [vmem:[%s5535_s15 + $0x7c0] sm:$0xff]  ;;  %v759_v61 = vld [vmem:[%s5535_s15 + $0x7c8] sm:$0xff]  ;;  %756 = vst [vmem:[%s5540_s16 + $0x3d8] sm:$0xff] %v755_v59 }
  0x94   : > { %758 = vst [vmem:[%s5540_s16 + $0x3e0] sm:$0xff] %v757_v60  ;;  %760 = vst [vmem:[%s5540_s16 + $0x3e8] sm:$0xff] %v759_v61  ;;  %v761_v62 = vld [vmem:[%s5535_s15 + $0x7e0] sm:$0xff]  ;;  %v763_v63 = vld [vmem:[%s5535_s15 + $0x7e8] sm:$0xff] }
  0x95   : > { %762 = vst [vmem:[%s5540_s16 + $0x3f0] sm:$0xff] %v761_v62  ;;  %764 = vst [vmem:[%s5540_s16 + $0x3f8] sm:$0xff] %v763_v63 }
  0x96 PF: > { %p4056_p6 = scmp.ge.s32.totalorder %s5186_s22, 1  ;;  %p779_p7 = scmp.lt.s32.totalorder %s5186_s22, 3 }
  0x98   : > { %p780_p8 = pnand %p4056_p6, %p779_p7 }
  0x99   : > { %s786_s17 = sand.u32 (!%p780_p8), 1, %s5170_s18   ;;  %s4059_s24 = sshll.u32 (!%p780_p8), %s5178_s20, 6 }
  0x9a   : > { %783 = sbr.rel (%p780_p8) target bundleno = 1113 (0x459), region = 78  ;;  %s4057_s25 = sshll.u32 (!%p780_p8), %s786_s17, 10 }
  0x9b   : > { %p847_p9 = scmp.lt.s32.totalorder (!%p780_p8), %s4059_s24, 127  ;;  %s5804_s6 = scalar_lea.vmem (!%p780_p8), [#allocation4], %s4057_s25 }
  0x9c   : > { %s5806_s7 = scalar_lea.vmem (!%p780_p8), [#allocation5], %s4057_s25  ;;  %p4062_p10 = scmp.ne.s32.totalorder (!%p780_p8), %s5178_s20, 0 }
  0xa1   : > { %s6322_s24 = smov (!%p847_p9, %s4059_s24), 127  ;;  %863 = sbr.rel (%p4062_p10) target bundleno = 342 (0x156), region = 90 }
  0xa2   : > { %s4466_s26 = sshll.u32 %s6322_s24, 4  ;;  %v864_v0 = vld [vmem:[%s6308_s0] sm:$0xff] (!%p4062_p10)  ;;  %v865_v1 = vld [vmem:[%s6308_s0 + $0x8] sm:$0xff] (!%p4062_p10)  ;;  %v866_v2 = vld [vmem:[%s6308_s0 + $0x10] sm:$0xff] (!%p4062_p10)  ;;  %v5188_v26 = vmov (!%p4062_p10), 0.0   ;;  %v911_v30 = vlaneseq (!%p4062_p10) }
  0xa3   : > { %s5802_s30 = scalar_lea.vmem %s6312_s4, %s4466_s26  ;;  %v868_v3 = vunpack.c.l.bf16 (!%p4062_p10), %v864_v0  ;;  %v869_v4 = vunpack.c.h.bf16 (!%p4062_p10), %v864_v0  ;;  %v870_v5 = vunpack.c.l.bf16 (!%p4062_p10), %v865_v1  ;;  %v871_v6 = vunpack.c.h.bf16 (!%p4062_p10), %v865_v1  ;;  %v867_v7 = vld [vmem:[%s6308_s0 + $0x18] sm:$0xff] (!%p4062_p10)  ;;  %947 = vst [vmem:[#allocation3] sm:$0xff] (!%p4062_p10), %v5188_v26  ;;  %948 = vst [vmem:[#allocation3 + $0x8] sm:$0xff] (!%p4062_p10), %v5188_v26  ;;  %v909_v39 = vld [vmem:[%s6309_s1] sm:$0xf] (!%p4062_p10) }
  0xa4   : > { %v872_v8 = vunpack.c.l.bf16 (!%p4062_p10), %v866_v2  ;;  %v873_v9 = vunpack.c.h.bf16 (!%p4062_p10), %v866_v2  ;;  %v874_v10 = vunpack.c.l.bf16 (!%p4062_p10), %v867_v7  ;;  %v875_v14 = vunpack.c.h.bf16 (!%p4062_p10), %v867_v7  ;;  %949 = vst [vmem:[#allocation3 + $0x10] sm:$0xff] (!%p4062_p10), %v5188_v26  ;;  %950 = vst [vmem:[#allocation3 + $0x18] sm:$0xff] (!%p4062_p10), %v5188_v26 }
  0xa5   : > { %v876_v11 = vmul.f32 (!%p4062_p10), %v868_v3, %v868_v3  ;;  %v877_v12 = vmul.f32 (!%p4062_p10), %v869_v4, %v869_v4  ;;  %v878_v13 = vmul.f32 (!%p4062_p10), %v870_v5, %v870_v5  ;;  %v879_v18 = vmul.f32 (!%p4062_p10), %v871_v6, %v871_v6  ;;  %951 = vst [vmem:[#allocation3 + $0x20] sm:$0xff] (!%p4062_p10), %v5188_v26 }
  0xa6   : > { %v880_v15 = vmul.f32 (!%p4062_p10), %v872_v8, %v872_v8  ;;  %v881_v16 = vmul.f32 (!%p4062_p10), %v873_v9, %v873_v9  ;;  %v882_v17 = vmul.f32 (!%p4062_p10), %v874_v10, %v874_v10  ;;  %v883_v22 = vmul.f32 (!%p4062_p10), %v875_v14, %v875_v14  ;;  %952 = vst [vmem:[#allocation3 + $0x28] sm:$0xff] (!%p4062_p10), %v5188_v26 }
  0xa7   : > { %v884_v19 = vadd.f32 (!%p4062_p10), %v877_v12, %v876_v11  ;;  %953 = vst [vmem:[#allocation3 + $0x30] sm:$0xff] (!%p4062_p10), %v5188_v26  ;;  %954 = vst [vmem:[#allocation3 + $0x38] sm:$0xff] (!%p4062_p10), %v5188_v26  ;;  %v912_v34 = vshrl.u32 (!%p4062_p10), %v911_v30, 7 }
  0xa8   : > { %v889_v20 = vadd.f32 %v881_v16, %v880_v15 }
  0xa9   : > { %v885_v21 = vadd.f32 %v884_v19, %v878_v13  ;;  %v913_v35 = vsub.s32 0, %v912_v34  ;;  %v917_v36 = vsub.s32 1, %v912_v34  ;;  %v921_v37 = vsub.s32 2, %v912_v34 }
  0xaa   : > { %v890_v23 = vadd.f32 %v889_v20, %v882_v17  ;;  %v925_v38 = vsub.s32 3, %v912_v34 }
  0xab   : > { %v886_v24 = vadd.f32 %v885_v21, %v879_v18  ;;  %v914_v41 = vrot.slane %v909_v39, %v913_v35  ;;  %v918_v42 = vrot.slane %v909_v39, %v917_v36  ;;  %v922_v43 = vrot.slane %v909_v39, %v921_v37 }
  0xac   : > { %v891_v25 = vadd.f32 %v890_v23, %v883_v22  ;;  %v926_v44 = vrot.slane %v909_v39, %v925_v38 }
  0xad   : > { %887 = vadd.xlane.f32.xlu0 %v886_v24 }
  0xb1   : > { %892 = vadd.xlane.f32.xlu0 %v891_v25 }
 0x13a   : > { %v888_v27 = vpop.xlane.xlu0 %887 }
 0x13b   : > { %v895_v28 = vmul.f32 0.001953125, %v888_v27 }
 0x13d   : > { %v897_v29 = vadd.f32 1e-06, %v895_v28 }
 0x13e   : > { %v893_v31 = vpop.xlane.xlu0 %892 }
 0x13f   : > { %4536 = vrsqrt.f32 %v897_v29  ;;  %v896_v32 = vmul.f32 0.001953125, %v893_v31 }
 0x141   : > { %v898_v33 = vadd.f32 1e-06, %v896_v32 }
 0x143   : > { %4538 = vrsqrt.f32 %v898_v33 }
 0x149   : > { %v4537_v40 = vpop.eup %4536 }
 0x14a   : > { %v901_v45 = vmul.f32 %v4537_v40, %v868_v3  ;;  %v902_v46 = vmul.f32 %v4537_v40, %v869_v4  ;;  %v903_v47 = vmul.f32 %v4537_v40, %v870_v5  ;;  %v904_v48 = vmul.f32 %v4537_v40, %v871_v6 }
 0x14c   : > { %v931_v54 = vmul.f32 %v914_v41, %v901_v45  ;;  %v932_v55 = vmul.f32 %v918_v42, %v902_v46  ;;  %v933_v56 = vmul.f32 %v922_v43, %v903_v47  ;;  %v934_v57 = vmul.f32 %v926_v44, %v904_v48 }
 0x14d   : > { %v4539_v49 = vpop.eup %4538 }
 0x14e   : > { %v905_v50 = vmul.f32 %v4539_v49, %v872_v8  ;;  %v906_v51 = vmul.f32 %v4539_v49, %v873_v9  ;;  %v907_v52 = vmul.f32 %v4539_v49, %v874_v10  ;;  %v908_v53 = vmul.f32 %v4539_v49, %v875_v14 }
 0x150   : > { %v935_v58 = vmul.f32 %v914_v41, %v905_v50  ;;  %v936_v59 = vmul.f32 %v918_v42, %v906_v51  ;;  %v937_v60 = vmul.f32 %v922_v43, %v907_v52  ;;  %v938_v61 = vmul.f32 %v926_v44, %v908_v53 }
 0x152   : > { %v939_v62 = vpack.c.bf16 %v935_v58, %v931_v54  ;;  %v940_v63 = vpack.c.bf16 %v936_v59, %v932_v55  ;;  %v941_v0 = vpack.c.bf16 %v937_v60, %v933_v56  ;;  %v942_v1 = vpack.c.bf16 %v938_v61, %v934_v57 }
 0x154   : > { %943 = vst [vmem:[#allocation2] sm:$0xff] %v939_v62  ;;  %944 = vst [vmem:[#allocation2 + $0x8] sm:$0xff] %v940_v63 }
 0x155   : > { %945 = vst [vmem:[#allocation2 + $0x10] sm:$0xff] %v941_v0  ;;  %946 = vst [vmem:[#allocation2 + $0x18] sm:$0xff] %v942_v1 }
 0x156 PF: > { %v4540_v2 = vld [vmem:[%s5804_s6 + $0x4] ss:$16 sps:$4 sm:$0xff]   ;;  %v4542_v3 = vld [vmem:[%s5804_s6 + $0xc] ss:$16 sps:$4 sm:$0xff]   ;;  %v4544_v4 = vld [vmem:[%s5804_s6] ss:$16 sps:$4 sm:$0xff]  }
 0x157   : > { %1727 = vmatprep.subr.bf16.mxu0 %v4540_v2  ;;  %v4545_v5 = vld [vmem:[%s5804_s6 + $0x8] ss:$16 sps:$4 sm:$0xff]   ;;  %1813 = vmatprep.subr.bf16.mxu1 %v4542_v3  ;;  %v4546_v6 = vld [vmem:[%s5804_s6 + $0x24] ss:$16 sps:$4 sm:$0xff]   ;;  %v4548_v7 = vld [vmem:[%s5804_s6 + $0x2c] ss:$16 sps:$4 sm:$0xff]  }
 0x158   : > { %1728 = vmatpush1.bf16.msra.mxu0 %v4544_v4  ;;  %1814 = vmatpush1.bf16.msra.mxu1 %v4545_v5  ;;  %v4550_v8 = vld [vmem:[%s5804_s6 + $0x20] ss:$16 sps:$4 sm:$0xff]   ;;  %v4551_v9 = vld [vmem:[%s5804_s6 + $0x28] ss:$16 sps:$4 sm:$0xff]   ;;  %v4552_v10 = vld [vmem:[%s5804_s6 + $0x44] ss:$16 sps:$4 sm:$0xff]  }
 0x159   : > { %1729 = vmatprep.subr.bf16.mxu0 %v4546_v6  ;;  %1815 = vmatprep.subr.bf16.mxu1 %v4548_v7  ;;  %v4554_v11 = vld [vmem:[%s5804_s6 + $0x4c] ss:$16 sps:$4 sm:$0xff]   ;;  %v4556_v12 = vld [vmem:[%s5804_s6 + $0x40] ss:$16 sps:$4 sm:$0xff]   ;;  %v4557_v13 = vld [vmem:[%s5804_s6 + $0x48] ss:$16 sps:$4 sm:$0xff]  }
 0x15a   : > { %v4558_v14 = vld [vmem:[%s5804_s6 + $0x64] ss:$16 sps:$4 sm:$0xff]   ;;  %v4560_v15 = vld [vmem:[%s5804_s6 + $0x6c] ss:$16 sps:$4 sm:$0xff]   ;;  %v4562_v16 = vld [vmem:[%s5804_s6 + $0x60] ss:$16 sps:$4 sm:$0xff]  }
 0x15b   : > { %v4563_v17 = vld [vmem:[%s5804_s6 + $0x68] ss:$16 sps:$4 sm:$0xff]   ;;  %v4564_v18 = vld [vmem:[%s5804_s6 + $0x84] ss:$16 sps:$4 sm:$0xff]   ;;  %v4566_v19 = vld [vmem:[%s5804_s6 + $0x8c] ss:$16 sps:$4 sm:$0xff]  }
 0x15c   : > { %1730 = vmatpush1.bf16.msra.mxu0 %v4550_v8  ;;  %1816 = vmatpush1.bf16.msra.mxu1 %v4551_v9  ;;  %v4568_v20 = vld [vmem:[%s5804_s6 + $0x80] ss:$16 sps:$4 sm:$0xff]   ;;  %v4569_v21 = vld [vmem:[%s5804_s6 + $0x88] ss:$16 sps:$4 sm:$0xff]   ;;  %v4570_v22 = vld [vmem:[%s5804_s6 + $0xa4] ss:$16 sps:$4 sm:$0xff]  }
 0x15d   : > { %1731 = vmatprep.subr.bf16.mxu0 %v4552_v10  ;;  %1817 = vmatprep.subr.bf16.mxu1 %v4554_v11  ;;  %v4572_v23 = vld [vmem:[%s5804_s6 + $0xac] ss:$16 sps:$4 sm:$0xff]   ;;  %v4574_v24 = vld [vmem:[%s5804_s6 + $0xa0] ss:$16 sps:$4 sm:$0xff]   ;;  %v4575_v25 = vld [vmem:[%s5804_s6 + $0xa8] ss:$16 sps:$4 sm:$0xff]  }
 0x15e   : > { %v4576_v26 = vld [vmem:[%s5804_s6 + $0xc4] ss:$16 sps:$4 sm:$0xff]   ;;  %v4578_v27 = vld [vmem:[%s5804_s6 + $0xcc] ss:$16 sps:$4 sm:$0xff]   ;;  %v4580_v28 = vld [vmem:[%s5804_s6 + $0xc0] ss:$16 sps:$4 sm:$0xff]  }
 0x15f   : > { %v4581_v29 = vld [vmem:[%s5804_s6 + $0xc8] ss:$16 sps:$4 sm:$0xff]   ;;  %v4582_v30 = vld [vmem:[%s5804_s6 + $0xe4] ss:$16 sps:$4 sm:$0xff]   ;;  %v4584_v31 = vld [vmem:[%s5804_s6 + $0xec] ss:$16 sps:$4 sm:$0xff]  }
 0x160   : > { %1732 = vmatpush1.bf16.msra.mxu0 %v4556_v12  ;;  %1818 = vmatpush1.bf16.msra.mxu1 %v4557_v13  ;;  %v4586_v32 = vld [vmem:[%s5804_s6 + $0xe0] ss:$16 sps:$4 sm:$0xff]   ;;  %v4587_v33 = vld [vmem:[%s5804_s6 + $0xe8] ss:$16 sps:$4 sm:$0xff]   ;;  %v4588_v34 = vld [vmem:[%s5804_s6 + $0x104] ss:$16 sps:$4 sm:$0xff]  }
 0x161   : > { %1733 = vmatprep.subr.bf16.mxu0 %v4558_v14  ;;  %1819 = vmatprep.subr.bf16.mxu1 %v4560_v15  ;;  %v4590_v35 = vld [vmem:[%s5804_s6 + $0x10c] ss:$16 sps:$4 sm:$0xff]   ;;  %v4592_v36 = vld [vmem:[%s5804_s6 + $0x100] ss:$16 sps:$4 sm:$0xff]   ;;  %v4593_v37 = vld [vmem:[%s5804_s6 + $0x108] ss:$16 sps:$4 sm:$0xff]  }
 0x162   : > { %v4594_v38 = vld [vmem:[%s5804_s6 + $0x124] ss:$16 sps:$4 sm:$0xff]   ;;  %v4596_v39 = vld [vmem:[%s5804_s6 + $0x12c] ss:$16 sps:$4 sm:$0xff]   ;;  %v4598_v40 = vld [vmem:[%s5804_s6 + $0x120] ss:$16 sps:$4 sm:$0xff]  }
 0x163   : > { %v4599_v41 = vld [vmem:[%s5804_s6 + $0x128] ss:$16 sps:$4 sm:$0xff]   ;;  %v4600_v42 = vld [vmem:[%s5804_s6 + $0x144] ss:$16 sps:$4 sm:$0xff]   ;;  %v4602_v43 = vld [vmem:[%s5804_s6 + $0x14c] ss:$16 sps:$4 sm:$0xff]  }
 0x164   : > { %1734 = vmatpush1.bf16.msra.mxu0 %v4562_v16  ;;  %1820 = vmatpush1.bf16.msra.mxu1 %v4563_v17  ;;  %v4604_v44 = vld [vmem:[%s5804_s6 + $0x140] ss:$16 sps:$4 sm:$0xff]   ;;  %v4605_v45 = vld [vmem:[%s5804_s6 + $0x148] ss:$16 sps:$4 sm:$0xff]   ;;  %v4606_v46 = vld [vmem:[%s5804_s6 + $0x164] ss:$16 sps:$4 sm:$0xff]  }
 0x165   : > { %1735 = vmatprep.subr.bf16.mxu0 %v4564_v18  ;;  %1821 = vmatprep.subr.bf16.mxu1 %v4566_v19  ;;  %v4608_v47 = vld [vmem:[%s5804_s6 + $0x16c] ss:$16 sps:$4 sm:$0xff]   ;;  %v4610_v49 = vld [vmem:[%s5804_s6 + $0x160] ss:$16 sps:$4 sm:$0xff]   ;;  %v4611_v50 = vld [vmem:[%s5804_s6 + $0x168] ss:$16 sps:$4 sm:$0xff]  }
 0x166   : > { %v5870_v48 = vld [vmem:[#allocation2 + $0x8] sm:$0xff]  ;;  %v4612_v51 = vld [vmem:[%s5804_s6 + $0x184] ss:$16 sps:$4 sm:$0xff]   ;;  %v4616_v53 = vld [vmem:[%s5804_s6 + $0x180] ss:$16 sps:$4 sm:$0xff]   ;;  %p4455_p11 = scmp.ne.s32.totalorder %s5178_s20, 1 }
 0x167   : > { %1759 = vmatprep.mubr.bf16.mxu0 %v5870_v48  ;;  %1845 = vmatprep.mubr.bf16.mxu1 %v5870_v48  ;;  %v4614_v52 = vld [vmem:[%s5804_s6 + $0x18c] ss:$16 sps:$4 sm:$0xff]   ;;  %v4617_v54 = vld [vmem:[%s5804_s6 + $0x188] ss:$16 sps:$4 sm:$0xff]   ;;  %v4618_v55 = vld [vmem:[%s5804_s6 + $0x1a4] ss:$16 sps:$4 sm:$0xff]  }
 0x168   : > { %1736 = vmatpush1.bf16.msra.mxu0 %v4568_v20  ;;  %1822 = vmatpush1.bf16.msra.mxu1 %v4569_v21  ;;  %v4620_v56 = vld [vmem:[%s5804_s6 + $0x1ac] ss:$16 sps:$4 sm:$0xff]   ;;  %v4622_v57 = vld [vmem:[%s5804_s6 + $0x1a0] ss:$16 sps:$4 sm:$0xff]   ;;  %v4623_v58 = vld [vmem:[%s5804_s6 + $0x1a8] ss:$16 sps:$4 sm:$0xff]  }
 0x169   : > { %1737 = vmatprep.subr.bf16.mxu0 %v4570_v22  ;;  %1823 = vmatprep.subr.bf16.mxu1 %v4572_v23  ;;  %v4624_v59 = vld [vmem:[%s5804_s6 + $0x1c4] ss:$16 sps:$4 sm:$0xff]   ;;  %v4626_v60 = vld [vmem:[%s5804_s6 + $0x1cc] ss:$16 sps:$4 sm:$0xff]   ;;  %v4628_v61 = vld [vmem:[%s5804_s6 + $0x1c0] ss:$16 sps:$4 sm:$0xff]  }
 0x16a   : > { %v4629_v62 = vld [vmem:[%s5804_s6 + $0x1c8] ss:$16 sps:$4 sm:$0xff]   ;;  %v4630_v63 = vld [vmem:[%s5804_s6 + $0x1e4] ss:$16 sps:$4 sm:$0xff]   ;;  %v4632_v0 = vld [vmem:[%s5804_s6 + $0x1ec] ss:$16 sps:$4 sm:$0xff]  }
 0x16b   : > { %v4634_v1 = vld [vmem:[%s5804_s6 + $0x1e0] ss:$16 sps:$4 sm:$0xff]   ;;  %v4635_v2 = vld [vmem:[%s5804_s6 + $0x1e8] ss:$16 sps:$4 sm:$0xff]   ;;  %v4638_v3 = vld [vmem:[%s5804_s6 + $0x204] ss:$16 sps:$4 sm:$0xff]  }
 0x16c   : > { %1738 = vmatpush1.bf16.msra.mxu0 %v4574_v24  ;;  %1824 = vmatpush1.bf16.msra.mxu1 %v4575_v25  ;;  %v4641_v4 = vld [vmem:[%s5804_s6 + $0x20c] ss:$16 sps:$4 sm:$0xff]   ;;  %v4636_v5 = vld [vmem:[%s5804_s6 + $0x200] ss:$16 sps:$4 sm:$0xff]   ;;  %v4639_v6 = vld [vmem:[%s5804_s6 + $0x208] ss:$16 sps:$4 sm:$0xff]  }
 0x16d   : > { %1739 = vmatprep.subr.bf16.mxu0 %v4576_v26  ;;  %1825 = vmatprep.subr.bf16.mxu1 %v4578_v27  ;;  %v5896_v7 = vld [vmem:[#allocation2] sm:$0xff]  ;;  %v4647_v9 = vld [vmem:[%s5804_s6 + $0x22c] ss:$16 sps:$4 sm:$0xff]   ;;  %v4645_v11 = vld [vmem:[%s5804_s6 + $0x228] ss:$16 sps:$4 sm:$0xff]  }
 0x16e   : > { %v4644_v8 = vld [vmem:[%s5804_s6 + $0x224] ss:$16 sps:$4 sm:$0xff]   ;;  %v4642_v10 = vld [vmem:[%s5804_s6 + $0x220] ss:$16 sps:$4 sm:$0xff]   ;;  %v4653_v13 = vld [vmem:[%s5804_s6 + $0x24c] ss:$16 sps:$4 sm:$0xff]  }
 0x16f   : > { %v4650_v12 = vld [vmem:[%s5804_s6 + $0x244] ss:$16 sps:$4 sm:$0xff]   ;;  %v4648_v14 = vld [vmem:[%s5804_s6 + $0x240] ss:$16 sps:$4 sm:$0xff]   ;;  %v4651_v15 = vld [vmem:[%s5804_s6 + $0x248] ss:$16 sps:$4 sm:$0xff]  }
 0x170   : > { %1740 = vmatpush1.bf16.msra.mxu0 %v4580_v28  ;;  %1826 = vmatpush1.bf16.msra.mxu1 %v4581_v29  ;;  %v4656_v16 = vld [vmem:[%s5804_s6 + $0x264] ss:$16 sps:$4 sm:$0xff]   ;;  %v4659_v17 = vld [vmem:[%s5804_s6 + $0x26c] ss:$16 sps:$4 sm:$0xff]   ;;  %v4654_v18 = vld [vmem:[%s5804_s6 + $0x260] ss:$16 sps:$4 sm:$0xff]  }
 0x171   : > { %1741 = vmatprep.subr.bf16.mxu0 %v4582_v30  ;;  %1827 = vmatprep.subr.bf16.mxu1 %v4584_v31  ;;  %v4657_v19 = vld [vmem:[%s5804_s6 + $0x268] ss:$16 sps:$4 sm:$0xff]   ;;  %v4662_v20 = vld [vmem:[%s5804_s6 + $0x284] ss:$16 sps:$4 sm:$0xff]   ;;  %v4665_v21 = vld [vmem:[%s5804_s6 + $0x28c] ss:$16 sps:$4 sm:$0xff]  }
 0x172   : > { %v4660_v22 = vld [vmem:[%s5804_s6 + $0x280] ss:$16 sps:$4 sm:$0xff]   ;;  %v4663_v23 = vld [vmem:[%s5804_s6 + $0x288] ss:$16 sps:$4 sm:$0xff]   ;;  %v4668_v24 = vld [vmem:[%s5804_s6 + $0x2a4] ss:$16 sps:$4 sm:$0xff]  }
 0x173   : > { %v4671_v25 = vld [vmem:[%s5804_s6 + $0x2ac] ss:$16 sps:$4 sm:$0xff]   ;;  %v4666_v26 = vld [vmem:[%s5804_s6 + $0x2a0] ss:$16 sps:$4 sm:$0xff]   ;;  %v4669_v27 = vld [vmem:[%s5804_s6 + $0x2a8] ss:$16 sps:$4 sm:$0xff]  }
 0x174   : > { %1742 = vmatpush1.bf16.msra.mxu0 %v4586_v32  ;;  %1828 = vmatpush1.bf16.msra.mxu1 %v4587_v33  ;;  %v4674_v28 = vld [vmem:[%s5804_s6 + $0x2c4] ss:$16 sps:$4 sm:$0xff]   ;;  %v4677_v29 = vld [vmem:[%s5804_s6 + $0x2cc] ss:$16 sps:$4 sm:$0xff]   ;;  %v4672_v31 = vld [vmem:[%s5804_s6 + $0x2c0] ss:$16 sps:$4 sm:$0xff]  }
 0x175   : > { %1743 = vmatprep.subr.bf16.mxu0 %v4588_v34  ;;  %1829 = vmatprep.subr.bf16.mxu1 %v4590_v35  ;;  %v5922_v30 = vld [vmem:[#allocation2 + $0x18] sm:$0xff]  ;;  %v4680_v33 = vld [vmem:[%s5804_s6 + $0x2e4] ss:$16 sps:$4 sm:$0xff]   ;;  %v4678_v35 = vld [vmem:[%s5804_s6 + $0x2e0] ss:$16 sps:$4 sm:$0xff]  }
 0x176   : > { %v4675_v32 = vld [vmem:[%s5804_s6 + $0x2c8] ss:$16 sps:$4 sm:$0xff]   ;;  %v4683_v34 = vld [vmem:[%s5804_s6 + $0x2ec] ss:$16 sps:$4 sm:$0xff]  }
 0x178   : > { %1744 = vmatpush1.bf16.msra.mxu0 %v4592_v36  ;;  %1830 = vmatpush1.bf16.msra.mxu1 %v4593_v37  ;;  %v4681_v36 = vld [vmem:[%s5804_s6 + $0x2e8] ss:$16 sps:$4 sm:$0xff]   ;;  %v4686_v37 = vld [vmem:[%s5804_s6 + $0x304] ss:$16 sps:$4 sm:$0xff]  }
 0x179   : > { %1745 = vmatprep.subr.bf16.mxu0 %v4594_v38  ;;  %1831 = vmatprep.subr.bf16.mxu1 %v4596_v39  ;;  %v4689_v38 = vld [vmem:[%s5804_s6 + $0x30c] ss:$16 sps:$4 sm:$0xff]   ;;  %v4684_v39 = vld [vmem:[%s5804_s6 + $0x300] ss:$16 sps:$4 sm:$0xff]  }
 0x17c   : > { %1746 = vmatpush1.bf16.msra.mxu0 %v4598_v40  ;;  %1832 = vmatpush1.bf16.msra.mxu1 %v4599_v41  ;;  %v4687_v40 = vld [vmem:[%s5804_s6 + $0x308] ss:$16 sps:$4 sm:$0xff]   ;;  %v4692_v41 = vld [vmem:[%s5804_s6 + $0x324] ss:$16 sps:$4 sm:$0xff]  }
 0x17d   : > { %1747 = vmatprep.subr.bf16.mxu0 %v4600_v42  ;;  %1833 = vmatprep.subr.bf16.mxu1 %v4602_v43  ;;  %v4695_v42 = vld [vmem:[%s5804_s6 + $0x32c] ss:$16 sps:$4 sm:$0xff]   ;;  %v4690_v43 = vld [vmem:[%s5804_s6 + $0x320] ss:$16 sps:$4 sm:$0xff]  }
 0x180   : > { %1748 = vmatpush1.bf16.msra.mxu0 %v4604_v44  ;;  %1834 = vmatpush1.bf16.msra.mxu1 %v4605_v45  ;;  %v4693_v44 = vld [vmem:[%s5804_s6 + $0x328] ss:$16 sps:$4 sm:$0xff]   ;;  %v4698_v45 = vld [vmem:[%s5804_s6 + $0x344] ss:$16 sps:$4 sm:$0xff]  }
 0x181   : > { %1749 = vmatprep.subr.bf16.mxu0 %v4606_v46  ;;  %1835 = vmatprep.subr.bf16.mxu1 %v4608_v47  ;;  %v4701_v46 = vld [vmem:[%s5804_s6 + $0x34c] ss:$16 sps:$4 sm:$0xff]   ;;  %v4696_v47 = vld [vmem:[%s5804_s6 + $0x340] ss:$16 sps:$4 sm:$0xff]  }
 0x184   : > { %1750 = vmatpush1.bf16.msra.mxu0 %v4610_v49  ;;  %1836 = vmatpush1.bf16.msra.mxu1 %v4611_v50  ;;  %v4699_v49 = vld [vmem:[%s5804_s6 + $0x348] ss:$16 sps:$4 sm:$0xff]   ;;  %v4704_v50 = vld [vmem:[%s5804_s6 + $0x364] ss:$16 sps:$4 sm:$0xff]  }
 0x185   : > { %1751 = vmatprep.subr.bf16.mxu0 %v4612_v51  ;;  %1837 = vmatprep.subr.bf16.mxu1 %v4614_v52  ;;  %v4707_v51 = vld [vmem:[%s5804_s6 + $0x36c] ss:$16 sps:$4 sm:$0xff]   ;;  %v4702_v52 = vld [vmem:[%s5804_s6 + $0x360] ss:$16 sps:$4 sm:$0xff]  }
 0x188   : > { %1752 = vmatpush1.bf16.msra.mxu0 %v4616_v53  ;;  %1838 = vmatpush1.bf16.msra.mxu1 %v4617_v54  ;;  %v4705_v53 = vld [vmem:[%s5804_s6 + $0x368] ss:$16 sps:$4 sm:$0xff]   ;;  %v4710_v54 = vld [vmem:[%s5804_s6 + $0x384] ss:$16 sps:$4 sm:$0xff]  }
 0x189   : > { %1753 = vmatprep.subr.bf16.mxu0 %v4618_v55  ;;  %1839 = vmatprep.subr.bf16.mxu1 %v4620_v56  ;;  %v4713_v55 = vld [vmem:[%s5804_s6 + $0x38c] ss:$16 sps:$4 sm:$0xff]   ;;  %v4708_v56 = vld [vmem:[%s5804_s6 + $0x380] ss:$16 sps:$4 sm:$0xff]  }
 0x18c   : > { %1754 = vmatpush1.bf16.msra.mxu0 %v4622_v57  ;;  %1840 = vmatpush1.bf16.msra.mxu1 %v4623_v58  ;;  %v4711_v57 = vld [vmem:[%s5804_s6 + $0x388] ss:$16 sps:$4 sm:$0xff]   ;;  %v4716_v58 = vld [vmem:[%s5804_s6 + $0x3a4] ss:$16 sps:$4 sm:$0xff]  }
 0x18d   : > { %1755 = vmatprep.subr.bf16.mxu0 %v4624_v59  ;;  %1841 = vmatprep.subr.bf16.mxu1 %v4626_v60  ;;  %v4719_v59 = vld [vmem:[%s5804_s6 + $0x3ac] ss:$16 sps:$4 sm:$0xff]   ;;  %v4714_v60 = vld [vmem:[%s5804_s6 + $0x3a0] ss:$16 sps:$4 sm:$0xff]  }
 0x190   : > { %1756 = vmatpush1.bf16.msra.mxu0 %v4628_v61  ;;  %1842 = vmatpush1.bf16.msra.mxu1 %v4629_v62  ;;  %v4717_v61 = vld [vmem:[%s5804_s6 + $0x3a8] ss:$16 sps:$4 sm:$0xff]   ;;  %v4722_v62 = vld [vmem:[%s5804_s6 + $0x3c4] ss:$16 sps:$4 sm:$0xff]  }
 0x191   : > { %1757 = vmatprep.subr.bf16.mxu0 %v4630_v63  ;;  %1843 = vmatprep.subr.bf16.mxu1 %v4632_v0  ;;  %v4725_v63 = vld [vmem:[%s5804_s6 + $0x3cc] ss:$16 sps:$4 sm:$0xff]   ;;  %v4720_v0 = vld [vmem:[%s5804_s6 + $0x3c0] ss:$16 sps:$4 sm:$0xff]  }
 0x194   : > { %1758 = vmatpush1.bf16.msra.mxu0 %v4634_v1  ;;  %1844 = vmatpush1.bf16.msra.mxu1 %v4635_v2  ;;  %v4723_v1 = vld [vmem:[%s5804_s6 + $0x3c8] ss:$16 sps:$4 sm:$0xff]   ;;  %v4728_v2 = vld [vmem:[%s5804_s6 + $0x3e4] ss:$16 sps:$4 sm:$0xff]  }
 0x195   : > { %1770 = vmatprep.subr.bf16.mxu0 %v4638_v3  ;;  %1856 = vmatprep.subr.bf16.mxu1 %v4641_v4  ;;  %v4731_v3 = vld [vmem:[%s5804_s6 + $0x3ec] ss:$16 sps:$4 sm:$0xff]   ;;  %v4726_v4 = vld [vmem:[%s5804_s6 + $0x3e0] ss:$16 sps:$4 sm:$0xff]  }
 0x197   : > { %1760 = vmatmul.mubr.bf16.vlgmr.msra.gmra.mrb[0].mxu0 %v5896_v7  ;;  %1846 = vmatmul.mubr.bf16.vlgmr.msra.gmra.mrb[0].mxu1 %v5896_v7 }
 0x198   : > { %1771 = vmatpush1.bf16.msra.mxu0 %v4636_v5  ;;  %1857 = vmatpush1.bf16.msra.mxu1 %v4639_v6  ;;  %v4729_v5 = vld [vmem:[%s5804_s6 + $0x3e8] ss:$16 sps:$4 sm:$0xff]   ;;  %v4734_v6 = vld [vmem:[%s5806_s7 + $0x4] ss:$16 sps:$4 sm:$0xff]  }
 0x199   : > { %1772 = vmatprep.subr.bf16.mxu0 %v4644_v8  ;;  %1858 = vmatprep.subr.bf16.mxu1 %v4647_v9  ;;  %v4737_v8 = vld [vmem:[%s5806_s7 + $0xc] ss:$16 sps:$4 sm:$0xff]   ;;  %v5966_v9 = vld [vmem:[#allocation2 + $0x10] sm:$0xff] }
 0x19a   : > { %1802 = vmatprep.mubr.bf16.mxu0 %v5922_v30  ;;  %1888 = vmatprep.mubr.bf16.mxu1 %v5922_v30 }
 0x19c   : > { %1773 = vmatpush1.bf16.msra.mxu0 %v4642_v10  ;;  %1859 = vmatpush1.bf16.msra.mxu1 %v4645_v11  ;;  %v4732_v10 = vld [vmem:[%s5806_s7] ss:$16 sps:$4 sm:$0xff]   ;;  %v4735_v11 = vld [vmem:[%s5806_s7 + $0x8] ss:$16 sps:$4 sm:$0xff]  }
 0x19d   : > { %1774 = vmatprep.subr.bf16.mxu0 %v4650_v12  ;;  %1860 = vmatprep.subr.bf16.mxu1 %v4653_v13  ;;  %v4740_v12 = vld [vmem:[%s5806_s7 + $0x24] ss:$16 sps:$4 sm:$0xff]   ;;  %v4743_v13 = vld [vmem:[%s5806_s7 + $0x2c] ss:$16 sps:$4 sm:$0xff]  }
 0x1a0   : > { %1775 = vmatpush1.bf16.msra.mxu0 %v4648_v14  ;;  %1861 = vmatpush1.bf16.msra.mxu1 %v4651_v15  ;;  %v4738_v14 = vld [vmem:[%s5806_s7 + $0x20] ss:$16 sps:$4 sm:$0xff]   ;;  %v4741_v15 = vld [vmem:[%s5806_s7 + $0x28] ss:$16 sps:$4 sm:$0xff]  }
 0x1a1   : > { %1776 = vmatprep.subr.bf16.mxu0 %v4656_v16  ;;  %1862 = vmatprep.subr.bf16.mxu1 %v4659_v17  ;;  %v4746_v16 = vld [vmem:[%s5806_s7 + $0x44] ss:$16 sps:$4 sm:$0xff]   ;;  %v4749_v17 = vld [vmem:[%s5806_s7 + $0x4c] ss:$16 sps:$4 sm:$0xff]  }
 0x1a4   : > { %1777 = vmatpush1.bf16.msra.mxu0 %v4654_v18  ;;  %1863 = vmatpush1.bf16.msra.mxu1 %v4657_v19  ;;  %v4744_v18 = vld [vmem:[%s5806_s7 + $0x40] ss:$16 sps:$4 sm:$0xff]   ;;  %v4747_v19 = vld [vmem:[%s5806_s7 + $0x48] ss:$16 sps:$4 sm:$0xff]  }
 0x1a5   : > { %1778 = vmatprep.subr.bf16.mxu0 %v4662_v20  ;;  %1864 = vmatprep.subr.bf16.mxu1 %v4665_v21  ;;  %v4752_v20 = vld [vmem:[%s5806_s7 + $0x64] ss:$16 sps:$4 sm:$0xff]   ;;  %v4755_v21 = vld [vmem:[%s5806_s7 + $0x6c] ss:$16 sps:$4 sm:$0xff]  }
 0x1a8   : > { %1779 = vmatpush1.bf16.msra.mxu0 %v4660_v22  ;;  %1865 = vmatpush1.bf16.msra.mxu1 %v4663_v23  ;;  %v4750_v22 = vld [vmem:[%s5806_s7 + $0x60] ss:$16 sps:$4 sm:$0xff]   ;;  %v4753_v23 = vld [vmem:[%s5806_s7 + $0x68] ss:$16 sps:$4 sm:$0xff]  }
 0x1a9   : > { %1780 = vmatprep.subr.bf16.mxu0 %v4668_v24  ;;  %1866 = vmatprep.subr.bf16.mxu1 %v4671_v25  ;;  %v4761_v24 = vld [vmem:[%s5806_s7 + $0x8c] ss:$16 sps:$4 sm:$0xff]   ;;  %v4756_v25 = vld [vmem:[%s5806_s7 + $0x80] ss:$16 sps:$4 sm:$0xff]  }
 0x1ac   : > { %1781 = vmatpush1.bf16.msra.mxu0 %v4666_v26  ;;  %1867 = vmatpush1.bf16.msra.mxu1 %v4669_v27  ;;  %v4759_v26 = vld [vmem:[%s5806_s7 + $0x88] ss:$16 sps:$4 sm:$0xff]   ;;  %v4764_v27 = vld [vmem:[%s5806_s7 + $0xa4] ss:$16 sps:$4 sm:$0xff]  }
 0x1ad   : > { %1782 = vmatprep.subr.bf16.mxu0 %v4674_v28  ;;  %1868 = vmatprep.subr.bf16.mxu1 %v4677_v29  ;;  %v4767_v28 = vld [vmem:[%s5806_s7 + $0xac] ss:$16 sps:$4 sm:$0xff]   ;;  %v4762_v29 = vld [vmem:[%s5806_s7 + $0xa0] ss:$16 sps:$4 sm:$0xff]  }
 0x1b0   : > { %1783 = vmatpush1.bf16.msra.mxu0 %v4672_v31  ;;  %1869 = vmatpush1.bf16.msra.mxu1 %v4675_v32  ;;  %v4765_v31 = vld [vmem:[%s5806_s7 + $0xa8] ss:$16 sps:$4 sm:$0xff]   ;;  %v4770_v32 = vld [vmem:[%s5806_s7 + $0xc4] ss:$16 sps:$4 sm:$0xff]  }
 0x1b1   : > { %1784 = vmatprep.subr.bf16.mxu0 %v4680_v33  ;;  %1870 = vmatprep.subr.bf16.mxu1 %v4683_v34  ;;  %v4773_v33 = vld [vmem:[%s5806_s7 + $0xcc] ss:$16 sps:$4 sm:$0xff]   ;;  %v4768_v34 = vld [vmem:[%s5806_s7 + $0xc0] ss:$16 sps:$4 sm:$0xff]  }
 0x1b4   : > { %1785 = vmatpush1.bf16.msra.mxu0 %v4678_v35  ;;  %1871 = vmatpush1.bf16.msra.mxu1 %v4681_v36  ;;  %v4771_v35 = vld [vmem:[%s5806_s7 + $0xc8] ss:$16 sps:$4 sm:$0xff]   ;;  %v4776_v36 = vld [vmem:[%s5806_s7 + $0xe4] ss:$16 sps:$4 sm:$0xff]  }
 0x1b5   : > { %1786 = vmatprep.subr.bf16.mxu0 %v4686_v37  ;;  %1872 = vmatprep.subr.bf16.mxu1 %v4689_v38  ;;  %v4779_v37 = vld [vmem:[%s5806_s7 + $0xec] ss:$16 sps:$4 sm:$0xff]   ;;  %v4774_v38 = vld [vmem:[%s5806_s7 + $0xe0] ss:$16 sps:$4 sm:$0xff]  }
 0x1b8   : > { %1787 = vmatpush1.bf16.msra.mxu0 %v4684_v39  ;;  %1873 = vmatpush1.bf16.msra.mxu1 %v4687_v40  ;;  %v4777_v39 = vld [vmem:[%s5806_s7 + $0xe8] ss:$16 sps:$4 sm:$0xff]   ;;  %v4782_v40 = vld [vmem:[%s5806_s7 + $0x104] ss:$16 sps:$4 sm:$0xff]  }
 0x1b9   : > { %1788 = vmatprep.subr.bf16.mxu0 %v4692_v41  ;;  %1874 = vmatprep.subr.bf16.mxu1 %v4695_v42  ;;  %v4785_v41 = vld [vmem:[%s5806_s7 + $0x10c] ss:$16 sps:$4 sm:$0xff]   ;;  %v4780_v42 = vld [vmem:[%s5806_s7 + $0x100] ss:$16 sps:$4 sm:$0xff]  }
 0x1bc   : > { %1789 = vmatpush1.bf16.msra.mxu0 %v4690_v43  ;;  %1875 = vmatpush1.bf16.msra.mxu1 %v4693_v44  ;;  %v4783_v43 = vld [vmem:[%s5806_s7 + $0x108] ss:$16 sps:$4 sm:$0xff]   ;;  %v4788_v44 = vld [vmem:[%s5806_s7 + $0x124] ss:$16 sps:$4 sm:$0xff]  }
 0x1bd   : > { %1790 = vmatprep.subr.bf16.mxu0 %v4698_v45  ;;  %1876 = vmatprep.subr.bf16.mxu1 %v4701_v46  ;;  %v4791_v45 = vld [vmem:[%s5806_s7 + $0x12c] ss:$16 sps:$4 sm:$0xff]   ;;  %v4786_v46 = vld [vmem:[%s5806_s7 + $0x120] ss:$16 sps:$4 sm:$0xff]  }
 0x1c0   : > { %1791 = vmatpush1.bf16.msra.mxu0 %v4696_v47  ;;  %1877 = vmatpush1.bf16.msra.mxu1 %v4699_v49  ;;  %v4789_v47 = vld [vmem:[%s5806_s7 + $0x128] ss:$16 sps:$4 sm:$0xff]   ;;  %v4794_v49 = vld [vmem:[%s5806_s7 + $0x144] ss:$16 sps:$4 sm:$0xff]  }
 0x1c1   : > { %1792 = vmatprep.subr.bf16.mxu0 %v4704_v50  ;;  %1878 = vmatprep.subr.bf16.mxu1 %v4707_v51  ;;  %v4797_v50 = vld [vmem:[%s5806_s7 + $0x14c] ss:$16 sps:$4 sm:$0xff]   ;;  %v4792_v51 = vld [vmem:[%s5806_s7 + $0x140] ss:$16 sps:$4 sm:$0xff]  }
 0x1c4   : > { %1793 = vmatpush1.bf16.msra.mxu0 %v4702_v52  ;;  %1879 = vmatpush1.bf16.msra.mxu1 %v4705_v53  ;;  %v4795_v52 = vld [vmem:[%s5806_s7 + $0x148] ss:$16 sps:$4 sm:$0xff]   ;;  %v4800_v53 = vld [vmem:[%s5806_s7 + $0x164] ss:$16 sps:$4 sm:$0xff]  }
 0x1c5   : > { %1794 = vmatprep.subr.bf16.mxu0 %v4710_v54  ;;  %1880 = vmatprep.subr.bf16.mxu1 %v4713_v55  ;;  %v4803_v54 = vld [vmem:[%s5806_s7 + $0x16c] ss:$16 sps:$4 sm:$0xff]   ;;  %v4798_v55 = vld [vmem:[%s5806_s7 + $0x160] ss:$16 sps:$4 sm:$0xff]  }
 0x1c8   : > { %1795 = vmatpush1.bf16.msra.mxu0 %v4708_v56  ;;  %1881 = vmatpush1.bf16.msra.mxu1 %v4711_v57  ;;  %v4801_v56 = vld [vmem:[%s5806_s7 + $0x168] ss:$16 sps:$4 sm:$0xff]   ;;  %v4806_v57 = vld [vmem:[%s5806_s7 + $0x184] ss:$16 sps:$4 sm:$0xff]  }
 0x1c9   : > { %1796 = vmatprep.subr.bf16.mxu0 %v4716_v58  ;;  %1882 = vmatprep.subr.bf16.mxu1 %v4719_v59  ;;  %v4809_v58 = vld [vmem:[%s5806_s7 + $0x18c] ss:$16 sps:$4 sm:$0xff]   ;;  %v4804_v59 = vld [vmem:[%s5806_s7 + $0x180] ss:$16 sps:$4 sm:$0xff]  }
 0x1cc   : > { %1797 = vmatpush1.bf16.msra.mxu0 %v4714_v60  ;;  %1883 = vmatpush1.bf16.msra.mxu1 %v4717_v61  ;;  %v4807_v60 = vld [vmem:[%s5806_s7 + $0x188] ss:$16 sps:$4 sm:$0xff]   ;;  %v4812_v61 = vld [vmem:[%s5806_s7 + $0x1a4] ss:$16 sps:$4 sm:$0xff]  }
 0x1cd   : > { %1798 = vmatprep.subr.bf16.mxu0 %v4722_v62  ;;  %1884 = vmatprep.subr.bf16.mxu1 %v4725_v63  ;;  %v4815_v62 = vld [vmem:[%s5806_s7 + $0x1ac] ss:$16 sps:$4 sm:$0xff]   ;;  %v4810_v63 = vld [vmem:[%s5806_s7 + $0x1a0] ss:$16 sps:$4 sm:$0xff]  }
 0x1d0   : > { %1799 = vmatpush1.bf16.msra.mxu0 %v4720_v0  ;;  %1885 = vmatpush1.bf16.msra.mxu1 %v4723_v1  ;;  %v4813_v0 = vld [vmem:[%s5806_s7 + $0x1a8] ss:$16 sps:$4 sm:$0xff]   ;;  %v4818_v1 = vld [vmem:[%s5806_s7 + $0x1c4] ss:$16 sps:$4 sm:$0xff]  }
 0x1d1   : > { %1800 = vmatprep.subr.bf16.mxu0 %v4728_v2  ;;  %1886 = vmatprep.subr.bf16.mxu1 %v4731_v3  ;;  %v4821_v2 = vld [vmem:[%s5806_s7 + $0x1cc] ss:$16 sps:$4 sm:$0xff]   ;;  %v4816_v3 = vld [vmem:[%s5806_s7 + $0x1c0] ss:$16 sps:$4 sm:$0xff]  }
 0x1d4   : > { %1801 = vmatpush1.bf16.msra.mxu0 %v4726_v4  ;;  %1887 = vmatpush1.bf16.msra.mxu1 %v4729_v5  ;;  %v4819_v4 = vld [vmem:[%s5806_s7 + $0x1c8] ss:$16 sps:$4 sm:$0xff]   ;;  %v4824_v5 = vld [vmem:[%s5806_s7 + $0x1e4] ss:$16 sps:$4 sm:$0xff]  }
 0x1d5   : > { %2667 = vmatprep.subr.bf16.mxu0 %v4734_v6  ;;  %2753 = vmatprep.subr.bf16.mxu1 %v4737_v8  ;;  %v4827_v6 = vld [vmem:[%s5806_s7 + $0x1ec] ss:$16 sps:$4 sm:$0xff]   ;;  %v4822_v8 = vld [vmem:[%s5806_s7 + $0x1e0] ss:$16 sps:$4 sm:$0xff]  }
 0x1d7   : > { %1803 = vmatmul.mubr.bf16.vlgmr.msra.gmra.mrb[0].mxu0 %v5966_v9  ;;  %1889 = vmatmul.mubr.bf16.vlgmr.msra.gmra.mrb[0].mxu1 %v5966_v9 }
 0x1d8   : > { %2668 = vmatpush1.bf16.msra.mxu0 %v4732_v10  ;;  %2754 = vmatpush1.bf16.msra.mxu1 %v4735_v11  ;;  %v4825_v10 = vld [vmem:[%s5806_s7 + $0x1e8] ss:$16 sps:$4 sm:$0xff]   ;;  %v4830_v11 = vld [vmem:[%s5806_s7 + $0x204] ss:$16 sps:$4 sm:$0xff]  }
 0x1d9   : > { %2669 = vmatprep.subr.bf16.mxu0 %v4740_v12  ;;  %2755 = vmatprep.subr.bf16.mxu1 %v4743_v13  ;;  %v4833_v12 = vld [vmem:[%s5806_s7 + $0x20c] ss:$16 sps:$4 sm:$0xff]   ;;  %v4828_v13 = vld [vmem:[%s5806_s7 + $0x200] ss:$16 sps:$4 sm:$0xff]  }
 0x1da   : > { %2699 = vmatprep.mubr.bf16.mxu0 %v5870_v48  ;;  %2785 = vmatprep.mubr.bf16.mxu1 %v5870_v48  ;;  %v4758_v48 = vld [vmem:[%s5806_s7 + $0x84] ss:$16 sps:$4 sm:$0xff]  }
 0x1dc   : > { %2670 = vmatpush1.bf16.msra.mxu0 %v4738_v14  ;;  %2756 = vmatpush1.bf16.msra.mxu1 %v4741_v15  ;;  %v4831_v14 = vld [vmem:[%s5806_s7 + $0x208] ss:$16 sps:$4 sm:$0xff]   ;;  %v4836_v15 = vld [vmem:[%s5806_s7 + $0x224] ss:$16 sps:$4 sm:$0xff]  }
 0x1dd   : > { %2671 = vmatprep.subr.bf16.mxu0 %v4746_v16  ;;  %2757 = vmatprep.subr.bf16.mxu1 %v4749_v17  ;;  %v4839_v16 = vld [vmem:[%s5806_s7 + $0x22c] ss:$16 sps:$4 sm:$0xff]   ;;  %v4834_v17 = vld [vmem:[%s5806_s7 + $0x220] ss:$16 sps:$4 sm:$0xff]  }
 0x1e0   : > { %2672 = vmatpush1.bf16.msra.mxu0 %v4744_v18  ;;  %2758 = vmatpush1.bf16.msra.mxu1 %v4747_v19  ;;  %v4837_v18 = vld [vmem:[%s5806_s7 + $0x228] ss:$16 sps:$4 sm:$0xff]   ;;  %v4842_v19 = vld [vmem:[%s5806_s7 + $0x244] ss:$16 sps:$4 sm:$0xff]  }
 0x1e1   : > { %2673 = vmatprep.subr.bf16.mxu0 %v4752_v20  ;;  %2759 = vmatprep.subr.bf16.mxu1 %v4755_v21  ;;  %v4845_v20 = vld [vmem:[%s5806_s7 + $0x24c] ss:$16 sps:$4 sm:$0xff]   ;;  %v4840_v21 = vld [vmem:[%s5806_s7 + $0x240] ss:$16 sps:$4 sm:$0xff]  }
 0x1e4   : > { %2674 = vmatpush1.bf16.msra.mxu0 %v4750_v22  ;;  %2760 = vmatpush1.bf16.msra.mxu1 %v4753_v23  ;;  %v4843_v22 = vld [vmem:[%s5806_s7 + $0x248] ss:$16 sps:$4 sm:$0xff]   ;;  %v4848_v23 = vld [vmem:[%s5806_s7 + $0x264] ss:$16 sps:$4 sm:$0xff]  }
 0x1e5   : > { %2675 = vmatprep.subr.bf16.mxu0 %v4758_v48  ;;  %2761 = vmatprep.subr.bf16.mxu1 %v4761_v24  ;;  %v4846_v48 = vld [vmem:[%s5806_s7 + $0x260] ss:$16 sps:$4 sm:$0xff]   ;;  %v4849_v24 = vld [vmem:[%s5806_s7 + $0x268] ss:$16 sps:$4 sm:$0xff]  }
 0x1e8   : > { %2676 = vmatpush1.bf16.msra.mxu0 %v4756_v25  ;;  %2762 = vmatpush1.bf16.msra.mxu1 %v4759_v26  ;;  %v4854_v25 = vld [vmem:[%s5806_s7 + $0x284] ss:$16 sps:$4 sm:$0xff]   ;;  %v4857_v26 = vld [vmem:[%s5806_s7 + $0x28c] ss:$16 sps:$4 sm:$0xff]  }
 0x1e9   : > { %2677 = vmatprep.subr.bf16.mxu0 %v4764_v27  ;;  %2763 = vmatprep.subr.bf16.mxu1 %v4767_v28  ;;  %v4855_v27 = vld [vmem:[%s5806_s7 + $0x288] ss:$16 sps:$4 sm:$0xff]   ;;  %v4860_v28 = vld [vmem:[%s5806_s7 + $0x2a4] ss:$16 sps:$4 sm:$0xff]  }
 0x1ec   : > { %2678 = vmatpush1.bf16.msra.mxu0 %v4762_v29  ;;  %2764 = vmatpush1.bf16.msra.mxu1 %v4765_v31  ;;  %v4863_v29 = vld [vmem:[%s5806_s7 + $0x2ac] ss:$16 sps:$4 sm:$0xff]   ;;  %v4858_v31 = vld [vmem:[%s5806_s7 + $0x2a0] ss:$16 sps:$4 sm:$0xff]  }
 0x1ed   : > { %2679 = vmatprep.subr.bf16.mxu0 %v4770_v32  ;;  %2765 = vmatprep.subr.bf16.mxu1 %v4773_v33  ;;  %v4861_v32 = vld [vmem:[%s5806_s7 + $0x2a8] ss:$16 sps:$4 sm:$0xff]   ;;  %v4866_v33 = vld [vmem:[%s5806_s7 + $0x2c4] ss:$16 sps:$4 sm:$0xff]  }
 0x1f0   : > { %2680 = vmatpush1.bf16.msra.mxu0 %v4768_v34  ;;  %2766 = vmatpush1.bf16.msra.mxu1 %v4771_v35  ;;  %v4869_v34 = vld [vmem:[%s5806_s7 + $0x2cc] ss:$16 sps:$4 sm:$0xff]   ;;  %v4864_v35 = vld [vmem:[%s5806_s7 + $0x2c0] ss:$16 sps:$4 sm:$0xff]  }
 0x1f1   : > { %2681 = vmatprep.subr.bf16.mxu0 %v4776_v36  ;;  %2767 = vmatprep.subr.bf16.mxu1 %v4779_v37  ;;  %v4867_v36 = vld [vmem:[%s5806_s7 + $0x2c8] ss:$16 sps:$4 sm:$0xff]   ;;  %v4872_v37 = vld [vmem:[%s5806_s7 + $0x2e4] ss:$16 sps:$4 sm:$0xff]  }
 0x1f4   : > { %2682 = vmatpush1.bf16.msra.mxu0 %v4774_v38  ;;  %2768 = vmatpush1.bf16.msra.mxu1 %v4777_v39  ;;  %v4875_v38 = vld [vmem:[%s5806_s7 + $0x2ec] ss:$16 sps:$4 sm:$0xff]   ;;  %v4870_v39 = vld [vmem:[%s5806_s7 + $0x2e0] ss:$16 sps:$4 sm:$0xff]  }
 0x1f5   : > { %2683 = vmatprep.subr.bf16.mxu0 %v4782_v40  ;;  %2769 = vmatprep.subr.bf16.mxu1 %v4785_v41  ;;  %v4873_v40 = vld [vmem:[%s5806_s7 + $0x2e8] ss:$16 sps:$4 sm:$0xff]   ;;  %v4878_v41 = vld [vmem:[%s5806_s7 + $0x304] ss:$16 sps:$4 sm:$0xff]  }
 0x1f8   : > { %2684 = vmatpush1.bf16.msra.mxu0 %v4780_v42  ;;  %2770 = vmatpush1.bf16.msra.mxu1 %v4783_v43  ;;  %v4881_v42 = vld [vmem:[%s5806_s7 + $0x30c] ss:$16 sps:$4 sm:$0xff]   ;;  %v4876_v43 = vld [vmem:[%s5806_s7 + $0x300] ss:$16 sps:$4 sm:$0xff]  }
 0x1f9   : > { %2685 = vmatprep.subr.bf16.mxu0 %v4788_v44  ;;  %2771 = vmatprep.subr.bf16.mxu1 %v4791_v45  ;;  %v4879_v44 = vld [vmem:[%s5806_s7 + $0x308] ss:$16 sps:$4 sm:$0xff]   ;;  %v4884_v45 = vld [vmem:[%s5806_s7 + $0x324] ss:$16 sps:$4 sm:$0xff]  }
 0x1fc   : > { %2686 = vmatpush1.bf16.msra.mxu0 %v4786_v46  ;;  %2772 = vmatpush1.bf16.msra.mxu1 %v4789_v47  ;;  %v4887_v46 = vld [vmem:[%s5806_s7 + $0x32c] ss:$16 sps:$4 sm:$0xff]   ;;  %v4882_v47 = vld [vmem:[%s5806_s7 + $0x320] ss:$16 sps:$4 sm:$0xff]  }
 0x1fd   : > { %2687 = vmatprep.subr.bf16.mxu0 %v4794_v49  ;;  %2773 = vmatprep.subr.bf16.mxu1 %v4797_v50  ;;  %v4885_v49 = vld [vmem:[%s5806_s7 + $0x328] ss:$16 sps:$4 sm:$0xff]   ;;  %v4890_v50 = vld [vmem:[%s5806_s7 + $0x344] ss:$16 sps:$4 sm:$0xff]  }
 0x200   : > { %2688 = vmatpush1.bf16.msra.mxu0 %v4792_v51  ;;  %2774 = vmatpush1.bf16.msra.mxu1 %v4795_v52  ;;  %v4893_v51 = vld [vmem:[%s5806_s7 + $0x34c] ss:$16 sps:$4 sm:$0xff]   ;;  %v4888_v52 = vld [vmem:[%s5806_s7 + $0x340] ss:$16 sps:$4 sm:$0xff]  }
 0x201   : > { %2689 = vmatprep.subr.bf16.mxu0 %v4800_v53  ;;  %2775 = vmatprep.subr.bf16.mxu1 %v4803_v54  ;;  %v4891_v53 = vld [vmem:[%s5806_s7 + $0x348] ss:$16 sps:$4 sm:$0xff]   ;;  %v4896_v54 = vld [vmem:[%s5806_s7 + $0x364] ss:$16 sps:$4 sm:$0xff]  }
 0x204   : > { %2690 = vmatpush1.bf16.msra.mxu0 %v4798_v55  ;;  %2776 = vmatpush1.bf16.msra.mxu1 %v4801_v56  ;;  %v4899_v55 = vld [vmem:[%s5806_s7 + $0x36c] ss:$16 sps:$4 sm:$0xff]   ;;  %v4894_v56 = vld [vmem:[%s5806_s7 + $0x360] ss:$16 sps:$4 sm:$0xff]  }
 0x205   : > { %2691 = vmatprep.subr.bf16.mxu0 %v4806_v57  ;;  %2777 = vmatprep.subr.bf16.mxu1 %v4809_v58  ;;  %v4897_v57 = vld [vmem:[%s5806_s7 + $0x368] ss:$16 sps:$4 sm:$0xff]   ;;  %v4902_v58 = vld [vmem:[%s5806_s7 + $0x384] ss:$16 sps:$4 sm:$0xff]  }
 0x208   : > { %2692 = vmatpush1.bf16.msra.mxu0 %v4804_v59  ;;  %2778 = vmatpush1.bf16.msra.mxu1 %v4807_v60  ;;  %v4905_v59 = vld [vmem:[%s5806_s7 + $0x38c] ss:$16 sps:$4 sm:$0xff]   ;;  %v4900_v60 = vld [vmem:[%s5806_s7 + $0x380] ss:$16 sps:$4 sm:$0xff]  }
 0x209   : > { %2693 = vmatprep.subr.bf16.mxu0 %v4812_v61  ;;  %2779 = vmatprep.subr.bf16.mxu1 %v4815_v62  ;;  %v4903_v61 = vld [vmem:[%s5806_s7 + $0x388] ss:$16 sps:$4 sm:$0xff]   ;;  %v4908_v62 = vld [vmem:[%s5806_s7 + $0x3a4] ss:$16 sps:$4 sm:$0xff]  }
 0x20c   : > { %2694 = vmatpush1.bf16.msra.mxu0 %v4810_v63  ;;  %2780 = vmatpush1.bf16.msra.mxu1 %v4813_v0  ;;  %v4911_v63 = vld [vmem:[%s5806_s7 + $0x3ac] ss:$16 sps:$4 sm:$0xff]   ;;  %v4906_v0 = vld [vmem:[%s5806_s7 + $0x3a0] ss:$16 sps:$4 sm:$0xff]  }
 0x20d   : > { %2695 = vmatprep.subr.bf16.mxu0 %v4818_v1  ;;  %2781 = vmatprep.subr.bf16.mxu1 %v4821_v2  ;;  %v4909_v1 = vld [vmem:[%s5806_s7 + $0x3a8] ss:$16 sps:$4 sm:$0xff]   ;;  %v4914_v2 = vld [vmem:[%s5806_s7 + $0x3c4] ss:$16 sps:$4 sm:$0xff]  }
 0x210   : > { %2696 = vmatpush1.bf16.msra.mxu0 %v4816_v3  ;;  %2782 = vmatpush1.bf16.msra.mxu1 %v4819_v4  ;;  %v4917_v3 = vld [vmem:[%s5806_s7 + $0x3cc] ss:$16 sps:$4 sm:$0xff]   ;;  %v4912_v4 = vld [vmem:[%s5806_s7 + $0x3c0] ss:$16 sps:$4 sm:$0xff]  }
 0x211   : > { %2697 = vmatprep.subr.bf16.mxu0 %v4824_v5  ;;  %2783 = vmatprep.subr.bf16.mxu1 %v4827_v6  ;;  %v4915_v5 = vld [vmem:[%s5806_s7 + $0x3c8] ss:$16 sps:$4 sm:$0xff]   ;;  %v4920_v6 = vld [vmem:[%s5806_s7 + $0x3e4] ss:$16 sps:$4 sm:$0xff]  }
 0x214   : > { %2698 = vmatpush1.bf16.msra.mxu0 %v4822_v8  ;;  %2784 = vmatpush1.bf16.msra.mxu1 %v4825_v10  ;;  %v4923_v8 = vld [vmem:[%s5806_s7 + $0x3ec] ss:$16 sps:$4 sm:$0xff]   ;;  %v4918_v10 = vld [vmem:[%s5806_s7 + $0x3e0] ss:$16 sps:$4 sm:$0xff]  }
 0x215   : > { %2710 = vmatprep.subr.bf16.mxu0 %v4830_v11  ;;  %2796 = vmatprep.subr.bf16.mxu1 %v4833_v12  ;;  %v4921_v11 = vld [vmem:[%s5806_s7 + $0x3e8] ss:$16 sps:$4 sm:$0xff]   ;;  %v4926_v12 = vld [vmem:[%s5802_s30 + $0x4] ss:$16 sps:$4 sm:$0xff]  }
 0x217   : > { %2700 = vmatmul.mubr.bf16.vlgmr.msra.gmra.mrb[4].mxu0 %v5896_v7  ;;  %2786 = vmatmul.mubr.bf16.vlgmr.msra.gmra.mrb[4].mxu1 %v5896_v7  ;;  %v4851_v7 = vld [vmem:[%s5806_s7 + $0x26c] ss:$16 sps:$4 sm:$0xff]  }
 0x218   : > { %2711 = vmatpush1.bf16.msra.mxu0 %v4828_v13  ;;  %2797 = vmatpush1.bf16.msra.mxu1 %v4831_v14  ;;  %v4929_v13 = vld [vmem:[%s5802_s30 + $0xc] ss:$16 sps:$4 sm:$0xff]   ;;  %v4924_v14 = vld [vmem:[%s5802_s30] ss:$16 sps:$4 sm:$0xff]  }
 0x219   : > { %2712 = vmatprep.subr.bf16.mxu0 %v4836_v15  ;;  %2798 = vmatprep.subr.bf16.mxu1 %v4839_v16  ;;  %v4927_v15 = vld [vmem:[%s5802_s30 + $0x8] ss:$16 sps:$4 sm:$0xff]   ;;  %v4932_v16 = vld [vmem:[%s5802_s30 + $0x24] ss:$16 sps:$4 sm:$0xff]  }
 0x21a   : > { %2742 = vmatprep.mubr.bf16.mxu0 %v5922_v30  ;;  %2828 = vmatprep.mubr.bf16.mxu1 %v5922_v30  ;;  %v4852_v30 = vld [vmem:[%s5806_s7 + $0x280] ss:$16 sps:$4 sm:$0xff]  }
 0x21c   : > { %2713 = vmatpush1.bf16.msra.mxu0 %v4834_v17  ;;  %2799 = vmatpush1.bf16.msra.mxu1 %v4837_v18  ;;  %v4935_v17 = vld [vmem:[%s5802_s30 + $0x2c] ss:$16 sps:$4 sm:$0xff]   ;;  %v4930_v18 = vld [vmem:[%s5802_s30 + $0x20] ss:$16 sps:$4 sm:$0xff]  }
 0x21d   : > { %2714 = vmatprep.subr.bf16.mxu0 %v4842_v19  ;;  %2800 = vmatprep.subr.bf16.mxu1 %v4845_v20  ;;  %v4933_v19 = vld [vmem:[%s5802_s30 + $0x28] ss:$16 sps:$4 sm:$0xff]   ;;  %v4938_v20 = vld [vmem:[%s5802_s30 + $0x44] ss:$16 sps:$4 sm:$0xff]  }
 0x220   : > { %2715 = vmatpush1.bf16.msra.mxu0 %v4840_v21  ;;  %2801 = vmatpush1.bf16.msra.mxu1 %v4843_v22  ;;  %v4941_v21 = vld [vmem:[%s5802_s30 + $0x4c] ss:$16 sps:$4 sm:$0xff]   ;;  %v4936_v22 = vld [vmem:[%s5802_s30 + $0x40] ss:$16 sps:$4 sm:$0xff]  }
 0x221   : > { %2716 = vmatprep.subr.bf16.mxu0 %v4848_v23  ;;  %2802 = vmatprep.subr.bf16.mxu1 %v4851_v7  ;;  %v4939_v23 = vld [vmem:[%s5802_s30 + $0x48] ss:$16 sps:$4 sm:$0xff]   ;;  %v4947_v7 = vld [vmem:[%s5802_s30 + $0x6c] ss:$16 sps:$4 sm:$0xff]  }
 0x224   : > { %2717 = vmatpush1.bf16.msra.mxu0 %v4846_v48  ;;  %2803 = vmatpush1.bf16.msra.mxu1 %v4849_v24  ;;  %v4942_v48 = vld [vmem:[%s5802_s30 + $0x60] ss:$16 sps:$4 sm:$0xff]   ;;  %v4945_v24 = vld [vmem:[%s5802_s30 + $0x68] ss:$16 sps:$4 sm:$0xff]  }
 0x225   : > { %2718 = vmatprep.subr.bf16.mxu0 %v4854_v25  ;;  %2804 = vmatprep.subr.bf16.mxu1 %v4857_v26  ;;  %v4950_v25 = vld [vmem:[%s5802_s30 + $0x84] ss:$16 sps:$4 sm:$0xff]   ;;  %v4953_v26 = vld [vmem:[%s5802_s30 + $0x8c] ss:$16 sps:$4 sm:$0xff]  }
 0x228   : > { %2719 = vmatpush1.bf16.msra.mxu0 %v4852_v30  ;;  %2805 = vmatpush1.bf16.msra.mxu1 %v4855_v27  ;;  %v4948_v30 = vld [vmem:[%s5802_s30 + $0x80] ss:$16 sps:$4 sm:$0xff]   ;;  %v4951_v27 = vld [vmem:[%s5802_s30 + $0x88] ss:$16 sps:$4 sm:$0xff]  }
 0x229   : > { %2720 = vmatprep.subr.bf16.mxu0 %v4860_v28  ;;  %2806 = vmatprep.subr.bf16.mxu1 %v4863_v29  ;;  %v4956_v28 = vld [vmem:[%s5802_s30 + $0xa4] ss:$16 sps:$4 sm:$0xff]   ;;  %v4959_v29 = vld [vmem:[%s5802_s30 + $0xac] ss:$16 sps:$4 sm:$0xff]  }
 0x22c   : > { %2721 = vmatpush1.bf16.msra.mxu0 %v4858_v31  ;;  %2807 = vmatpush1.bf16.msra.mxu1 %v4861_v32  ;;  %v4954_v31 = vld [vmem:[%s5802_s30 + $0xa0] ss:$16 sps:$4 sm:$0xff]   ;;  %v4957_v32 = vld [vmem:[%s5802_s30 + $0xa8] ss:$16 sps:$4 sm:$0xff]  }
 0x22d   : > { %2722 = vmatprep.subr.bf16.mxu0 %v4866_v33  ;;  %2808 = vmatprep.subr.bf16.mxu1 %v4869_v34  ;;  %v4962_v33 = vld [vmem:[%s5802_s30 + $0xc4] ss:$16 sps:$4 sm:$0xff]   ;;  %v4965_v34 = vld [vmem:[%s5802_s30 + $0xcc] ss:$16 sps:$4 sm:$0xff]  }
 0x230   : > { %2723 = vmatpush1.bf16.msra.mxu0 %v4864_v35  ;;  %2809 = vmatpush1.bf16.msra.mxu1 %v4867_v36  ;;  %v4960_v35 = vld [vmem:[%s5802_s30 + $0xc0] ss:$16 sps:$4 sm:$0xff]   ;;  %v4963_v36 = vld [vmem:[%s5802_s30 + $0xc8] ss:$16 sps:$4 sm:$0xff]  }
 0x231   : > { %2724 = vmatprep.subr.bf16.mxu0 %v4872_v37  ;;  %2810 = vmatprep.subr.bf16.mxu1 %v4875_v38  ;;  %v4968_v37 = vld [vmem:[%s5802_s30 + $0xe4] ss:$16 sps:$4 sm:$0xff]   ;;  %v4971_v38 = vld [vmem:[%s5802_s30 + $0xec] ss:$16 sps:$4 sm:$0xff]  }
 0x234   : > { %2725 = vmatpush1.bf16.msra.mxu0 %v4870_v39  ;;  %2811 = vmatpush1.bf16.msra.mxu1 %v4873_v40  ;;  %v4966_v39 = vld [vmem:[%s5802_s30 + $0xe0] ss:$16 sps:$4 sm:$0xff]   ;;  %v4969_v40 = vld [vmem:[%s5802_s30 + $0xe8] ss:$16 sps:$4 sm:$0xff]  }
 0x235   : > { %2726 = vmatprep.subr.bf16.mxu0 %v4878_v41  ;;  %2812 = vmatprep.subr.bf16.mxu1 %v4881_v42  ;;  %v4974_v41 = vld [vmem:[%s5802_s30 + $0x104] ss:$16 sps:$4 sm:$0xff]   ;;  %v4977_v42 = vld [vmem:[%s5802_s30 + $0x10c] ss:$16 sps:$4 sm:$0xff]  }
 0x238   : > { %2727 = vmatpush1.bf16.msra.mxu0 %v4876_v43  ;;  %2813 = vmatpush1.bf16.msra.mxu1 %v4879_v44  ;;  %v4972_v43 = vld [vmem:[%s5802_s30 + $0x100] ss:$16 sps:$4 sm:$0xff]   ;;  %v4975_v44 = vld [vmem:[%s5802_s30 + $0x108] ss:$16 sps:$4 sm:$0xff]  }
 0x239   : > { %2728 = vmatprep.subr.bf16.mxu0 %v4884_v45  ;;  %2814 = vmatprep.subr.bf16.mxu1 %v4887_v46  ;;  %v4980_v45 = vld [vmem:[%s5802_s30 + $0x124] ss:$16 sps:$4 sm:$0xff]   ;;  %v4983_v46 = vld [vmem:[%s5802_s30 + $0x12c] ss:$16 sps:$4 sm:$0xff]  }
 0x23c   : > { %2729 = vmatpush1.bf16.msra.mxu0 %v4882_v47  ;;  %2815 = vmatpush1.bf16.msra.mxu1 %v4885_v49  ;;  %v4978_v47 = vld [vmem:[%s5802_s30 + $0x120] ss:$16 sps:$4 sm:$0xff]   ;;  %v4981_v49 = vld [vmem:[%s5802_s30 + $0x128] ss:$16 sps:$4 sm:$0xff]  }
 0x23d   : > { %2730 = vmatprep.subr.bf16.mxu0 %v4890_v50  ;;  %2816 = vmatprep.subr.bf16.mxu1 %v4893_v51  ;;  %v4986_v50 = vld [vmem:[%s5802_s30 + $0x144] ss:$16 sps:$4 sm:$0xff]   ;;  %v4989_v51 = vld [vmem:[%s5802_s30 + $0x14c] ss:$16 sps:$4 sm:$0xff]  }
 0x240   : > { %2731 = vmatpush1.bf16.msra.mxu0 %v4888_v52  ;;  %2817 = vmatpush1.bf16.msra.mxu1 %v4891_v53  ;;  %v4984_v52 = vld [vmem:[%s5802_s30 + $0x140] ss:$16 sps:$4 sm:$0xff]   ;;  %v4987_v53 = vld [vmem:[%s5802_s30 + $0x148] ss:$16 sps:$4 sm:$0xff]  }
 0x241   : > { %2732 = vmatprep.subr.bf16.mxu0 %v4896_v54  ;;  %2818 = vmatprep.subr.bf16.mxu1 %v4899_v55  ;;  %v4992_v54 = vld [vmem:[%s5802_s30 + $0x164] ss:$16 sps:$4 sm:$0xff]   ;;  %v4995_v55 = vld [vmem:[%s5802_s30 + $0x16c] ss:$16 sps:$4 sm:$0xff]  }
 0x244   : > { %2733 = vmatpush1.bf16.msra.mxu0 %v4894_v56  ;;  %2819 = vmatpush1.bf16.msra.mxu1 %v4897_v57  ;;  %v4990_v56 = vld [vmem:[%s5802_s30 + $0x160] ss:$16 sps:$4 sm:$0xff]   ;;  %v4993_v57 = vld [vmem:[%s5802_s30 + $0x168] ss:$16 sps:$4 sm:$0xff]  }
 0x245   : > { %2734 = vmatprep.subr.bf16.mxu0 %v4902_v58  ;;  %2820 = vmatprep.subr.bf16.mxu1 %v4905_v59  ;;  %v4998_v58 = vld [vmem:[%s5802_s30 + $0x184] ss:$16 sps:$4 sm:$0xff]   ;;  %v5001_v59 = vld [vmem:[%s5802_s30 + $0x18c] ss:$16 sps:$4 sm:$0xff]  }
 0x248   : > { %2735 = vmatpush1.bf16.msra.mxu0 %v4900_v60  ;;  %2821 = vmatpush1.bf16.msra.mxu1 %v4903_v61  ;;  %v4996_v60 = vld [vmem:[%s5802_s30 + $0x180] ss:$16 sps:$4 sm:$0xff]   ;;  %v4999_v61 = vld [vmem:[%s5802_s30 + $0x188] ss:$16 sps:$4 sm:$0xff]  }
 0x249   : > { %2736 = vmatprep.subr.bf16.mxu0 %v4908_v62  ;;  %2822 = vmatprep.subr.bf16.mxu1 %v4911_v63  ;;  %v5004_v62 = vld [vmem:[%s5802_s30 + $0x1a4] ss:$16 sps:$4 sm:$0xff]   ;;  %v5007_v63 = vld [vmem:[%s5802_s30 + $0x1ac] ss:$16 sps:$4 sm:$0xff]  }
 0x24c   : > { %2737 = vmatpush1.bf16.msra.mxu0 %v4906_v0  ;;  %2823 = vmatpush1.bf16.msra.mxu1 %v4909_v1  ;;  %v5002_v0 = vld [vmem:[%s5802_s30 + $0x1a0] ss:$16 sps:$4 sm:$0xff]   ;;  %v5005_v1 = vld [vmem:[%s5802_s30 + $0x1a8] ss:$16 sps:$4 sm:$0xff]  }
 0x24d   : > { %2738 = vmatprep.subr.bf16.mxu0 %v4914_v2  ;;  %2824 = vmatprep.subr.bf16.mxu1 %v4917_v3 }
 0x250   : > { %2739 = vmatpush1.bf16.msra.mxu0 %v4912_v4  ;;  %2825 = vmatpush1.bf16.msra.mxu1 %v4915_v5 }
 0x251   : > { %2740 = vmatprep.subr.bf16.mxu0 %v4920_v6  ;;  %2826 = vmatprep.subr.bf16.mxu1 %v4923_v8 }
 0x254   : > { %2741 = vmatpush1.bf16.msra.mxu0 %v4918_v10  ;;  %2827 = vmatpush1.bf16.msra.mxu1 %v4921_v11 }
 0x255   : > { %3683 = vmatprep.subr.bf16.mxu0 %v4926_v12  ;;  %3769 = vmatprep.subr.bf16.mxu1 %v4929_v13  ;;  %v5008_v12 = vld [vmem:[%s5802_s30 + $0x1c0] ss:$16 sps:$4 sm:$0xff]   ;;  %v5010_v13 = vld [vmem:[%s5802_s30 + $0x1c4] ss:$16 sps:$4 sm:$0xff]  }
 0x257   : > { %2743 = vmatmul.mubr.bf16.vlgmr.msra.gmra.mrb[4].mxu0 %v5966_v9  ;;  %2829 = vmatmul.mubr.bf16.vlgmr.msra.gmra.mrb[4].mxu1 %v5966_v9  ;;  %v4944_v9 = vld [vmem:[%s5802_s30 + $0x64] ss:$16 sps:$4 sm:$0xff]  }
 0x258   : > { %3684 = vmatpush1.bf16.msra.mxu0 %v4924_v14  ;;  %3770 = vmatpush1.bf16.msra.mxu1 %v4927_v15  ;;  %v5011_v14 = vld [vmem:[%s5802_s30 + $0x1c8] ss:$16 sps:$4 sm:$0xff]   ;;  %v5013_v15 = vld [vmem:[%s5802_s30 + $0x1cc] ss:$16 sps:$4 sm:$0xff]  }
 0x259   : > { %3685 = vmatprep.subr.bf16.mxu0 %v4932_v16  ;;  %3771 = vmatprep.subr.bf16.mxu1 %v4935_v17  ;;  %v5016_v16 = vld [vmem:[%s5802_s30 + $0x1e4] ss:$16 sps:$4 sm:$0xff]   ;;  %v5019_v17 = vld [vmem:[%s5802_s30 + $0x1ec] ss:$16 sps:$4 sm:$0xff]  }
 0x25c   : > { %3686 = vmatpush1.bf16.msra.mxu0 %v4930_v18  ;;  %3772 = vmatpush1.bf16.msra.mxu1 %v4933_v19  ;;  %v5014_v18 = vld [vmem:[%s5802_s30 + $0x1e0] ss:$16 sps:$4 sm:$0xff]   ;;  %v5017_v19 = vld [vmem:[%s5802_s30 + $0x1e8] ss:$16 sps:$4 sm:$0xff]  }
 0x25d   : > { %3687 = vmatprep.subr.bf16.mxu0 %v4938_v20  ;;  %3773 = vmatprep.subr.bf16.mxu1 %v4941_v21  ;;  %v5022_v20 = vld [vmem:[%s5802_s30 + $0x204] ss:$16 sps:$4 sm:$0xff]   ;;  %v5025_v21 = vld [vmem:[%s5802_s30 + $0x20c] ss:$16 sps:$4 sm:$0xff]  }
 0x260   : > { %3688 = vmatpush1.bf16.msra.mxu0 %v4936_v22  ;;  %3774 = vmatpush1.bf16.msra.mxu1 %v4939_v23 }
 0x261   : > { %3689 = vmatprep.subr.bf16.mxu0 %v4944_v9  ;;  %3775 = vmatprep.subr.bf16.mxu1 %v4947_v7 }
 0x264   : > { %3690 = vmatpush1.bf16.msra.mxu0 %v4942_v48  ;;  %3776 = vmatpush1.bf16.msra.mxu1 %v4945_v24 }
 0x265   : > { %3691 = vmatprep.subr.bf16.mxu0 %v4950_v25  ;;  %3777 = vmatprep.subr.bf16.mxu1 %v4953_v26 }
 0x268   : > { %3692 = vmatpush1.bf16.msra.mxu0 %v4948_v30  ;;  %3778 = vmatpush1.bf16.msra.mxu1 %v4951_v27 }
 0x269   : > { %3693 = vmatprep.subr.bf16.mxu0 %v4956_v28  ;;  %3779 = vmatprep.subr.bf16.mxu1 %v4959_v29 }
 0x26c   : > { %3694 = vmatpush1.bf16.msra.mxu0 %v4954_v31  ;;  %3780 = vmatpush1.bf16.msra.mxu1 %v4957_v32 }
 0x26d   : > { %3695 = vmatprep.subr.bf16.mxu0 %v4962_v33  ;;  %3781 = vmatprep.subr.bf16.mxu1 %v4965_v34 }
 0x270   : > { %3696 = vmatpush1.bf16.msra.mxu0 %v4960_v35  ;;  %3782 = vmatpush1.bf16.msra.mxu1 %v4963_v36 }
 0x271   : > { %3697 = vmatprep.subr.bf16.mxu0 %v4968_v37  ;;  %3783 = vmatprep.subr.bf16.mxu1 %v4971_v38 }
 0x274   : > { %3698 = vmatpush1.bf16.msra.mxu0 %v4966_v39  ;;  %3784 = vmatpush1.bf16.msra.mxu1 %v4969_v40 }
 0x275   : > { %3699 = vmatprep.subr.bf16.mxu0 %v4974_v41  ;;  %3785 = vmatprep.subr.bf16.mxu1 %v4977_v42 }
 0x278   : > { %3700 = vmatpush1.bf16.msra.mxu0 %v4972_v43  ;;  %3786 = vmatpush1.bf16.msra.mxu1 %v4975_v44 }
 0x279   : > { %3701 = vmatprep.subr.bf16.mxu0 %v4980_v45  ;;  %3787 = vmatprep.subr.bf16.mxu1 %v4983_v46 }
 0x27c   : > { %3702 = vmatpush1.bf16.msra.mxu0 %v4978_v47  ;;  %3788 = vmatpush1.bf16.msra.mxu1 %v4981_v49 }
 0x27d   : > { %3703 = vmatprep.subr.bf16.mxu0 %v4986_v50  ;;  %3789 = vmatprep.subr.bf16.mxu1 %v4989_v51 }
 0x280   : > { %3704 = vmatpush1.bf16.msra.mxu0 %v4984_v52  ;;  %3790 = vmatpush1.bf16.msra.mxu1 %v4987_v53 }
 0x281   : > { %3705 = vmatprep.subr.bf16.mxu0 %v4992_v54  ;;  %3791 = vmatprep.subr.bf16.mxu1 %v4995_v55 }
 0x284   : > { %3706 = vmatpush1.bf16.msra.mxu0 %v4990_v56  ;;  %3792 = vmatpush1.bf16.msra.mxu1 %v4993_v57 }
 0x285   : > { %3707 = vmatprep.subr.bf16.mxu0 %v4998_v58  ;;  %3793 = vmatprep.subr.bf16.mxu1 %v5001_v59 }
 0x288   : > { %3708 = vmatpush1.bf16.msra.mxu0 %v4996_v60  ;;  %3794 = vmatpush1.bf16.msra.mxu1 %v4999_v61 }
 0x289   : > { %3709 = vmatprep.subr.bf16.mxu0 %v5004_v62  ;;  %3795 = vmatprep.subr.bf16.mxu1 %v5007_v63 }
 0x28c   : > { %3710 = vmatpush1.bf16.msra.mxu0 %v5002_v0  ;;  %3796 = vmatpush1.bf16.msra.mxu1 %v5005_v1 }
 0x28d   : > { %3711 = vmatprep.subr.bf16.mxu0 %v5010_v13  ;;  %3797 = vmatprep.subr.bf16.mxu1 %v5013_v15 }
 0x290   : > { %3712 = vmatpush1.bf16.msra.mxu0 %v5008_v12  ;;  %3798 = vmatpush1.bf16.msra.mxu1 %v5011_v14 }
 0x291   : > { %3713 = vmatprep.subr.bf16.mxu0 %v5016_v16  ;;  %3799 = vmatprep.subr.bf16.mxu1 %v5019_v17 }
 0x294   : > { %3714 = vmatpush1.bf16.msra.mxu0 %v5014_v18  ;;  %3800 = vmatpush1.bf16.msra.mxu1 %v5017_v19  ;;  %v5020_v18 = vld [vmem:[%s5802_s30 + $0x200] ss:$16 sps:$4 sm:$0xff]   ;;  %v5023_v19 = vld [vmem:[%s5802_s30 + $0x208] ss:$16 sps:$4 sm:$0xff]  }
 0x295   : > { %3726 = vmatprep.subr.bf16.mxu0 %v5022_v20  ;;  %3812 = vmatprep.subr.bf16.mxu1 %v5025_v21  ;;  %v5028_v20 = vld [vmem:[%s5802_s30 + $0x224] ss:$16 sps:$4 sm:$0xff]   ;;  %v5031_v21 = vld [vmem:[%s5802_s30 + $0x22c] ss:$16 sps:$4 sm:$0xff]  }
 0x2aa   : > { %v6160_v2 = vpop.f32.mrb[0].mxu0  ;;  %v6162_v3 = vpop.f32.mrb[0].mxu1 }
 0x2ab   : > { %v6164_v4 = vpop.f32.mrb[1].mxu0  ;;  %v6166_v5 = vpop.f32.mrb[1].mxu1  ;;  %v4319_v22 = vmul.f32 -1.442695, %v6160_v2  ;;  %v4321_v23 = vmul.f32 -1.442695, %v6162_v3 }
 0x2ac   : > { %v6168_v6 = vpop.f32.mrb[2].mxu0  ;;  %v6170_v8 = vpop.f32.mrb[2].mxu1  ;;  %v4320_v9 = vmul.f32 -1.442695, %v6164_v4  ;;  %v4322_v7 = vmul.f32 -1.442695, %v6166_v5 }
 0x2ad   : > { %v6172_v10 = vpop.f32.mrb[3].mxu0  ;;  %v6174_v11 = vpop.f32.mrb[3].mxu1  ;;  %5116 = vpow2.f32 %v4319_v22  ;;  %v4323_v48 = vmul.f32 -1.442695, %v6168_v6  ;;  %v4325_v24 = vmul.f32 -1.442695, %v6170_v8 }
 0x2ae   : > { %5118 = vpow2.f32 %v4321_v23  ;;  %v4324_v25 = vmul.f32 -1.442695, %v6172_v10  ;;  %v4326_v26 = vmul.f32 -1.442695, %v6174_v11  ;;  %v5026_v22 = vld [vmem:[%s5802_s30 + $0x220] ss:$16 sps:$4 sm:$0xff]  }
 0x2af   : > { %5120 = vpow2.f32 %v4320_v9  ;;  %v5029_v23 = vld [vmem:[%s5802_s30 + $0x228] ss:$16 sps:$4 sm:$0xff]   ;;  %v5034_v9 = vld [vmem:[%s5802_s30 + $0x244] ss:$16 sps:$4 sm:$0xff]  }
 0x2b0   : > { %5122 = vpow2.f32 %v4322_v7  ;;  %v5037_v7 = vld [vmem:[%s5802_s30 + $0x24c] ss:$16 sps:$4 sm:$0xff]  }
 0x2b1   : > { %5124 = vpow2.f32 %v4323_v48  ;;  %v5032_v48 = vld [vmem:[%s5802_s30 + $0x240] ss:$16 sps:$4 sm:$0xff]  }
 0x2b2   : > { %5126 = vpow2.f32 %v4325_v24  ;;  %v5035_v24 = vld [vmem:[%s5802_s30 + $0x248] ss:$16 sps:$4 sm:$0xff]  }
 0x2b3   : > { %5128 = vpow2.f32 %v4324_v25  ;;  %v5040_v25 = vld [vmem:[%s5802_s30 + $0x264] ss:$16 sps:$4 sm:$0xff]  }
 0x2b4   : > { %5130 = vpow2.f32 %v4326_v26  ;;  %v5043_v26 = vld [vmem:[%s5802_s30 + $0x26c] ss:$16 sps:$4 sm:$0xff]  }
 0x2b7   : > { %v5117_v30 = vpop.eup %5116 }
 0x2b8   : > { %v5119_v27 = vpop.eup %5118  ;;  %v2863_v31 = vadd.f32 1.0, %v5117_v30  ;;  %v5038_v30 = vld [vmem:[%s5802_s30 + $0x260] ss:$16 sps:$4 sm:$0xff]  }
 0x2b9   : > { %v5121_v28 = vpop.eup %5120  ;;  %v2865_v33 = vadd.f32 1.0, %v5119_v27  ;;  %v5041_v27 = vld [vmem:[%s5802_s30 + $0x268] ss:$16 sps:$4 sm:$0xff]  }
 0x2ba   : > { %v5123_v29 = vpop.eup %5122  ;;  %v2864_v35 = vadd.f32 1.0, %v5121_v28  ;;  %5132 = vrcp.f32 %v2863_v31  ;;  %v5046_v28 = vld [vmem:[%s5802_s30 + $0x284] ss:$16 sps:$4 sm:$0xff]   ;;  %v5044_v31 = vld [vmem:[%s5802_s30 + $0x280] ss:$16 sps:$4 sm:$0xff]  }
 0x2bb   : > { %v5125_v32 = vpop.eup %5124  ;;  %v2866_v37 = vadd.f32 1.0, %v5123_v29  ;;  %5134 = vrcp.f32 %v2865_v33  ;;  %v5049_v29 = vld [vmem:[%s5802_s30 + $0x28c] ss:$16 sps:$4 sm:$0xff]   ;;  %v5052_v33 = vld [vmem:[%s5802_s30 + $0x2a4] ss:$16 sps:$4 sm:$0xff]  }
 0x2bc   : > { %v5127_v34 = vpop.eup %5126  ;;  %v2867_v39 = vadd.f32 1.0, %v5125_v32  ;;  %5136 = vrcp.f32 %v2864_v35  ;;  %v5047_v32 = vld [vmem:[%s5802_s30 + $0x288] ss:$16 sps:$4 sm:$0xff]   ;;  %v5050_v35 = vld [vmem:[%s5802_s30 + $0x2a0] ss:$16 sps:$4 sm:$0xff]  }
 0x2bd   : > { %v5129_v36 = vpop.eup %5128  ;;  %v2869_v40 = vadd.f32 1.0, %v5127_v34  ;;  %5138 = vrcp.f32 %v2866_v37  ;;  %v5055_v34 = vld [vmem:[%s5802_s30 + $0x2ac] ss:$16 sps:$4 sm:$0xff]   ;;  %v5058_v37 = vld [vmem:[%s5802_s30 + $0x2c4] ss:$16 sps:$4 sm:$0xff]  }
 0x2be   : > { %v5131_v38 = vpop.eup %5130  ;;  %v2868_v41 = vadd.f32 1.0, %v5129_v36  ;;  %5140 = vrcp.f32 %v2867_v39  ;;  %v5053_v36 = vld [vmem:[%s5802_s30 + $0x2a8] ss:$16 sps:$4 sm:$0xff]   ;;  %v5056_v39 = vld [vmem:[%s5802_s30 + $0x2c0] ss:$16 sps:$4 sm:$0xff]  }
 0x2bf   : > { %v2870_v42 = vadd.f32 1.0, %v5131_v38  ;;  %5142 = vrcp.f32 %v2869_v40  ;;  %v5061_v38 = vld [vmem:[%s5802_s30 + $0x2cc] ss:$16 sps:$4 sm:$0xff]   ;;  %v5059_v40 = vld [vmem:[%s5802_s30 + $0x2c8] ss:$16 sps:$4 sm:$0xff]  }
 0x2c0   : > { %5144 = vrcp.f32 %v2868_v41  ;;  %v5064_v41 = vld [vmem:[%s5802_s30 + $0x2e4] ss:$16 sps:$4 sm:$0xff]  }
 0x2c1   : > { %5146 = vrcp.f32 %v2870_v42  ;;  %v5067_v42 = vld [vmem:[%s5802_s30 + $0x2ec] ss:$16 sps:$4 sm:$0xff]  }
 0x2c4   : > { %v5133_v43 = vpop.eup %5132 }
 0x2c5   : > { %v5135_v44 = vpop.eup %5134  ;;  %v2887_v52 = vmul.f32 %v5133_v43, %v6160_v2  ;;  %v5062_v43 = vld [vmem:[%s5802_s30 + $0x2e0] ss:$16 sps:$4 sm:$0xff]  }
 0x2c6   : > { %v5137_v45 = vpop.eup %5136  ;;  %v2889_v53 = vmul.f32 %v5135_v44, %v6162_v3  ;;  %v5065_v44 = vld [vmem:[%s5802_s30 + $0x2e8] ss:$16 sps:$4 sm:$0xff]  }
 0x2c7   : > { %v5139_v46 = vpop.eup %5138  ;;  %v2888_v54 = vmul.f32 %v5137_v45, %v6164_v4  ;;  %v5070_v45 = vld [vmem:[%s5802_s30 + $0x304] ss:$16 sps:$4 sm:$0xff]  }
 0x2c8   : > { %v5141_v47 = vpop.eup %5140  ;;  %v2890_v55 = vmul.f32 %v5139_v46, %v6166_v5  ;;  %v5073_v46 = vld [vmem:[%s5802_s30 + $0x30c] ss:$16 sps:$4 sm:$0xff]  }
 0x2c9   : > { %v5143_v49 = vpop.eup %5142  ;;  %v2891_v58 = vmul.f32 %v5141_v47, %v6168_v6  ;;  %v5068_v47 = vld [vmem:[%s5802_s30 + $0x300] ss:$16 sps:$4 sm:$0xff]  }
 0x2ca   : > { %v5145_v50 = vpop.eup %5144  ;;  %v2893_v59 = vmul.f32 %v5143_v49, %v6170_v8  ;;  %v5071_v49 = vld [vmem:[%s5802_s30 + $0x308] ss:$16 sps:$4 sm:$0xff]  }
 0x2cb   : > { %v5147_v51 = vpop.eup %5146  ;;  %v2892_v0 = vmul.f32 %v5145_v50, %v6172_v10  ;;  %v5076_v50 = vld [vmem:[%s5802_s30 + $0x324] ss:$16 sps:$4 sm:$0xff]  }
 0x2cc   : > { %v2894_v1 = vmul.f32 %v5147_v51, %v6174_v11  ;;  %v5079_v51 = vld [vmem:[%s5802_s30 + $0x32c] ss:$16 sps:$4 sm:$0xff]  }
 0x32a   : > { %v2744_v56 = vpop.f32.mrb[4].mxu0  ;;  %v2830_v57 = vpop.f32.mrb[4].mxu1 }
 0x32b   : > { %v2895_v60 = vmul.f32 %v2887_v52, %v2744_v56  ;;  %v2897_v61 = vmul.f32 %v2889_v53, %v2830_v57  ;;  %v2746_v62 = vpop.f32.mrb[5].mxu0  ;;  %v2832_v63 = vpop.f32.mrb[5].mxu1  ;;  %v5074_v52 = vld [vmem:[%s5802_s30 + $0x320] ss:$16 sps:$4 sm:$0xff]   ;;  %v5077_v53 = vld [vmem:[%s5802_s30 + $0x328] ss:$16 sps:$4 sm:$0xff]  }
 0x32c   : > { %v2896_v2 = vmul.f32 %v2888_v54, %v2746_v62  ;;  %v2898_v3 = vmul.f32 %v2890_v55, %v2832_v63  ;;  %v2748_v4 = vpop.f32.mrb[6].mxu0  ;;  %v2834_v5 = vpop.f32.mrb[6].mxu1  ;;  %v5082_v54 = vld [vmem:[%s5802_s30 + $0x344] ss:$16 sps:$4 sm:$0xff]   ;;  %v5085_v55 = vld [vmem:[%s5802_s30 + $0x34c] ss:$16 sps:$4 sm:$0xff]  }
 0x32d   : > { %v2899_v12 = vmul.f32 %v2891_v58, %v2748_v4  ;;  %v2901_v6 = vmul.f32 %v2893_v59, %v2834_v5  ;;  %v2750_v13 = vpop.f32.mrb[7].mxu0  ;;  %v2836_v8 = vpop.f32.mrb[7].mxu1  ;;  %v5080_v56 = vld [vmem:[%s5802_s30 + $0x340] ss:$16 sps:$4 sm:$0xff]   ;;  %v5083_v57 = vld [vmem:[%s5802_s30 + $0x348] ss:$16 sps:$4 sm:$0xff]  }
 0x32e   : > { %v2900_v14 = vmul.f32 %v2892_v0, %v2750_v13  ;;  %v2902_v15 = vmul.f32 %v2894_v1, %v2836_v8  ;;  %v5088_v58 = vld [vmem:[%s5802_s30 + $0x364] ss:$16 sps:$4 sm:$0xff]   ;;  %v5091_v59 = vld [vmem:[%s5802_s30 + $0x36c] ss:$16 sps:$4 sm:$0xff]   ;;  %v5092_v0 = vld [vmem:[%s5802_s30 + $0x380] ss:$16 sps:$4 sm:$0xff]  }
 0x32f   : > { %v2911_v16 = vpack.c.bf16 %v2899_v12, %v2895_v60  ;;  %v6202_v10 = vpack.c.bf16 %v2901_v6, %v2897_v61  ;;  %v5086_v60 = vld [vmem:[%s5802_s30 + $0x360] ss:$16 sps:$4 sm:$0xff]   ;;  %v5089_v61 = vld [vmem:[%s5802_s30 + $0x368] ss:$16 sps:$4 sm:$0xff]   ;;  %v5094_v62 = vld [vmem:[%s5802_s30 + $0x384] ss:$16 sps:$4 sm:$0xff]  }
 0x330   : > { %v2912_v17 = vpack.c.bf16 %v2900_v14, %v2896_v2  ;;  %v2914_v11 = vpack.c.bf16 %v2902_v15, %v2898_v3  ;;  %v5097_v63 = vld [vmem:[%s5802_s30 + $0x38c] ss:$16 sps:$4 sm:$0xff]   ;;  %v5095_v1 = vld [vmem:[%s5802_s30 + $0x388] ss:$16 sps:$4 sm:$0xff]   ;;  %v5100_v2 = vld [vmem:[%s5802_s30 + $0x3a4] ss:$16 sps:$4 sm:$0xff]  }
 0x331   : > { %v5103_v3 = vld [vmem:[%s5802_s30 + $0x3ac] ss:$16 sps:$4 sm:$0xff]   ;;  %v5098_v4 = vld [vmem:[%s5802_s30 + $0x3a0] ss:$16 sps:$4 sm:$0xff]   ;;  %v5101_v5 = vld [vmem:[%s5802_s30 + $0x3a8] ss:$16 sps:$4 sm:$0xff]  }
 0x332   : > { %3715 = vmatprep.mubr.bf16.mxu0 %v2912_v17  ;;  %3801 = vmatprep.mubr.bf16.mxu1 %v2912_v17  ;;  %v5106_v12 = vld [vmem:[%s5802_s30 + $0x3c4] ss:$16 sps:$4 sm:$0xff]   ;;  %v5109_v6 = vld [vmem:[%s5802_s30 + $0x3cc] ss:$16 sps:$4 sm:$0xff]   ;;  %v5104_v13 = vld [vmem:[%s5802_s30 + $0x3c0] ss:$16 sps:$4 sm:$0xff]  }
 0x333   : > { %3716 = vmatmul.mubr.bf16.vlgmr.msra.gmra.mrb[8].mxu0 %v2911_v16  ;;  %3802 = vmatmul.mubr.bf16.vlgmr.msra.gmra.mrb[8].mxu1 %v2911_v16  ;;  %v5107_v8 = vld [vmem:[%s5802_s30 + $0x3c8] ss:$16 sps:$4 sm:$0xff]   ;;  %v5112_v14 = vld [vmem:[%s5802_s30 + $0x3e4] ss:$16 sps:$4 sm:$0xff]   ;;  %v5115_v15 = vld [vmem:[%s5802_s30 + $0x3ec] ss:$16 sps:$4 sm:$0xff]  }
 0x334   : > { %3727 = vmatpush1.bf16.msra.mxu0 %v5020_v18  ;;  %3813 = vmatpush1.bf16.msra.mxu1 %v5023_v19  ;;  %v5110_v16 = vld [vmem:[%s5802_s30 + $0x3e0] ss:$16 sps:$4 sm:$0xff]   ;;  %v5113_v17 = vld [vmem:[%s5802_s30 + $0x3e8] ss:$16 sps:$4 sm:$0xff]  }
 0x335   : > { %3758 = vmatprep.mubr.bf16.mxu0 %v2914_v11  ;;  %3844 = vmatprep.mubr.bf16.mxu1 %v2914_v11  ;;  %v2903_v11 = vld [vmem:[#allocation3] sm:$0xff]  ;;  %v2905_v18 = vld [vmem:[#allocation3 + $0x10] sm:$0xff]  ;;  %v2904_v19 = vld [vmem:[#allocation3 + $0x8] sm:$0xff] }
 0x336   : > { %3728 = vmatprep.subr.bf16.mxu0 %v5028_v20  ;;  %3814 = vmatprep.subr.bf16.mxu1 %v5031_v21  ;;  %v2906_v20 = vld [vmem:[#allocation3 + $0x18] sm:$0xff] }
 0x338   : > { %3729 = vmatpush1.bf16.msra.mxu0 %v5026_v22  ;;  %3815 = vmatpush1.bf16.msra.mxu1 %v5029_v23  ;;  %v2907_v23 = vld [vmem:[#allocation3 + $0x20] sm:$0xff] }
 0x339   : > { %3730 = vmatprep.subr.bf16.mxu0 %v5034_v9  ;;  %3816 = vmatprep.subr.bf16.mxu1 %v5037_v7  ;;  %v2909_v9 = vld [vmem:[#allocation3 + $0x30] sm:$0xff] }
 0x33c   : > { %3731 = vmatpush1.bf16.msra.mxu0 %v5032_v48  ;;  %3817 = vmatpush1.bf16.msra.mxu1 %v5035_v24 }
 0x33d   : > { %3732 = vmatprep.subr.bf16.mxu0 %v5040_v25  ;;  %3818 = vmatprep.subr.bf16.mxu1 %v5043_v26  ;;  %v2908_v26 = vld [vmem:[#allocation3 + $0x28] sm:$0xff] }
 0x340   : > { %3733 = vmatpush1.bf16.msra.mxu0 %v5038_v30  ;;  %3819 = vmatpush1.bf16.msra.mxu1 %v5041_v27  ;;  %v2910_v30 = vld [vmem:[#allocation3 + $0x38] sm:$0xff] }
 0x341   : > { %3734 = vmatprep.subr.bf16.mxu0 %v5046_v28  ;;  %3820 = vmatprep.subr.bf16.mxu1 %v5049_v29 }
 0x344   : > { %3735 = vmatpush1.bf16.msra.mxu0 %v5044_v31  ;;  %3821 = vmatpush1.bf16.msra.mxu1 %v5047_v32 }
 0x345   : > { %3736 = vmatprep.subr.bf16.mxu0 %v5052_v33  ;;  %3822 = vmatprep.subr.bf16.mxu1 %v5055_v34 }
 0x348   : > { %3737 = vmatpush1.bf16.msra.mxu0 %v5050_v35  ;;  %3823 = vmatpush1.bf16.msra.mxu1 %v5053_v36 }
 0x349   : > { %3738 = vmatprep.subr.bf16.mxu0 %v5058_v37  ;;  %3824 = vmatprep.subr.bf16.mxu1 %v5061_v38  ;;  %v3875_v37 = vld [vmem:[%s6308_s0] sm:$0xff] (!%p4455_p11) }
 0x34c   : > { %3739 = vmatpush1.bf16.msra.mxu0 %v5056_v39  ;;  %3825 = vmatpush1.bf16.msra.mxu1 %v5059_v40  ;;  %v3879_v40 = vunpack.c.l.bf16 (!%p4455_p11), %v3875_v37 }
 0x34d   : > { %3740 = vmatprep.subr.bf16.mxu0 %v5064_v41  ;;  %3826 = vmatprep.subr.bf16.mxu1 %v5067_v42  ;;  %v3880_v41 = vunpack.c.h.bf16 (!%p4455_p11), %v3875_v37  ;;  %v3876_v42 = vld [vmem:[%s6308_s0 + $0x8] sm:$0xff] (!%p4455_p11) }
 0x350   : > { %3741 = vmatpush1.bf16.msra.mxu0 %v5062_v43  ;;  %3827 = vmatpush1.bf16.msra.mxu1 %v5065_v44 }
 0x351   : > { %3742 = vmatprep.subr.bf16.mxu0 %v5070_v45  ;;  %3828 = vmatprep.subr.bf16.mxu1 %v5073_v46  ;;  %v3881_v45 = vunpack.c.l.bf16 (!%p4455_p11), %v3876_v42  ;;  %v3882_v46 = vunpack.c.h.bf16 (!%p4455_p11), %v3876_v42 }
 0x354   : > { %3743 = vmatpush1.bf16.msra.mxu0 %v5068_v47  ;;  %3829 = vmatpush1.bf16.msra.mxu1 %v5071_v49  ;;  %v3877_v47 = vld [vmem:[%s6308_s0 + $0x10] sm:$0xff] (!%p4455_p11) }
 0x355   : > { %3744 = vmatprep.subr.bf16.mxu0 %v5076_v50  ;;  %3830 = vmatprep.subr.bf16.mxu1 %v5079_v51 }
 0x358   : > { %3745 = vmatpush1.bf16.msra.mxu0 %v5074_v52  ;;  %3831 = vmatpush1.bf16.msra.mxu1 %v5077_v53  ;;  %v3883_v53 = vunpack.c.l.bf16 (!%p4455_p11), %v3877_v47 }
 0x359   : > { %3746 = vmatprep.subr.bf16.mxu0 %v5082_v54  ;;  %3832 = vmatprep.subr.bf16.mxu1 %v5085_v55  ;;  %v3884_v54 = vunpack.c.h.bf16 (!%p4455_p11), %v3877_v47  ;;  %v3878_v55 = vld [vmem:[%s6308_s0 + $0x18] sm:$0xff] (!%p4455_p11) }
 0x35c   : > { %3747 = vmatpush1.bf16.msra.mxu0 %v5080_v56  ;;  %3833 = vmatpush1.bf16.msra.mxu1 %v5083_v57 }
 0x35d   : > { %3748 = vmatprep.subr.bf16.mxu0 %v5088_v58  ;;  %3834 = vmatprep.subr.bf16.mxu1 %v5091_v59 }
 0x360   : > { %3749 = vmatpush1.bf16.msra.mxu0 %v5086_v60  ;;  %3835 = vmatpush1.bf16.msra.mxu1 %v5089_v61  ;;  %v3885_v60 = vunpack.c.l.bf16 (!%p4455_p11), %v3878_v55  ;;  %v3886_v61 = vunpack.c.h.bf16 (!%p4455_p11), %v3878_v55 }
 0x361   : > { %3750 = vmatprep.subr.bf16.mxu0 %v5094_v62  ;;  %3836 = vmatprep.subr.bf16.mxu1 %v5097_v63 }
 0x364   : > { %3751 = vmatpush1.bf16.msra.mxu0 %v5092_v0  ;;  %3837 = vmatpush1.bf16.msra.mxu1 %v5095_v1 }
 0x365   : > { %3752 = vmatprep.subr.bf16.mxu0 %v5100_v2  ;;  %3838 = vmatprep.subr.bf16.mxu1 %v5103_v3 }
 0x368   : > { %3753 = vmatpush1.bf16.msra.mxu0 %v5098_v4  ;;  %3839 = vmatpush1.bf16.msra.mxu1 %v5101_v5 }
 0x369   : > { %3754 = vmatprep.subr.bf16.mxu0 %v5106_v12  ;;  %3840 = vmatprep.subr.bf16.mxu1 %v5109_v6 }
 0x36c   : > { %3755 = vmatpush1.bf16.msra.mxu0 %v5104_v13  ;;  %3841 = vmatpush1.bf16.msra.mxu1 %v5107_v8 }
 0x36d   : > { %3756 = vmatprep.subr.bf16.mxu0 %v5112_v14  ;;  %3842 = vmatprep.subr.bf16.mxu1 %v5115_v15 }
 0x370   : > { %3757 = vmatpush1.bf16.msra.mxu0 %v5110_v16  ;;  %3843 = vmatpush1.bf16.msra.mxu1 %v5113_v17 }
 0x373   : > { %3759 = vmatmul.mubr.bf16.vlgmr.msra.gmra.mrb[8].mxu0 %v6202_v10  ;;  %3845 = vmatmul.mubr.bf16.vlgmr.msra.gmra.mrb[8].mxu1 %v6202_v10 }
 0x446   : > { %v3760_v21 = vpop.f32.mrb[8].mxu0  ;;  %v3846_v22 = vpop.f32.mrb[8].mxu1  ;;  %3874 = sbr.rel (%p4455_p11) target bundleno = 1113 (0x459), region = 94 }
 0x447   : > { %v3855_v7 = vadd.f32 %v3760_v21, %v2903_v11  ;;  %v3857_v48 = vadd.f32 %v3846_v22, %v2905_v18  ;;  %v3762_v24 = vpop.f32.mrb[9].mxu0  ;;  %v3848_v25 = vpop.f32.mrb[9].mxu1 }
 0x448   : > { %v3856_v27 = vadd.f32 %v3762_v24, %v2904_v19  ;;  %v3858_v28 = vadd.f32 %v3848_v25, %v2906_v20  ;;  %v3764_v29 = vpop.f32.mrb[10].mxu0  ;;  %v3850_v31 = vpop.f32.mrb[10].mxu1 }
 0x449   : > { %3863 = vst [vmem:[#allocation3] sm:$0xff] %v3855_v7  ;;  %3865 = vst [vmem:[#allocation3 + $0x10] sm:$0xff] %v3857_v48  ;;  %v3859_v10 = vadd.f32 %v3764_v29, %v2907_v23  ;;  %v3861_v32 = vadd.f32 %v3850_v31, %v2909_v9  ;;  %v3766_v33 = vpop.f32.mrb[11].mxu0  ;;  %v3852_v34 = vpop.f32.mrb[11].mxu1 }
 0x44a   : > { %3864 = vst [vmem:[#allocation3 + $0x8] sm:$0xff] %v3856_v27  ;;  %3866 = vst [vmem:[#allocation3 + $0x18] sm:$0xff] %v3858_v28  ;;  %v3860_v35 = vadd.f32 %v3766_v33, %v2908_v26  ;;  %v3862_v36 = vadd.f32 %v3852_v34, %v2910_v30 }
 0x44b   : > { %3867 = vst [vmem:[#allocation3 + $0x20] sm:$0xff] %v3859_v10  ;;  %3869 = vst [vmem:[#allocation3 + $0x30] sm:$0xff] %v3861_v32 }
 0x44c   : > { %3868 = vst [vmem:[#allocation3 + $0x28] sm:$0xff] %v3860_v35  ;;  %3870 = vst [vmem:[#allocation3 + $0x38] sm:$0xff] %v3862_v36 }
 0x450   : > { %v3887_v38 = vld [vmem:[#allocation3] sm:$0xff]  ;;  %v3889_v43 = vld [vmem:[#allocation3 + $0x10] sm:$0xff] }
 0x451   : > { %v3888_v39 = vld [vmem:[#allocation3 + $0x8] sm:$0xff]  ;;  %v3890_v44 = vld [vmem:[#allocation3 + $0x18] sm:$0xff]  ;;  %v3895_v51 = vadd.f32 %v3887_v38, %v3879_v40  ;;  %v3897_v58 = vadd.f32 %v3889_v43, %v3881_v45 }
 0x452   : > { %v3891_v49 = vld [vmem:[#allocation3 + $0x20] sm:$0xff]  ;;  %v3896_v52 = vadd.f32 %v3888_v39, %v3880_v41  ;;  %v3893_v56 = vld [vmem:[#allocation3 + $0x30] sm:$0xff]  ;;  %v3898_v59 = vadd.f32 %v3890_v44, %v3882_v46 }
 0x453   : > { %v3892_v50 = vld [vmem:[#allocation3 + $0x28] sm:$0xff]  ;;  %v3894_v57 = vld [vmem:[#allocation3 + $0x38] sm:$0xff]  ;;  %v3899_v63 = vadd.f32 %v3891_v49, %v3883_v53  ;;  %v3901_v2 = vadd.f32 %v3893_v56, %v3885_v60 }
 0x454   : > { %v4467_v62 = vpack.c.bf16 %v3896_v52, %v3895_v51  ;;  %v3900_v0 = vadd.f32 %v3892_v50, %v3884_v54  ;;  %v4468_v1 = vpack.c.bf16 %v3898_v59, %v3897_v58  ;;  %v3902_v3 = vadd.f32 %v3894_v57, %v3886_v61 }
 0x456   : > { %3927 = vst [vmem:[%s6313_s5] sm:$0xff] %v4467_v62  ;;  %v4469_v4 = vpack.c.bf16 %v3900_v0, %v3899_v63  ;;  %3928 = vst [vmem:[%s6313_s5 + $0x8] sm:$0xff] %v4468_v1  ;;  %v4470_v5 = vpack.c.bf16 %v3902_v3, %v3901_v2 }
 0x458   : > { %3929 = vst [vmem:[%s6313_s5 + $0x10] sm:$0xff] %v4469_v4  ;;  %3930 = vst [vmem:[%s6313_s5 + $0x18] sm:$0xff] %v4470_v5 }
 0x459 PF: > { %s15_s22 = sadd.s32 1, %s5186_s22   ;;  %s6315_s18 = smov %s5174_s19 }
 0x45a   : > { %p12_p12 = scmp.ge.s32.totalorder %s15_s22, 4   ;;  %s6316_s19 = smov %s5258_s27 }
 0x45b   : > { %s6317_s20 = smov %s5182_s21  ;;  %s6318_s21 = smov %s6320_s23 }
 0x45c   :  { %14 = sbr.rel (!%p12_p12) target bundleno = 3 (0x3), region = 143 }

</bundles_post_ra>
